<compile_context>
chip_gen: v7x
topology: tpu7x:2x2x1
jax: 0.10.0
libtpu: 0.0.40
codegen_flags: <defaults>
</compile_context>

<pallas_src>
import functools
import math

import jax
import jax.numpy as jnp
from jax import lax
from jax.experimental import pallas as pl
from jax.experimental.pallas import tpu as pltpu  # noqa: F401  (TPU backend)


# ----------------------------------------------------------------------------
# shared math helpers (pure jnp -> usable inside kernels and in the reference)
# ----------------------------------------------------------------------------
def _gelu_tanh(x):
    c = math.sqrt(2.0 / math.pi)
    return 0.5 * x * (1.0 + jnp.tanh(c * (x + 0.044715 * x * x * x)))


def _layer_norm(x, gamma, beta, eps):
    # single-pass stats: mean and mean-of-squares
    mean = jnp.mean(x, axis=-1, keepdims=True)
    msq = jnp.mean(x * x, axis=-1, keepdims=True)
    var = msq - mean * mean
    return (x - mean) * lax.rsqrt(var + eps) * gamma + beta


# ----------------------------------------------------------------------------
# the single fused kernel: embed -> 2 encoder layers -> MLP head -> 5 outputs
# ----------------------------------------------------------------------------
def _fused_forward_kernel(
        x_tok_ref, wpt_ref, bp_ref, pe_ref,
        wqkvt_ref, bqkv_ref, wot_ref, bo_ref,
        ln1g_ref, ln1b_ref, w1t_ref, b1_ref,
        w2t_ref, b2_ref, ln2g_ref, ln2b_ref,
        fc1t3_ref, fc1b_ref, s1_ref, t1_ref,
        fc2t_ref, fc2b_ref, s2_ref, t2_ref,
        wht_ref, bh_ref,
        out_ref,
        *, n_batch, seq_len, d_model, nhead, n_layers, eps, n_head_cols):
    f32 = jnp.float32
    N, L, D = n_batch, seq_len, d_model
    hd = D // nhead
    scale = 1.0 / math.sqrt(hd)

    # ---- 1) 1x1-conv input projection + positional encoding --------------
    h = jnp.dot(x_tok_ref[...], wpt_ref[...],
                preferred_element_type=f32) + bp_ref[...]            # (N*L, D)
    pe = pe_ref[...]                                                 # (L, D)
    h = h + jnp.concatenate([pe] * N, axis=0)                        # bcast pos

    # ---- 2) transformer encoder layers (post-LN), statically unrolled ----
    for li in range(n_layers):
        # QKV projection over the full (N*L, D) token slab
        qkv = jnp.dot(h, wqkvt_ref[li],
                      preferred_element_type=f32) + bqkv_ref[li]     # (N*L,3D)
        q = qkv[:, 0 * D:1 * D]
        k = qkv[:, 1 * D:2 * D]
        v = qkv[:, 2 * D:3 * D]
        wot = wot_ref[li]                                            # (D, D)

        attn_rows = []
        for n in range(N):                                           # static
            r0, r1 = n * L, (n + 1) * L
            acc = jnp.zeros((L, D), dtype=f32)
            for hh in range(nhead):                                  # static
                lo, hi = hh * hd, (hh + 1) * hd
                s = lax.dot_general(q[r0:r1, lo:hi] * scale, k[r0:r1, lo:hi],
                                    (((1,), (1,)), ((), ())),
                                    preferred_element_type=f32)      # (L, L)
                s = s - jnp.max(s, axis=-1, keepdims=True)
                p = jnp.exp(s)
                p = p * pl.reciprocal(jnp.sum(p, axis=-1, keepdims=True),
                                      approx=True)
                ctx = jnp.dot(p, v[r0:r1, lo:hi],
                              preferred_element_type=f32)            # (L, hd)
                # accumulate through matching out_proj rows (no head concat)
                acc = acc + jnp.dot(ctx, wot[lo:hi, :],
                                    preferred_element_type=f32)
            attn_rows.append(acc)
        attn = jnp.concatenate(attn_rows, axis=0)                    # (N*L, D)

        src = _layer_norm(h + attn + bo_ref[li],
                          ln1g_ref[li], ln1b_ref[li], eps)

        # feed-forward (relu) over the full token slab
        ff = jnp.maximum(
            jnp.dot(src, w1t_ref[li], preferred_element_type=f32)
            + b1_ref[li], 0.0)
        ff = jnp.dot(ff, w2t_ref[li],
                     preferred_element_type=f32) + b2_ref[li]
        h = _layer_norm(src + ff, ln2g_ref[li], ln2b_ref[li], eps)

    # ---- 3) MLP head ------------------------------------------------------
    # PyTorch flatten order (N, D*L) is folded into fc1t3[l] = (D, 128)
    # blocks, so no activation transpose is needed: z = sum_l h[:,l,:] @ W_l.
    n_fc1 = fc1b_ref.shape[-1]
    h3 = h.reshape(N, L, D)          # split of leading dims only (lane-safe)
    z = jnp.zeros((N, n_fc1), dtype=f32)
    for l in range(L):                                               # static
        z = z + jnp.dot(h3[:, l, :], fc1t3_ref[l],
                        preferred_element_type=f32)
    z = _gelu_tanh((z + fc1b_ref[...]) * s1_ref[...] + t1_ref[...])  # BN fold
    z = jnp.dot(z, fc2t_ref[...],
                preferred_element_type=f32) + fc2b_ref[...]
    z = _gelu_tanh(z * s2_ref[...] + t2_ref[...])

    # ---- 4) fused 5-way output heads (one (64, 25) matmul) ----------------
    y = jnp.dot(z, wht_ref[...], preferred_element_type=f32) + bh_ref[...]
    cols = lax.broadcasted_iota(jnp.int32, y.shape, 1)
    sig = 1.0 / (1.0 + jnp.exp(-y))
    softplus = jnp.maximum(y, 0.0) + jnp.log(1.0 + jnp.exp(-jnp.abs(y)))
    y = jnp.where(cols == 0, sig, y)                      # fc_check  -> sigmoid
    y = jnp.where(cols == n_head_cols - 1, softplus, y)   # size_reg  -> softplus
    out_ref[...] = y


# ----------------------------------------------------------------------------
# one-time parameter preparation (all layout plumbing hoisted out of forward)
# ----------------------------------------------------------------------------
def prepare_params(params, *, eps_bn=1e-5):
    f32 = jnp.float32
    D = params["proj_w"].shape[0]
    L = params["pos"].shape[0]
    n_fc1 = params["fc1_w"].shape[0]

    def stk(fn):
        return jnp.stack([fn(l).astype(f32) for l in params["layers"]], axis=0)

    prep = dict(
        wpt=params["proj_w"].T.astype(f32),                       # (C_in, D)
        bp=params["proj_b"].reshape(1, D).astype(f32),
        pe=params["pos"].astype(f32),                             # (L, D)
        wqkvt=stk(lambda l: l["in_w"].T),                         # (2, D, 3D)
        bqkv=stk(lambda l: l["in_b"].reshape(1, -1)),
        wot=stk(lambda l: l["out_w"].T),                          # (2, D, D)
        bo=stk(lambda l: l["out_b"].reshape(1, -1)),
        ln1g=stk(lambda l: l["ln1_g"].reshape(1, -1)),
        ln1b=stk(lambda l: l["ln1_b"].reshape(1, -1)),
        w1t=stk(lambda l: l["lin1_w"].T),                         # (2, D, F)
        b1=stk(lambda l: l["lin1_b"].reshape(1, -1)),
        w2t=stk(lambda l: l["lin2_w"].T),                         # (2, F, D)
        b2=stk(lambda l: l["lin2_b"].reshape(1, -1)),
        ln2g=stk(lambda l: l["ln2_g"].reshape(1, -1)),
        ln2b=stk(lambda l: l["ln2_b"].reshape(1, -1)),
        # fc1 weight with PyTorch (N, D*L) flatten order folded in:
        #   fc1t3[l, d, j] = fc1_w[j, d*L + l]
        fc1t3=jnp.transpose(params["fc1_w"].reshape(n_fc1, D, L),
                            (2, 1, 0)).astype(f32),               # (L, D, 128)
        fc1b=params["fc1_b"].reshape(1, -1).astype(f32),
        fc2t=params["fc2_w"].T.astype(f32),                       # (128, 64)
        fc2b=params["fc2_b"].reshape(1, -1).astype(f32),
        # 5 output heads fused into a single (64, 25) matmul
        wht=jnp.concatenate([params["w_check"], params["w_type"],
                             params["w_size_cls"], params["w_type_size"],
                             params["w_size_reg"]], axis=0).T.astype(f32),
        bh=jnp.concatenate([params["b_check"], params["b_type"],
                            params["b_size_cls"], params["b_type_size"],
                            params["b_size_reg"]], axis=0).reshape(1, -1)
           .astype(f32),
    )

    # eval-mode BatchNorm folded into per-feature scale/shift
    s1 = params["bn1_g"] * lax.rsqrt(params["bn1_rv"] + eps_bn)
    prep["s1"] = s1.reshape(1, -1).astype(f32)
    prep["t1"] = (params["bn1_b"] - params["bn1_rm"] * s1).reshape(1, -1) \
        .astype(f32)
    s2 = params["bn2_g"] * lax.rsqrt(params["bn2_rv"] + eps_bn)
    prep["s2"] = s2.reshape(1, -1).astype(f32)
    prep["t2"] = (params["bn2_b"] - params["bn2_rm"] * s2).reshape(1, -1) \
        .astype(f32)

    head_sizes = (params["w_type"].shape[0], params["w_size_cls"].shape[0],
                  params["w_type_size"].shape[0])
    return prep, head_sizes


# ----------------------------------------------------------------------------
# forward wrapper (jit-friendly; only a tiny input transpose + output slicing
# happen outside the single fused pallas_call)
# ----------------------------------------------------------------------------
def transformer1d_forward(x, prep, *, d_model, nhead, head_sizes, eps_ln=1e-5):
    f32 = jnp.float32
    N, C_in, L = x.shape
    D = d_model
    n_layers = prep["wqkvt"].shape[0]
    n_cols = prep["wht"].shape[1]

    # tiny (N*C_in*L floats) layout op for the raw input; everything else
    # stays VMEM-resident inside the fused kernel.
    x_tok = jnp.transpose(x.astype(f32), (0, 2, 1)).reshape(N * L, C_in)

    kernel = functools.partial(
        _fused_forward_kernel, n_batch=N, seq_len=L, d_model=D, nhead=nhead,
        n_layers=n_layers, eps=eps_ln, n_head_cols=n_cols)

    logits = pl.pallas_call(
        kernel,
        out_shape=jax.ShapeDtypeStruct((N, n_cols), f32),
    )(x_tok, prep["wpt"], prep["bp"], prep["pe"],
      prep["wqkvt"], prep["bqkv"], prep["wot"], prep["bo"],
      prep["ln1g"], prep["ln1b"], prep["w1t"], prep["b1"],
      prep["w2t"], prep["b2"], prep["ln2g"], prep["ln2b"],
      prep["fc1t3"], prep["fc1b"], prep["s1"], prep["t1"],
      prep["fc2t"], prep["fc2b"], prep["s2"], prep["t2"],
      prep["wht"], prep["bh"])

    nt, ns, nts = head_sizes
    out_check = logits[:, 0:1]
    out_type = logits[:, 1:1 + nt]
    out_size_cls = logits[:, 1 + nt:1 + nt + ns]
    out_type_size = logits[:, 1 + nt + ns:1 + nt + ns + nts]
    out_size_reg = logits[:, 1 + nt + ns + nts:]
    return out_check, out_type, out_size_cls, out_type_size, out_size_reg


# ----------------------------------------------------------------------------
# pure-jnp reference mirroring PyTorch eval-mode forward
# ----------------------------------------------------------------------------
def _reference(x, params, *, d_model, nhead=4, eps_ln=1e-5, eps_bn=1e-5):
    N, C_in, L = x.shape
    D, H = d_model, nhead
    hd = D // H

    h = jnp.einsum("oc,ncl->nlo", params["proj_w"], x) + params["proj_b"]
    h = h + params["pos"][None, :L, :]

    def ln(z, g, b):
        m = jnp.mean(z, axis=-1, keepdims=True)
        v = jnp.mean((z - m) ** 2, axis=-1, keepdims=True)
        return (z - m) / jnp.sqrt(v + eps_ln) * g + b

    for lyr in params["layers"]:
        qkv = h @ lyr["in_w"].T + lyr["in_b"]
        q, k, v = jnp.split(qkv, 3, axis=-1)
        q = q.reshape(N, L, H, hd).transpose(0, 2, 1, 3)
        k = k.reshape(N, L, H, hd).transpose(0, 2, 1, 3)
        v = v.reshape(N, L, H, hd).transpose(0, 2, 1, 3)
        s = jnp.einsum("nhqd,nhkd->nhqk", q, k) / math.sqrt(hd)
        p = jax.nn.softmax(s, axis=-1)
        ctx = jnp.einsum("nhqk,nhkd->nhqd", p, v)
        ctx = ctx.transpose(0, 2, 1, 3).reshape(N, L, D)
        attn = ctx @ lyr["out_w"].T + lyr["out_b"]
        h = ln(h + attn, lyr["ln1_g"], lyr["ln1_b"])
        ff = jax.nn.relu(h @ lyr["lin1_w"].T + lyr["lin1_b"])
        ff = ff @ lyr["lin2_w"].T + lyr["lin2_b"]
        h = ln(h + ff, lyr["ln2_g"], lyr["ln2_b"])

    feat = jnp.transpose(h, (0, 2, 1)).reshape(N, D * L)

    def bn(z, g, b, rm, rv):
        return (z - rm) / jnp.sqrt(rv + eps_bn) * g + b

    z = feat @ params["fc1_w"].T + params["fc1_b"]
    z = _gelu_tanh(bn(z, params["bn1_g"], params["bn1_b"],
                      params["bn1_rm"], params["bn1_rv"]))
    z = z @ params["fc2_w"].T + params["fc2_b"]
    z = _gelu_tanh(bn(z, params["bn2_g"], params["bn2_b"],
                      params["bn2_rm"], params["bn2_rv"]))

    out_check = jax.nn.sigmoid(z @ params["w_check"].T + params["b_check"])
    out_type = z @ params["w_type"].T + params["b_type"]
    out_size_cls = z @ params["w_size_cls"].T + params["b_size_cls"]
    out_type_size = z @ params["w_type_size"].T + params["b_type_size"]
    out_size_reg = jax.nn.softplus(z @ params["w_size_reg"].T
                                   + params["b_size_reg"])
    return out_check, out_type, out_size_cls, out_type_size, out_size_reg


# ----------------------------------------------------------------------------
if __name__ == "__main__":
    # Small shapes consistent with the module: batch=2, input_channels=4,
    # input_size (sequence length) = 16, d_model=64, nhead=4, dim_ff=2048
    # (TransformerEncoderLayer default), 2 encoder layers, heads 1/3/7/13/1.
    N, C_in, L = 2, 4, 16
    D, H, F_ff = 64, 4, 2048
    num_type, num_size, num_type_size = 3, 7, 13

    keys = iter(jax.random.split(jax.random.PRNGKey(0), 128))
    nk = lambda: next(keys)  # noqa: E731

    def xavier(k, out_f, in_f):
        bound = math.sqrt(6.0 / (in_f + out_f))
        return jax.random.uniform(k, (out_f, in_f), jnp.float32, -bound, bound)

    def small(k, shape, s=0.05):
        return s * jax.random.normal(k, shape, jnp.float32)

    layers = []
    for _ in range(2):
        layers.append(dict(
            in_w=xavier(nk(), 3 * D, D), in_b=small(nk(), (3 * D,)),
            out_w=xavier(nk(), D, D), out_b=small(nk(), (D,)),
            ln1_g=1.0 + small(nk(), (D,)), ln1_b=small(nk(), (D,)),
            lin1_w=xavier(nk(), F_ff, D), lin1_b=small(nk(), (F_ff,)),
            lin2_w=xavier(nk(), D, F_ff), lin2_b=small(nk(), (D,)),
            ln2_g=1.0 + small(nk(), (D,)), ln2_b=small(nk(), (D,)),
        ))

    params = dict(
        proj_w=xavier(nk(), D, C_in), proj_b=small(nk(), (D,)),
        pos=small(nk(), (L, D), s=0.1),
        layers=layers,
        fc1_w=xavier(nk(), 128, D * L), fc1_b=small(nk(), (128,)),
        bn1_g=1.0 + small(nk(), (128,)), bn1_b=small(nk(), (128,)),
        bn1_rm=small(nk(), (128,)),
        bn1_rv=1.0 + jnp.abs(small(nk(), (128,))),
        fc2_w=xavier(nk(), 64, 128), fc2_b=small(nk(), (64,)),
        bn2_g=1.0 + small(nk(), (64,)), bn2_b=small(nk(), (64,)),
        bn2_rm=small(nk(), (64,)),
        bn2_rv=1.0 + jnp.abs(small(nk(), (64,))),
        w_check=xavier(nk(), 1, 64), b_check=small(nk(), (1,)),
        w_type=xavier(nk(), num_type, 64), b_type=small(nk(), (num_type,)),
        w_size_cls=xavier(nk(), num_size, 64),
        b_size_cls=small(nk(), (num_size,)),
        w_type_size=xavier(nk(), num_type_size, 64),
        b_type_size=small(nk(), (num_type_size,)),
        w_size_reg=xavier(nk(), 1, 64), b_size_reg=small(nk(), (1,)),
    )

    x = jax.random.normal(jax.random.PRNGKey(42), (N, C_in, L), jnp.float32)

    # one-time layout prep, then a jitted forward that is a single pallas_call
    prep, head_sizes = prepare_params(params)
    fwd = jax.jit(functools.partial(transformer1d_forward, d_model=D, nhead=H,
                                    head_sizes=head_sizes))

    outs = jax.block_until_ready(fwd(x, prep))
    refs = _reference(x, params, d_model=D, nhead=H)

    names = ["check", "type", "size_cls", "type_size", "size_reg"]
    shapes = [(N, 1), (N, num_type), (N, num_size), (N, num_type_size), (N, 1)]
    for name, o, r, es in zip(names, outs, refs, shapes):
        assert o.shape == es, (name, o.shape, es)
        err = float(jnp.max(jnp.abs(o - r)))
        assert jnp.allclose(o, r, atol=1e-3, rtol=1e-3), \
            f"{name}: max abs err {err}"
    print("KERNEL_OK")
</pallas_src>

<mosaic_0001>
module attributes {stable_mosaic.version = 11 : i64} {
  func.func @_fused_forward_kernel(%arg0: memref<32x4xf32, #tpu.memory_space<vmem>>, %arg1: memref<4x64xf32, #tpu.memory_space<vmem>>, %arg2: memref<1x64xf32, #tpu.memory_space<vmem>>, %arg3: memref<16x64xf32, #tpu.memory_space<vmem>>, %arg4: memref<2x64x192xf32, #tpu.memory_space<vmem>>, %arg5: memref<2x1x192xf32, #tpu.memory_space<vmem>>, %arg6: memref<2x64x64xf32, #tpu.memory_space<vmem>>, %arg7: memref<2x1x64xf32, #tpu.memory_space<vmem>>, %arg8: memref<2x1x64xf32, #tpu.memory_space<vmem>>, %arg9: memref<2x1x64xf32, #tpu.memory_space<vmem>>, %arg10: memref<2x64x2048xf32, #tpu.memory_space<vmem>>, %arg11: memref<2x1x2048xf32, #tpu.memory_space<vmem>>, %arg12: memref<2x2048x64xf32, #tpu.memory_space<vmem>>, %arg13: memref<2x1x64xf32, #tpu.memory_space<vmem>>, %arg14: memref<2x1x64xf32, #tpu.memory_space<vmem>>, %arg15: memref<2x1x64xf32, #tpu.memory_space<vmem>>, %arg16: memref<16x64x128xf32, #tpu.memory_space<vmem>>, %arg17: memref<1x128xf32, #tpu.memory_space<vmem>>, %arg18: memref<1x128xf32, #tpu.memory_space<vmem>>, %arg19: memref<1x128xf32, #tpu.memory_space<vmem>>, %arg20: memref<128x64xf32, #tpu.memory_space<vmem>>, %arg21: memref<1x64xf32, #tpu.memory_space<vmem>>, %arg22: memref<1x64xf32, #tpu.memory_space<vmem>>, %arg23: memref<1x64xf32, #tpu.memory_space<vmem>>, %arg24: memref<64x25xf32, #tpu.memory_space<vmem>>, %arg25: memref<1x25xf32, #tpu.memory_space<vmem>>, %arg26: memref<2x25xf32, #tpu.memory_space<vmem>>) attributes {dimension_semantics = [], scalar_prefetch = 0 : i64, scratch_operands = 0 : i64, tpu.core_type = #tpu.core_type<tc>} {
    %c0 = arith.constant 0 : index
    %c0_0 = arith.constant 0 : index
    %0 = vector.load %arg0[%c0, %c0_0] : memref<32x4xf32, #tpu.memory_space<vmem>>, vector<32x4xf32>
    %c0_1 = arith.constant 0 : index
    %c0_2 = arith.constant 0 : index
    %1 = vector.load %arg1[%c0_1, %c0_2] : memref<4x64xf32, #tpu.memory_space<vmem>>, vector<4x64xf32>
    %cst = arith.constant dense<0.000000e+00> : vector<32x64xf32>
    %2 = tpu.matmul %0, %1, %cst {dimension_numbers = #tpu.dot_dimension_numbers<[1], [0], [0], [1], [0, 0, 1, 1], [], []>} : vector<32x4xf32>, vector<4x64xf32>, vector<32x64xf32> -> vector<32x64xf32>
    %c0_3 = arith.constant 0 : index
    %c0_4 = arith.constant 0 : index
    %3 = vector.load %arg2[%c0_3, %c0_4] : memref<1x64xf32, #tpu.memory_space<vmem>>, vector<1x64xf32>
    %4 = vector.broadcast %3 : vector<1x64xf32> to vector<32x64xf32>
    %5 = arith.addf %2, %4 : vector<32x64xf32>
    %c0_5 = arith.constant 0 : index
    %c0_6 = arith.constant 0 : index
    %6 = vector.load %arg3[%c0_5, %c0_6] : memref<16x64xf32, #tpu.memory_space<vmem>>, vector<16x64xf32>
    %7 = tpu.concatenate %6, %6 in 0 : vector<16x64xf32>, vector<16x64xf32> -> vector<32x64xf32>
    %8 = arith.addf %5, %7 : vector<32x64xf32>
    %c0_7 = arith.constant 0 : index
    %c0_8 = arith.constant 0 : index
    %c0_9 = arith.constant 0 : index
    %9 = vector.load %arg4[%c0_7, %c0_8, %c0_9] : memref<2x64x192xf32, #tpu.memory_space<vmem>>, vector<1x64x192xf32>
    %10 = vector.shape_cast %9 : vector<1x64x192xf32> to vector<64x192xf32>
    %cst_10 = arith.constant dense<0.000000e+00> : vector<32x192xf32>
    %11 = tpu.matmul %8, %10, %cst_10 {dimension_numbers = #tpu.dot_dimension_numbers<[1], [0], [0], [1], [0, 0, 1, 1], [], []>} : vector<32x64xf32>, vector<64x192xf32>, vector<32x192xf32> -> vector<32x192xf32>
    %c0_11 = arith.constant 0 : index
    %c0_12 = arith.constant 0 : index
    %c0_13 = arith.constant 0 : index
    %12 = vector.load %arg5[%c0_11, %c0_12, %c0_13] : memref<2x1x192xf32, #tpu.memory_space<vmem>>, vector<1x1x192xf32>
    %13 = vector.shape_cast %12 : vector<1x1x192xf32> to vector<1x192xf32>
    %14 = vector.broadcast %13 : vector<1x192xf32> to vector<32x192xf32>
    %15 = arith.addf %11, %14 : vector<32x192xf32>
    %16 = vector.extract_strided_slice %15 {offsets = [0, 0], sizes = [32, 64], strides = [1, 1]} : vector<32x192xf32> to vector<32x64xf32>
    %17 = vector.extract_strided_slice %15 {offsets = [0, 64], sizes = [32, 64], strides = [1, 1]} : vector<32x192xf32> to vector<32x64xf32>
    %18 = vector.extract_strided_slice %15 {offsets = [0, 128], sizes = [32, 64], strides = [1, 1]} : vector<32x192xf32> to vector<32x64xf32>
    %c0_14 = arith.constant 0 : index
    %c0_15 = arith.constant 0 : index
    %c0_16 = arith.constant 0 : index
    %19 = vector.load %arg6[%c0_14, %c0_15, %c0_16] : memref<2x64x64xf32, #tpu.memory_space<vmem>>, vector<1x64x64xf32>
    %20 = vector.shape_cast %19 : vector<1x64x64xf32> to vector<64x64xf32>
    %cst_17 = arith.constant 0.000000e+00 : f32
    %21 = vector.broadcast %cst_17 : f32 to vector<16x64xf32>
    %22 = vector.extract_strided_slice %16 {offsets = [0, 0], sizes = [16, 16], strides = [1, 1]} : vector<32x64xf32> to vector<16x16xf32>
    %cst_18 = arith.constant 2.500000e-01 : f32
    %23 = vector.broadcast %cst_18 : f32 to vector<16x16xf32>
    %24 = arith.mulf %22, %23 : vector<16x16xf32>
    %25 = vector.extract_strided_slice %17 {offsets = [0, 0], sizes = [16, 16], strides = [1, 1]} : vector<32x64xf32> to vector<16x16xf32>
    %cst_19 = arith.constant dense<0.000000e+00> : vector<16x16xf32>
    %26 = tpu.matmul %24, %25, %cst_19 {dimension_numbers = #tpu.dot_dimension_numbers<[1], [1], [0], [0], [0, 0, 1, 0], [], []>} : vector<16x16xf32>, vector<16x16xf32>, vector<16x16xf32> -> vector<16x16xf32>
    %cst_20 = arith.constant dense<0xFF800000> : vector<16xf32>
    %27 = vector.multi_reduction <maximumf>, %26, %cst_20 [1] : vector<16x16xf32> to vector<16xf32>
    %28 = vector.shape_cast %27 : vector<16xf32> to vector<16x1xf32>
    %29 = vector.broadcast %28 : vector<16x1xf32> to vector<16x16xf32>
    %30 = arith.subf %26, %29 : vector<16x16xf32>
    %31 = math.exp %30 : vector<16x16xf32>
    %cst_21 = arith.constant dense<0.000000e+00> : vector<16xf32>
    %32 = vector.multi_reduction <add>, %31, %cst_21 [1] : vector<16x16xf32> to vector<16xf32>
    %33 = vector.shape_cast %32 : vector<16xf32> to vector<16x1xf32>
    %34 = tpu.reciprocal %33 {approx = true} : vector<16x1xf32> -> vector<16x1xf32>
    %35 = vector.broadcast %34 : vector<16x1xf32> to vector<16x16xf32>
    %36 = arith.mulf %31, %35 : vector<16x16xf32>
    %37 = vector.extract_strided_slice %18 {offsets = [0, 0], sizes = [16, 16], strides = [1, 1]} : vector<32x64xf32> to vector<16x16xf32>
    %cst_22 = arith.constant dense<0.000000e+00> : vector<16x16xf32>
    %38 = tpu.matmul %36, %37, %cst_22 {dimension_numbers = #tpu.dot_dimension_numbers<[1], [0], [0], [1], [0, 0, 1, 1], [], []>} : vector<16x16xf32>, vector<16x16xf32>, vector<16x16xf32> -> vector<16x16xf32>
    %39 = vector.extract_strided_slice %20 {offsets = [0, 0], sizes = [16, 64], strides = [1, 1]} : vector<64x64xf32> to vector<16x64xf32>
    %cst_23 = arith.constant dense<0.000000e+00> : vector<16x64xf32>
    %40 = tpu.matmul %38, %39, %cst_23 {dimension_numbers = #tpu.dot_dimension_numbers<[1], [0], [0], [1], [0, 0, 1, 1], [], []>} : vector<16x16xf32>, vector<16x64xf32>, vector<16x64xf32> -> vector<16x64xf32>
    %41 = arith.addf %21, %40 : vector<16x64xf32>
    %42 = vector.extract_strided_slice %16 {offsets = [0, 16], sizes = [16, 16], strides = [1, 1]} : vector<32x64xf32> to vector<16x16xf32>
    %cst_24 = arith.constant 2.500000e-01 : f32
    %43 = vector.broadcast %cst_24 : f32 to vector<16x16xf32>
    %44 = arith.mulf %42, %43 : vector<16x16xf32>
    %45 = vector.extract_strided_slice %17 {offsets = [0, 16], sizes = [16, 16], strides = [1, 1]} : vector<32x64xf32> to vector<16x16xf32>
    %cst_25 = arith.constant dense<0.000000e+00> : vector<16x16xf32>
    %46 = tpu.matmul %44, %45, %cst_25 {dimension_numbers = #tpu.dot_dimension_numbers<[1], [1], [0], [0], [0, 0, 1, 0], [], []>} : vector<16x16xf32>, vector<16x16xf32>, vector<16x16xf32> -> vector<16x16xf32>
    %cst_26 = arith.constant dense<0xFF800000> : vector<16xf32>
    %47 = vector.multi_reduction <maximumf>, %46, %cst_26 [1] : vector<16x16xf32> to vector<16xf32>
    %48 = vector.shape_cast %47 : vector<16xf32> to vector<16x1xf32>
    %49 = vector.broadcast %48 : vector<16x1xf32> to vector<16x16xf32>
    %50 = arith.subf %46, %49 : vector<16x16xf32>
    %51 = math.exp %50 : vector<16x16xf32>
    %cst_27 = arith.constant dense<0.000000e+00> : vector<16xf32>
    %52 = vector.multi_reduction <add>, %51, %cst_27 [1] : vector<16x16xf32> to vector<16xf32>
    %53 = vector.shape_cast %52 : vector<16xf32> to vector<16x1xf32>
    %54 = tpu.reciprocal %53 {approx = true} : vector<16x1xf32> -> vector<16x1xf32>
    %55 = vector.broadcast %54 : vector<16x1xf32> to vector<16x16xf32>
    %56 = arith.mulf %51, %55 : vector<16x16xf32>
    %57 = vector.extract_strided_slice %18 {offsets = [0, 16], sizes = [16, 16], strides = [1, 1]} : vector<32x64xf32> to vector<16x16xf32>
    %cst_28 = arith.constant dense<0.000000e+00> : vector<16x16xf32>
    %58 = tpu.matmul %56, %57, %cst_28 {dimension_numbers = #tpu.dot_dimension_numbers<[1], [0], [0], [1], [0, 0, 1, 1], [], []>} : vector<16x16xf32>, vector<16x16xf32>, vector<16x16xf32> -> vector<16x16xf32>
    %59 = vector.extract_strided_slice %20 {offsets = [16, 0], sizes = [16, 64], strides = [1, 1]} : vector<64x64xf32> to vector<16x64xf32>
    %cst_29 = arith.constant dense<0.000000e+00> : vector<16x64xf32>
    %60 = tpu.matmul %58, %59, %cst_29 {dimension_numbers = #tpu.dot_dimension_numbers<[1], [0], [0], [1], [0, 0, 1, 1], [], []>} : vector<16x16xf32>, vector<16x64xf32>, vector<16x64xf32> -> vector<16x64xf32>
    %61 = arith.addf %41, %60 : vector<16x64xf32>
    %62 = vector.extract_strided_slice %16 {offsets = [0, 32], sizes = [16, 16], strides = [1, 1]} : vector<32x64xf32> to vector<16x16xf32>
    %cst_30 = arith.constant 2.500000e-01 : f32
    %63 = vector.broadcast %cst_30 : f32 to vector<16x16xf32>
    %64 = arith.mulf %62, %63 : vector<16x16xf32>
    %65 = vector.extract_strided_slice %17 {offsets = [0, 32], sizes = [16, 16], strides = [1, 1]} : vector<32x64xf32> to vector<16x16xf32>
    %cst_31 = arith.constant dense<0.000000e+00> : vector<16x16xf32>
    %66 = tpu.matmul %64, %65, %cst_31 {dimension_numbers = #tpu.dot_dimension_numbers<[1], [1], [0], [0], [0, 0, 1, 0], [], []>} : vector<16x16xf32>, vector<16x16xf32>, vector<16x16xf32> -> vector<16x16xf32>
    %cst_32 = arith.constant dense<0xFF800000> : vector<16xf32>
    %67 = vector.multi_reduction <maximumf>, %66, %cst_32 [1] : vector<16x16xf32> to vector<16xf32>
    %68 = vector.shape_cast %67 : vector<16xf32> to vector<16x1xf32>
    %69 = vector.broadcast %68 : vector<16x1xf32> to vector<16x16xf32>
    %70 = arith.subf %66, %69 : vector<16x16xf32>
    %71 = math.exp %70 : vector<16x16xf32>
    %cst_33 = arith.constant dense<0.000000e+00> : vector<16xf32>
    %72 = vector.multi_reduction <add>, %71, %cst_33 [1] : vector<16x16xf32> to vector<16xf32>
    %73 = vector.shape_cast %72 : vector<16xf32> to vector<16x1xf32>
    %74 = tpu.reciprocal %73 {approx = true} : vector<16x1xf32> -> vector<16x1xf32>
    %75 = vector.broadcast %74 : vector<16x1xf32> to vector<16x16xf32>
    %76 = arith.mulf %71, %75 : vector<16x16xf32>
    %77 = vector.extract_strided_slice %18 {offsets = [0, 32], sizes = [16, 16], strides = [1, 1]} : vector<32x64xf32> to vector<16x16xf32>
    %cst_34 = arith.constant dense<0.000000e+00> : vector<16x16xf32>
    %78 = tpu.matmul %76, %77, %cst_34 {dimension_numbers = #tpu.dot_dimension_numbers<[1], [0], [0], [1], [0, 0, 1, 1], [], []>} : vector<16x16xf32>, vector<16x16xf32>, vector<16x16xf32> -> vector<16x16xf32>
    %79 = vector.extract_strided_slice %20 {offsets = [32, 0], sizes = [16, 64], strides = [1, 1]} : vector<64x64xf32> to vector<16x64xf32>
    %cst_35 = arith.constant dense<0.000000e+00> : vector<16x64xf32>
    %80 = tpu.matmul %78, %79, %cst_35 {dimension_numbers = #tpu.dot_dimension_numbers<[1], [0], [0], [1], [0, 0, 1, 1], [], []>} : vector<16x16xf32>, vector<16x64xf32>, vector<16x64xf32> -> vector<16x64xf32>
    %81 = arith.addf %61, %80 : vector<16x64xf32>
    %82 = vector.extract_strided_slice %16 {offsets = [0, 48], sizes = [16, 16], strides = [1, 1]} : vector<32x64xf32> to vector<16x16xf32>
    %cst_36 = arith.constant 2.500000e-01 : f32
    %83 = vector.broadcast %cst_36 : f32 to vector<16x16xf32>
    %84 = arith.mulf %82, %83 : vector<16x16xf32>
    %85 = vector.extract_strided_slice %17 {offsets = [0, 48], sizes = [16, 16], strides = [1, 1]} : vector<32x64xf32> to vector<16x16xf32>
    %cst_37 = arith.constant dense<0.000000e+00> : vector<16x16xf32>
    %86 = tpu.matmul %84, %85, %cst_37 {dimension_numbers = #tpu.dot_dimension_numbers<[1], [1], [0], [0], [0, 0, 1, 0], [], []>} : vector<16x16xf32>, vector<16x16xf32>, vector<16x16xf32> -> vector<16x16xf32>
    %cst_38 = arith.constant dense<0xFF800000> : vector<16xf32>
    %87 = vector.multi_reduction <maximumf>, %86, %cst_38 [1] : vector<16x16xf32> to vector<16xf32>
    %88 = vector.shape_cast %87 : vector<16xf32> to vector<16x1xf32>
    %89 = vector.broadcast %88 : vector<16x1xf32> to vector<16x16xf32>
    %90 = arith.subf %86, %89 : vector<16x16xf32>
    %91 = math.exp %90 : vector<16x16xf32>
    %cst_39 = arith.constant dense<0.000000e+00> : vector<16xf32>
    %92 = vector.multi_reduction <add>, %91, %cst_39 [1] : vector<16x16xf32> to vector<16xf32>
    %93 = vector.shape_cast %92 : vector<16xf32> to vector<16x1xf32>
    %94 = tpu.reciprocal %93 {approx = true} : vector<16x1xf32> -> vector<16x1xf32>
    %95 = vector.broadcast %94 : vector<16x1xf32> to vector<16x16xf32>
    %96 = arith.mulf %91, %95 : vector<16x16xf32>
    %97 = vector.extract_strided_slice %18 {offsets = [0, 48], sizes = [16, 16], strides = [1, 1]} : vector<32x64xf32> to vector<16x16xf32>
    %cst_40 = arith.constant dense<0.000000e+00> : vector<16x16xf32>
    %98 = tpu.matmul %96, %97, %cst_40 {dimension_numbers = #tpu.dot_dimension_numbers<[1], [0], [0], [1], [0, 0, 1, 1], [], []>} : vector<16x16xf32>, vector<16x16xf32>, vector<16x16xf32> -> vector<16x16xf32>
    %99 = vector.extract_strided_slice %20 {offsets = [48, 0], sizes = [16, 64], strides = [1, 1]} : vector<64x64xf32> to vector<16x64xf32>
    %cst_41 = arith.constant dense<0.000000e+00> : vector<16x64xf32>
    %100 = tpu.matmul %98, %99, %cst_41 {dimension_numbers = #tpu.dot_dimension_numbers<[1], [0], [0], [1], [0, 0, 1, 1], [], []>} : vector<16x16xf32>, vector<16x64xf32>, vector<16x64xf32> -> vector<16x64xf32>
    %101 = arith.addf %81, %100 : vector<16x64xf32>
    %cst_42 = arith.constant 0.000000e+00 : f32
    %102 = vector.broadcast %cst_42 : f32 to vector<16x64xf32>
    %103 = vector.extract_strided_slice %16 {offsets = [16, 0], sizes = [16, 16], strides = [1, 1]} : vector<32x64xf32> to vector<16x16xf32>
    %cst_43 = arith.constant 2.500000e-01 : f32
    %104 = vector.broadcast %cst_43 : f32 to vector<16x16xf32>
    %105 = arith.mulf %103, %104 : vector<16x16xf32>
    %106 = vector.extract_strided_slice %17 {offsets = [16, 0], sizes = [16, 16], strides = [1, 1]} : vector<32x64xf32> to vector<16x16xf32>
    %cst_44 = arith.constant dense<0.000000e+00> : vector<16x16xf32>
    %107 = tpu.matmul %105, %106, %cst_44 {dimension_numbers = #tpu.dot_dimension_numbers<[1], [1], [0], [0], [0, 0, 1, 0], [], []>} : vector<16x16xf32>, vector<16x16xf32>, vector<16x16xf32> -> vector<16x16xf32>
    %cst_45 = arith.constant dense<0xFF800000> : vector<16xf32>
    %108 = vector.multi_reduction <maximumf>, %107, %cst_45 [1] : vector<16x16xf32> to vector<16xf32>
    %109 = vector.shape_cast %108 : vector<16xf32> to vector<16x1xf32>
    %110 = vector.broadcast %109 : vector<16x1xf32> to vector<16x16xf32>
    %111 = arith.subf %107, %110 : vector<16x16xf32>
    %112 = math.exp %111 : vector<16x16xf32>
    %cst_46 = arith.constant dense<0.000000e+00> : vector<16xf32>
    %113 = vector.multi_reduction <add>, %112, %cst_46 [1] : vector<16x16xf32> to vector<16xf32>
    %114 = vector.shape_cast %113 : vector<16xf32> to vector<16x1xf32>
    %115 = tpu.reciprocal %114 {approx = true} : vector<16x1xf32> -> vector<16x1xf32>
    %116 = vector.broadcast %115 : vector<16x1xf32> to vector<16x16xf32>
    %117 = arith.mulf %112, %116 : vector<16x16xf32>
    %118 = vector.extract_strided_slice %18 {offsets = [16, 0], sizes = [16, 16], strides = [1, 1]} : vector<32x64xf32> to vector<16x16xf32>
    %cst_47 = arith.constant dense<0.000000e+00> : vector<16x16xf32>
    %119 = tpu.matmul %117, %118, %cst_47 {dimension_numbers = #tpu.dot_dimension_numbers<[1], [0], [0], [1], [0, 0, 1, 1], [], []>} : vector<16x16xf32>, vector<16x16xf32>, vector<16x16xf32> -> vector<16x16xf32>
    %120 = vector.extract_strided_slice %20 {offsets = [0, 0], sizes = [16, 64], strides = [1, 1]} : vector<64x64xf32> to vector<16x64xf32>
    %cst_48 = arith.constant dense<0.000000e+00> : vector<16x64xf32>
    %121 = tpu.matmul %119, %120, %cst_48 {dimension_numbers = #tpu.dot_dimension_numbers<[1], [0], [0], [1], [0, 0, 1, 1], [], []>} : vector<16x16xf32>, vector<16x64xf32>, vector<16x64xf32> -> vector<16x64xf32>
    %122 = arith.addf %102, %121 : vector<16x64xf32>
    %123 = vector.extract_strided_slice %16 {offsets = [16, 16], sizes = [16, 16], strides = [1, 1]} : vector<32x64xf32> to vector<16x16xf32>
    %cst_49 = arith.constant 2.500000e-01 : f32
    %124 = vector.broadcast %cst_49 : f32 to vector<16x16xf32>
    %125 = arith.mulf %123, %124 : vector<16x16xf32>
    %126 = vector.extract_strided_slice %17 {offsets = [16, 16], sizes = [16, 16], strides = [1, 1]} : vector<32x64xf32> to vector<16x16xf32>
    %cst_50 = arith.constant dense<0.000000e+00> : vector<16x16xf32>
    %127 = tpu.matmul %125, %126, %cst_50 {dimension_numbers = #tpu.dot_dimension_numbers<[1], [1], [0], [0], [0, 0, 1, 0], [], []>} : vector<16x16xf32>, vector<16x16xf32>, vector<16x16xf32> -> vector<16x16xf32>
    %cst_51 = arith.constant dense<0xFF800000> : vector<16xf32>
    %128 = vector.multi_reduction <maximumf>, %127, %cst_51 [1] : vector<16x16xf32> to vector<16xf32>
    %129 = vector.shape_cast %128 : vector<16xf32> to vector<16x1xf32>
    %130 = vector.broadcast %129 : vector<16x1xf32> to vector<16x16xf32>
    %131 = arith.subf %127, %130 : vector<16x16xf32>
    %132 = math.exp %131 : vector<16x16xf32>
    %cst_52 = arith.constant dense<0.000000e+00> : vector<16xf32>
    %133 = vector.multi_reduction <add>, %132, %cst_52 [1] : vector<16x16xf32> to vector<16xf32>
    %134 = vector.shape_cast %133 : vector<16xf32> to vector<16x1xf32>
    %135 = tpu.reciprocal %134 {approx = true} : vector<16x1xf32> -> vector<16x1xf32>
    %136 = vector.broadcast %135 : vector<16x1xf32> to vector<16x16xf32>
    %137 = arith.mulf %132, %136 : vector<16x16xf32>
    %138 = vector.extract_strided_slice %18 {offsets = [16, 16], sizes = [16, 16], strides = [1, 1]} : vector<32x64xf32> to vector<16x16xf32>
    %cst_53 = arith.constant dense<0.000000e+00> : vector<16x16xf32>
    %139 = tpu.matmul %137, %138, %cst_53 {dimension_numbers = #tpu.dot_dimension_numbers<[1], [0], [0], [1], [0, 0, 1, 1], [], []>} : vector<16x16xf32>, vector<16x16xf32>, vector<16x16xf32> -> vector<16x16xf32>
    %140 = vector.extract_strided_slice %20 {offsets = [16, 0], sizes = [16, 64], strides = [1, 1]} : vector<64x64xf32> to vector<16x64xf32>
    %cst_54 = arith.constant dense<0.000000e+00> : vector<16x64xf32>
    %141 = tpu.matmul %139, %140, %cst_54 {dimension_numbers = #tpu.dot_dimension_numbers<[1], [0], [0], [1], [0, 0, 1, 1], [], []>} : vector<16x16xf32>, vector<16x64xf32>, vector<16x64xf32> -> vector<16x64xf32>
    %142 = arith.addf %122, %141 : vector<16x64xf32>
    %143 = vector.extract_strided_slice %16 {offsets = [16, 32], sizes = [16, 16], strides = [1, 1]} : vector<32x64xf32> to vector<16x16xf32>
    %cst_55 = arith.constant 2.500000e-01 : f32
    %144 = vector.broadcast %cst_55 : f32 to vector<16x16xf32>
    %145 = arith.mulf %143, %144 : vector<16x16xf32>
    %146 = vector.extract_strided_slice %17 {offsets = [16, 32], sizes = [16, 16], strides = [1, 1]} : vector<32x64xf32> to vector<16x16xf32>
    %cst_56 = arith.constant dense<0.000000e+00> : vector<16x16xf32>
    %147 = tpu.matmul %145, %146, %cst_56 {dimension_numbers = #tpu.dot_dimension_numbers<[1], [1], [0], [0], [0, 0, 1, 0], [], []>} : vector<16x16xf32>, vector<16x16xf32>, vector<16x16xf32> -> vector<16x16xf32>
    %cst_57 = arith.constant dense<0xFF800000> : vector<16xf32>
    %148 = vector.multi_reduction <maximumf>, %147, %cst_57 [1] : vector<16x16xf32> to vector<16xf32>
    %149 = vector.shape_cast %148 : vector<16xf32> to vector<16x1xf32>
    %150 = vector.broadcast %149 : vector<16x1xf32> to vector<16x16xf32>
    %151 = arith.subf %147, %150 : vector<16x16xf32>
    %152 = math.exp %151 : vector<16x16xf32>
    %cst_58 = arith.constant dense<0.000000e+00> : vector<16xf32>
    %153 = vector.multi_reduction <add>, %152, %cst_58 [1] : vector<16x16xf32> to vector<16xf32>
    %154 = vector.shape_cast %153 : vector<16xf32> to vector<16x1xf32>
    %155 = tpu.reciprocal %154 {approx = true} : vector<16x1xf32> -> vector<16x1xf32>
    %156 = vector.broadcast %155 : vector<16x1xf32> to vector<16x16xf32>
    %157 = arith.mulf %152, %156 : vector<16x16xf32>
    %158 = vector.extract_strided_slice %18 {offsets = [16, 32], sizes = [16, 16], strides = [1, 1]} : vector<32x64xf32> to vector<16x16xf32>
    %cst_59 = arith.constant dense<0.000000e+00> : vector<16x16xf32>
    %159 = tpu.matmul %157, %158, %cst_59 {dimension_numbers = #tpu.dot_dimension_numbers<[1], [0], [0], [1], [0, 0, 1, 1], [], []>} : vector<16x16xf32>, vector<16x16xf32>, vector<16x16xf32> -> vector<16x16xf32>
    %160 = vector.extract_strided_slice %20 {offsets = [32, 0], sizes = [16, 64], strides = [1, 1]} : vector<64x64xf32> to vector<16x64xf32>
    %cst_60 = arith.constant dense<0.000000e+00> : vector<16x64xf32>
    %161 = tpu.matmul %159, %160, %cst_60 {dimension_numbers = #tpu.dot_dimension_numbers<[1], [0], [0], [1], [0, 0, 1, 1], [], []>} : vector<16x16xf32>, vector<16x64xf32>, vector<16x64xf32> -> vector<16x64xf32>
    %162 = arith.addf %142, %161 : vector<16x64xf32>
    %163 = vector.extract_strided_slice %16 {offsets = [16, 48], sizes = [16, 16], strides = [1, 1]} : vector<32x64xf32> to vector<16x16xf32>
    %cst_61 = arith.constant 2.500000e-01 : f32
    %164 = vector.broadcast %cst_61 : f32 to vector<16x16xf32>
    %165 = arith.mulf %163, %164 : vector<16x16xf32>
    %166 = vector.extract_strided_slice %17 {offsets = [16, 48], sizes = [16, 16], strides = [1, 1]} : vector<32x64xf32> to vector<16x16xf32>
    %cst_62 = arith.constant dense<0.000000e+00> : vector<16x16xf32>
    %167 = tpu.matmul %165, %166, %cst_62 {dimension_numbers = #tpu.dot_dimension_numbers<[1], [1], [0], [0], [0, 0, 1, 0], [], []>} : vector<16x16xf32>, vector<16x16xf32>, vector<16x16xf32> -> vector<16x16xf32>
    %cst_63 = arith.constant dense<0xFF800000> : vector<16xf32>
    %168 = vector.multi_reduction <maximumf>, %167, %cst_63 [1] : vector<16x16xf32> to vector<16xf32>
    %169 = vector.shape_cast %168 : vector<16xf32> to vector<16x1xf32>
    %170 = vector.broadcast %169 : vector<16x1xf32> to vector<16x16xf32>
    %171 = arith.subf %167, %170 : vector<16x16xf32>
    %172 = math.exp %171 : vector<16x16xf32>
    %cst_64 = arith.constant dense<0.000000e+00> : vector<16xf32>
    %173 = vector.multi_reduction <add>, %172, %cst_64 [1] : vector<16x16xf32> to vector<16xf32>
    %174 = vector.shape_cast %173 : vector<16xf32> to vector<16x1xf32>
    %175 = tpu.reciprocal %174 {approx = true} : vector<16x1xf32> -> vector<16x1xf32>
    %176 = vector.broadcast %175 : vector<16x1xf32> to vector<16x16xf32>
    %177 = arith.mulf %172, %176 : vector<16x16xf32>
    %178 = vector.extract_strided_slice %18 {offsets = [16, 48], sizes = [16, 16], strides = [1, 1]} : vector<32x64xf32> to vector<16x16xf32>
    %cst_65 = arith.constant dense<0.000000e+00> : vector<16x16xf32>
    %179 = tpu.matmul %177, %178, %cst_65 {dimension_numbers = #tpu.dot_dimension_numbers<[1], [0], [0], [1], [0, 0, 1, 1], [], []>} : vector<16x16xf32>, vector<16x16xf32>, vector<16x16xf32> -> vector<16x16xf32>
    %180 = vector.extract_strided_slice %20 {offsets = [48, 0], sizes = [16, 64], strides = [1, 1]} : vector<64x64xf32> to vector<16x64xf32>
    %cst_66 = arith.constant dense<0.000000e+00> : vector<16x64xf32>
    %181 = tpu.matmul %179, %180, %cst_66 {dimension_numbers = #tpu.dot_dimension_numbers<[1], [0], [0], [1], [0, 0, 1, 1], [], []>} : vector<16x16xf32>, vector<16x64xf32>, vector<16x64xf32> -> vector<16x64xf32>
    %182 = arith.addf %162, %181 : vector<16x64xf32>
    %183 = tpu.concatenate %101, %182 in 0 : vector<16x64xf32>, vector<16x64xf32> -> vector<32x64xf32>
    %184 = arith.addf %8, %183 : vector<32x64xf32>
    %c0_67 = arith.constant 0 : index
    %c0_68 = arith.constant 0 : index
    %c0_69 = arith.constant 0 : index
    %185 = vector.load %arg7[%c0_67, %c0_68, %c0_69] : memref<2x1x64xf32, #tpu.memory_space<vmem>>, vector<1x1x64xf32>
    %186 = vector.shape_cast %185 : vector<1x1x64xf32> to vector<1x64xf32>
    %187 = vector.broadcast %186 : vector<1x64xf32> to vector<32x64xf32>
    %188 = arith.addf %184, %187 : vector<32x64xf32>
    %c0_70 = arith.constant 0 : index
    %c0_71 = arith.constant 0 : index
    %c0_72 = arith.constant 0 : index
    %189 = vector.load %arg8[%c0_70, %c0_71, %c0_72] : memref<2x1x64xf32, #tpu.memory_space<vmem>>, vector<1x1x64xf32>
    %190 = vector.shape_cast %189 : vector<1x1x64xf32> to vector<1x64xf32>
    %c0_73 = arith.constant 0 : index
    %c0_74 = arith.constant 0 : index
    %c0_75 = arith.constant 0 : index
    %191 = vector.load %arg9[%c0_73, %c0_74, %c0_75] : memref<2x1x64xf32, #tpu.memory_space<vmem>>, vector<1x1x64xf32>
    %192 = vector.shape_cast %191 : vector<1x1x64xf32> to vector<1x64xf32>
    %cst_76 = arith.constant dense<0.000000e+00> : vector<32xf32>
    %193 = vector.multi_reduction <add>, %188, %cst_76 [1] : vector<32x64xf32> to vector<32xf32>
    %194 = vector.shape_cast %193 : vector<32xf32> to vector<32x1xf32>
    %cst_77 = arith.constant 6.400000e+01 : f32
    %195 = vector.broadcast %cst_77 : f32 to vector<32x1xf32>
    %196 = arith.divf %194, %195 : vector<32x1xf32>
    %197 = arith.mulf %188, %188 : vector<32x64xf32>
    %cst_78 = arith.constant dense<0.000000e+00> : vector<32xf32>
    %198 = vector.multi_reduction <add>, %197, %cst_78 [1] : vector<32x64xf32> to vector<32xf32>
    %199 = vector.shape_cast %198 : vector<32xf32> to vector<32x1xf32>
    %cst_79 = arith.constant 6.400000e+01 : f32
    %200 = vector.broadcast %cst_79 : f32 to vector<32x1xf32>
    %201 = arith.divf %199, %200 : vector<32x1xf32>
    %202 = arith.mulf %196, %196 : vector<32x1xf32>
    %203 = arith.subf %201, %202 : vector<32x1xf32>
    %204 = vector.broadcast %196 : vector<32x1xf32> to vector<32x64xf32>
    %205 = arith.subf %188, %204 : vector<32x64xf32>
    %cst_80 = arith.constant 9.99999974E-6 : f32
    %206 = vector.broadcast %cst_80 : f32 to vector<32x1xf32>
    %207 = arith.addf %203, %206 : vector<32x1xf32>
    %208 = math.rsqrt %207 : vector<32x1xf32>
    %209 = vector.broadcast %208 : vector<32x1xf32> to vector<32x64xf32>
    %210 = arith.mulf %205, %209 : vector<32x64xf32>
    %211 = vector.broadcast %190 : vector<1x64xf32> to vector<32x64xf32>
    %212 = arith.mulf %210, %211 : vector<32x64xf32>
    %213 = vector.broadcast %192 : vector<1x64xf32> to vector<32x64xf32>
    %214 = arith.addf %212, %213 : vector<32x64xf32>
    %c0_81 = arith.constant 0 : index
    %c0_82 = arith.constant 0 : index
    %c0_83 = arith.constant 0 : index
    %215 = vector.load %arg10[%c0_81, %c0_82, %c0_83] : memref<2x64x2048xf32, #tpu.memory_space<vmem>>, vector<1x64x2048xf32>
    %216 = vector.shape_cast %215 : vector<1x64x2048xf32> to vector<64x2048xf32>
    %cst_84 = arith.constant dense<0.000000e+00> : vector<32x2048xf32>
    %217 = tpu.matmul %214, %216, %cst_84 {dimension_numbers = #tpu.dot_dimension_numbers<[1], [0], [0], [1], [0, 0, 1, 1], [], []>} : vector<32x64xf32>, vector<64x2048xf32>, vector<32x2048xf32> -> vector<32x2048xf32>
    %c0_85 = arith.constant 0 : index
    %c0_86 = arith.constant 0 : index
    %c0_87 = arith.constant 0 : index
    %218 = vector.load %arg11[%c0_85, %c0_86, %c0_87] : memref<2x1x2048xf32, #tpu.memory_space<vmem>>, vector<1x1x2048xf32>
    %219 = vector.shape_cast %218 : vector<1x1x2048xf32> to vector<1x2048xf32>
    %220 = vector.broadcast %219 : vector<1x2048xf32> to vector<32x2048xf32>
    %221 = arith.addf %217, %220 : vector<32x2048xf32>
    %cst_88 = arith.constant 0.000000e+00 : f32
    %222 = vector.broadcast %cst_88 : f32 to vector<32x2048xf32>
    %223 = arith.maximumf %221, %222 : vector<32x2048xf32>
    %c0_89 = arith.constant 0 : index
    %c0_90 = arith.constant 0 : index
    %c0_91 = arith.constant 0 : index
    %224 = vector.load %arg12[%c0_89, %c0_90, %c0_91] : memref<2x2048x64xf32, #tpu.memory_space<vmem>>, vector<1x2048x64xf32>
    %225 = vector.shape_cast %224 : vector<1x2048x64xf32> to vector<2048x64xf32>
    %cst_92 = arith.constant dense<0.000000e+00> : vector<32x64xf32>
    %226 = tpu.matmul %223, %225, %cst_92 {dimension_numbers = #tpu.dot_dimension_numbers<[1], [0], [0], [1], [0, 0, 1, 1], [], []>} : vector<32x2048xf32>, vector<2048x64xf32>, vector<32x64xf32> -> vector<32x64xf32>
    %c0_93 = arith.constant 0 : index
    %c0_94 = arith.constant 0 : index
    %c0_95 = arith.constant 0 : index
    %227 = vector.load %arg13[%c0_93, %c0_94, %c0_95] : memref<2x1x64xf32, #tpu.memory_space<vmem>>, vector<1x1x64xf32>
    %228 = vector.shape_cast %227 : vector<1x1x64xf32> to vector<1x64xf32>
    %229 = vector.broadcast %228 : vector<1x64xf32> to vector<32x64xf32>
    %230 = arith.addf %226, %229 : vector<32x64xf32>
    %231 = arith.addf %214, %230 : vector<32x64xf32>
    %c0_96 = arith.constant 0 : index
    %c0_97 = arith.constant 0 : index
    %c0_98 = arith.constant 0 : index
    %232 = vector.load %arg14[%c0_96, %c0_97, %c0_98] : memref<2x1x64xf32, #tpu.memory_space<vmem>>, vector<1x1x64xf32>
    %233 = vector.shape_cast %232 : vector<1x1x64xf32> to vector<1x64xf32>
    %c0_99 = arith.constant 0 : index
    %c0_100 = arith.constant 0 : index
    %c0_101 = arith.constant 0 : index
    %234 = vector.load %arg15[%c0_99, %c0_100, %c0_101] : memref<2x1x64xf32, #tpu.memory_space<vmem>>, vector<1x1x64xf32>
    %235 = vector.shape_cast %234 : vector<1x1x64xf32> to vector<1x64xf32>
    %cst_102 = arith.constant dense<0.000000e+00> : vector<32xf32>
    %236 = vector.multi_reduction <add>, %231, %cst_102 [1] : vector<32x64xf32> to vector<32xf32>
    %237 = vector.shape_cast %236 : vector<32xf32> to vector<32x1xf32>
    %cst_103 = arith.constant 6.400000e+01 : f32
    %238 = vector.broadcast %cst_103 : f32 to vector<32x1xf32>
    %239 = arith.divf %237, %238 : vector<32x1xf32>
    %240 = arith.mulf %231, %231 : vector<32x64xf32>
    %cst_104 = arith.constant dense<0.000000e+00> : vector<32xf32>
    %241 = vector.multi_reduction <add>, %240, %cst_104 [1] : vector<32x64xf32> to vector<32xf32>
    %242 = vector.shape_cast %241 : vector<32xf32> to vector<32x1xf32>
    %cst_105 = arith.constant 6.400000e+01 : f32
    %243 = vector.broadcast %cst_105 : f32 to vector<32x1xf32>
    %244 = arith.divf %242, %243 : vector<32x1xf32>
    %245 = arith.mulf %239, %239 : vector<32x1xf32>
    %246 = arith.subf %244, %245 : vector<32x1xf32>
    %247 = vector.broadcast %239 : vector<32x1xf32> to vector<32x64xf32>
    %248 = arith.subf %231, %247 : vector<32x64xf32>
    %cst_106 = arith.constant 9.99999974E-6 : f32
    %249 = vector.broadcast %cst_106 : f32 to vector<32x1xf32>
    %250 = arith.addf %246, %249 : vector<32x1xf32>
    %251 = math.rsqrt %250 : vector<32x1xf32>
    %252 = vector.broadcast %251 : vector<32x1xf32> to vector<32x64xf32>
    %253 = arith.mulf %248, %252 : vector<32x64xf32>
    %254 = vector.broadcast %233 : vector<1x64xf32> to vector<32x64xf32>
    %255 = arith.mulf %253, %254 : vector<32x64xf32>
    %256 = vector.broadcast %235 : vector<1x64xf32> to vector<32x64xf32>
    %257 = arith.addf %255, %256 : vector<32x64xf32>
    %c1 = arith.constant 1 : index
    %c0_107 = arith.constant 0 : index
    %c0_108 = arith.constant 0 : index
    %258 = vector.load %arg4[%c1, %c0_107, %c0_108] : memref<2x64x192xf32, #tpu.memory_space<vmem>>, vector<1x64x192xf32>
    %259 = vector.shape_cast %258 : vector<1x64x192xf32> to vector<64x192xf32>
    %cst_109 = arith.constant dense<0.000000e+00> : vector<32x192xf32>
    %260 = tpu.matmul %257, %259, %cst_109 {dimension_numbers = #tpu.dot_dimension_numbers<[1], [0], [0], [1], [0, 0, 1, 1], [], []>} : vector<32x64xf32>, vector<64x192xf32>, vector<32x192xf32> -> vector<32x192xf32>
    %c1_110 = arith.constant 1 : index
    %c0_111 = arith.constant 0 : index
    %c0_112 = arith.constant 0 : index
    %261 = vector.load %arg5[%c1_110, %c0_111, %c0_112] : memref<2x1x192xf32, #tpu.memory_space<vmem>>, vector<1x1x192xf32>
    %262 = vector.shape_cast %261 : vector<1x1x192xf32> to vector<1x192xf32>
    %263 = vector.broadcast %262 : vector<1x192xf32> to vector<32x192xf32>
    %264 = arith.addf %260, %263 : vector<32x192xf32>
    %265 = vector.extract_strided_slice %264 {offsets = [0, 0], sizes = [32, 64], strides = [1, 1]} : vector<32x192xf32> to vector<32x64xf32>
    %266 = vector.extract_strided_slice %264 {offsets = [0, 64], sizes = [32, 64], strides = [1, 1]} : vector<32x192xf32> to vector<32x64xf32>
    %267 = vector.extract_strided_slice %264 {offsets = [0, 128], sizes = [32, 64], strides = [1, 1]} : vector<32x192xf32> to vector<32x64xf32>
    %c1_113 = arith.constant 1 : index
    %c0_114 = arith.constant 0 : index
    %c0_115 = arith.constant 0 : index
    %268 = vector.load %arg6[%c1_113, %c0_114, %c0_115] : memref<2x64x64xf32, #tpu.memory_space<vmem>>, vector<1x64x64xf32>
    %269 = vector.shape_cast %268 : vector<1x64x64xf32> to vector<64x64xf32>
    %cst_116 = arith.constant 0.000000e+00 : f32
    %270 = vector.broadcast %cst_116 : f32 to vector<16x64xf32>
    %271 = vector.extract_strided_slice %265 {offsets = [0, 0], sizes = [16, 16], strides = [1, 1]} : vector<32x64xf32> to vector<16x16xf32>
    %cst_117 = arith.constant 2.500000e-01 : f32
    %272 = vector.broadcast %cst_117 : f32 to vector<16x16xf32>
    %273 = arith.mulf %271, %272 : vector<16x16xf32>
    %274 = vector.extract_strided_slice %266 {offsets = [0, 0], sizes = [16, 16], strides = [1, 1]} : vector<32x64xf32> to vector<16x16xf32>
    %cst_118 = arith.constant dense<0.000000e+00> : vector<16x16xf32>
    %275 = tpu.matmul %273, %274, %cst_118 {dimension_numbers = #tpu.dot_dimension_numbers<[1], [1], [0], [0], [0, 0, 1, 0], [], []>} : vector<16x16xf32>, vector<16x16xf32>, vector<16x16xf32> -> vector<16x16xf32>
    %cst_119 = arith.constant dense<0xFF800000> : vector<16xf32>
    %276 = vector.multi_reduction <maximumf>, %275, %cst_119 [1] : vector<16x16xf32> to vector<16xf32>
    %277 = vector.shape_cast %276 : vector<16xf32> to vector<16x1xf32>
    %278 = vector.broadcast %277 : vector<16x1xf32> to vector<16x16xf32>
    %279 = arith.subf %275, %278 : vector<16x16xf32>
    %280 = math.exp %279 : vector<16x16xf32>
    %cst_120 = arith.constant dense<0.000000e+00> : vector<16xf32>
    %281 = vector.multi_reduction <add>, %280, %cst_120 [1] : vector<16x16xf32> to vector<16xf32>
    %282 = vector.shape_cast %281 : vector<16xf32> to vector<16x1xf32>
    %283 = tpu.reciprocal %282 {approx = true} : vector<16x1xf32> -> vector<16x1xf32>
    %284 = vector.broadcast %283 : vector<16x1xf32> to vector<16x16xf32>
    %285 = arith.mulf %280, %284 : vector<16x16xf32>
    %286 = vector.extract_strided_slice %267 {offsets = [0, 0], sizes = [16, 16], strides = [1, 1]} : vector<32x64xf32> to vector<16x16xf32>
    %cst_121 = arith.constant dense<0.000000e+00> : vector<16x16xf32>
    %287 = tpu.matmul %285, %286, %cst_121 {dimension_numbers = #tpu.dot_dimension_numbers<[1], [0], [0], [1], [0, 0, 1, 1], [], []>} : vector<16x16xf32>, vector<16x16xf32>, vector<16x16xf32> -> vector<16x16xf32>
    %288 = vector.extract_strided_slice %269 {offsets = [0, 0], sizes = [16, 64], strides = [1, 1]} : vector<64x64xf32> to vector<16x64xf32>
    %cst_122 = arith.constant dense<0.000000e+00> : vector<16x64xf32>
    %289 = tpu.matmul %287, %288, %cst_122 {dimension_numbers = #tpu.dot_dimension_numbers<[1], [0], [0], [1], [0, 0, 1, 1], [], []>} : vector<16x16xf32>, vector<16x64xf32>, vector<16x64xf32> -> vector<16x64xf32>
    %290 = arith.addf %270, %289 : vector<16x64xf32>
    %291 = vector.extract_strided_slice %265 {offsets = [0, 16], sizes = [16, 16], strides = [1, 1]} : vector<32x64xf32> to vector<16x16xf32>
    %cst_123 = arith.constant 2.500000e-01 : f32
    %292 = vector.broadcast %cst_123 : f32 to vector<16x16xf32>
    %293 = arith.mulf %291, %292 : vector<16x16xf32>
    %294 = vector.extract_strided_slice %266 {offsets = [0, 16], sizes = [16, 16], strides = [1, 1]} : vector<32x64xf32> to vector<16x16xf32>
    %cst_124 = arith.constant dense<0.000000e+00> : vector<16x16xf32>
    %295 = tpu.matmul %293, %294, %cst_124 {dimension_numbers = #tpu.dot_dimension_numbers<[1], [1], [0], [0], [0, 0, 1, 0], [], []>} : vector<16x16xf32>, vector<16x16xf32>, vector<16x16xf32> -> vector<16x16xf32>
    %cst_125 = arith.constant dense<0xFF800000> : vector<16xf32>
    %296 = vector.multi_reduction <maximumf>, %295, %cst_125 [1] : vector<16x16xf32> to vector<16xf32>
    %297 = vector.shape_cast %296 : vector<16xf32> to vector<16x1xf32>
    %298 = vector.broadcast %297 : vector<16x1xf32> to vector<16x16xf32>
    %299 = arith.subf %295, %298 : vector<16x16xf32>
    %300 = math.exp %299 : vector<16x16xf32>
    %cst_126 = arith.constant dense<0.000000e+00> : vector<16xf32>
    %301 = vector.multi_reduction <add>, %300, %cst_126 [1] : vector<16x16xf32> to vector<16xf32>
    %302 = vector.shape_cast %301 : vector<16xf32> to vector<16x1xf32>
    %303 = tpu.reciprocal %302 {approx = true} : vector<16x1xf32> -> vector<16x1xf32>
    %304 = vector.broadcast %303 : vector<16x1xf32> to vector<16x16xf32>
    %305 = arith.mulf %300, %304 : vector<16x16xf32>
    %306 = vector.extract_strided_slice %267 {offsets = [0, 16], sizes = [16, 16], strides = [1, 1]} : vector<32x64xf32> to vector<16x16xf32>
    %cst_127 = arith.constant dense<0.000000e+00> : vector<16x16xf32>
    %307 = tpu.matmul %305, %306, %cst_127 {dimension_numbers = #tpu.dot_dimension_numbers<[1], [0], [0], [1], [0, 0, 1, 1], [], []>} : vector<16x16xf32>, vector<16x16xf32>, vector<16x16xf32> -> vector<16x16xf32>
    %308 = vector.extract_strided_slice %269 {offsets = [16, 0], sizes = [16, 64], strides = [1, 1]} : vector<64x64xf32> to vector<16x64xf32>
    %cst_128 = arith.constant dense<0.000000e+00> : vector<16x64xf32>
    %309 = tpu.matmul %307, %308, %cst_128 {dimension_numbers = #tpu.dot_dimension_numbers<[1], [0], [0], [1], [0, 0, 1, 1], [], []>} : vector<16x16xf32>, vector<16x64xf32>, vector<16x64xf32> -> vector<16x64xf32>
    %310 = arith.addf %290, %309 : vector<16x64xf32>
    %311 = vector.extract_strided_slice %265 {offsets = [0, 32], sizes = [16, 16], strides = [1, 1]} : vector<32x64xf32> to vector<16x16xf32>
    %cst_129 = arith.constant 2.500000e-01 : f32
    %312 = vector.broadcast %cst_129 : f32 to vector<16x16xf32>
    %313 = arith.mulf %311, %312 : vector<16x16xf32>
    %314 = vector.extract_strided_slice %266 {offsets = [0, 32], sizes = [16, 16], strides = [1, 1]} : vector<32x64xf32> to vector<16x16xf32>
    %cst_130 = arith.constant dense<0.000000e+00> : vector<16x16xf32>
    %315 = tpu.matmul %313, %314, %cst_130 {dimension_numbers = #tpu.dot_dimension_numbers<[1], [1], [0], [0], [0, 0, 1, 0], [], []>} : vector<16x16xf32>, vector<16x16xf32>, vector<16x16xf32> -> vector<16x16xf32>
    %cst_131 = arith.constant dense<0xFF800000> : vector<16xf32>
    %316 = vector.multi_reduction <maximumf>, %315, %cst_131 [1] : vector<16x16xf32> to vector<16xf32>
    %317 = vector.shape_cast %316 : vector<16xf32> to vector<16x1xf32>
    %318 = vector.broadcast %317 : vector<16x1xf32> to vector<16x16xf32>
    %319 = arith.subf %315, %318 : vector<16x16xf32>
    %320 = math.exp %319 : vector<16x16xf32>
    %cst_132 = arith.constant dense<0.000000e+00> : vector<16xf32>
    %321 = vector.multi_reduction <add>, %320, %cst_132 [1] : vector<16x16xf32> to vector<16xf32>
    %322 = vector.shape_cast %321 : vector<16xf32> to vector<16x1xf32>
    %323 = tpu.reciprocal %322 {approx = true} : vector<16x1xf32> -> vector<16x1xf32>
    %324 = vector.broadcast %323 : vector<16x1xf32> to vector<16x16xf32>
    %325 = arith.mulf %320, %324 : vector<16x16xf32>
    %326 = vector.extract_strided_slice %267 {offsets = [0, 32], sizes = [16, 16], strides = [1, 1]} : vector<32x64xf32> to vector<16x16xf32>
    %cst_133 = arith.constant dense<0.000000e+00> : vector<16x16xf32>
    %327 = tpu.matmul %325, %326, %cst_133 {dimension_numbers = #tpu.dot_dimension_numbers<[1], [0], [0], [1], [0, 0, 1, 1], [], []>} : vector<16x16xf32>, vector<16x16xf32>, vector<16x16xf32> -> vector<16x16xf32>
    %328 = vector.extract_strided_slice %269 {offsets = [32, 0], sizes = [16, 64], strides = [1, 1]} : vector<64x64xf32> to vector<16x64xf32>
    %cst_134 = arith.constant dense<0.000000e+00> : vector<16x64xf32>
    %329 = tpu.matmul %327, %328, %cst_134 {dimension_numbers = #tpu.dot_dimension_numbers<[1], [0], [0], [1], [0, 0, 1, 1], [], []>} : vector<16x16xf32>, vector<16x64xf32>, vector<16x64xf32> -> vector<16x64xf32>
    %330 = arith.addf %310, %329 : vector<16x64xf32>
    %331 = vector.extract_strided_slice %265 {offsets = [0, 48], sizes = [16, 16], strides = [1, 1]} : vector<32x64xf32> to vector<16x16xf32>
    %cst_135 = arith.constant 2.500000e-01 : f32
    %332 = vector.broadcast %cst_135 : f32 to vector<16x16xf32>
    %333 = arith.mulf %331, %332 : vector<16x16xf32>
    %334 = vector.extract_strided_slice %266 {offsets = [0, 48], sizes = [16, 16], strides = [1, 1]} : vector<32x64xf32> to vector<16x16xf32>
    %cst_136 = arith.constant dense<0.000000e+00> : vector<16x16xf32>
    %335 = tpu.matmul %333, %334, %cst_136 {dimension_numbers = #tpu.dot_dimension_numbers<[1], [1], [0], [0], [0, 0, 1, 0], [], []>} : vector<16x16xf32>, vector<16x16xf32>, vector<16x16xf32> -> vector<16x16xf32>
    %cst_137 = arith.constant dense<0xFF800000> : vector<16xf32>
    %336 = vector.multi_reduction <maximumf>, %335, %cst_137 [1] : vector<16x16xf32> to vector<16xf32>
    %337 = vector.shape_cast %336 : vector<16xf32> to vector<16x1xf32>
    %338 = vector.broadcast %337 : vector<16x1xf32> to vector<16x16xf32>
    %339 = arith.subf %335, %338 : vector<16x16xf32>
    %340 = math.exp %339 : vector<16x16xf32>
    %cst_138 = arith.constant dense<0.000000e+00> : vector<16xf32>
    %341 = vector.multi_reduction <add>, %340, %cst_138 [1] : vector<16x16xf32> to vector<16xf32>
    %342 = vector.shape_cast %341 : vector<16xf32> to vector<16x1xf32>
    %343 = tpu.reciprocal %342 {approx = true} : vector<16x1xf32> -> vector<16x1xf32>
    %344 = vector.broadcast %343 : vector<16x1xf32> to vector<16x16xf32>
    %345 = arith.mulf %340, %344 : vector<16x16xf32>
    %346 = vector.extract_strided_slice %267 {offsets = [0, 48], sizes = [16, 16], strides = [1, 1]} : vector<32x64xf32> to vector<16x16xf32>
    %cst_139 = arith.constant dense<0.000000e+00> : vector<16x16xf32>
    %347 = tpu.matmul %345, %346, %cst_139 {dimension_numbers = #tpu.dot_dimension_numbers<[1], [0], [0], [1], [0, 0, 1, 1], [], []>} : vector<16x16xf32>, vector<16x16xf32>, vector<16x16xf32> -> vector<16x16xf32>
    %348 = vector.extract_strided_slice %269 {offsets = [48, 0], sizes = [16, 64], strides = [1, 1]} : vector<64x64xf32> to vector<16x64xf32>
    %cst_140 = arith.constant dense<0.000000e+00> : vector<16x64xf32>
    %349 = tpu.matmul %347, %348, %cst_140 {dimension_numbers = #tpu.dot_dimension_numbers<[1], [0], [0], [1], [0, 0, 1, 1], [], []>} : vector<16x16xf32>, vector<16x64xf32>, vector<16x64xf32> -> vector<16x64xf32>
    %350 = arith.addf %330, %349 : vector<16x64xf32>
    %cst_141 = arith.constant 0.000000e+00 : f32
    %351 = vector.broadcast %cst_141 : f32 to vector<16x64xf32>
    %352 = vector.extract_strided_slice %265 {offsets = [16, 0], sizes = [16, 16], strides = [1, 1]} : vector<32x64xf32> to vector<16x16xf32>
    %cst_142 = arith.constant 2.500000e-01 : f32
    %353 = vector.broadcast %cst_142 : f32 to vector<16x16xf32>
    %354 = arith.mulf %352, %353 : vector<16x16xf32>
    %355 = vector.extract_strided_slice %266 {offsets = [16, 0], sizes = [16, 16], strides = [1, 1]} : vector<32x64xf32> to vector<16x16xf32>
    %cst_143 = arith.constant dense<0.000000e+00> : vector<16x16xf32>
    %356 = tpu.matmul %354, %355, %cst_143 {dimension_numbers = #tpu.dot_dimension_numbers<[1], [1], [0], [0], [0, 0, 1, 0], [], []>} : vector<16x16xf32>, vector<16x16xf32>, vector<16x16xf32> -> vector<16x16xf32>
    %cst_144 = arith.constant dense<0xFF800000> : vector<16xf32>
    %357 = vector.multi_reduction <maximumf>, %356, %cst_144 [1] : vector<16x16xf32> to vector<16xf32>
    %358 = vector.shape_cast %357 : vector<16xf32> to vector<16x1xf32>
    %359 = vector.broadcast %358 : vector<16x1xf32> to vector<16x16xf32>
    %360 = arith.subf %356, %359 : vector<16x16xf32>
    %361 = math.exp %360 : vector<16x16xf32>
    %cst_145 = arith.constant dense<0.000000e+00> : vector<16xf32>
    %362 = vector.multi_reduction <add>, %361, %cst_145 [1] : vector<16x16xf32> to vector<16xf32>
    %363 = vector.shape_cast %362 : vector<16xf32> to vector<16x1xf32>
    %364 = tpu.reciprocal %363 {approx = true} : vector<16x1xf32> -> vector<16x1xf32>
    %365 = vector.broadcast %364 : vector<16x1xf32> to vector<16x16xf32>
    %366 = arith.mulf %361, %365 : vector<16x16xf32>
    %367 = vector.extract_strided_slice %267 {offsets = [16, 0], sizes = [16, 16], strides = [1, 1]} : vector<32x64xf32> to vector<16x16xf32>
    %cst_146 = arith.constant dense<0.000000e+00> : vector<16x16xf32>
    %368 = tpu.matmul %366, %367, %cst_146 {dimension_numbers = #tpu.dot_dimension_numbers<[1], [0], [0], [1], [0, 0, 1, 1], [], []>} : vector<16x16xf32>, vector<16x16xf32>, vector<16x16xf32> -> vector<16x16xf32>
    %369 = vector.extract_strided_slice %269 {offsets = [0, 0], sizes = [16, 64], strides = [1, 1]} : vector<64x64xf32> to vector<16x64xf32>
    %cst_147 = arith.constant dense<0.000000e+00> : vector<16x64xf32>
    %370 = tpu.matmul %368, %369, %cst_147 {dimension_numbers = #tpu.dot_dimension_numbers<[1], [0], [0], [1], [0, 0, 1, 1], [], []>} : vector<16x16xf32>, vector<16x64xf32>, vector<16x64xf32> -> vector<16x64xf32>
    %371 = arith.addf %351, %370 : vector<16x64xf32>
    %372 = vector.extract_strided_slice %265 {offsets = [16, 16], sizes = [16, 16], strides = [1, 1]} : vector<32x64xf32> to vector<16x16xf32>
    %cst_148 = arith.constant 2.500000e-01 : f32
    %373 = vector.broadcast %cst_148 : f32 to vector<16x16xf32>
    %374 = arith.mulf %372, %373 : vector<16x16xf32>
    %375 = vector.extract_strided_slice %266 {offsets = [16, 16], sizes = [16, 16], strides = [1, 1]} : vector<32x64xf32> to vector<16x16xf32>
    %cst_149 = arith.constant dense<0.000000e+00> : vector<16x16xf32>
    %376 = tpu.matmul %374, %375, %cst_149 {dimension_numbers = #tpu.dot_dimension_numbers<[1], [1], [0], [0], [0, 0, 1, 0], [], []>} : vector<16x16xf32>, vector<16x16xf32>, vector<16x16xf32> -> vector<16x16xf32>
    %cst_150 = arith.constant dense<0xFF800000> : vector<16xf32>
    %377 = vector.multi_reduction <maximumf>, %376, %cst_150 [1] : vector<16x16xf32> to vector<16xf32>
    %378 = vector.shape_cast %377 : vector<16xf32> to vector<16x1xf32>
    %379 = vector.broadcast %378 : vector<16x1xf32> to vector<16x16xf32>
    %380 = arith.subf %376, %379 : vector<16x16xf32>
    %381 = math.exp %380 : vector<16x16xf32>
    %cst_151 = arith.constant dense<0.000000e+00> : vector<16xf32>
    %382 = vector.multi_reduction <add>, %381, %cst_151 [1] : vector<16x16xf32> to vector<16xf32>
    %383 = vector.shape_cast %382 : vector<16xf32> to vector<16x1xf32>
    %384 = tpu.reciprocal %383 {approx = true} : vector<16x1xf32> -> vector<16x1xf32>
    %385 = vector.broadcast %384 : vector<16x1xf32> to vector<16x16xf32>
    %386 = arith.mulf %381, %385 : vector<16x16xf32>
    %387 = vector.extract_strided_slice %267 {offsets = [16, 16], sizes = [16, 16], strides = [1, 1]} : vector<32x64xf32> to vector<16x16xf32>
    %cst_152 = arith.constant dense<0.000000e+00> : vector<16x16xf32>
    %388 = tpu.matmul %386, %387, %cst_152 {dimension_numbers = #tpu.dot_dimension_numbers<[1], [0], [0], [1], [0, 0, 1, 1], [], []>} : vector<16x16xf32>, vector<16x16xf32>, vector<16x16xf32> -> vector<16x16xf32>
    %389 = vector.extract_strided_slice %269 {offsets = [16, 0], sizes = [16, 64], strides = [1, 1]} : vector<64x64xf32> to vector<16x64xf32>
    %cst_153 = arith.constant dense<0.000000e+00> : vector<16x64xf32>
    %390 = tpu.matmul %388, %389, %cst_153 {dimension_numbers = #tpu.dot_dimension_numbers<[1], [0], [0], [1], [0, 0, 1, 1], [], []>} : vector<16x16xf32>, vector<16x64xf32>, vector<16x64xf32> -> vector<16x64xf32>
    %391 = arith.addf %371, %390 : vector<16x64xf32>
    %392 = vector.extract_strided_slice %265 {offsets = [16, 32], sizes = [16, 16], strides = [1, 1]} : vector<32x64xf32> to vector<16x16xf32>
    %cst_154 = arith.constant 2.500000e-01 : f32
    %393 = vector.broadcast %cst_154 : f32 to vector<16x16xf32>
    %394 = arith.mulf %392, %393 : vector<16x16xf32>
    %395 = vector.extract_strided_slice %266 {offsets = [16, 32], sizes = [16, 16], strides = [1, 1]} : vector<32x64xf32> to vector<16x16xf32>
    %cst_155 = arith.constant dense<0.000000e+00> : vector<16x16xf32>
    %396 = tpu.matmul %394, %395, %cst_155 {dimension_numbers = #tpu.dot_dimension_numbers<[1], [1], [0], [0], [0, 0, 1, 0], [], []>} : vector<16x16xf32>, vector<16x16xf32>, vector<16x16xf32> -> vector<16x16xf32>
    %cst_156 = arith.constant dense<0xFF800000> : vector<16xf32>
    %397 = vector.multi_reduction <maximumf>, %396, %cst_156 [1] : vector<16x16xf32> to vector<16xf32>
    %398 = vector.shape_cast %397 : vector<16xf32> to vector<16x1xf32>
    %399 = vector.broadcast %398 : vector<16x1xf32> to vector<16x16xf32>
    %400 = arith.subf %396, %399 : vector<16x16xf32>
    %401 = math.exp %400 : vector<16x16xf32>
    %cst_157 = arith.constant dense<0.000000e+00> : vector<16xf32>
    %402 = vector.multi_reduction <add>, %401, %cst_157 [1] : vector<16x16xf32> to vector<16xf32>
    %403 = vector.shape_cast %402 : vector<16xf32> to vector<16x1xf32>
    %404 = tpu.reciprocal %403 {approx = true} : vector<16x1xf32> -> vector<16x1xf32>
    %405 = vector.broadcast %404 : vector<16x1xf32> to vector<16x16xf32>
    %406 = arith.mulf %401, %405 : vector<16x16xf32>
    %407 = vector.extract_strided_slice %267 {offsets = [16, 32], sizes = [16, 16], strides = [1, 1]} : vector<32x64xf32> to vector<16x16xf32>
    %cst_158 = arith.constant dense<0.000000e+00> : vector<16x16xf32>
    %408 = tpu.matmul %406, %407, %cst_158 {dimension_numbers = #tpu.dot_dimension_numbers<[1], [0], [0], [1], [0, 0, 1, 1], [], []>} : vector<16x16xf32>, vector<16x16xf32>, vector<16x16xf32> -> vector<16x16xf32>
    %409 = vector.extract_strided_slice %269 {offsets = [32, 0], sizes = [16, 64], strides = [1, 1]} : vector<64x64xf32> to vector<16x64xf32>
    %cst_159 = arith.constant dense<0.000000e+00> : vector<16x64xf32>
    %410 = tpu.matmul %408, %409, %cst_159 {dimension_numbers = #tpu.dot_dimension_numbers<[1], [0], [0], [1], [0, 0, 1, 1], [], []>} : vector<16x16xf32>, vector<16x64xf32>, vector<16x64xf32> -> vector<16x64xf32>
    %411 = arith.addf %391, %410 : vector<16x64xf32>
    %412 = vector.extract_strided_slice %265 {offsets = [16, 48], sizes = [16, 16], strides = [1, 1]} : vector<32x64xf32> to vector<16x16xf32>
    %cst_160 = arith.constant 2.500000e-01 : f32
    %413 = vector.broadcast %cst_160 : f32 to vector<16x16xf32>
    %414 = arith.mulf %412, %413 : vector<16x16xf32>
    %415 = vector.extract_strided_slice %266 {offsets = [16, 48], sizes = [16, 16], strides = [1, 1]} : vector<32x64xf32> to vector<16x16xf32>
    %cst_161 = arith.constant dense<0.000000e+00> : vector<16x16xf32>
    %416 = tpu.matmul %414, %415, %cst_161 {dimension_numbers = #tpu.dot_dimension_numbers<[1], [1], [0], [0], [0, 0, 1, 0], [], []>} : vector<16x16xf32>, vector<16x16xf32>, vector<16x16xf32> -> vector<16x16xf32>
    %cst_162 = arith.constant dense<0xFF800000> : vector<16xf32>
    %417 = vector.multi_reduction <maximumf>, %416, %cst_162 [1] : vector<16x16xf32> to vector<16xf32>
    %418 = vector.shape_cast %417 : vector<16xf32> to vector<16x1xf32>
    %419 = vector.broadcast %418 : vector<16x1xf32> to vector<16x16xf32>
    %420 = arith.subf %416, %419 : vector<16x16xf32>
    %421 = math.exp %420 : vector<16x16xf32>
    %cst_163 = arith.constant dense<0.000000e+00> : vector<16xf32>
    %422 = vector.multi_reduction <add>, %421, %cst_163 [1] : vector<16x16xf32> to vector<16xf32>
    %423 = vector.shape_cast %422 : vector<16xf32> to vector<16x1xf32>
    %424 = tpu.reciprocal %423 {approx = true} : vector<16x1xf32> -> vector<16x1xf32>
    %425 = vector.broadcast %424 : vector<16x1xf32> to vector<16x16xf32>
    %426 = arith.mulf %421, %425 : vector<16x16xf32>
    %427 = vector.extract_strided_slice %267 {offsets = [16, 48], sizes = [16, 16], strides = [1, 1]} : vector<32x64xf32> to vector<16x16xf32>
    %cst_164 = arith.constant dense<0.000000e+00> : vector<16x16xf32>
    %428 = tpu.matmul %426, %427, %cst_164 {dimension_numbers = #tpu.dot_dimension_numbers<[1], [0], [0], [1], [0, 0, 1, 1], [], []>} : vector<16x16xf32>, vector<16x16xf32>, vector<16x16xf32> -> vector<16x16xf32>
    %429 = vector.extract_strided_slice %269 {offsets = [48, 0], sizes = [16, 64], strides = [1, 1]} : vector<64x64xf32> to vector<16x64xf32>
    %cst_165 = arith.constant dense<0.000000e+00> : vector<16x64xf32>
    %430 = tpu.matmul %428, %429, %cst_165 {dimension_numbers = #tpu.dot_dimension_numbers<[1], [0], [0], [1], [0, 0, 1, 1], [], []>} : vector<16x16xf32>, vector<16x64xf32>, vector<16x64xf32> -> vector<16x64xf32>
    %431 = arith.addf %411, %430 : vector<16x64xf32>
    %432 = tpu.concatenate %350, %431 in 0 : vector<16x64xf32>, vector<16x64xf32> -> vector<32x64xf32>
    %433 = arith.addf %257, %432 : vector<32x64xf32>
    %c1_166 = arith.constant 1 : index
    %c0_167 = arith.constant 0 : index
    %c0_168 = arith.constant 0 : index
    %434 = vector.load %arg7[%c1_166, %c0_167, %c0_168] : memref<2x1x64xf32, #tpu.memory_space<vmem>>, vector<1x1x64xf32>
    %435 = vector.shape_cast %434 : vector<1x1x64xf32> to vector<1x64xf32>
    %436 = vector.broadcast %435 : vector<1x64xf32> to vector<32x64xf32>
    %437 = arith.addf %433, %436 : vector<32x64xf32>
    %c1_169 = arith.constant 1 : index
    %c0_170 = arith.constant 0 : index
    %c0_171 = arith.constant 0 : index
    %438 = vector.load %arg8[%c1_169, %c0_170, %c0_171] : memref<2x1x64xf32, #tpu.memory_space<vmem>>, vector<1x1x64xf32>
    %439 = vector.shape_cast %438 : vector<1x1x64xf32> to vector<1x64xf32>
    %c1_172 = arith.constant 1 : index
    %c0_173 = arith.constant 0 : index
    %c0_174 = arith.constant 0 : index
    %440 = vector.load %arg9[%c1_172, %c0_173, %c0_174] : memref<2x1x64xf32, #tpu.memory_space<vmem>>, vector<1x1x64xf32>
    %441 = vector.shape_cast %440 : vector<1x1x64xf32> to vector<1x64xf32>
    %cst_175 = arith.constant dense<0.000000e+00> : vector<32xf32>
    %442 = vector.multi_reduction <add>, %437, %cst_175 [1] : vector<32x64xf32> to vector<32xf32>
    %443 = vector.shape_cast %442 : vector<32xf32> to vector<32x1xf32>
    %cst_176 = arith.constant 6.400000e+01 : f32
    %444 = vector.broadcast %cst_176 : f32 to vector<32x1xf32>
    %445 = arith.divf %443, %444 : vector<32x1xf32>
    %446 = arith.mulf %437, %437 : vector<32x64xf32>
    %cst_177 = arith.constant dense<0.000000e+00> : vector<32xf32>
    %447 = vector.multi_reduction <add>, %446, %cst_177 [1] : vector<32x64xf32> to vector<32xf32>
    %448 = vector.shape_cast %447 : vector<32xf32> to vector<32x1xf32>
    %cst_178 = arith.constant 6.400000e+01 : f32
    %449 = vector.broadcast %cst_178 : f32 to vector<32x1xf32>
    %450 = arith.divf %448, %449 : vector<32x1xf32>
    %451 = arith.mulf %445, %445 : vector<32x1xf32>
    %452 = arith.subf %450, %451 : vector<32x1xf32>
    %453 = vector.broadcast %445 : vector<32x1xf32> to vector<32x64xf32>
    %454 = arith.subf %437, %453 : vector<32x64xf32>
    %cst_179 = arith.constant 9.99999974E-6 : f32
    %455 = vector.broadcast %cst_179 : f32 to vector<32x1xf32>
    %456 = arith.addf %452, %455 : vector<32x1xf32>
    %457 = math.rsqrt %456 : vector<32x1xf32>
    %458 = vector.broadcast %457 : vector<32x1xf32> to vector<32x64xf32>
    %459 = arith.mulf %454, %458 : vector<32x64xf32>
    %460 = vector.broadcast %439 : vector<1x64xf32> to vector<32x64xf32>
    %461 = arith.mulf %459, %460 : vector<32x64xf32>
    %462 = vector.broadcast %441 : vector<1x64xf32> to vector<32x64xf32>
    %463 = arith.addf %461, %462 : vector<32x64xf32>
    %c1_180 = arith.constant 1 : index
    %c0_181 = arith.constant 0 : index
    %c0_182 = arith.constant 0 : index
    %464 = vector.load %arg10[%c1_180, %c0_181, %c0_182] : memref<2x64x2048xf32, #tpu.memory_space<vmem>>, vector<1x64x2048xf32>
    %465 = vector.shape_cast %464 : vector<1x64x2048xf32> to vector<64x2048xf32>
    %cst_183 = arith.constant dense<0.000000e+00> : vector<32x2048xf32>
    %466 = tpu.matmul %463, %465, %cst_183 {dimension_numbers = #tpu.dot_dimension_numbers<[1], [0], [0], [1], [0, 0, 1, 1], [], []>} : vector<32x64xf32>, vector<64x2048xf32>, vector<32x2048xf32> -> vector<32x2048xf32>
    %c1_184 = arith.constant 1 : index
    %c0_185 = arith.constant 0 : index
    %c0_186 = arith.constant 0 : index
    %467 = vector.load %arg11[%c1_184, %c0_185, %c0_186] : memref<2x1x2048xf32, #tpu.memory_space<vmem>>, vector<1x1x2048xf32>
    %468 = vector.shape_cast %467 : vector<1x1x2048xf32> to vector<1x2048xf32>
    %469 = vector.broadcast %468 : vector<1x2048xf32> to vector<32x2048xf32>
    %470 = arith.addf %466, %469 : vector<32x2048xf32>
    %cst_187 = arith.constant 0.000000e+00 : f32
    %471 = vector.broadcast %cst_187 : f32 to vector<32x2048xf32>
    %472 = arith.maximumf %470, %471 : vector<32x2048xf32>
    %c1_188 = arith.constant 1 : index
    %c0_189 = arith.constant 0 : index
    %c0_190 = arith.constant 0 : index
    %473 = vector.load %arg12[%c1_188, %c0_189, %c0_190] : memref<2x2048x64xf32, #tpu.memory_space<vmem>>, vector<1x2048x64xf32>
    %474 = vector.shape_cast %473 : vector<1x2048x64xf32> to vector<2048x64xf32>
    %cst_191 = arith.constant dense<0.000000e+00> : vector<32x64xf32>
    %475 = tpu.matmul %472, %474, %cst_191 {dimension_numbers = #tpu.dot_dimension_numbers<[1], [0], [0], [1], [0, 0, 1, 1], [], []>} : vector<32x2048xf32>, vector<2048x64xf32>, vector<32x64xf32> -> vector<32x64xf32>
    %c1_192 = arith.constant 1 : index
    %c0_193 = arith.constant 0 : index
    %c0_194 = arith.constant 0 : index
    %476 = vector.load %arg13[%c1_192, %c0_193, %c0_194] : memref<2x1x64xf32, #tpu.memory_space<vmem>>, vector<1x1x64xf32>
    %477 = vector.shape_cast %476 : vector<1x1x64xf32> to vector<1x64xf32>
    %478 = vector.broadcast %477 : vector<1x64xf32> to vector<32x64xf32>
    %479 = arith.addf %475, %478 : vector<32x64xf32>
    %480 = arith.addf %463, %479 : vector<32x64xf32>
    %c1_195 = arith.constant 1 : index
    %c0_196 = arith.constant 0 : index
    %c0_197 = arith.constant 0 : index
    %481 = vector.load %arg14[%c1_195, %c0_196, %c0_197] : memref<2x1x64xf32, #tpu.memory_space<vmem>>, vector<1x1x64xf32>
    %482 = vector.shape_cast %481 : vector<1x1x64xf32> to vector<1x64xf32>
    %c1_198 = arith.constant 1 : index
    %c0_199 = arith.constant 0 : index
    %c0_200 = arith.constant 0 : index
    %483 = vector.load %arg15[%c1_198, %c0_199, %c0_200] : memref<2x1x64xf32, #tpu.memory_space<vmem>>, vector<1x1x64xf32>
    %484 = vector.shape_cast %483 : vector<1x1x64xf32> to vector<1x64xf32>
    %cst_201 = arith.constant dense<0.000000e+00> : vector<32xf32>
    %485 = vector.multi_reduction <add>, %480, %cst_201 [1] : vector<32x64xf32> to vector<32xf32>
    %486 = vector.shape_cast %485 : vector<32xf32> to vector<32x1xf32>
    %cst_202 = arith.constant 6.400000e+01 : f32
    %487 = vector.broadcast %cst_202 : f32 to vector<32x1xf32>
    %488 = arith.divf %486, %487 : vector<32x1xf32>
    %489 = arith.mulf %480, %480 : vector<32x64xf32>
    %cst_203 = arith.constant dense<0.000000e+00> : vector<32xf32>
    %490 = vector.multi_reduction <add>, %489, %cst_203 [1] : vector<32x64xf32> to vector<32xf32>
    %491 = vector.shape_cast %490 : vector<32xf32> to vector<32x1xf32>
    %cst_204 = arith.constant 6.400000e+01 : f32
    %492 = vector.broadcast %cst_204 : f32 to vector<32x1xf32>
    %493 = arith.divf %491, %492 : vector<32x1xf32>
    %494 = arith.mulf %488, %488 : vector<32x1xf32>
    %495 = arith.subf %493, %494 : vector<32x1xf32>
    %496 = vector.broadcast %488 : vector<32x1xf32> to vector<32x64xf32>
    %497 = arith.subf %480, %496 : vector<32x64xf32>
    %cst_205 = arith.constant 9.99999974E-6 : f32
    %498 = vector.broadcast %cst_205 : f32 to vector<32x1xf32>
    %499 = arith.addf %495, %498 : vector<32x1xf32>
    %500 = math.rsqrt %499 : vector<32x1xf32>
    %501 = vector.broadcast %500 : vector<32x1xf32> to vector<32x64xf32>
    %502 = arith.mulf %497, %501 : vector<32x64xf32>
    %503 = vector.broadcast %482 : vector<1x64xf32> to vector<32x64xf32>
    %504 = arith.mulf %502, %503 : vector<32x64xf32>
    %505 = vector.broadcast %484 : vector<1x64xf32> to vector<32x64xf32>
    %506 = arith.addf %504, %505 : vector<32x64xf32>
    %507 = vector.shape_cast %506 : vector<32x64xf32> to vector<2x16x64xf32>
    %cst_206 = arith.constant 0.000000e+00 : f32
    %508 = vector.broadcast %cst_206 : f32 to vector<2x128xf32>
    %509 = vector.extract_strided_slice %507 {offsets = [0, 0, 0], sizes = [2, 1, 64], strides = [1, 1, 1]} : vector<2x16x64xf32> to vector<2x1x64xf32>
    %510 = vector.shape_cast %509 : vector<2x1x64xf32> to vector<2x64xf32>
    %c0_207 = arith.constant 0 : index
    %c0_208 = arith.constant 0 : index
    %c0_209 = arith.constant 0 : index
    %511 = vector.load %arg16[%c0_207, %c0_208, %c0_209] : memref<16x64x128xf32, #tpu.memory_space<vmem>>, vector<1x64x128xf32>
    %512 = vector.shape_cast %511 : vector<1x64x128xf32> to vector<64x128xf32>
    %cst_210 = arith.constant dense<0.000000e+00> : vector<2x128xf32>
    %513 = tpu.matmul %510, %512, %cst_210 {dimension_numbers = #tpu.dot_dimension_numbers<[1], [0], [0], [1], [0, 0, 1, 1], [], []>} : vector<2x64xf32>, vector<64x128xf32>, vector<2x128xf32> -> vector<2x128xf32>
    %514 = arith.addf %508, %513 : vector<2x128xf32>
    %515 = vector.extract_strided_slice %507 {offsets = [0, 1, 0], sizes = [2, 1, 64], strides = [1, 1, 1]} : vector<2x16x64xf32> to vector<2x1x64xf32>
    %516 = vector.shape_cast %515 : vector<2x1x64xf32> to vector<2x64xf32>
    %c1_211 = arith.constant 1 : index
    %c0_212 = arith.constant 0 : index
    %c0_213 = arith.constant 0 : index
    %517 = vector.load %arg16[%c1_211, %c0_212, %c0_213] : memref<16x64x128xf32, #tpu.memory_space<vmem>>, vector<1x64x128xf32>
    %518 = vector.shape_cast %517 : vector<1x64x128xf32> to vector<64x128xf32>
    %cst_214 = arith.constant dense<0.000000e+00> : vector<2x128xf32>
    %519 = tpu.matmul %516, %518, %cst_214 {dimension_numbers = #tpu.dot_dimension_numbers<[1], [0], [0], [1], [0, 0, 1, 1], [], []>} : vector<2x64xf32>, vector<64x128xf32>, vector<2x128xf32> -> vector<2x128xf32>
    %520 = arith.addf %514, %519 : vector<2x128xf32>
    %521 = vector.extract_strided_slice %507 {offsets = [0, 2, 0], sizes = [2, 1, 64], strides = [1, 1, 1]} : vector<2x16x64xf32> to vector<2x1x64xf32>
    %522 = vector.shape_cast %521 : vector<2x1x64xf32> to vector<2x64xf32>
    %c2 = arith.constant 2 : index
    %c0_215 = arith.constant 0 : index
    %c0_216 = arith.constant 0 : index
    %523 = vector.load %arg16[%c2, %c0_215, %c0_216] : memref<16x64x128xf32, #tpu.memory_space<vmem>>, vector<1x64x128xf32>
    %524 = vector.shape_cast %523 : vector<1x64x128xf32> to vector<64x128xf32>
    %cst_217 = arith.constant dense<0.000000e+00> : vector<2x128xf32>
    %525 = tpu.matmul %522, %524, %cst_217 {dimension_numbers = #tpu.dot_dimension_numbers<[1], [0], [0], [1], [0, 0, 1, 1], [], []>} : vector<2x64xf32>, vector<64x128xf32>, vector<2x128xf32> -> vector<2x128xf32>
    %526 = arith.addf %520, %525 : vector<2x128xf32>
    %527 = vector.extract_strided_slice %507 {offsets = [0, 3, 0], sizes = [2, 1, 64], strides = [1, 1, 1]} : vector<2x16x64xf32> to vector<2x1x64xf32>
    %528 = vector.shape_cast %527 : vector<2x1x64xf32> to vector<2x64xf32>
    %c3 = arith.constant 3 : index
    %c0_218 = arith.constant 0 : index
    %c0_219 = arith.constant 0 : index
    %529 = vector.load %arg16[%c3, %c0_218, %c0_219] : memref<16x64x128xf32, #tpu.memory_space<vmem>>, vector<1x64x128xf32>
    %530 = vector.shape_cast %529 : vector<1x64x128xf32> to vector<64x128xf32>
    %cst_220 = arith.constant dense<0.000000e+00> : vector<2x128xf32>
    %531 = tpu.matmul %528, %530, %cst_220 {dimension_numbers = #tpu.dot_dimension_numbers<[1], [0], [0], [1], [0, 0, 1, 1], [], []>} : vector<2x64xf32>, vector<64x128xf32>, vector<2x128xf32> -> vector<2x128xf32>
    %532 = arith.addf %526, %531 : vector<2x128xf32>
    %533 = vector.extract_strided_slice %507 {offsets = [0, 4, 0], sizes = [2, 1, 64], strides = [1, 1, 1]} : vector<2x16x64xf32> to vector<2x1x64xf32>
    %534 = vector.shape_cast %533 : vector<2x1x64xf32> to vector<2x64xf32>
    %c4 = arith.constant 4 : index
    %c0_221 = arith.constant 0 : index
    %c0_222 = arith.constant 0 : index
    %535 = vector.load %arg16[%c4, %c0_221, %c0_222] : memref<16x64x128xf32, #tpu.memory_space<vmem>>, vector<1x64x128xf32>
    %536 = vector.shape_cast %535 : vector<1x64x128xf32> to vector<64x128xf32>
    %cst_223 = arith.constant dense<0.000000e+00> : vector<2x128xf32>
    %537 = tpu.matmul %534, %536, %cst_223 {dimension_numbers = #tpu.dot_dimension_numbers<[1], [0], [0], [1], [0, 0, 1, 1], [], []>} : vector<2x64xf32>, vector<64x128xf32>, vector<2x128xf32> -> vector<2x128xf32>
    %538 = arith.addf %532, %537 : vector<2x128xf32>
    %539 = vector.extract_strided_slice %507 {offsets = [0, 5, 0], sizes = [2, 1, 64], strides = [1, 1, 1]} : vector<2x16x64xf32> to vector<2x1x64xf32>
    %540 = vector.shape_cast %539 : vector<2x1x64xf32> to vector<2x64xf32>
    %c5 = arith.constant 5 : index
    %c0_224 = arith.constant 0 : index
    %c0_225 = arith.constant 0 : index
    %541 = vector.load %arg16[%c5, %c0_224, %c0_225] : memref<16x64x128xf32, #tpu.memory_space<vmem>>, vector<1x64x128xf32>
    %542 = vector.shape_cast %541 : vector<1x64x128xf32> to vector<64x128xf32>
    %cst_226 = arith.constant dense<0.000000e+00> : vector<2x128xf32>
    %543 = tpu.matmul %540, %542, %cst_226 {dimension_numbers = #tpu.dot_dimension_numbers<[1], [0], [0], [1], [0, 0, 1, 1], [], []>} : vector<2x64xf32>, vector<64x128xf32>, vector<2x128xf32> -> vector<2x128xf32>
    %544 = arith.addf %538, %543 : vector<2x128xf32>
    %545 = vector.extract_strided_slice %507 {offsets = [0, 6, 0], sizes = [2, 1, 64], strides = [1, 1, 1]} : vector<2x16x64xf32> to vector<2x1x64xf32>
    %546 = vector.shape_cast %545 : vector<2x1x64xf32> to vector<2x64xf32>
    %c6 = arith.constant 6 : index
    %c0_227 = arith.constant 0 : index
    %c0_228 = arith.constant 0 : index
    %547 = vector.load %arg16[%c6, %c0_227, %c0_228] : memref<16x64x128xf32, #tpu.memory_space<vmem>>, vector<1x64x128xf32>
    %548 = vector.shape_cast %547 : vector<1x64x128xf32> to vector<64x128xf32>
    %cst_229 = arith.constant dense<0.000000e+00> : vector<2x128xf32>
    %549 = tpu.matmul %546, %548, %cst_229 {dimension_numbers = #tpu.dot_dimension_numbers<[1], [0], [0], [1], [0, 0, 1, 1], [], []>} : vector<2x64xf32>, vector<64x128xf32>, vector<2x128xf32> -> vector<2x128xf32>
    %550 = arith.addf %544, %549 : vector<2x128xf32>
    %551 = vector.extract_strided_slice %507 {offsets = [0, 7, 0], sizes = [2, 1, 64], strides = [1, 1, 1]} : vector<2x16x64xf32> to vector<2x1x64xf32>
    %552 = vector.shape_cast %551 : vector<2x1x64xf32> to vector<2x64xf32>
    %c7 = arith.constant 7 : index
    %c0_230 = arith.constant 0 : index
    %c0_231 = arith.constant 0 : index
    %553 = vector.load %arg16[%c7, %c0_230, %c0_231] : memref<16x64x128xf32, #tpu.memory_space<vmem>>, vector<1x64x128xf32>
    %554 = vector.shape_cast %553 : vector<1x64x128xf32> to vector<64x128xf32>
    %cst_232 = arith.constant dense<0.000000e+00> : vector<2x128xf32>
    %555 = tpu.matmul %552, %554, %cst_232 {dimension_numbers = #tpu.dot_dimension_numbers<[1], [0], [0], [1], [0, 0, 1, 1], [], []>} : vector<2x64xf32>, vector<64x128xf32>, vector<2x128xf32> -> vector<2x128xf32>
    %556 = arith.addf %550, %555 : vector<2x128xf32>
    %557 = vector.extract_strided_slice %507 {offsets = [0, 8, 0], sizes = [2, 1, 64], strides = [1, 1, 1]} : vector<2x16x64xf32> to vector<2x1x64xf32>
    %558 = vector.shape_cast %557 : vector<2x1x64xf32> to vector<2x64xf32>
    %c8 = arith.constant 8 : index
    %c0_233 = arith.constant 0 : index
    %c0_234 = arith.constant 0 : index
    %559 = vector.load %arg16[%c8, %c0_233, %c0_234] : memref<16x64x128xf32, #tpu.memory_space<vmem>>, vector<1x64x128xf32>
    %560 = vector.shape_cast %559 : vector<1x64x128xf32> to vector<64x128xf32>
    %cst_235 = arith.constant dense<0.000000e+00> : vector<2x128xf32>
    %561 = tpu.matmul %558, %560, %cst_235 {dimension_numbers = #tpu.dot_dimension_numbers<[1], [0], [0], [1], [0, 0, 1, 1], [], []>} : vector<2x64xf32>, vector<64x128xf32>, vector<2x128xf32> -> vector<2x128xf32>
    %562 = arith.addf %556, %561 : vector<2x128xf32>
    %563 = vector.extract_strided_slice %507 {offsets = [0, 9, 0], sizes = [2, 1, 64], strides = [1, 1, 1]} : vector<2x16x64xf32> to vector<2x1x64xf32>
    %564 = vector.shape_cast %563 : vector<2x1x64xf32> to vector<2x64xf32>
    %c9 = arith.constant 9 : index
    %c0_236 = arith.constant 0 : index
    %c0_237 = arith.constant 0 : index
    %565 = vector.load %arg16[%c9, %c0_236, %c0_237] : memref<16x64x128xf32, #tpu.memory_space<vmem>>, vector<1x64x128xf32>
    %566 = vector.shape_cast %565 : vector<1x64x128xf32> to vector<64x128xf32>
    %cst_238 = arith.constant dense<0.000000e+00> : vector<2x128xf32>
    %567 = tpu.matmul %564, %566, %cst_238 {dimension_numbers = #tpu.dot_dimension_numbers<[1], [0], [0], [1], [0, 0, 1, 1], [], []>} : vector<2x64xf32>, vector<64x128xf32>, vector<2x128xf32> -> vector<2x128xf32>
    %568 = arith.addf %562, %567 : vector<2x128xf32>
    %569 = vector.extract_strided_slice %507 {offsets = [0, 10, 0], sizes = [2, 1, 64], strides = [1, 1, 1]} : vector<2x16x64xf32> to vector<2x1x64xf32>
    %570 = vector.shape_cast %569 : vector<2x1x64xf32> to vector<2x64xf32>
    %c10 = arith.constant 10 : index
    %c0_239 = arith.constant 0 : index
    %c0_240 = arith.constant 0 : index
    %571 = vector.load %arg16[%c10, %c0_239, %c0_240] : memref<16x64x128xf32, #tpu.memory_space<vmem>>, vector<1x64x128xf32>
    %572 = vector.shape_cast %571 : vector<1x64x128xf32> to vector<64x128xf32>
    %cst_241 = arith.constant dense<0.000000e+00> : vector<2x128xf32>
    %573 = tpu.matmul %570, %572, %cst_241 {dimension_numbers = #tpu.dot_dimension_numbers<[1], [0], [0], [1], [0, 0, 1, 1], [], []>} : vector<2x64xf32>, vector<64x128xf32>, vector<2x128xf32> -> vector<2x128xf32>
    %574 = arith.addf %568, %573 : vector<2x128xf32>
    %575 = vector.extract_strided_slice %507 {offsets = [0, 11, 0], sizes = [2, 1, 64], strides = [1, 1, 1]} : vector<2x16x64xf32> to vector<2x1x64xf32>
    %576 = vector.shape_cast %575 : vector<2x1x64xf32> to vector<2x64xf32>
    %c11 = arith.constant 11 : index
    %c0_242 = arith.constant 0 : index
    %c0_243 = arith.constant 0 : index
    %577 = vector.load %arg16[%c11, %c0_242, %c0_243] : memref<16x64x128xf32, #tpu.memory_space<vmem>>, vector<1x64x128xf32>
    %578 = vector.shape_cast %577 : vector<1x64x128xf32> to vector<64x128xf32>
    %cst_244 = arith.constant dense<0.000000e+00> : vector<2x128xf32>
    %579 = tpu.matmul %576, %578, %cst_244 {dimension_numbers = #tpu.dot_dimension_numbers<[1], [0], [0], [1], [0, 0, 1, 1], [], []>} : vector<2x64xf32>, vector<64x128xf32>, vector<2x128xf32> -> vector<2x128xf32>
    %580 = arith.addf %574, %579 : vector<2x128xf32>
    %581 = vector.extract_strided_slice %507 {offsets = [0, 12, 0], sizes = [2, 1, 64], strides = [1, 1, 1]} : vector<2x16x64xf32> to vector<2x1x64xf32>
    %582 = vector.shape_cast %581 : vector<2x1x64xf32> to vector<2x64xf32>
    %c12 = arith.constant 12 : index
    %c0_245 = arith.constant 0 : index
    %c0_246 = arith.constant 0 : index
    %583 = vector.load %arg16[%c12, %c0_245, %c0_246] : memref<16x64x128xf32, #tpu.memory_space<vmem>>, vector<1x64x128xf32>
    %584 = vector.shape_cast %583 : vector<1x64x128xf32> to vector<64x128xf32>
    %cst_247 = arith.constant dense<0.000000e+00> : vector<2x128xf32>
    %585 = tpu.matmul %582, %584, %cst_247 {dimension_numbers = #tpu.dot_dimension_numbers<[1], [0], [0], [1], [0, 0, 1, 1], [], []>} : vector<2x64xf32>, vector<64x128xf32>, vector<2x128xf32> -> vector<2x128xf32>
    %586 = arith.addf %580, %585 : vector<2x128xf32>
    %587 = vector.extract_strided_slice %507 {offsets = [0, 13, 0], sizes = [2, 1, 64], strides = [1, 1, 1]} : vector<2x16x64xf32> to vector<2x1x64xf32>
    %588 = vector.shape_cast %587 : vector<2x1x64xf32> to vector<2x64xf32>
    %c13 = arith.constant 13 : index
    %c0_248 = arith.constant 0 : index
    %c0_249 = arith.constant 0 : index
    %589 = vector.load %arg16[%c13, %c0_248, %c0_249] : memref<16x64x128xf32, #tpu.memory_space<vmem>>, vector<1x64x128xf32>
    %590 = vector.shape_cast %589 : vector<1x64x128xf32> to vector<64x128xf32>
    %cst_250 = arith.constant dense<0.000000e+00> : vector<2x128xf32>
    %591 = tpu.matmul %588, %590, %cst_250 {dimension_numbers = #tpu.dot_dimension_numbers<[1], [0], [0], [1], [0, 0, 1, 1], [], []>} : vector<2x64xf32>, vector<64x128xf32>, vector<2x128xf32> -> vector<2x128xf32>
    %592 = arith.addf %586, %591 : vector<2x128xf32>
    %593 = vector.extract_strided_slice %507 {offsets = [0, 14, 0], sizes = [2, 1, 64], strides = [1, 1, 1]} : vector<2x16x64xf32> to vector<2x1x64xf32>
    %594 = vector.shape_cast %593 : vector<2x1x64xf32> to vector<2x64xf32>
    %c14 = arith.constant 14 : index
    %c0_251 = arith.constant 0 : index
    %c0_252 = arith.constant 0 : index
    %595 = vector.load %arg16[%c14, %c0_251, %c0_252] : memref<16x64x128xf32, #tpu.memory_space<vmem>>, vector<1x64x128xf32>
    %596 = vector.shape_cast %595 : vector<1x64x128xf32> to vector<64x128xf32>
    %cst_253 = arith.constant dense<0.000000e+00> : vector<2x128xf32>
    %597 = tpu.matmul %594, %596, %cst_253 {dimension_numbers = #tpu.dot_dimension_numbers<[1], [0], [0], [1], [0, 0, 1, 1], [], []>} : vector<2x64xf32>, vector<64x128xf32>, vector<2x128xf32> -> vector<2x128xf32>
    %598 = arith.addf %592, %597 : vector<2x128xf32>
    %599 = vector.extract_strided_slice %507 {offsets = [0, 15, 0], sizes = [2, 1, 64], strides = [1, 1, 1]} : vector<2x16x64xf32> to vector<2x1x64xf32>
    %600 = vector.shape_cast %599 : vector<2x1x64xf32> to vector<2x64xf32>
    %c15 = arith.constant 15 : index
    %c0_254 = arith.constant 0 : index
    %c0_255 = arith.constant 0 : index
    %601 = vector.load %arg16[%c15, %c0_254, %c0_255] : memref<16x64x128xf32, #tpu.memory_space<vmem>>, vector<1x64x128xf32>
    %602 = vector.shape_cast %601 : vector<1x64x128xf32> to vector<64x128xf32>
    %cst_256 = arith.constant dense<0.000000e+00> : vector<2x128xf32>
    %603 = tpu.matmul %600, %602, %cst_256 {dimension_numbers = #tpu.dot_dimension_numbers<[1], [0], [0], [1], [0, 0, 1, 1], [], []>} : vector<2x64xf32>, vector<64x128xf32>, vector<2x128xf32> -> vector<2x128xf32>
    %604 = arith.addf %598, %603 : vector<2x128xf32>
    %c0_257 = arith.constant 0 : index
    %c0_258 = arith.constant 0 : index
    %605 = vector.load %arg17[%c0_257, %c0_258] : memref<1x128xf32, #tpu.memory_space<vmem>>, vector<1x128xf32>
    %606 = vector.broadcast %605 : vector<1x128xf32> to vector<2x128xf32>
    %607 = arith.addf %604, %606 : vector<2x128xf32>
    %c0_259 = arith.constant 0 : index
    %c0_260 = arith.constant 0 : index
    %608 = vector.load %arg18[%c0_259, %c0_260] : memref<1x128xf32, #tpu.memory_space<vmem>>, vector<1x128xf32>
    %609 = vector.broadcast %608 : vector<1x128xf32> to vector<2x128xf32>
    %610 = arith.mulf %607, %609 : vector<2x128xf32>
    %c0_261 = arith.constant 0 : index
    %c0_262 = arith.constant 0 : index
    %611 = vector.load %arg19[%c0_261, %c0_262] : memref<1x128xf32, #tpu.memory_space<vmem>>, vector<1x128xf32>
    %612 = vector.broadcast %611 : vector<1x128xf32> to vector<2x128xf32>
    %613 = arith.addf %610, %612 : vector<2x128xf32>
    %cst_263 = arith.constant 5.000000e-01 : f32
    %614 = vector.broadcast %cst_263 : f32 to vector<2x128xf32>
    %615 = arith.mulf %614, %613 : vector<2x128xf32>
    %cst_264 = arith.constant 4.471500e-02 : f32
    %616 = vector.broadcast %cst_264 : f32 to vector<2x128xf32>
    %617 = arith.mulf %616, %613 : vector<2x128xf32>
    %618 = arith.mulf %617, %613 : vector<2x128xf32>
    %619 = arith.mulf %618, %613 : vector<2x128xf32>
    %620 = arith.addf %613, %619 : vector<2x128xf32>
    %cst_265 = arith.constant 0.797884583 : f32
    %621 = vector.broadcast %cst_265 : f32 to vector<2x128xf32>
    %622 = arith.mulf %621, %620 : vector<2x128xf32>
    %623 = math.tanh %622 : vector<2x128xf32>
    %cst_266 = arith.constant 1.000000e+00 : f32
    %624 = vector.broadcast %cst_266 : f32 to vector<2x128xf32>
    %625 = arith.addf %624, %623 : vector<2x128xf32>
    %626 = arith.mulf %615, %625 : vector<2x128xf32>
    %c0_267 = arith.constant 0 : index
    %c0_268 = arith.constant 0 : index
    %627 = vector.load %arg20[%c0_267, %c0_268] : memref<128x64xf32, #tpu.memory_space<vmem>>, vector<128x64xf32>
    %cst_269 = arith.constant dense<0.000000e+00> : vector<2x64xf32>
    %628 = tpu.matmul %626, %627, %cst_269 {dimension_numbers = #tpu.dot_dimension_numbers<[1], [0], [0], [1], [0, 0, 1, 1], [], []>} : vector<2x128xf32>, vector<128x64xf32>, vector<2x64xf32> -> vector<2x64xf32>
    %c0_270 = arith.constant 0 : index
    %c0_271 = arith.constant 0 : index
    %629 = vector.load %arg21[%c0_270, %c0_271] : memref<1x64xf32, #tpu.memory_space<vmem>>, vector<1x64xf32>
    %630 = vector.broadcast %629 : vector<1x64xf32> to vector<2x64xf32>
    %631 = arith.addf %628, %630 : vector<2x64xf32>
    %c0_272 = arith.constant 0 : index
    %c0_273 = arith.constant 0 : index
    %632 = vector.load %arg22[%c0_272, %c0_273] : memref<1x64xf32, #tpu.memory_space<vmem>>, vector<1x64xf32>
    %633 = vector.broadcast %632 : vector<1x64xf32> to vector<2x64xf32>
    %634 = arith.mulf %631, %633 : vector<2x64xf32>
    %c0_274 = arith.constant 0 : index
    %c0_275 = arith.constant 0 : index
    %635 = vector.load %arg23[%c0_274, %c0_275] : memref<1x64xf32, #tpu.memory_space<vmem>>, vector<1x64xf32>
    %636 = vector.broadcast %635 : vector<1x64xf32> to vector<2x64xf32>
    %637 = arith.addf %634, %636 : vector<2x64xf32>
    %cst_276 = arith.constant 5.000000e-01 : f32
    %638 = vector.broadcast %cst_276 : f32 to vector<2x64xf32>
    %639 = arith.mulf %638, %637 : vector<2x64xf32>
    %cst_277 = arith.constant 4.471500e-02 : f32
    %640 = vector.broadcast %cst_277 : f32 to vector<2x64xf32>
    %641 = arith.mulf %640, %637 : vector<2x64xf32>
    %642 = arith.mulf %641, %637 : vector<2x64xf32>
    %643 = arith.mulf %642, %637 : vector<2x64xf32>
    %644 = arith.addf %637, %643 : vector<2x64xf32>
    %cst_278 = arith.constant 0.797884583 : f32
    %645 = vector.broadcast %cst_278 : f32 to vector<2x64xf32>
    %646 = arith.mulf %645, %644 : vector<2x64xf32>
    %647 = math.tanh %646 : vector<2x64xf32>
    %cst_279 = arith.constant 1.000000e+00 : f32
    %648 = vector.broadcast %cst_279 : f32 to vector<2x64xf32>
    %649 = arith.addf %648, %647 : vector<2x64xf32>
    %650 = arith.mulf %639, %649 : vector<2x64xf32>
    %c0_280 = arith.constant 0 : index
    %c0_281 = arith.constant 0 : index
    %651 = vector.load %arg24[%c0_280, %c0_281] : memref<64x25xf32, #tpu.memory_space<vmem>>, vector<64x25xf32>
    %cst_282 = arith.constant dense<0.000000e+00> : vector<2x25xf32>
    %652 = tpu.matmul %650, %651, %cst_282 {dimension_numbers = #tpu.dot_dimension_numbers<[1], [0], [0], [1], [0, 0, 1, 1], [], []>} : vector<2x64xf32>, vector<64x25xf32>, vector<2x25xf32> -> vector<2x25xf32>
    %c0_283 = arith.constant 0 : index
    %c0_284 = arith.constant 0 : index
    %653 = vector.load %arg25[%c0_283, %c0_284] : memref<1x25xf32, #tpu.memory_space<vmem>>, vector<1x25xf32>
    %654 = vector.broadcast %653 : vector<1x25xf32> to vector<2x25xf32>
    %655 = arith.addf %652, %654 : vector<2x25xf32>
    %656 = tpu.iota {dimensions = array<i32: 1>} : vector<2x25xi32>
    %cst_285 = arith.constant 0.000000e+00 : f32
    %657 = vector.broadcast %cst_285 : f32 to vector<2x25xf32>
    %658 = arith.subf %657, %655 : vector<2x25xf32>
    %659 = math.exp %658 : vector<2x25xf32>
    %cst_286 = arith.constant 1.000000e+00 : f32
    %660 = vector.broadcast %cst_286 : f32 to vector<2x25xf32>
    %661 = arith.addf %660, %659 : vector<2x25xf32>
    %cst_287 = arith.constant 1.000000e+00 : f32
    %662 = vector.broadcast %cst_287 : f32 to vector<2x25xf32>
    %663 = arith.divf %662, %661 : vector<2x25xf32>
    %cst_288 = arith.constant 0.000000e+00 : f32
    %664 = vector.broadcast %cst_288 : f32 to vector<2x25xf32>
    %665 = arith.maximumf %655, %664 : vector<2x25xf32>
    %666 = math.absf %655 : vector<2x25xf32>
    %cst_289 = arith.constant 0.000000e+00 : f32
    %667 = vector.broadcast %cst_289 : f32 to vector<2x25xf32>
    %668 = arith.subf %667, %666 : vector<2x25xf32>
    %669 = math.exp %668 : vector<2x25xf32>
    %cst_290 = arith.constant 1.000000e+00 : f32
    %670 = vector.broadcast %cst_290 : f32 to vector<2x25xf32>
    %671 = arith.addf %670, %669 : vector<2x25xf32>
    %672 = math.log %671 : vector<2x25xf32>
    %673 = arith.addf %665, %672 : vector<2x25xf32>
    %c0_i32 = arith.constant 0 : i32
    %674 = vector.broadcast %c0_i32 : i32 to vector<2x25xi32>
    %675 = arith.cmpi eq, %656, %674 : vector<2x25xi32>
    %676 = arith.select %675, %663, %655 : vector<2x25xi1>, vector<2x25xf32>
    %c24_i32 = arith.constant 24 : i32
    %677 = vector.broadcast %c24_i32 : i32 to vector<2x25xi32>
    %678 = arith.cmpi eq, %656, %677 : vector<2x25xi32>
    %679 = arith.select %678, %673, %676 : vector<2x25xi1>, vector<2x25xf32>
    %c0_291 = arith.constant 0 : index
    %c0_292 = arith.constant 0 : index
    %680 = vector.load %arg26[%c0_291, %c0_292] : memref<2x25xf32, #tpu.memory_space<vmem>>, vector<2x25xf32>
    tpu.vector_store %arg26[%c0_291, %c0_292], %679 {strides = array<i32>} : memref<2x25xf32, #tpu.memory_space<vmem>>, vector<2x25xf32>,
    return
  }
}

</mosaic_0001>

<bundles_post_ra>
// kernel: transformer1d_forward.1
= control target key start
LH: loop header
LB: loop body
LE: loop exit
PB: predicated region body
PF: predicated region fallthrough
CT: control target
= control target key end

     0   :  { %vm108_vm0 = vcmask 1043456   ;;  %vm95_vm1 = vcmask 31744   ;;  %v15022_v27 = vmov 0.0   ;;  %vm231_vm2 = vcmask 523264   ;;  %s20090_s28 = smov 32   ;;  %s20092_s29 = smov 112   ;;  %s20044_s1 = inlined_call_operand.vmem [shape: f32[4,64], index: 1, kind: input, shape index: {}]   ;;  %s20045_s0 = inlined_call_operand.vmem [shape: f32[32,4], index: 0, kind: input, shape index: {}]   ;;  %s20046_s4 = inlined_call_operand.vmem [shape: f32[2,64,192], index: 4, kind: input, shape index: {}]   ;;  %s20047_s2 = inlined_call_operand.vmem [shape: f32[1,64], index: 2, kind: input, shape index: {}]   ;;  %s20048_s3 = inlined_call_operand.vmem [shape: f32[16,64], index: 3, kind: input, shape index: {}]   ;;  %s20049_s5 = inlined_call_operand.vmem [shape: f32[2,1,192], index: 5, kind: input, shape index: {}]   ;;  %s20050_s6 = inlined_call_operand.vmem [shape: f32[2,64,64], index: 6, kind: input, shape index: {}]   ;;  %s20051_s7 = inlined_call_operand.vmem [shape: f32[2,1,64], index: 7, kind: input, shape index: {}]   ;;  %s20052_s10 = inlined_call_operand.vmem [shape: f32[2,64,2048], index: 10, kind: input, shape index: {}]   ;;  %s20053_s8 = inlined_call_operand.vmem [shape: f32[2,1,64], index: 8, kind: input, shape index: {}]   ;;  %s20054_s9 = inlined_call_operand.vmem [shape: f32[2,1,64], index: 9, kind: input, shape index: {}]   ;;  %s20055_s12 = inlined_call_operand.vmem [shape: f32[2,2048,64], index: 12, kind: input, shape index: {}]   ;;  %s20056_s11 = inlined_call_operand.vmem [shape: f32[2,1,2048], index: 11, kind: input, shape index: {}]   ;;  %s20057_s13 = inlined_call_operand.vmem [shape: f32[2,1,64], index: 13, kind: input, shape index: {}]   ;;  %s20058_s14 = inlined_call_operand.vmem [shape: f32[2,1,64], index: 14, kind: input, shape index: {}]   ;;  %s20059_s15 = inlined_call_operand.vmem [shape: f32[2,1,64], index: 15, kind: input, shape index: {}]   ;;  %s20060_s16 = inlined_call_operand.vmem [shape: f32[16,64,128], index: 16, kind: input, shape index: {}]   ;;  %s20061_s20 = inlined_call_operand.vmem [shape: f32[128,64], index: 20, kind: input, shape index: {}]   ;;  %s20062_s17 = inlined_call_operand.vmem [shape: f32[1,128], index: 17, kind: input, shape index: {}]   ;;  %s20063_s18 = inlined_call_operand.vmem [shape: f32[1,128], index: 18, kind: input, shape index: {}]   ;;  %s20064_s19 = inlined_call_operand.vmem [shape: f32[1,128], index: 19, kind: input, shape index: {}]   ;;  %s20065_s24 = inlined_call_operand.vmem [shape: f32[64,25], index: 24, kind: input, shape index: {}]   ;;  %s20066_s21 = inlined_call_operand.vmem [shape: f32[1,64], index: 21, kind: input, shape index: {}]   ;;  %s20067_s22 = inlined_call_operand.vmem [shape: f32[1,64], index: 22, kind: input, shape index: {}]   ;;  %s20068_s23 = inlined_call_operand.vmem [shape: f32[1,64], index: 23, kind: input, shape index: {}]   ;;  %s20069_s25 = inlined_call_operand.vmem [shape: f32[1,25], index: 25, kind: input, shape index: {}]   ;;  %s20070_s26 = inlined_call_operand.vmem [shape: f32[2,25], index: 26, kind: output, shape index: {}]  }
   0x1   :  { %20096 = sst [smem:[#allocation2_spill]] %s20044_s1  ;;  %308 = vmatprep.mubr.f32.mxu1 %v15022_v27  ;;  %v20095_v45 = vlaneseq  ;;  %vm349_vm3 = vcmask 130048   ;;  %vm15031_vm5 = vmmov 0   ;;  %vm9268_vm6 = vcmask 1041409  }
   0x2   :  { %20097 = sst [smem:[#allocation3_spill]] %s20045_s0  ;;  %vm15298_vm4 = vmpackc.low %vm349_vm3, %vm349_vm3  ;;  %vm10866_vm9 = vcmask 197632  }
   0x3   :  { %20098 = sst [smem:[#allocation4_spill]] %s20046_s4  ;;  %v15264_v46 = vshrl.u32 %v20095_v45, 7 }
   0x4   :  { %20099 = sst [smem:[#allocation5_spill]] %s20047_s2  ;;  %s20115_s4 = sld [smem:[#allocation4_spill]] }
   0x5   :  { %20100 = sst [smem:[#allocation6_spill]] %s20048_s3  ;;  %s20114_s3 = sld [smem:[#allocation3_spill]]  ;;  %v15267_v47 = vsub.s32 0, %v15264_v46  ;;  %v15274_v50 = vsub.s32 1, %v15264_v46 }
   0x6   :  { %20101 = sst [smem:[#allocation7_spill]] %s20049_s5  ;;  %s20116_s1 = sld [smem:[#allocation5_spill]] }
   0x7   :  { %20102 = sst [smem:[#allocation8_spill]] %s20050_s6  ;;  %s20117_s5 = sld [smem:[#allocation6_spill]] }
   0x8   :  { %20103 = sst [smem:[#allocation9_spill]] %s20051_s7  ;;  %s20113_s7 = sld [smem:[#allocation2_spill]] }
   0x9   :  { %20104 = sst [smem:[#allocation10_spill]] %s20052_s10  ;;  %s20118_s27 = sld [smem:[#allocation7_spill]] }
   0xa   :  { %20105 = sst [smem:[#allocation11_spill]] %s20053_s8  ;;  %v204_v3 = vld [vmem:[%s20115_s4 + $0x8] sm:$0xff]  ;;  %v206_v4 = vld [vmem:[%s20115_s4 + $0x18] sm:$0xff]  ;;  %v203_v5 = vld [vmem:[%s20115_s4] sm:$0xff]  ;;  %s20088_s2 = smov 96  }
   0xb   :  { %20106 = sst [smem:[#allocation12_spill]] %s20054_s9  ;;  %v83_v1 = vld [vmem:[%s20114_s3] sm:$0xff]  ;;  %v84_v2 = vld [vmem:[%s20114_s3 + $0x8] sm:$0xff]  ;;  %v13424_v6 = vpack.c.bf16 %v206_v4, %v204_v3  ;;  %v205_v7 = vld [vmem:[%s20115_s4 + $0x10] sm:$0xff]  ;;  %s20084_s10 = smov 48  }
   0xc   :  { %20107 = sst [smem:[#allocation13_spill]] %s20065_s24  ;;  %12724 = vmatprep.mubr.msk.f32.mxu0 %vm95_vm1, %v83_v1  ;;  %v208_v8 = vld [vmem:[%s20115_s4 + $0x28] sm:$0xff]  ;;  %v210_v9 = vld [vmem:[%s20115_s4 + $0x38] sm:$0xff]  ;;  %v13426_v10 = vpack.c.bf16 %v205_v7, %v203_v5  ;;  %v207_v12 = vld [vmem:[%s20115_s4 + $0x20] sm:$0xff]  ;;  %s20082_s6 = smov 16  }
   0xd   :  { %20108 = sst [smem:[#allocation14_spill]] %s20066_s21  ;;  %v13428_v11 = vpack.c.bf16 %v210_v9, %v208_v8  ;;  %v209_v13 = vld [vmem:[%s20115_s4 + $0x30] sm:$0xff]  ;;  %v212_v14 = vld [vmem:[%s20115_s4 + $0x48] sm:$0xff]  ;;  %13425 = vmatprep.subr.bf16.mxu1 %v13424_v6  ;;  %v214_v15 = vld [vmem:[%s20115_s4 + $0x58] sm:$0xff]  ;;  %s20122_s8 = smov 48  }
   0xe   :  { %20109 = sst [smem:[#allocation15_spill]] %s20067_s22  ;;  %v87_v0 = vld [vmem:[%s20113_s7] sm:$0xf]  ;;  %13427 = vmatpush1.bf16.msra.mxu1 %v13426_v10  ;;  %v13430_v16 = vpack.c.bf16 %v209_v13, %v207_v12  ;;  %v13432_v17 = vpack.c.bf16 %v214_v15, %v212_v14  ;;  %v213_v19 = vld [vmem:[%s20115_s4 + $0x50] sm:$0xff]  ;;  %v216_v21 = vld [vmem:[%s20115_s4 + $0x68] sm:$0xff]  ;;  %s20080_s7 = smov 64  }
   0xf   :  { %20110 = sst [smem:[#allocation16_spill]] %s20068_s23  ;;  %12722 = vmatprep.subr.msk.mxu0 %vm108_vm0, %v87_v0  ;;  %13429 = vmatprep.subr.bf16.mxu1 %v13428_v11  ;;  %v211_v18 = vld [vmem:[%s20115_s4 + $0x40] sm:$0xff]  ;;  %v218_v22 = vld [vmem:[%s20115_s4 + $0x78] sm:$0xff]  ;;  %v217_v25 = vld [vmem:[%s20115_s4 + $0x70] sm:$0xff]  ;;  %s20123_s9 = sld [smem:[#allocation9_spill]] }
  0x10   :  { %20111 = sst [smem:[#allocation17_spill]] %s20069_s25  ;;  %12723 = vmatpush3.msk.msra.mxu0 %vm108_vm0, %v87_v0  ;;  %v13434_v20 = vpack.c.bf16 %v213_v19, %v211_v18  ;;  %v13436_v23 = vpack.c.bf16 %v218_v22, %v216_v21  ;;  %v215_v24 = vld [vmem:[%s20115_s4 + $0x60] sm:$0xff]  ;;  %v85_v28 = vld [vmem:[%s20114_s3 + $0x10] sm:$0xff]  ;;  %v86_v29 = vld [vmem:[%s20114_s3 + $0x18] sm:$0xff]  ;;  %s20125_s0 = sld [smem:[#allocation10_spill]] }
  0x11   :  { %20112 = sst [smem:[#allocation18_spill]] %s20070_s26  ;;  %12725 = vmatmul.mubr.msk.f32.vlgmr.msra.gmra.mrb[0].mxu0 %vm95_vm1, %v84_v2  ;;  %v13438_v26 = vpack.c.bf16 %v217_v25, %v215_v24  ;;  %v10872_v30 = vld [vmem:[%s20116_s1] ss:$0 sm:$0xff]  ;;  %v198_v37 = vld [vmem:[%s20117_s5 + $0x8] sm:$0xff]  ;;  %s20086_s1 = smov 80  }
  0x12   :  { %13431 = vmatpush1.bf16.msra.mxu1 %v13430_v16  ;;  %12727 = vmatprep.mubr.msk.f32.mxu0 %vm95_vm1, %v85_v28  ;;  %v197_v33 = vld [vmem:[%s20117_s5] sm:$0xff]  ;;  %s20121_s5 = sld [smem:[#allocation8_spill]]  ;;  %s20130_s21 = smov 32  }
  0x13   :  { %13433 = vmatprep.subr.bf16.mxu1 %v13432_v17  ;;  %v219_v48 = vld [vmem:[%s20118_s27] sm:$0x3]  ;;  %s20132_s24 = smov 80   ;;  %s20133_s26 = sld [smem:[#allocation13_spill]] }
  0x14   :  { %v224_v49 = vrot.slane %v219_v48, %v15267_v47  ;;  %v228_v54 = vrot.slane %v219_v48, %v15274_v50 }
  0x15   :  { %12728 = vmatmul.mubr.msk.f32.gmra.mrb[2].mxu0 %vm95_vm1, %v86_v29 }
  0x16   :  { %13435 = vmatpush1.bf16.msra.mxu1 %v13434_v20 }
  0x17   :  { %13437 = vmatprep.subr.bf16.mxu1 %v13436_v23 }
  0x1a   :  { %13439 = vmatpush1.bf16.msra.mxu1 %v13438_v26 }
  0xe4   :  { %v12726_v31 = vpop.f32.mrb[0].mxu0 }
  0xe5   :  { %v178_v32 = vpop.f32.mrb[1].mxu0  ;;  %v184_v35 = vadd.f32 %v12726_v31, %v10872_v30 }
  0xe6   :  { %v179_v34 = vadd.f32 %v10872_v30, %v178_v32 }
  0xe7   :  { %v15249_v38 = vadd.f32 %v198_v37, %v184_v35 }
  0xe8   :  { %v15241_v36 = vadd.f32 %v197_v33, %v179_v34  ;;  %v12729_v39 = vpop.f32.mrb[2].mxu0 }
  0xe9   :  { %v188_v40 = vpop.f32.mrb[3].mxu0  ;;  %v194_v41 = vadd.f32 %v12729_v39, %v10872_v30 }
  0xea   :  { %10878 = vmatmul.mubr.msk.f32.vlgmr.msra.gmra.mrb[0].mxu1 %vm231_vm2, %v15241_v36  ;;  %v189_v42 = vadd.f32 %v10872_v30, %v188_v40 }
  0xeb   :  { %314 = vmatprep.mubr.f32.mxu1 %v15022_v27  ;;  %v15256_v44 = vadd.f32 %v198_v37, %v194_v41 }
  0xec   :  { %v15254_v43 = vadd.f32 %v197_v33, %v189_v42 }
  0xee   :  { %10879 = vmatmul.mubr.msk.f32.gmra.mrb[2].mxu1 %vm231_vm2, %v15249_v38 }
  0xef   :  { %320 = vmatprep.mubr.f32.mxu1 %v15022_v27 }
  0xf2   :  { %10880 = vmatmul.mubr.msk.f32.gmra.mrb[4].mxu1 %vm231_vm2, %v15254_v43 }
  0xf3   :  { %326 = vmatprep.mubr.f32.mxu1 %v15022_v27 }
  0xf6   :  { %10881 = vmatmul.mubr.msk.f32.gmra.mrb[6].mxu1 %vm231_vm2, %v15256_v44 }
 0x1bd   :  { %v310_v51 = vpop.f32.mrb[0].mxu1 }
 0x1be   :  { %v311_v52 = vadd.f32 %v310_v51, %v224_v49  ;;  %v312_v53 = vpop.f32.mrb[1].mxu1 }
 0x1bf   :  { %v313_v59 = vadd.f32 %v312_v53, %v228_v54 }
 0x1c0   :  { %v15277_v55 = vmul.f32 0.25, %v311_v52 }
 0x1c1   :  { %v316_v56 = vpop.f32.mrb[2].mxu1 }
 0x1c2   :  { %v317_v57 = vadd.f32 %v316_v56, %v224_v49  ;;  %v318_v58 = vpop.f32.mrb[3].mxu1  ;;  %902 = vrot.lane.b32.xlu1 %v15277_v55, %s20088_s2  ;;  %12734 = vmatprep.mubr.msk.f32.mxu0 %vm349_vm3, %v15277_v55 }
 0x1c3   :  { %v319_v60 = vadd.f32 %v318_v58, %v228_v54 }
 0x1c4   :  { %v15283_v61 = vpack.i.bf16 %v317_v57, %v311_v52  ;;  %v15285_v62 = vmul.f32 0.25, %v317_v57 }
 0x1c5   :  { %v13446_v63 = vpack.c.bf16 %v319_v60, %v313_v59  ;;  %v15287_v0 = vpack.i.bf16 %v319_v60, %v313_v59  ;;  %v322_v1 = vpop.f32.mrb[4].mxu1 }
 0x1c6   :  { %14711 = vrot.lane.b32.xlu0 %v15283_v61, %s20080_s7  ;;  %904 = vrot.lane.b32.xlu1 %v15285_v62, %s20088_s2  ;;  %v324_v13 = vpop.f32.mrb[5].mxu1  ;;  %v15313_v16 = vadd.f32 %v322_v1, %v224_v49 }
 0x1c7   :  { %v325_v18 = vadd.f32 %v324_v13, %v228_v54 }
 0x1c9   :  { %v328_v14 = vpop.f32.mrb[6].mxu1 }
 0x1ca   :  { %14716 = vrot.lane.b32.xlu0 %v15283_v61, %s20090_s28  ;;  %v330_v15 = vpop.f32.mrb[7].mxu1  ;;  %v15315_v17 = vadd.f32 %v328_v14, %v224_v49 }
 0x1cb   :  { %v331_v19 = vadd.f32 %v330_v15, %v228_v54 }
 0x1cc   :  { %v15319_v20 = vpack.i.bf16 %v15315_v17, %v15313_v16 }
 0x1cd   :  { %v15321_v21 = vpack.c.bf16 %v331_v19, %v325_v18  ;;  %v15323_v22 = vpack.i.bf16 %v331_v19, %v325_v18 }
 0x234   :  { %v903_v2 = vpop.permute.xlu1 %902 }
 0x235   :  { %12776 = vmatprep.mubr.msk.f32.mxu1 %vm349_vm3, %v903_v2 }
 0x238   :  { %v14712_v3 = vpop.permute.xlu0 %14711  ;;  %v905_v12 = vpop.permute.xlu1 %904 }
 0x239   :  { %v14714_v4 = vunpack.i.h.bf16 %v14712_v3  ;;  %v14713_v5 = vunpack.i.l.bf16 %v14712_v3 }
 0x23b   :  { %v13440_v7 = vpack.c.bf16 %v14714_v4, %v14713_v5 }
 0x23c   :  { %v14717_v8 = vpop.permute.xlu0 %14716 }
 0x23d   :  { %v14719_v9 = vunpack.i.h.bf16 %v14717_v8  ;;  %v14718_v10 = vunpack.i.l.bf16 %v14717_v8  ;;  %13442 = vmatprep.subr.msk.bf16.mxu0 %vm15298_vm4, %v13440_v7 }
 0x23e   :  { %13445 = vmatpush3.bf16.xpose.msk.msra.mxu0 %vm15298_vm4, %v13440_v7 }
 0x23f   :  { %v13468_v11 = vpack.c.bf16 %v14719_v9, %v14718_v10  ;;  %13447 = vmatprep.subr.bf16.mxu0 %v13446_v63  ;;  %v337_v9 = vld [vmem:[%s20121_s5 + $0x20] sm:$0xff]  ;;  %v338_v10 = vld [vmem:[%s20121_s5 + $0x28] sm:$0xff] }
 0x241   :  { %13470 = vmatprep.subr.msk.bf16.mxu1 %vm15298_vm4, %v13468_v11 }
 0x242   :  { %13473 = vmatpush3.bf16.xpose.msk.msra.mxu1 %vm15298_vm4, %v13468_v11  ;;  %v15351_v11 = vpack.c.bf16 %v338_v10, %v337_v9 }
 0x245   :  { %12735 = vmatmul.mubr.msk.f32.vlgmr.msra.gmra.mrb[4].mxu0 %vm349_vm3, %v15285_v62 }
 0x246   :  { %13449 = vmatpush3.bf16.msra.mxu0 %v13446_v63 }
 0x249   :  { %12777 = vmatmul.mubr.msk.f32.vlgmr.msra.gmra.mrb[8].mxu1 %vm349_vm3, %v905_v12 }
 0x318   :  { %v12736_v23 = vpop.f32.mrb[4].mxu0 }
 0x319   :  { %v426_v24 = vpop.f32.mrb[5].mxu0  ;;  %v438_v25 = vsel %vm349_vm3, %v12736_v23, -inf }
 0x31a   :  { %439 = vmax.xlane.f32.xlu1 %v438_v25  ;;  %v435_v26 = vsel %vm349_vm3, %v426_v24, -inf }
 0x31b   :  { %436 = vmax.xlane.f32.xlu0 %v435_v26 }
 0x31c   :  { %v12778_v28 = vpop.f32.mrb[8].mxu1 }
 0x31d   :  { %v984_v29 = vpop.f32.mrb[9].mxu1  ;;  %v996_v31 = vsel %vm349_vm3, %v12778_v28, -inf }
 0x31e   :  { %v993_v30 = vsel %vm349_vm3, %v984_v29, -inf }
 0x31f   :  { %994 = vmax.xlane.f32.xlu0 %v993_v30 }
 0x323   :  { %997 = vmax.xlane.f32.xlu0 %v996_v31 }
 0x32b   :  { %14721 = vrot.lane.b32.xlu1 %v15283_v61, %s20084_s10 }
 0x32f   :  { %14726 = vrot.lane.b32.xlu1 %v15287_v0, %s20088_s2 }
 0x3a7   :  { %v440_v32 = vpop.xlane.xlu1 %439 }
 0x3a8   :  { %v442_v33 = vsub.f32 %v12736_v23, %v440_v32  ;;  %v437_v34 = vpop.xlane.xlu0 %436 }
 0x3a9   :  { %v441_v35 = vsub.f32 %v426_v24, %v437_v34 }
 0x3aa   :  { %v445_v37 = vmul.f32 1.442695, %v442_v33 }
 0x3ab   :  { %v443_v39 = vmul.f32 1.442695, %v441_v35  ;;  %v14722_v40 = vpop.permute.xlu1 %14721 }
 0x3ac   :  { %14850 = vpow2.f32 %v445_v37  ;;  %v14724_v41 = vunpack.i.h.bf16 %v14722_v40  ;;  %v14723_v42 = vunpack.i.l.bf16 %v14722_v40  ;;  %v995_v48 = vpop.xlane.xlu0 %994 }
 0x3ad   :  { %14852 = vpow2.f32 %v443_v39  ;;  %v999_v49 = vsub.f32 %v984_v29, %v995_v48 }
 0x3ae   :  { %v13450_v51 = vpack.c.bf16 %v14724_v41, %v14723_v42 }
 0x3af   :  { %v1001_v52 = vmul.f32 1.442695, %v999_v49  ;;  %v14727_v53 = vpop.permute.xlu1 %14726 }
 0x3b0   :  { %v14729_v54 = vunpack.i.h.bf16 %v14727_v53  ;;  %v14728_v56 = vunpack.i.l.bf16 %v14727_v53  ;;  %13452 = vmatprep.subr.msk.bf16.mxu0 %vm15298_vm4, %v13450_v51  ;;  %v998_v57 = vpop.xlane.xlu0 %997 }
 0x3b1   :  { %14854 = vpow2.f32 %v1001_v52  ;;  %v1000_v58 = vsub.f32 %v12778_v28, %v998_v57 }
 0x3b2   :  { %v13474_v59 = vpack.c.bf16 %v14729_v54, %v14728_v56 }
 0x3b3   :  { %v1003_v60 = vmul.f32 1.442695, %v1000_v58 }
 0x3b4   :  { %13475 = vmatprep.subr.bf16.mxu1 %v13474_v59 }
 0x3b5   :  { %14856 = vpow2.f32 %v1003_v60  ;;  %13477 = vmatpush3.bf16.msra.mxu1 %v13474_v59 }
 0x3b6   :  { %v14851_v63 = vpop.eup %14850  ;;  %13479 = vmatprep.subr.bf16.mxu1 %v15351_v11 }
 0x3b7   :  { %v14853_v1 = vpop.eup %14852  ;;  %v450_v2 = vsel %vm349_vm3, %v14851_v63, 0.0 }
 0x3b8   :  { %451 = vadd.xlane.f32.xlu0 %v450_v2  ;;  %v447_v3 = vsel %vm349_vm3, %v14853_v1, 0.0 }
 0x3b9   :  { %448 = vadd.xlane.f32.xlu1 %v447_v3 }
 0x3bb   :  { %v14855_v4 = vpop.eup %14854 }
 0x3bc   :  { %v1005_v5 = vsel %vm349_vm3, %v14855_v4, 0.0 }
 0x3bd   :  { %1006 = vadd.xlane.f32.xlu1 %v1005_v5 }
 0x3bf   :  { %v14857_v7 = vpop.eup %14856 }
 0x3c0   :  { %v1008_v8 = vsel %vm349_vm3, %v14857_v7, 0.0 }
 0x3c1   :  { %1009 = vadd.xlane.f32.xlu0 %v1008_v8 }
 0x3ce   :  { %540 = vrot.lane.b32.xlu1 %v15285_v62, %s20092_s29 }
 0x3d2   :  { %1185 = vrot.lane.b32.xlu1 %v15277_v55, %s20086_s1 }
 0x3d7   :  { %538 = vrot.lane.b32.xlu0 %v15277_v55, %s20092_s29 }
 0x3db   :  { %14731 = vrot.lane.b32.xlu0 %v15283_v61, %s20082_s6 }
 0x3df   :  { %1187 = vrot.lane.b32.xlu0 %v15285_v62, %s20086_s1 }
 0x445   :  { %v452_v55 = vpop.xlane.xlu0 %451 }
 0x446   :  { %14858 = vrcp.f32 %v452_v55  ;;  %v449_v12 = vpop.xlane.xlu1 %448 }
 0x447   :  { %14860 = vrcp.f32 %v449_v12 }
 0x44a   :  { %v1007_v13 = vpop.xlane.xlu1 %1006 }
 0x44b   :  { %14862 = vrcp.f32 %v1007_v13 }
 0x44e   :  { %v1010_v14 = vpop.xlane.xlu0 %1009  ;;  %v541_v31 = vpop.permute.xlu1 %540 }
 0x44f   :  { %14864 = vrcp.f32 %v1010_v14 }
 0x450   :  { %v14859_v15 = vpop.eup %14858 }
 0x451   :  { %v14861_v18 = vpop.eup %14860  ;;  %v456_v24 = vmul.f32 %v14859_v15, %v14851_v63 }
 0x452   :  { %v539_v19 = vpop.permute.xlu0 %538  ;;  %v455_v23 = vmul.f32 %v14861_v18, %v14853_v1  ;;  %v1186_v48 = vpop.permute.xlu1 %1185 }
 0x454   :  { %12741 = vmatprep.mubr.msk.f32.mxu0 %vm349_vm3, %v455_v23 }
 0x455   :  { %v14863_v61 = vpop.eup %14862  ;;  %12742 = vmatmul.mubr.msk.f32.vlgmr.msra.gmra.mrb[6].mxu0 %vm349_vm3, %v456_v24 }
 0x456   :  { %13455 = vmatpush3.bf16.xpose.msk.msra.mxu0 %vm15298_vm4, %v13450_v51  ;;  %12748 = vmatprep.mubr.msk.f32.mxu0 %vm349_vm3, %v539_v19  ;;  %v14732_v62 = vpop.permute.xlu0 %14731  ;;  %v1013_v25 = vmul.f32 %v14863_v61, %v14855_v4  ;;  %v15381_v51 = vmul.f32 0.25, %v15313_v16 }
 0x457   :  { %v14734_v26 = vunpack.i.h.bf16 %v14732_v62  ;;  %v14733_v28 = vunpack.i.l.bf16 %v14732_v62 }
 0x458   :  { %12783 = vmatprep.mubr.msk.f32.mxu1 %vm349_vm3, %v1013_v25  ;;  %v15404_v25 = vmul.f32 0.25, %v15315_v17 }
 0x459   :  { %v14865_v29 = vpop.eup %14864  ;;  %v13482_v32 = vpack.c.bf16 %v14734_v26, %v14733_v28 }
 0x45a   :  { %v1014_v30 = vmul.f32 %v14865_v29, %v14857_v7  ;;  %v1188_v49 = vpop.permute.xlu0 %1187 }
 0x45c   :  { %12784 = vmatmul.mubr.msk.f32.vlgmr.msra.gmra.mrb[10].mxu1 %vm349_vm3, %v1014_v30 }
 0x45d   :  { %12749 = vmatmul.mubr.msk.f32.vlgmr.msra.gmra.mrb[8].mxu0 %vm349_vm3, %v541_v31  ;;  %13481 = vmatpush3.bf16.msra.mxu1 %v15351_v11 }
 0x45e   :  { %13484 = vmatprep.subr.msk.bf16.mxu1 %vm15298_vm4, %v13482_v32 }
 0x528   :  { %v15369_v33 = vpop.f32.mrb[6].mxu0 }
 0x529   :  { %v15371_v34 = vpop.f32.mrb[7].mxu0 }
 0x52f   :  { %v12785_v35 = vpop.f32.mrb[10].mxu1 }
 0x530   :  { %v12750_v37 = vpop.f32.mrb[8].mxu0  ;;  %v1093_v39 = vpop.f32.mrb[11].mxu1 }
 0x531   :  { %v620_v40 = vpop.f32.mrb[9].mxu0  ;;  %12790 = vmatprep.mubr.msk.f32.mxu1 %vm349_vm3, %v1093_v39  ;;  %v632_v41 = vsel %vm349_vm3, %v12750_v37, -inf }
 0x532   :  { %633 = vmax.xlane.f32.xlu0 %v632_v41  ;;  %12791 = vmatmul.mubr.msk.f32.vlgmr.msra.gmra.mrb[12].mxu1 %vm349_vm3, %v12785_v35  ;;  %v629_v42 = vsel %vm349_vm3, %v620_v40, -inf  ;;  %v336_v41 = vld [vmem:[%s20121_s5 + $0x18] sm:$0xff] }
 0x533   :  { %630 = vmax.xlane.f32.xlu1 %v629_v42  ;;  %13487 = vmatpush3.bf16.xpose.msk.msra.mxu1 %vm15298_vm4, %v13482_v32 }
 0x534   :  { %12797 = vmatprep.mubr.msk.f32.mxu1 %vm349_vm3, %v1186_v48  ;;  %v333_v48 = vld [vmem:[%s20121_s5] sm:$0xff] }
 0x53a   :  { %12798 = vmatmul.mubr.msk.f32.vlgmr.msra.gmra.mrb[14].mxu1 %vm349_vm3, %v1188_v49  ;;  %v334_v49 = vld [vmem:[%s20121_s5 + $0x8] sm:$0xff] }
 0x53b   :  { %12818 = vmatprep.mubr.msk.f32.mxu1 %vm349_vm3, %v15381_v51 }
 0x5bf   :  { %v634_v52 = vpop.xlane.xlu0 %633 }
 0x5c0   :  { %v636_v53 = vsub.f32 %v12750_v37, %v634_v52  ;;  %v631_v54 = vpop.xlane.xlu1 %630  ;;  %v15427_v52 = vpack.c.bf16 %v334_v49, %v333_v48 }
 0x5c1   :  { %v635_v56 = vsub.f32 %v620_v40, %v631_v54  ;;  %v335_v40 = vld [vmem:[%s20121_s5 + $0x10] sm:$0xff] }
 0x5c2   :  { %v639_v57 = vmul.f32 1.442695, %v636_v53  ;;  %v15417_v42 = vpack.c.bf16 %v336_v41, %v335_v40 }
 0x5c3   :  { %v637_v58 = vmul.f32 1.442695, %v635_v56 }
 0x5c4   :  { %14866 = vpow2.f32 %v639_v57 }
 0x5c5   :  { %14868 = vpow2.f32 %v637_v58 }
 0x5ce   :  { %v14867_v59 = vpop.eup %14866 }
 0x5cf   :  { %v14869_v60 = vpop.eup %14868  ;;  %v644_v63 = vsel %vm349_vm3, %v14867_v59, 0.0 }
 0x5d0   :  { %645 = vadd.xlane.f32.xlu1 %v644_v63  ;;  %v641_v16 = vsel %vm349_vm3, %v14869_v60, 0.0 }
 0x5d1   :  { %642 = vadd.xlane.f32.xlu0 %v641_v16 }
 0x5e1   :  { %14741 = vrot.lane.b32.xlu1 %v15319_v20, %s20080_s7  ;;  %s20124_s7 = smov 16  }
 0x5e7   :  { %14736 = vrot.lane.b32.xlu0 %v15287_v0, %s20092_s29 }
 0x605   :  { %v15392_v1 = vpop.f32.mrb[12].mxu1 }
 0x606   :  { %v15394_v2 = vpop.f32.mrb[13].mxu1 }
 0x60d   :  { %v12799_v3 = vpop.f32.mrb[14].mxu1 }
 0x60e   :  { %v1267_v4 = vpop.f32.mrb[15].mxu1  ;;  %v1279_v5 = vsel %vm349_vm3, %v12799_v3, -inf }
 0x60f   :  { %1280 = vmax.xlane.f32.xlu0 %v1279_v5  ;;  %v1276_v7 = vsel %vm349_vm3, %v1267_v4, -inf  ;;  %v340_v5 = vld [vmem:[%s20121_s5 + $0x38] sm:$0xff] }
 0x610   :  { %1277 = vmax.xlane.f32.xlu1 %v1276_v7 }
 0x65d   :  { %v646_v8 = vpop.xlane.xlu1 %645 }
 0x65e   :  { %14870 = vrcp.f32 %v646_v8  ;;  %v643_v9 = vpop.xlane.xlu0 %642 }
 0x65f   :  { %14872 = vrcp.f32 %v643_v9 }
 0x661   :  { %v14742_v10 = vpop.permute.xlu1 %14741 }
 0x662   :  { %v14744_v55 = vunpack.i.h.bf16 %v14742_v10  ;;  %v14743_v12 = vunpack.i.l.bf16 %v14742_v10  ;;  %v14737_v13 = vpop.permute.xlu0 %14736 }
 0x663   :  { %v14739_v14 = vunpack.i.h.bf16 %v14737_v13  ;;  %v14738_v15 = vunpack.i.l.bf16 %v14737_v13 }
 0x664   :  { %v13496_v18 = vpack.c.bf16 %v14744_v55, %v14743_v12 }
 0x665   :  { %v13456_v19 = vpack.c.bf16 %v14739_v14, %v14738_v15 }
 0x666   :  { %13498 = vmatprep.subr.msk.bf16.mxu1 %vm15298_vm4, %v13496_v18 }
 0x667   :  { %13457 = vmatprep.subr.bf16.mxu0 %v13456_v19  ;;  %13501 = vmatpush3.bf16.xpose.msk.msra.mxu1 %vm15298_vm4, %v13496_v18 }
 0x668   :  { %v14871_v23 = vpop.eup %14870  ;;  %13459 = vmatpush3.bf16.msra.mxu0 %v13456_v19 }
 0x669   :  { %v14873_v24 = vpop.eup %14872  ;;  %v650_v62 = vmul.f32 %v14871_v23, %v14867_v59  ;;  %13461 = vmatprep.subr.bf16.mxu0 %v15417_v42 }
 0x66a   :  { %v649_v61 = vmul.f32 %v14873_v24, %v14869_v60 }
 0x66c   :  { %12755 = vmatprep.mubr.msk.f32.mxu0 %vm349_vm3, %v649_v61 }
 0x66d   :  { %12756 = vmatmul.mubr.msk.f32.vlgmr.msra.gmra.mrb[10].mxu0 %vm349_vm3, %v650_v62 }
 0x66e   :  { %12819 = vmatmul.mubr.msk.f32.vlgmr.msra.gmra.mrb[16].mxu1 %vm349_vm3, %v15404_v25  ;;  %13463 = vmatpush3.bf16.msra.mxu0 %v15417_v42 }
 0x66f   :  { %13465 = vmatprep.subr.bf16.mxu0 %v15427_v52 }
 0x69c   :  { %v1281_v26 = vpop.xlane.xlu0 %1280 }
 0x69d   :  { %v1283_v28 = vsub.f32 %v12799_v3, %v1281_v26  ;;  %v1278_v29 = vpop.xlane.xlu1 %1277 }
 0x69e   :  { %v1282_v30 = vsub.f32 %v1267_v4, %v1278_v29  ;;  %v339_v4 = vld [vmem:[%s20121_s5 + $0x30] sm:$0xff] }
 0x69f   :  { %v1286_v31 = vmul.f32 1.442695, %v1283_v28  ;;  %v15453_v9 = vpack.c.bf16 %v340_v5, %v339_v4 }
 0x6a0   :  { %v1284_v32 = vmul.f32 1.442695, %v1282_v30 }
 0x6a1   :  { %14874 = vpow2.f32 %v1286_v31 }
 0x6a2   :  { %14876 = vpow2.f32 %v1284_v32 }
 0x6ab   :  { %v14875_v35 = vpop.eup %14874 }
 0x6ac   :  { %v14877_v37 = vpop.eup %14876  ;;  %v1291_v39 = vsel %vm349_vm3, %v14875_v35, 0.0 }
 0x6ad   :  { %1292 = vadd.xlane.f32.xlu1 %v1291_v39  ;;  %v1288_v17 = vsel %vm349_vm3, %v14877_v37, 0.0 }
 0x6ae   :  { %1289 = vadd.xlane.f32.xlu0 %v1288_v17 }
 0x6c4   :  { %14746 = vrot.lane.b32.xlu0 %v15287_v0, %s20086_s1 }
 0x6c8   :  { %1664 = vrot.lane.b32.xlu0 %v15381_v51, %s20092_s29 }
 0x6cc   :  { %1666 = vrot.lane.b32.xlu0 %v15404_v25, %s20092_s29 }
 0x6d0   :  { %14756 = vrot.lane.b32.xlu0 %v15319_v20, %s20090_s28  ;;  %s20131_s28 = smov 96  }
 0x6d4   :  { %2028 = vrot.lane.b32.xlu0 %v15381_v51, %s20088_s2 }
 0x73a   :  { %v1293_v54 = vpop.xlane.xlu1 %1292 }
 0x73b   :  { %v1290_v53 = vpop.xlane.xlu0 %1289 }
 0x73c   :  { %14878 = vrcp.f32 %v1290_v53 }
 0x73d   :  { %14880 = vrcp.f32 %v1293_v54 }
 0x73f   :  { %v14747_v56 = vpop.permute.xlu0 %14746 }
 0x740   :  { %v14749_v57 = vunpack.i.h.bf16 %v14747_v56  ;;  %v14748_v58 = vunpack.i.l.bf16 %v14747_v56  ;;  %v12757_v0 = vpop.f32.mrb[10].mxu0 }
 0x741   :  { %v731_v59 = vpop.f32.mrb[11].mxu0  ;;  %v12820_v60 = vpop.f32.mrb[16].mxu1 }
 0x742   :  { %12762 = vmatprep.mubr.msk.f32.mxu0 %vm349_vm3, %v731_v59  ;;  %v1552_v63 = vpop.f32.mrb[17].mxu1  ;;  %v13488_v16 = vpack.c.bf16 %v14749_v57, %v14748_v58  ;;  %v1564_v8 = vsel %vm349_vm3, %v12820_v60, -inf }
 0x743   :  { %12763 = vmatmul.mubr.msk.f32.vlgmr.msra.gmra.mrb[12].mxu0 %vm349_vm3, %v12757_v0  ;;  %v1561_v3 = vsel %vm349_vm3, %v1552_v63, -inf  ;;  %v1665_v32 = vpop.permute.xlu0 %1664 }
 0x744   :  { %13467 = vmatpush3.bf16.msra.mxu0 %v15427_v52  ;;  %12769 = vmatprep.mubr.msk.f32.mxu0 %vm349_vm3, %v15371_v34 }
 0x745   :  { %1562 = vmax.xlane.f32.xlu1 %v1561_v3  ;;  %13489 = vmatprep.subr.bf16.mxu0 %v13488_v16 }
 0x746   :  { %v14879_v7 = vpop.eup %14878 }
 0x747   :  { %v14881_v10 = vpop.eup %14880  ;;  %v1296_v55 = vmul.f32 %v14879_v7, %v14877_v37  ;;  %v1667_v39 = vpop.permute.xlu0 %1666 }
 0x748   :  { %v1297_v34 = vmul.f32 %v14881_v10, %v14875_v35 }
 0x749   :  { %1565 = vmax.xlane.f32.xlu1 %v1564_v8 }
 0x74b   :  { %12770 = vmatmul.mubr.msk.f32.vlgmr.msra.gmra.mrb[12].mxu0 %vm349_vm3, %v15369_v33  ;;  %v14757_v48 = vpop.permute.xlu0 %14756 }
 0x74c   :  { %13491 = vmatpush3.bf16.msra.mxu0 %v13488_v16  ;;  %12804 = vmatprep.mubr.msk.f32.mxu0 %vm349_vm3, %v1296_v55  ;;  %v14759_v53 = vunpack.i.h.bf16 %v14757_v48  ;;  %v14758_v54 = vunpack.i.l.bf16 %v14757_v48 }
 0x74d   :  { %13493 = vmatprep.subr.bf16.mxu0 %v15453_v9 }
 0x74e   :  { %v13524_v57 = vpack.c.bf16 %v14759_v53, %v14758_v54 }
 0x74f   :  { %12805 = vmatmul.mubr.msk.f32.vlgmr.msra.gmra.mrb[14].mxu0 %vm349_vm3, %v1297_v34  ;;  %v2029_v58 = vpop.permute.xlu0 %2028 }
 0x750   :  { %13495 = vmatpush3.bf16.msra.mxu0 %v15453_v9 }
 0x751   :  { %13503 = vmatprep.subr.bf16.mxu0 %v15321_v21 }
 0x7d2   :  { %v1563_v12 = vpop.xlane.xlu1 %1562 }
 0x7d3   :  { %v1567_v13 = vsub.f32 %v1552_v63, %v1563_v12 }
 0x7d5   :  { %v1569_v18 = vmul.f32 1.442695, %v1567_v13 }
 0x7d6   :  { %v1566_v14 = vpop.xlane.xlu1 %1565 }
 0x7d7   :  { %v1568_v15 = vsub.f32 %v12820_v60, %v1566_v14  ;;  %v15515_v14 = vld [vmem:[%s20123_s9] ss:$0 sm:$0xff] }
 0x7d9   :  { %v1571_v19 = vmul.f32 1.442695, %v1568_v15 }
 0x7db   :  { %14882 = vpow2.f32 %v1571_v19 }
 0x7dc   :  { %14884 = vpow2.f32 %v1569_v18 }
 0x7e5   :  { %v14883_v33 = vpop.eup %14882 }
 0x7e6   :  { %v1576_v23 = vsel %vm349_vm3, %v14883_v33, 0.0  ;;  %v14885_v24 = vpop.eup %14884 }
 0x7e7   :  { %1577 = vadd.xlane.f32.xlu1 %v1576_v23  ;;  %v1573_v61 = vsel %vm349_vm3, %v14885_v24, 0.0 }
 0x7eb   :  { %1574 = vadd.xlane.f32.xlu1 %v1573_v61 }
 0x7fc   :  { %14751 = vrot.lane.b32.xlu1 %v15319_v20, %s20122_s8 }
 0x800   :  { %2030 = vrot.lane.b32.xlu1 %v15404_v25, %s20088_s2 }
 0x81e   :  { %v12771_v62 = vpop.f32.mrb[12].mxu0 }
 0x81f   :  { %v14676_v26 = vadd.f32 %v15392_v1, %v12771_v62  ;;  %v893_v28 = vpop.f32.mrb[13].mxu0 }
 0x820   :  { %v14678_v29 = vadd.f32 %v15394_v2, %v893_v28 }
 0x822   :  { %v12806_v30 = vpop.f32.mrb[14].mxu0 }
 0x823   :  { %v1376_v31 = vpop.f32.mrb[15].mxu0 }
 0x824   :  { %12811 = vmatprep.mubr.msk.f32.mxu0 %vm349_vm3, %v1376_v31 }
 0x825   :  { %12812 = vmatmul.mubr.msk.f32.vlgmr.msra.gmra.mrb[16].mxu0 %vm349_vm3, %v12806_v30 }
 0x826   :  { %13505 = vmatpush3.bf16.msra.mxu0 %v15321_v21 }
 0x874   :  { %v1578_v35 = vpop.xlane.xlu1 %1577 }
 0x875   :  { %14886 = vrcp.f32 %v1578_v35 }
 0x878   :  { %v1575_v37 = vpop.xlane.xlu1 %1574 }
 0x879   :  { %14888 = vrcp.f32 %v1575_v37 }
 0x87c   :  { %v14752_v17 = vpop.permute.xlu1 %14751 }
 0x87d   :  { %v14754_v40 = vunpack.i.h.bf16 %v14752_v17  ;;  %v14753_v1 = vunpack.i.l.bf16 %v14752_v17 }
 0x87f   :  { %v13506_v41 = vpack.c.bf16 %v14754_v40, %v14753_v1  ;;  %v14887_v2 = vpop.eup %14886 }
 0x880   :  { %v1582_v21 = vmul.f32 %v14887_v2, %v14883_v33  ;;  %v2031_v0 = vpop.permute.xlu1 %2030 }
 0x881   :  { %13508 = vmatprep.subr.msk.bf16.mxu0 %vm15298_vm4, %v13506_v41 }
 0x883   :  { %v14889_v49 = vpop.eup %14888 }
 0x884   :  { %v1581_v56 = vmul.f32 %v14889_v49, %v14885_v24 }
 0x886   :  { %12825 = vmatprep.mubr.msk.f32.mxu0 %vm349_vm3, %v1581_v56 }
 0x887   :  { %12826 = vmatmul.mubr.msk.f32.vlgmr.msra.gmra.mrb[18].mxu0 %vm349_vm3, %v1582_v21 }
 0x888   :  { %13511 = vmatpush3.bf16.xpose.msk.msra.mxu0 %vm15298_vm4, %v13506_v41  ;;  %12832 = vmatprep.mubr.msk.f32.mxu0 %vm349_vm3, %v1665_v32 }
 0x889   :  { %13526 = vmatprep.subr.msk.bf16.mxu0 %vm15298_vm4, %v13524_v57 }
 0x88f   :  { %12833 = vmatmul.mubr.msk.f32.vlgmr.msra.gmra.mrb[20].mxu0 %vm349_vm3, %v1667_v39 }
 0x890   :  { %13529 = vmatpush3.bf16.xpose.msk.msra.mxu0 %vm15298_vm4, %v13524_v57  ;;  %12860 = vmatprep.mubr.msk.f32.mxu0 %vm349_vm3, %v2029_v58 }
 0x897   :  { %12861 = vmatmul.mubr.msk.f32.vlgmr.msra.gmra.mrb[22].mxu0 %vm349_vm3, %v2031_v0 }
 0x8f8   :  { %v12813_v59 = vpop.f32.mrb[16].mxu0 }
 0x8f9   :  { %v15487_v60 = vadd.f32 %v14676_v26, %v12813_v59  ;;  %v1457_v63 = vpop.f32.mrb[17].mxu0 }
 0x8fa   :  { %v14679_v16 = vadd.f32 %v14678_v29, %v1457_v63 }
 0x8fc   :  { %v2594_v13 = vadd.f32 %v14679_v16, %v15241_v36 }
 0x95a   :  { %v15489_v3 = vpop.f32.mrb[18].mxu0 }
 0x95b   :  { %v15491_v4 = vpop.f32.mrb[19].mxu0 }
 0x962   :  { %v12834_v5 = vpop.f32.mrb[20].mxu0 }
 0x963   :  { %v1746_v7 = vpop.f32.mrb[21].mxu0  ;;  %v1758_v8 = vsel %vm349_vm3, %v12834_v5, -inf }
 0x964   :  { %1759 = vmax.xlane.f32.xlu1 %v1758_v8  ;;  %v1755_v10 = vsel %vm349_vm3, %v1746_v7, -inf }
 0x965   :  { %1756 = vmax.xlane.f32.xlu0 %v1755_v10 }
 0x96a   :  { %v15495_v55 = vpop.f32.mrb[22].mxu0 }
 0x96b   :  { %v15497_v34 = vpop.f32.mrb[23].mxu0  ;;  %v2122_v12 = vsel %vm349_vm3, %v15495_v55, -inf }
 0x96c   :  { %v2119_v35 = vsel %vm349_vm3, %v15497_v34, -inf }
 0x975   :  { %14761 = vrot.lane.b32.xlu1 %v15323_v22, %s20092_s29  ;;  %s20127_s29 = sld [smem:[#allocation12_spill]] }
 0x979   :  { %2311 = vrot.lane.b32.xlu1 %v15381_v51, %s20086_s1  ;;  %v15518_v51 = vadd.f32 %v15515_v14, %v2594_v13 }
 0x97d   :  { %2313 = vrot.lane.b32.xlu1 %v15404_v25, %s20086_s1  ;;  %v2628_v25 = vmul.f32 %v15518_v51, %v15518_v51 }
 0x97f   :  { %v2632_v15 = vsel %vm231_vm2, %v2628_v25, 0.0 }
 0x9a1   :  { %2123 = vmax.xlane.f32.xlu1 %v2122_v12 }
 0x9b2   :  { %14771 = vrot.lane.b32.xlu1 %v15323_v22, %s20088_s2  ;;  %s20126_s2 = sld [smem:[#allocation11_spill]] }
 0x9b6   :  { %14776 = vrot.lane.b32.xlu1 %v15323_v22, %s20086_s1  ;;  %s20129_s1 = smov 112  }
 0x9da   :  { %2633 = vadd.xlane.f32.xlu1 %v2632_v15 }
 0x9f1   :  { %v1760_v18 = vpop.xlane.xlu1 %1759 }
 0x9f2   :  { %v1762_v19 = vsub.f32 %v12834_v5, %v1760_v18  ;;  %v1757_v33 = vpop.xlane.xlu0 %1756 }
 0x9f3   :  { %v1761_v22 = vsub.f32 %v1746_v7, %v1757_v33 }
 0x9f4   :  { %v1765_v23 = vmul.f32 1.442695, %v1762_v19 }
 0x9f5   :  { %v1763_v36 = vmul.f32 1.442695, %v1761_v22  ;;  %v14762_v24 = vpop.permute.xlu1 %14761 }
 0x9f6   :  { %v14764_v61 = vunpack.i.h.bf16 %v14762_v24  ;;  %v14763_v62 = vunpack.i.l.bf16 %v14762_v24 }
 0x9f7   :  { %14890 = vpow2.f32 %v1763_v36 }
 0x9f8   :  { %v13512_v26 = vpack.c.bf16 %v14764_v61, %v14763_v62  ;;  %14892 = vpow2.f32 %v1765_v23 }
 0x9f9   :  { %v2312_v28 = vpop.permute.xlu1 %2311 }
 0x9fa   :  { %13513 = vmatprep.subr.bf16.mxu1 %v13512_v26  ;;  %12881 = vmatprep.mubr.msk.f32.mxu0 %vm349_vm3, %v2312_v28 }
 0x9fb   :  { %13515 = vmatpush3.bf16.msra.mxu1 %v13512_v26 }
 0x9fc   :  { %13517 = vmatprep.subr.bf16.mxu1 %v15417_v42 }
 0x9fd   :  { %v2314_v53 = vpop.permute.xlu1 %2313 }
 0xa01   :  { %v14891_v29 = vpop.eup %14890 }
 0xa02   :  { %v1767_v30 = vsel %vm349_vm3, %v14891_v29, 0.0  ;;  %v14893_v31 = vpop.eup %14892 }
 0xa03   :  { %1768 = vadd.xlane.f32.xlu0 %v1767_v30  ;;  %v1770_v32 = vsel %vm349_vm3, %v14893_v31, 0.0 }
 0xa07   :  { %1771 = vadd.xlane.f32.xlu0 %v1770_v32 }
 0xa1d   :  { %14766 = vrot.lane.b32.xlu0 %v15319_v20, %s20124_s7 }
 0xa2e   :  { %v2124_v54 = vpop.xlane.xlu1 %2123 }
 0xa2f   :  { %v2126_v56 = vsub.f32 %v15495_v55, %v2124_v54  ;;  %v2741_v54 = vld [vmem:[%s20125_s0 + $0x188] sm:$0xff] }
 0xa31   :  { %v2129_v58 = vmul.f32 1.442695, %v2126_v56 }
 0xa32   :  { %v14772_v7 = vpop.permute.xlu1 %14771 }
 0xa33   :  { %v14774_v10 = vunpack.i.h.bf16 %v14772_v7  ;;  %v14773_v55 = vunpack.i.l.bf16 %v14772_v7  ;;  %v2789_v7 = vld [vmem:[%s20125_s0 + $0x308] sm:$0xff] }
 0xa35   :  { %v13530_v13 = vpack.c.bf16 %v14774_v10, %v14773_v55  ;;  %v2788_v55 = vld [vmem:[%s20125_s0 + $0x300] sm:$0xff] }
 0xa36   :  { %v14777_v33 = vpop.permute.xlu1 %14776 }
 0xa37   :  { %v14779_v24 = vunpack.i.h.bf16 %v14777_v33  ;;  %v14778_v61 = vunpack.i.l.bf16 %v14777_v33 }
 0xa3c   :  { %2120 = vmax.xlane.f32.xlu0 %v2119_v35 }
 0xa90   :  { %v1769_v37 = vpop.xlane.xlu0 %1768 }
 0xa91   :  { %14894 = vrcp.f32 %v1769_v37 }
 0xa94   :  { %v1772_v39 = vpop.xlane.xlu0 %1771 }
 0xa95   :  { %14896 = vrcp.f32 %v1772_v39 }
 0xa98   :  { %v14767_v17 = vpop.permute.xlu0 %14766 }
 0xa99   :  { %v14769_v40 = vunpack.i.h.bf16 %v14767_v17  ;;  %v14768_v1 = vunpack.i.l.bf16 %v14767_v17  ;;  %v2611_v17 = vsel %vm231_vm2, %v15518_v51, 0.0 }
 0xa9b   :  { %v14895_v41 = vpop.eup %14894  ;;  %v13538_v48 = vpack.c.bf16 %v14769_v40, %v14768_v1 }
 0xa9c   :  { %v1775_v2 = vmul.f32 %v14895_v41, %v14891_v29  ;;  %v2709_v41 = vld [vmem:[%s20125_s0 + $0x88] sm:$0xff] }
 0xa9d   :  { %13540 = vmatprep.subr.msk.bf16.mxu0 %vm15298_vm4, %v13538_v48 }
 0xa9e   :  { %12839 = vmatprep.mubr.msk.f32.mxu1 %vm349_vm3, %v1775_v2  ;;  %13543 = vmatpush3.bf16.xpose.msk.msra.mxu0 %vm15298_vm4, %v13538_v48  ;;  %v2692_v2 = vld [vmem:[%s20125_s0] sm:$0xff] }
 0xa9f   :  { %v14897_v20 = vpop.eup %14896 }
 0xaa0   :  { %v1776_v49 = vmul.f32 %v14897_v20, %v14893_v31  ;;  %v2708_v20 = vld [vmem:[%s20125_s0 + $0x80] sm:$0xff] }
 0xaa2   :  { %12840 = vmatmul.mubr.msk.f32.vlgmr.msra.gmra.mrb[18].mxu1 %vm349_vm3, %v1776_v49  ;;  %v13554_v49 = vpack.c.bf16 %v2708_v20, %v2692_v2  ;;  %v2711_v20 = vld [vmem:[%s20125_s0 + $0x98] sm:$0xff] }
 0xaa3   :  { %13519 = vmatpush3.bf16.msra.mxu1 %v15417_v42 }
 0xaa4   :  { %13521 = vmatprep.subr.bf16.mxu1 %v15427_v52 }
 0xaa5   :  { %12882 = vmatmul.mubr.msk.f32.vlgmr.msra.gmra.mrb[24].mxu0 %vm349_vm3, %v2314_v53  ;;  %v2725_v53 = vld [vmem:[%s20125_s0 + $0x108] sm:$0xff] }
 0xaa6   :  { %2980 = vmatprep.mubr.f32.mxu0 %v15022_v27  ;;  %v13556_v56 = vpack.c.bf16 %v2741_v54, %v2725_v53  ;;  %v2694_v53 = vld [vmem:[%s20125_s0 + $0x10] sm:$0xff] }
 0xaa7   :  { %v2710_v54 = vld [vmem:[%s20125_s0 + $0x90] sm:$0xff] }
 0xac9   :  { %v2121_v21 = vpop.xlane.xlu0 %2120 }
 0xaca   :  { %v2125_v57 = vsub.f32 %v15497_v34, %v2121_v21  ;;  %v2724_v21 = vld [vmem:[%s20125_s0 + $0x100] sm:$0xff] }
 0xacc   :  { %v2127_v0 = vmul.f32 1.442695, %v2125_v57  ;;  %v2740_v57 = vld [vmem:[%s20125_s0 + $0x180] sm:$0xff] }
 0xace   :  { %14898 = vpow2.f32 %v2127_v0  ;;  %v2757_v0 = vld [vmem:[%s20125_s0 + $0x208] sm:$0xff] }
 0xacf   :  { %14900 = vpow2.f32 %v2129_v58  ;;  %v13558_v58 = vpack.c.bf16 %v2740_v57, %v2724_v21  ;;  %v2743_v21 = vld [vmem:[%s20125_s0 + $0x198] sm:$0xff] }
 0xad8   :  { %v14899_v59 = vpop.eup %14898 }
 0xad9   :  { %v2131_v42 = vsel %vm349_vm3, %v14899_v59, 0.0  ;;  %v14901_v63 = vpop.eup %14900 }
 0xada   :  { %2132 = vadd.xlane.f32.xlu0 %v2131_v42  ;;  %v2134_v16 = vsel %vm349_vm3, %v14901_v63, 0.0 }
 0xade   :  { %2135 = vadd.xlane.f32.xlu0 %v2134_v16  ;;  %v2772_v16 = vld [vmem:[%s20125_s0 + $0x280] sm:$0xff] }
 0xb67   :  { %v2133_v5 = vpop.xlane.xlu0 %2132 }
 0xb68   :  { %14902 = vrcp.f32 %v2133_v5 }
 0xb6b   :  { %v2136_v8 = vpop.xlane.xlu0 %2135 }
 0xb6c   :  { %14904 = vrcp.f32 %v2136_v8  ;;  %v2805_v8 = vld [vmem:[%s20125_s0 + $0x388] sm:$0xff] }
 0xb6d   :  { %v13564_v10 = vpack.c.bf16 %v2805_v8, %v2789_v7 }
 0xb72   :  { %v14903_v19 = vpop.eup %14902 }
 0xb73   :  { %v2139_v36 = vmul.f32 %v14903_v19, %v14899_v59  ;;  %v2773_v59 = vld [vmem:[%s20125_s0 + $0x288] sm:$0xff]  ;;  %v2634_v19 = vpop.xlane.xlu1 %2633 }
 0xb74   :  { %v13560_v42 = vpack.c.bf16 %v2773_v59, %v2757_v0 }
 0xb75   :  { %v12841_v34 = vpop.f32.mrb[18].mxu1 }
 0xb76   :  { %v1857_v12 = vpop.f32.mrb[19].mxu1  ;;  %v14905_v23 = vpop.eup %14904 }
 0xb77   :  { %12846 = vmatprep.mubr.msk.f32.mxu1 %vm349_vm3, %v1857_v12 }
 0xb78   :  { %12847 = vmatmul.mubr.msk.f32.vlgmr.msra.gmra.mrb[20].mxu1 %vm349_vm3, %v12841_v34  ;;  %v12883_v25 = vpop.f32.mrb[24].mxu0  ;;  %v2804_v34 = vld [vmem:[%s20125_s0 + $0x380] sm:$0xff] }
 0xb79   :  { %13523 = vmatpush3.bf16.msra.mxu1 %v15427_v52  ;;  %12853 = vmatprep.mubr.msk.f32.mxu1 %vm349_vm3, %v15491_v4  ;;  %v2393_v15 = vpop.f32.mrb[25].mxu0  ;;  %v2405_v22 = vsel %vm349_vm3, %v12883_v25, -inf  ;;  %v2140_v52 = vmul.f32 %v14905_v23, %v14901_v63  ;;  %v15556_v4 = vpack.c.bf16 %v14779_v24, %v14778_v61  ;;  %v2756_v63 = vld [vmem:[%s20125_s0 + $0x200] sm:$0xff]  ;;  %v13566_v12 = vpack.c.bf16 %v2804_v34, %v2788_v55  ;;  %v2774_v55 = vld [vmem:[%s20125_s0 + $0x290] sm:$0xff]  ;;  %v2791_v34 = vld [vmem:[%s20125_s0 + $0x318] sm:$0xff] }
 0xb7a   :  { %13531 = vmatprep.subr.bf16.mxu1 %v13530_v13  ;;  %v2402_v18 = vsel %vm349_vm3, %v2393_v15, -inf  ;;  %v13562_v5 = vpack.c.bf16 %v2772_v16, %v2756_v63  ;;  %v2742_v63 = vld [vmem:[%s20125_s0 + $0x190] sm:$0xff]  ;;  %v2759_v16 = vld [vmem:[%s20125_s0 + $0x218] sm:$0xff] }
 0xb7b   :  { %2403 = vmax.xlane.f32.xlu0 %v2402_v18 }
 0xb7f   :  { %2406 = vmax.xlane.f32.xlu0 %v2405_v22 }
 0xb80   :  { %12854 = vmatmul.mubr.msk.f32.vlgmr.msra.gmra.mrb[20].mxu1 %vm349_vm3, %v15489_v3 }
 0xb81   :  { %13533 = vmatpush3.bf16.msra.mxu1 %v13530_v13  ;;  %12867 = vmatprep.mubr.msk.f32.mxu1 %vm349_vm3, %v2139_v36  ;;  %v2644_v36 = vmul.f32 0.015625, %v2634_v19 }
 0xb82   :  { %13535 = vmatprep.subr.bf16.mxu1 %v15351_v11 }
 0xb84   :  { %12868 = vmatmul.mubr.msk.f32.vlgmr.msra.gmra.mrb[22].mxu1 %vm349_vm3, %v2140_v52 }
 0xb85   :  { %13537 = vmatpush3.bf16.msra.mxu1 %v15351_v11  ;;  %v2595_v11 = vadd.f32 %v15487_v60, %v15249_v38  ;;  %v2693_v60 = vld [vmem:[%s20125_s0 + $0x8] sm:$0xff] }
 0xb86   :  { %13545 = vmatprep.subr.bf16.mxu1 %v15556_v4  ;;  %v13552_v48 = vpack.c.bf16 %v2709_v41, %v2693_v60 }
 0xb87   :  { %v15572_v39 = vadd.f32 %v15515_v14, %v2595_v11 }
 0xb88   :  { %13553 = vmatprep.subr.bf16.mxu0 %v13552_v48 }
 0xb89   :  { %v2614_v40 = vsel %vm231_vm2, %v15572_v39, 0.0  ;;  %v2629_v1 = vmul.f32 %v15572_v39, %v15572_v39  ;;  %13555 = vmatpush1.bf16.msra.mxu0 %v13554_v49 }
 0xb8a   :  { %13557 = vmatprep.subr.bf16.mxu0 %v13556_v56  ;;  %v2727_v56 = vld [vmem:[%s20125_s0 + $0x118] sm:$0xff] }
 0xb8b   :  { %v2635_v38 = vsel %vm231_vm2, %v2629_v1, 0.0  ;;  %v13572_v59 = vpack.c.bf16 %v2743_v21, %v2727_v56  ;;  %v2745_v56 = vld [vmem:[%s20125_s0 + $0x1a8] sm:$0xff]  ;;  %v2731_v21 = vld [vmem:[%s20125_s0 + $0x138] sm:$0xff] }
 0xb8d   :  { %13559 = vmatpush1.bf16.msra.mxu0 %v13558_v58  ;;  %v13570_v58 = vpack.c.bf16 %v2710_v54, %v2694_v53  ;;  %v2729_v54 = vld [vmem:[%s20125_s0 + $0x128] sm:$0xff] }
 0xb8e   :  { %13561 = vmatprep.subr.bf16.mxu0 %v13560_v42  ;;  %v2726_v42 = vld [vmem:[%s20125_s0 + $0x110] sm:$0xff] }
 0xb8f   :  { %v13574_v7 = vpack.c.bf16 %v2742_v63, %v2726_v42 }
 0xb91   :  { %13563 = vmatpush1.bf16.msra.mxu0 %v13562_v5  ;;  %v2775_v5 = vld [vmem:[%s20125_s0 + $0x298] sm:$0xff] }
 0xb92   :  { %13565 = vmatprep.subr.bf16.mxu0 %v13564_v10  ;;  %v13576_v8 = vpack.c.bf16 %v2775_v5, %v2759_v16  ;;  %v2758_v10 = vld [vmem:[%s20125_s0 + $0x210] sm:$0xff] }
 0xb93   :  { %v2730_v16 = vld [vmem:[%s20125_s0 + $0x130] sm:$0xff] }
 0xb94   :  { %v2746_v5 = vld [vmem:[%s20125_s0 + $0x1b0] sm:$0xff] }
 0xb95   :  { %13567 = vmatpush1.bf16.msra.mxu0 %v13566_v12  ;;  %v2807_v12 = vld [vmem:[%s20125_s0 + $0x398] sm:$0xff] }
 0xc08   :  { %v2404_v62 = vpop.xlane.xlu0 %2403 }
 0xc09   :  { %v2408_v26 = vsub.f32 %v2393_v15, %v2404_v62 }
 0xc0b   :  { %v2410_v28 = vmul.f32 1.442695, %v2408_v26 }
 0xc0c   :  { %v2407_v29 = vpop.xlane.xlu0 %2406 }
 0xc0d   :  { %14906 = vpow2.f32 %v2410_v28  ;;  %v2409_v3 = vsub.f32 %v12883_v25, %v2407_v29 }
 0xc0f   :  { %v2412_v30 = vmul.f32 1.442695, %v2409_v3 }
 0xc11   :  { %14908 = vpow2.f32 %v2412_v30 }
 0xc17   :  { %v15561_v31 = vpop.eup %14906 }
 0xc18   :  { %v2414_v32 = vsel %vm349_vm3, %v15561_v31, 0.0 }
 0xc19   :  { %2415 = vadd.xlane.f32.xlu0 %v2414_v32 }
 0xc1b   :  { %v15565_v35 = vpop.eup %14908 }
 0xc1c   :  { %v2417_v37 = vsel %vm349_vm3, %v15565_v35, 0.0 }
 0xc1d   :  { %2418 = vadd.xlane.f32.xlu0 %v2417_v37 }
 0xc21   :  { %2612 = vadd.xlane.f32.xlu0 %v2611_v17 }
 0xc25   :  { %2615 = vadd.xlane.f32.xlu0 %v2614_v40  ;;  %v15642_v40 = vld [vmem:[%s20126_s2] ss:$0 sm:$0xff] }
 0xc29   :  { %2636 = vadd.xlane.f32.xlu0 %v2635_v38 }
 0xc57   :  { %v12869_v13 = vpop.f32.mrb[22].mxu1 }
 0xc58   :  { %v2219_v25 = vpop.f32.mrb[23].mxu1 }
 0xc59   :  { %12874 = vmatprep.mubr.msk.f32.mxu1 %vm349_vm3, %v2219_v25  ;;  %v13580_v25 = vpack.c.bf16 %v2807_v12, %v2791_v34  ;;  %v2779_v12 = vld [vmem:[%s20125_s0 + $0x2b8] sm:$0xff] }
 0xc5a   :  { %12875 = vmatmul.mubr.msk.f32.vlgmr.msra.gmra.mrb[20].mxu1 %vm349_vm3, %v12869_v13  ;;  %v13578_v13 = vpack.c.bf16 %v2774_v55, %v2758_v10  ;;  %v2777_v10 = vld [vmem:[%s20125_s0 + $0x2a8] sm:$0xff]  ;;  %v2763_v55 = vld [vmem:[%s20125_s0 + $0x238] sm:$0xff] }
 0xc5b   :  { %13547 = vmatpush3.bf16.msra.mxu1 %v15556_v4 }
 0xc5c   :  { %13549 = vmatprep.subr.bf16.mxu1 %v15453_v9 }
 0xca6   :  { %v2416_v15 = vpop.xlane.xlu0 %2415 }
 0xca7   :  { %14910 = vrcp.f32 %v2416_v15  ;;  %v2790_v15 = vld [vmem:[%s20125_s0 + $0x310] sm:$0xff] }
 0xcaa   :  { %v2419_v18 = vpop.xlane.xlu0 %2418 }
 0xcab   :  { %14912 = vrcp.f32 %v2419_v18  ;;  %v2806_v18 = vld [vmem:[%s20125_s0 + $0x390] sm:$0xff] }
 0xcac   :  { %v13582_v19 = vpack.c.bf16 %v2806_v18, %v2790_v15  ;;  %v13608_v15 = vpack.c.bf16 %v2779_v12, %v2763_v55 }
 0xcae   :  { %v2613_v33 = vpop.xlane.xlu0 %2612 }
 0xcaf   :  { %v2624_v22 = vmul.f32 0.015625, %v2613_v33 }
 0xcb1   :  { %v14911_v23 = vpop.eup %14910  ;;  %v2648_v24 = vmul.f32 %v2624_v22, %v2624_v22 }
 0xcb2   :  { %v2616_v61 = vpop.xlane.xlu0 %2615  ;;  %v2422_v52 = vmul.f32 %v14911_v23, %v15561_v31  ;;  %v2656_v31 = vsub.f32 %v15518_v51, %v2624_v22 }
 0xcb3   :  { %v2652_v62 = vsub.f32 %v2644_v36, %v2648_v24  ;;  %v2625_v26 = vmul.f32 0.015625, %v2616_v61 }
 0xcb4   :  { %12888 = vmatprep.mubr.msk.f32.mxu1 %vm349_vm3, %v2422_v52 }
 0xcb5   :  { %v14913_v4 = vpop.eup %14912  ;;  %v2660_v28 = vadd.f32 1e-05, %v2652_v62  ;;  %v2649_v30 = vmul.f32 %v2625_v26, %v2625_v26  ;;  %v2657_v60 = vsub.f32 %v15572_v39, %v2625_v26  ;;  %v2695_v39 = vld [vmem:[%s20125_s0 + $0x18] sm:$0xff] }
 0xcb6   :  { %v2637_v29 = vpop.xlane.xlu0 %2636  ;;  %v2423_v3 = vmul.f32 %v14913_v4, %v15565_v35  ;;  %v15647_v35 = vld [vmem:[%s20127_s29] ss:$0 sm:$0xff]  ;;  %v13568_v49 = vpack.c.bf16 %v2711_v20, %v2695_v39  ;;  %v2698_v20 = vld [vmem:[%s20125_s0 + $0x30] sm:$0xff] }
 0xcb7   :  { %14914 = vrsqrt.f32 %v2660_v28  ;;  %v2645_v32 = vmul.f32 0.015625, %v2637_v29 }
 0xcb8   :  { %12889 = vmatmul.mubr.msk.f32.vlgmr.msra.gmra.mrb[24].mxu1 %vm349_vm3, %v2423_v3 }
 0xcb9   :  { %v2653_v11 = vsub.f32 %v2645_v32, %v2649_v30  ;;  %13551 = vmatpush3.bf16.msra.mxu1 %v15453_v9 }
 0xcba   :  { %13569 = vmatprep.subr.bf16.mxu1 %v13568_v49  ;;  %v2714_v49 = vld [vmem:[%s20125_s0 + $0xb0] sm:$0xff] }
 0xcbb   :  { %v2661_v37 = vadd.f32 1e-05, %v2653_v11  ;;  %v13602_v53 = vpack.c.bf16 %v2714_v49, %v2698_v20 }
 0xcbd   :  { %14916 = vrsqrt.f32 %v2661_v37 }
 0xcc1   :  { %v14915_v17 = vpop.eup %14914 }
 0xcc2   :  { %v2668_v1 = vmul.f32 %v14915_v17, %v2656_v31  ;;  %v2697_v31 = vld [vmem:[%s20125_s0 + $0x28] sm:$0xff] }
 0xcc3   :  { %v2713_v17 = vld [vmem:[%s20125_s0 + $0xa8] sm:$0xff] }
 0xcc4   :  { %v2678_v38 = vmul.f32 %v15642_v40, %v2668_v1  ;;  %v2699_v1 = vld [vmem:[%s20125_s0 + $0x38] sm:$0xff] }
 0xcc6   :  { %v15651_v9 = vadd.f32 %v15647_v35, %v2678_v38  ;;  %v13584_v38 = vpack.c.bf16 %v2713_v17, %v2697_v31  ;;  %v2794_v17 = vld [vmem:[%s20125_s0 + $0x330] sm:$0xff] }
 0xcc7   :  { %v14917_v51 = vpop.eup %14916 }
 0xcc8   :  { %v2669_v41 = vmul.f32 %v14917_v51, %v2657_v60  ;;  %10949 = vmatmul.mubr.msk.f32.vlgmr.msra.gmra.mrb[26].mxu0 %vm231_vm2, %v15651_v9  ;;  %v2715_v60 = vld [vmem:[%s20125_s0 + $0xb8] sm:$0xff]  ;;  %v2696_v51 = vld [vmem:[%s20125_s0 + $0x20] sm:$0xff]  ;;  %13585 = vmatprep.subr.bf16.mxu0 %v13584_v38 }
 0xcc9   :  { %2986 = vmatprep.mubr.f32.mxu0 %v15022_v27 }
 0xcca   :  { %v2679_v48 = vmul.f32 %v15642_v40, %v2669_v41  ;;  %v2712_v41 = vld [vmem:[%s20125_s0 + $0xa0] sm:$0xff] }
 0xccb   :  { %v13586_v39 = vpack.c.bf16 %v2712_v41, %v2696_v51  ;;  %v2717_v51 = vld [vmem:[%s20125_s0 + $0xc8] sm:$0xff]  ;;  %v2703_v41 = vld [vmem:[%s20125_s0 + $0x58] sm:$0xff] }
 0xccc   :  { %v15659_v2 = vadd.f32 %v15647_v35, %v2679_v48  ;;  %v13600_v48 = vpack.c.bf16 %v2715_v60, %v2699_v1  ;;  %v2810_v1 = vld [vmem:[%s20125_s0 + $0x3b0] sm:$0xff]  ;;  %v2701_v60 = vld [vmem:[%s20125_s0 + $0x48] sm:$0xff] }
 0xccd   :  { %13587 = vmatpush1.bf16.msra.mxu0 %v13586_v39  ;;  %v13614_v38 = vpack.c.bf16 %v2810_v1, %v2794_v17  ;;  %v2719_v39 = vld [vmem:[%s20125_s0 + $0xd8] sm:$0xff]  ;;  %v2765_v1 = vld [vmem:[%s20125_s0 + $0x248] sm:$0xff] }
 0xcce   :  { %10950 = vmatmul.mubr.msk.f32.gmra.mrb[28].mxu0 %vm231_vm2, %v15659_v2  ;;  %v13632_v20 = vpack.c.bf16 %v2719_v39, %v2703_v41  ;;  %v2764_v39 = vld [vmem:[%s20125_s0 + $0x240] sm:$0xff] }
 0xccf   :  { %2992 = vmatprep.mubr.f32.mxu0 %v15022_v27 }
 0xd8b   :  { %v12890_v57 = vpop.f32.mrb[24].mxu1 }
 0xd8c   :  { %v2502_v0 = vpop.f32.mrb[25].mxu1 }
 0xd8d   :  { %12895 = vmatprep.mubr.msk.f32.mxu1 %vm349_vm3, %v2502_v0  ;;  %v2728_v0 = vld [vmem:[%s20125_s0 + $0x120] sm:$0xff] }
 0xd8e   :  { %12896 = vmatmul.mubr.msk.f32.vlgmr.msra.gmra.mrb[20].mxu1 %vm349_vm3, %v12890_v57  ;;  %v13588_v57 = vpack.c.bf16 %v2745_v56, %v2729_v54 }
 0xd8f   :  { %13571 = vmatpush1.bf16.msra.mxu1 %v13570_v58  ;;  %3069 = vmatprep.mubr.f32.mxu1 %v15022_v27  ;;  %v2747_v58 = vld [vmem:[%s20125_s0 + $0x1b8] sm:$0xff] }
 0xd90   :  { %13573 = vmatprep.subr.bf16.mxu1 %v13572_v59  ;;  %v2744_v59 = vld [vmem:[%s20125_s0 + $0x1a0] sm:$0xff]  ;;  %v13604_v42 = vpack.c.bf16 %v2747_v58, %v2731_v21  ;;  %13589 = vmatprep.subr.bf16.mxu0 %v13588_v57 }
 0xd91   :  { %v13590_v63 = vpack.c.bf16 %v2744_v59, %v2728_v0 }
 0xd93   :  { %13575 = vmatpush1.bf16.msra.mxu1 %v13574_v7  ;;  %v13606_v7 = vpack.c.bf16 %v2746_v5, %v2730_v16  ;;  %13591 = vmatpush1.bf16.msra.mxu0 %v13590_v63 }
 0xd94   :  { %13577 = vmatprep.subr.bf16.mxu1 %v13576_v8  ;;  %v2761_v8 = vld [vmem:[%s20125_s0 + $0x228] sm:$0xff] }
 0xd95   :  { %v13592_v34 = vpack.c.bf16 %v2777_v10, %v2761_v8 }
 0xd97   :  { %13579 = vmatpush1.bf16.msra.mxu1 %v13578_v13  ;;  %v2760_v13 = vld [vmem:[%s20125_s0 + $0x220] sm:$0xff]  ;;  %13593 = vmatprep.subr.bf16.mxu0 %v13592_v34 }
 0xd98   :  { %13581 = vmatprep.subr.bf16.mxu1 %v13580_v25  ;;  %v2776_v25 = vld [vmem:[%s20125_s0 + $0x2a0] sm:$0xff] }
 0xd99   :  { %v13594_v18 = vpack.c.bf16 %v2776_v25, %v2760_v13 }
 0xd9b   :  { %13583 = vmatpush1.bf16.msra.mxu1 %v13582_v19  ;;  %v15715_v33 = vpop.f32.mrb[26].mxu0  ;;  %v2762_v19 = vld [vmem:[%s20125_s0 + $0x230] sm:$0xff]  ;;  %13595 = vmatpush1.bf16.msra.mxu0 %v13594_v18 }
 0xd9c   :  { %v15717_v22 = vpop.f32.mrb[27].mxu0  ;;  %13601 = vmatprep.subr.bf16.mxu1 %v13600_v48  ;;  %v13616_v48 = vpack.c.bf16 %v2717_v51, %v2701_v60  ;;  %v2767_v60 = vld [vmem:[%s20125_s0 + $0x258] sm:$0xff] }
 0xd9d   :  { %v2783_v51 = vld [vmem:[%s20125_s0 + $0x2d8] sm:$0xff] }
 0xd9e   :  { %10953 = vmatmul.mubr.msk.f32.vlgmr.msra.gmra.mrb[26].mxu1 %vm231_vm2, %v15651_v9 }
 0xd9f   :  { %3075 = vmatprep.mubr.f32.mxu1 %v15022_v27  ;;  %13603 = vmatpush1.bf16.msra.mxu1 %v13602_v53 }
 0xda0   :  { %13605 = vmatprep.subr.bf16.mxu1 %v13604_v42 }
 0xda1   :  { %v15722_v23 = vpop.f32.mrb[28].mxu0 }
 0xda2   :  { %10954 = vmatmul.mubr.msk.f32.gmra.mrb[28].mxu1 %vm231_vm2, %v15659_v2  ;;  %v15726_v36 = vpop.f32.mrb[29].mxu0 }
 0xda3   :  { %3081 = vmatprep.mubr.f32.mxu1 %v15022_v27  ;;  %13607 = vmatpush1.bf16.msra.mxu1 %v13606_v7 }
 0xda4   :  { %13609 = vmatprep.subr.bf16.mxu1 %v13608_v15 }
 0xe61   :  { %v12897_v24 = vpop.f32.mrb[20].mxu1 }
 0xe62   :  { %v2597_v61 = vadd.f32 %v12897_v24, %v15256_v44  ;;  %v2583_v52 = vpop.f32.mrb[21].mxu1  ;;  %v2778_v24 = vld [vmem:[%s20125_s0 + $0x2b0] sm:$0xff] }
 0xe63   :  { %v2596_v62 = vadd.f32 %v2583_v52, %v15254_v43  ;;  %v2793_v52 = vld [vmem:[%s20125_s0 + $0x328] sm:$0xff] }
 0xe64   :  { %v15732_v26 = vadd.f32 %v15515_v14, %v2597_v61  ;;  %v13610_v61 = vpack.c.bf16 %v2778_v24, %v2762_v19  ;;  %v2702_v19 = vld [vmem:[%s20125_s0 + $0x50] sm:$0xff] }
 0xe65   :  { %v15735_v4 = vadd.f32 %v15515_v14, %v2596_v62  ;;  %v2809_v62 = vld [vmem:[%s20125_s0 + $0x3a8] sm:$0xff]  ;;  %v2718_v24 = vld [vmem:[%s20125_s0 + $0xd0] sm:$0xff] }
 0xe66   :  { %v2620_v28 = vsel %vm231_vm2, %v15732_v26, 0.0  ;;  %v2631_v43 = vmul.f32 %v15732_v26, %v15732_v26  ;;  %13611 = vmatpush1.bf16.msra.mxu1 %v13610_v61  ;;  %v2733_v61 = vld [vmem:[%s20125_s0 + $0x148] sm:$0xff] }
 0xe67   :  { %2621 = vadd.xlane.f32.xlu0 %v2620_v28  ;;  %v2617_v29 = vsel %vm231_vm2, %v15735_v4, 0.0  ;;  %v2630_v3 = vmul.f32 %v15735_v4, %v15735_v4  ;;  %v2795_v28 = vld [vmem:[%s20125_s0 + $0x338] sm:$0xff] }
 0xe68   :  { %v2641_v32 = vsel %vm231_vm2, %v2631_v43, 0.0  ;;  %v2808_v43 = vld [vmem:[%s20125_s0 + $0x3a0] sm:$0xff] }
 0xe69   :  { %v2638_v44 = vsel %vm231_vm2, %v2630_v3, 0.0  ;;  %v2811_v3 = vld [vmem:[%s20125_s0 + $0x3b8] sm:$0xff] }
 0xe6b   :  { %2618 = vadd.xlane.f32.xlu0 %v2617_v29  ;;  %v13596_v29 = vpack.c.bf16 %v2809_v62, %v2793_v52  ;;  %v2735_v52 = vld [vmem:[%s20125_s0 + $0x158] sm:$0xff] }
 0xe6c   :  { %v2751_v62 = vld [vmem:[%s20125_s0 + $0x1d8] sm:$0xff] }
 0xe6d   :  { %13597 = vmatprep.subr.bf16.mxu0 %v13596_v29  ;;  %v13634_v29 = vpack.c.bf16 %v2718_v24, %v2702_v19  ;;  %v13636_v17 = vpack.c.bf16 %v2751_v62, %v2735_v52  ;;  %v2706_v19 = vld [vmem:[%s20125_s0 + $0x70] sm:$0xff]  ;;  %v2737_v52 = vld [vmem:[%s20125_s0 + $0x168] sm:$0xff] }
 0xe6e   :  { %v2722_v24 = vld [vmem:[%s20125_s0 + $0xf0] sm:$0xff]  ;;  %v2753_v62 = vld [vmem:[%s20125_s0 + $0x1e8] sm:$0xff] }
 0xe6f   :  { %2639 = vadd.xlane.f32.xlu0 %v2638_v44  ;;  %v2792_v44 = vld [vmem:[%s20125_s0 + $0x320] sm:$0xff] }
 0xe70   :  { %v13598_v31 = vpack.c.bf16 %v2808_v43, %v2792_v44  ;;  %v2748_v44 = vld [vmem:[%s20125_s0 + $0x1c0] sm:$0xff]  ;;  %v2734_v43 = vld [vmem:[%s20125_s0 + $0x150] sm:$0xff] }
 0xe71   :  { %v15746_v30 = vpop.f32.mrb[26].mxu1 }
 0xe72   :  { %v15748_v14 = vpop.f32.mrb[27].mxu1  ;;  %13599 = vmatpush1.bf16.msra.mxu0 %v13598_v31 }
 0xe73   :  { %2642 = vadd.xlane.f32.xlu0 %v2641_v32  ;;  %v13612_v32 = vpack.c.bf16 %v2811_v3, %v2795_v28  ;;  %13617 = vmatprep.subr.bf16.mxu0 %v13616_v48  ;;  %v2732_v3 = vld [vmem:[%s20125_s0 + $0x140] sm:$0xff] }
 0xe74   :  { %v13622_v41 = vpack.c.bf16 %v2748_v44, %v2732_v3  ;;  %v13666_v44 = vpack.c.bf16 %v2722_v24, %v2706_v19  ;;  %v3692_v19 = vld [vmem:[%s20055_s12] sm:$0xff]  ;;  %v3693_v24 = vld [vmem:[%s20055_s12 + $0x8] sm:$0xff] }
 0xe75   :  { %v15751_v11 = vpop.f32.mrb[28].mxu1  ;;  %13613 = vmatprep.subr.bf16.mxu1 %v13612_v32  ;;  %v2750_v32 = vld [vmem:[%s20125_s0 + $0x1d0] sm:$0xff] }
 0xe76   :  { %v15753_v37 = vpop.f32.mrb[29].mxu1  ;;  %13615 = vmatpush1.bf16.msra.mxu1 %v13614_v38  ;;  %v2781_v38 = vld [vmem:[%s20125_s0 + $0x2c8] sm:$0xff]  ;;  %v13638_v48 = vpack.c.bf16 %v2750_v32, %v2734_v43  ;;  %v2736_v43 = vld [vmem:[%s20125_s0 + $0x160] sm:$0xff] }
 0xe77   :  { %13633 = vmatprep.subr.bf16.mxu1 %v13632_v20  ;;  %v2780_v20 = vld [vmem:[%s20125_s0 + $0x2c0] sm:$0xff] }
 0xe78   :  { %v2752_v32 = vld [vmem:[%s20125_s0 + $0x1e0] sm:$0xff] }
 0xef4   :  { %v2622_v49 = vpop.xlane.xlu0 %2621 }
 0xef5   :  { %v2627_v21 = vmul.f32 0.015625, %v2622_v49  ;;  %v2766_v49 = vld [vmem:[%s20125_s0 + $0x250] sm:$0xff] }
 0xef7   :  { %v2651_v42 = vmul.f32 %v2627_v21, %v2627_v21  ;;  %v2659_v34 = vsub.f32 %v15732_v26, %v2627_v21  ;;  %v2700_v26 = vld [vmem:[%s20125_s0 + $0x40] sm:$0xff]  ;;  %v2797_v21 = vld [vmem:[%s20125_s0 + $0x348] sm:$0xff] }
 0xef8   :  { %v2619_v53 = vpop.xlane.xlu0 %2618 }
 0xef9   :  { %v2626_v54 = vmul.f32 0.015625, %v2619_v53  ;;  %v2782_v53 = vld [vmem:[%s20125_s0 + $0x2d0] sm:$0xff] }
 0xefb   :  { %v2650_v57 = vmul.f32 %v2626_v54, %v2626_v54  ;;  %v2658_v8 = vsub.f32 %v15735_v4, %v2626_v54  ;;  %v13624_v54 = vpack.c.bf16 %v2781_v38, %v2765_v1  ;;  %v13652_v1 = vpack.c.bf16 %v2753_v62, %v2737_v52 }
 0xefc   :  { %v2640_v56 = vpop.xlane.xlu0 %2639 }
 0xefd   :  { %v2646_v58 = vmul.f32 0.015625, %v2640_v56  ;;  %v13640_v56 = vpack.c.bf16 %v2783_v51, %v2767_v60  ;;  %v2769_v60 = vld [vmem:[%s20125_s0 + $0x268] sm:$0xff] }
 0xefe   :  { %v2785_v51 = vld [vmem:[%s20125_s0 + $0x2e8] sm:$0xff] }
 0xeff   :  { %v2654_v0 = vsub.f32 %v2646_v58, %v2650_v57  ;;  %v2813_v57 = vld [vmem:[%s20125_s0 + $0x3c8] sm:$0xff]  ;;  %v2799_v58 = vld [vmem:[%s20125_s0 + $0x358] sm:$0xff] }
 0xf00   :  { %v2643_v59 = vpop.xlane.xlu0 %2642 }
 0xf01   :  { %v2662_v63 = vadd.f32 1e-05, %v2654_v0  ;;  %v2647_v16 = vmul.f32 0.015625, %v2643_v59  ;;  %v2815_v0 = vld [vmem:[%s20125_s0 + $0x3d8] sm:$0xff]  ;;  %v13626_v59 = vpack.c.bf16 %v2780_v20, %v2764_v39  ;;  %v13654_v39 = vpack.c.bf16 %v2752_v32, %v2736_v43 }
 0xf02   :  { %v13682_v43 = vpack.c.bf16 %v3693_v24, %v3692_v19  ;;  %v3716_v19 = vld [vmem:[%s20055_s12 + $0xc0] sm:$0xff] }
 0xf03   :  { %14918 = vrsqrt.f32 %v2662_v63  ;;  %v2655_v5 = vsub.f32 %v2647_v16, %v2651_v42  ;;  %v13642_v42 = vpack.c.bf16 %v2782_v53, %v2766_v49  ;;  %v2796_v63 = vld [vmem:[%s20125_s0 + $0x340] sm:$0xff] }
 0xf04   :  { %v2812_v16 = vld [vmem:[%s20125_s0 + $0x3c0] sm:$0xff] }
 0xf05   :  { %v2663_v7 = vadd.f32 1e-05, %v2655_v5  ;;  %v2798_v5 = vld [vmem:[%s20125_s0 + $0x350] sm:$0xff]  ;;  %v2768_v49 = vld [vmem:[%s20125_s0 + $0x260] sm:$0xff] }
 0xf06   :  { %v2784_v53 = vld [vmem:[%s20125_s0 + $0x2e0] sm:$0xff] }
 0xf07   :  { %14920 = vrsqrt.f32 %v2663_v7  ;;  %v2814_v7 = vld [vmem:[%s20125_s0 + $0x3d0] sm:$0xff] }
 0xf0d   :  { %v14919_v10 = vpop.eup %14918 }
 0xf0e   :  { %v2670_v55 = vmul.f32 %v14919_v10, %v2658_v8  ;;  %v13628_v8 = vpack.c.bf16 %v2813_v57, %v2797_v21  ;;  %v13644_v10 = vpack.c.bf16 %v2815_v0, %v2799_v58  ;;  %v13656_v21 = vpack.c.bf16 %v2785_v51, %v2769_v60  ;;  %v2801_v58 = vld [vmem:[%s20125_s0 + $0x368] sm:$0xff] }
 0xf0f   :  { %v2817_v0 = vld [vmem:[%s20125_s0 + $0x3e8] sm:$0xff] }
 0xf10   :  { %v2680_v12 = vmul.f32 %v15642_v40, %v2670_v55  ;;  %v2705_v55 = vld [vmem:[%s20125_s0 + $0x68] sm:$0xff] }
 0xf11   :  { %v14921_v13 = vpop.eup %14920 }
 0xf12   :  { %v15867_v25 = vadd.f32 %v15647_v35, %v2680_v12  ;;  %v2671_v15 = vmul.f32 %v14921_v13, %v2659_v34  ;;  %v2721_v34 = vld [vmem:[%s20125_s0 + $0xe8] sm:$0xff]  ;;  %v2707_v12 = vld [vmem:[%s20125_s0 + $0x78] sm:$0xff] }
 0xf13   :  { %v2723_v13 = vld [vmem:[%s20125_s0 + $0xf8] sm:$0xff] }
 0xf14   :  { %v2681_v18 = vmul.f32 %v15642_v40, %v2671_v15  ;;  %10951 = vmatmul.mubr.msk.f32.gmra.mrb[30].mxu0 %vm231_vm2, %v15867_v25  ;;  %10955 = vmatmul.mubr.msk.f32.gmra.mrb[30].mxu1 %vm231_vm2, %v15867_v25  ;;  %v2716_v40 = vld [vmem:[%s20125_s0 + $0xc0] sm:$0xff]  ;;  %v13630_v15 = vpack.c.bf16 %v2812_v16, %v2796_v63  ;;  %v13658_v63 = vpack.c.bf16 %v2784_v53, %v2768_v49  ;;  %v3745_v49 = vld [vmem:[%s20055_s12 + $0x1a8] sm:$0xff] }
 0xf15   :  { %2998 = vmatprep.mubr.f32.mxu0 %v15022_v27  ;;  %3087 = vmatprep.mubr.f32.mxu1 %v15022_v27  ;;  %v13618_v28 = vpack.c.bf16 %v2716_v40, %v2700_v26  ;;  %v2704_v26 = vld [vmem:[%s20125_s0 + $0x60] sm:$0xff] }
 0xf16   :  { %v15880_v4 = vadd.f32 %v15647_v35, %v2681_v18  ;;  %v2749_v35 = vld [vmem:[%s20125_s0 + $0x1c8] sm:$0xff]  ;;  %v13646_v18 = vpack.c.bf16 %v2814_v7, %v2798_v5  ;;  %v2720_v40 = vld [vmem:[%s20125_s0 + $0xe0] sm:$0xff] }
 0xf17   :  { %v13620_v31 = vpack.c.bf16 %v2749_v35, %v2733_v61  ;;  %v13648_v61 = vpack.c.bf16 %v2721_v34, %v2705_v55  ;;  %v13664_v35 = vpack.c.bf16 %v2723_v13, %v2707_v12  ;;  %v13650_v3 = vpack.c.bf16 %v2720_v40, %v2704_v26  ;;  %v2800_v5 = vld [vmem:[%s20125_s0 + $0x360] sm:$0xff]  ;;  %v3709_v13 = vld [vmem:[%s20055_s12 + $0x88] sm:$0xff] }
 0xf18   :  { %10952 = vmatmul.mubr.msk.f32.gmra.mrb[32].mxu0 %vm231_vm2, %v15880_v4  ;;  %10956 = vmatmul.mubr.msk.f32.gmra.mrb[32].mxu1 %vm231_vm2, %v15880_v4  ;;  %v2816_v7 = vld [vmem:[%s20125_s0 + $0x3e0] sm:$0xff]  ;;  %v13660_v55 = vpack.c.bf16 %v2817_v0, %v2801_v58  ;;  %v3729_v0 = vld [vmem:[%s20055_s12 + $0x128] sm:$0xff] }
 0xf19   :  { %3158 = vmatprep.mubr.f32.mxu0 %v15022_v27  ;;  %3247 = vmatprep.mubr.f32.mxu1 %v15022_v27  ;;  %v3708_v12 = vld [vmem:[%s20055_s12 + $0x80] sm:$0xff]  ;;  %v13662_v26 = vpack.c.bf16 %v2816_v7, %v2800_v5  ;;  %v3715_v7 = vld [vmem:[%s20055_s12 + $0xb8] sm:$0xff] }
 0xf1a   :  { %v13680_v52 = vpack.c.bf16 %v3709_v13, %v3708_v12  ;;  %v16183_v53 = vld [vmem:[%s20056_s11] sm:$0xff]  ;;  %v3698_v12 = vld [vmem:[%s20055_s12 + $0x30] sm:$0xff]  ;;  %v3699_v13 = vld [vmem:[%s20055_s12 + $0x38] sm:$0xff] }
 0xf1b   :  { %v3728_v58 = vld [vmem:[%s20055_s12 + $0x120] sm:$0xff] }
 0xf1c   :  { %10957 = vmatmul.mubr.msk.f32.vlgmr.msra.gmra.mrb[34].mxu0 %vm231_vm2, %v15651_v9  ;;  %10961 = vmatmul.mubr.msk.f32.vlgmr.msra.gmra.mrb[34].mxu1 %vm231_vm2, %v15651_v9 }
 0xf1d   :  { %13619 = vmatpush1.bf16.msra.mxu0 %v13618_v28  ;;  %13635 = vmatpush1.bf16.msra.mxu1 %v13634_v29  ;;  %v2739_v28 = vld [vmem:[%s20125_s0 + $0x178] sm:$0xff] }
 0xf1e   :  { %3164 = vmatprep.mubr.f32.mxu0 %v15022_v27  ;;  %3253 = vmatprep.mubr.f32.mxu1 %v15022_v27  ;;  %v2755_v29 = vld [vmem:[%s20125_s0 + $0x1f8] sm:$0xff] }
 0xf1f   :  { %13621 = vmatprep.subr.bf16.mxu0 %v13620_v31  ;;  %13637 = vmatprep.subr.bf16.mxu1 %v13636_v17  ;;  %v2738_v31 = vld [vmem:[%s20125_s0 + $0x170] sm:$0xff]  ;;  %v13668_v38 = vpack.c.bf16 %v2755_v29, %v2739_v28  ;;  %v3711_v29 = vld [vmem:[%s20055_s12 + $0x98] sm:$0xff] }
 0xf20   :  { %10958 = vmatmul.mubr.msk.f32.gmra.mrb[36].mxu0 %vm231_vm2, %v15659_v2  ;;  %10962 = vmatmul.mubr.msk.f32.gmra.mrb[36].mxu1 %vm231_vm2, %v15659_v2  ;;  %v2754_v17 = vld [vmem:[%s20125_s0 + $0x1f0] sm:$0xff] }
 0xf21   :  { %13623 = vmatpush1.bf16.msra.mxu0 %v13622_v41  ;;  %13639 = vmatpush1.bf16.msra.mxu1 %v13638_v48  ;;  %v2771_v41 = vld [vmem:[%s20125_s0 + $0x278] sm:$0xff]  ;;  %v13670_v20 = vpack.c.bf16 %v2754_v17, %v2738_v31  ;;  %v3710_v28 = vld [vmem:[%s20055_s12 + $0x90] sm:$0xff] }
 0xf22   :  { %3170 = vmatprep.mubr.f32.mxu0 %v15022_v27  ;;  %3259 = vmatprep.mubr.f32.mxu1 %v15022_v27  ;;  %v2787_v48 = vld [vmem:[%s20125_s0 + $0x2f8] sm:$0xff]  ;;  %v3694_v31 = vld [vmem:[%s20055_s12 + $0x10] sm:$0xff]  ;;  %v13684_v60 = vpack.c.bf16 %v3711_v29, %v3710_v28  ;;  %v3700_v28 = vld [vmem:[%s20055_s12 + $0x40] sm:$0xff] }
 0xf23   :  { %13625 = vmatprep.subr.bf16.mxu0 %v13624_v54  ;;  %13641 = vmatprep.subr.bf16.mxu1 %v13640_v56  ;;  %v2770_v54 = vld [vmem:[%s20125_s0 + $0x270] sm:$0xff]  ;;  %v13672_v57 = vpack.c.bf16 %v2787_v48, %v2771_v41  ;;  %v3695_v17 = vld [vmem:[%s20055_s12 + $0x18] sm:$0xff]  ;;  %v3712_v41 = vld [vmem:[%s20055_s12 + $0xa0] sm:$0xff]  ;;  %v16165_v48 = vsub.s32 3, %v15264_v46 }
 0xf24   :  { %10959 = vmatmul.mubr.msk.f32.gmra.mrb[38].mxu0 %vm231_vm2, %v15867_v25  ;;  %10963 = vmatmul.mubr.msk.f32.gmra.mrb[38].mxu1 %vm231_vm2, %v15867_v25  ;;  %v2786_v56 = vld [vmem:[%s20125_s0 + $0x2f0] sm:$0xff]  ;;  %v3701_v29 = vld [vmem:[%s20055_s12 + $0x48] sm:$0xff] }
 0xf25   :  { %13627 = vmatpush1.bf16.msra.mxu0 %v13626_v59  ;;  %13643 = vmatpush1.bf16.msra.mxu1 %v13642_v42  ;;  %v2803_v59 = vld [vmem:[%s20125_s0 + $0x378] sm:$0xff]  ;;  %v13674_v16 = vpack.c.bf16 %v2786_v56, %v2770_v54  ;;  %v13686_v54 = vpack.c.bf16 %v3695_v17, %v3694_v31  ;;  %v16208_v5 = vrot.slane %v16183_v53, %v16165_v48 }
 0xf26   :  { %3176 = vmatprep.mubr.f32.mxu0 %v15022_v27  ;;  %3265 = vmatprep.mubr.f32.mxu1 %v15022_v27  ;;  %v2819_v42 = vld [vmem:[%s20125_s0 + $0x3f8] sm:$0xff] }
 0xf27   :  { %13629 = vmatprep.subr.bf16.mxu0 %v13628_v8  ;;  %13645 = vmatprep.subr.bf16.mxu1 %v13644_v10  ;;  %v2802_v8 = vld [vmem:[%s20125_s0 + $0x370] sm:$0xff]  ;;  %v13676_v34 = vpack.c.bf16 %v2819_v42, %v2803_v59  ;;  %v3719_v17 = vld [vmem:[%s20055_s12 + $0xd8] sm:$0xff] }
 0xf28   :  { %10960 = vmatmul.mubr.msk.f32.gmra.mrb[40].mxu0 %vm231_vm2, %v15880_v4  ;;  %10964 = vmatmul.mubr.msk.f32.gmra.mrb[40].mxu1 %vm231_vm2, %v15880_v4  ;;  %v2818_v10 = vld [vmem:[%s20125_s0 + $0x3f0] sm:$0xff] }
 0xf29   :  { %13631 = vmatpush1.bf16.msra.mxu0 %v13630_v15  ;;  %13647 = vmatpush1.bf16.msra.mxu1 %v13646_v18  ;;  %v3740_v15 = vld [vmem:[%s20055_s12 + $0x180] sm:$0xff]  ;;  %v3741_v18 = vld [vmem:[%s20055_s12 + $0x188] sm:$0xff]  ;;  %v13678_v40 = vpack.c.bf16 %v2818_v10, %v2802_v8  ;;  %v3746_v8 = vld [vmem:[%s20055_s12 + $0x1b0] sm:$0xff] }
 0xf2a   :  { %3336 = vmatprep.mubr.f32.mxu0 %v15022_v27  ;;  %3425 = vmatprep.mubr.f32.mxu1 %v15022_v27  ;;  %v13712_v62 = vpack.c.bf16 %v3741_v18, %v3740_v15  ;;  %v3747_v10 = vld [vmem:[%s20055_s12 + $0x1b8] sm:$0xff]  ;;  %v3730_v15 = vld [vmem:[%s20055_s12 + $0x130] sm:$0xff] }
 0xf2b   :  { %13649 = vmatprep.subr.bf16.mxu0 %v13648_v61  ;;  %13665 = vmatprep.subr.bf16.mxu1 %v13664_v35  ;;  %v3724_v61 = vld [vmem:[%s20055_s12 + $0x100] sm:$0xff]  ;;  %v3725_v35 = vld [vmem:[%s20055_s12 + $0x108] sm:$0xff]  ;;  %v3731_v18 = vld [vmem:[%s20055_s12 + $0x138] sm:$0xff] }
 0xf2c   :  { %10965 = vmatmul.mubr.msk.f32.vlgmr.msra.gmra.mrb[42].mxu0 %vm231_vm2, %v15651_v9  ;;  %10969 = vmatmul.mubr.msk.f32.vlgmr.msra.gmra.mrb[42].mxu1 %vm231_vm2, %v15651_v9  ;;  %v13714_v32 = vpack.c.bf16 %v3725_v35, %v3724_v61  ;;  %v3074_v61 = vadd.f32 %v15748_v14, %v16208_v5  ;;  %v3717_v35 = vld [vmem:[%s20055_s12 + $0xc8] sm:$0xff]  ;;  %v13694_v14 = vpack.c.bf16 %v3699_v13, %v3698_v12  ;;  %v3736_v13 = vld [vmem:[%s20055_s12 + $0x160] sm:$0xff] }
 0xf2d   :  { %13651 = vmatpush1.bf16.msra.mxu0 %v13650_v3  ;;  %13667 = vmatpush1.bf16.msra.mxu1 %v13666_v44  ;;  %v3742_v3 = vld [vmem:[%s20055_s12 + $0x190] sm:$0xff]  ;;  %v3743_v44 = vld [vmem:[%s20055_s12 + $0x198] sm:$0xff] }
 0xf2e   :  { %3342 = vmatprep.mubr.f32.mxu0 %v15022_v27  ;;  %3431 = vmatprep.mubr.f32.mxu1 %v15022_v27  ;;  %v13716_v51 = vpack.c.bf16 %v3743_v44, %v3742_v3  ;;  %v3732_v3 = vld [vmem:[%s20055_s12 + $0x140] sm:$0xff]  ;;  %v3733_v44 = vld [vmem:[%s20055_s12 + $0x148] sm:$0xff] }
 0xf2f   :  { %13653 = vmatprep.subr.bf16.mxu0 %v13652_v1  ;;  %13669 = vmatprep.subr.bf16.mxu1 %v13668_v38  ;;  %v3726_v1 = vld [vmem:[%s20055_s12 + $0x110] sm:$0xff]  ;;  %v3727_v38 = vld [vmem:[%s20055_s12 + $0x118] sm:$0xff] }
 0xf30   :  { %10966 = vmatmul.mubr.msk.f32.gmra.mrb[44].mxu0 %vm231_vm2, %v15659_v2  ;;  %10970 = vmatmul.mubr.msk.f32.gmra.mrb[44].mxu1 %vm231_vm2, %v15659_v2  ;;  %v13718_v56 = vpack.c.bf16 %v3727_v38, %v3726_v1  ;;  %v3750_v1 = vld [vmem:[%s20055_s12 + $0x1d0] sm:$0xff]  ;;  %v3751_v38 = vld [vmem:[%s20055_s12 + $0x1d8] sm:$0xff] }
 0xf31   :  { %13655 = vmatpush1.bf16.msra.mxu0 %v13654_v39  ;;  %13671 = vmatpush1.bf16.msra.mxu1 %v13670_v20  ;;  %v3713_v39 = vld [vmem:[%s20055_s12 + $0xa8] sm:$0xff]  ;;  %v3744_v20 = vld [vmem:[%s20055_s12 + $0x1a0] sm:$0xff] }
 0xf32   :  { %3348 = vmatprep.mubr.f32.mxu0 %v15022_v27  ;;  %3437 = vmatprep.mubr.f32.mxu1 %v15022_v27  ;;  %v13688_v59 = vpack.c.bf16 %v3713_v39, %v3712_v41  ;;  %v13720_v42 = vpack.c.bf16 %v3745_v49, %v3744_v20  ;;  %v13698_v41 = vpack.c.bf16 %v3701_v29, %v3700_v28  ;;  %v3702_v20 = vld [vmem:[%s20055_s12 + $0x50] sm:$0xff]  ;;  %v3703_v49 = vld [vmem:[%s20055_s12 + $0x58] sm:$0xff] }
 0xf33   :  { %13657 = vmatprep.subr.bf16.mxu0 %v13656_v21  ;;  %13673 = vmatprep.subr.bf16.mxu1 %v13672_v57  ;;  %v3696_v21 = vld [vmem:[%s20055_s12 + $0x20] sm:$0xff]  ;;  %v3697_v57 = vld [vmem:[%s20055_s12 + $0x28] sm:$0xff]  ;;  %v13730_v39 = vpack.c.bf16 %v3733_v44, %v3732_v3  ;;  %v3738_v29 = vld [vmem:[%s20055_s12 + $0x170] sm:$0xff] }
 0xf34   :  { %10967 = vmatmul.mubr.msk.f32.gmra.mrb[46].mxu0 %vm231_vm2, %v15867_v25  ;;  %10971 = vmatmul.mubr.msk.f32.gmra.mrb[46].mxu1 %vm231_vm2, %v15867_v25  ;;  %v3739_v3 = vld [vmem:[%s20055_s12 + $0x178] sm:$0xff]  ;;  %v3772_v44 = vld [vmem:[%s20055_s12 + $0x280] sm:$0xff] }
 0xf35   :  { %13659 = vmatpush1.bf16.msra.mxu0 %v13658_v63  ;;  %13675 = vmatpush1.bf16.msra.mxu1 %v13674_v16  ;;  %v3714_v63 = vld [vmem:[%s20055_s12 + $0xb0] sm:$0xff]  ;;  %v16204_v16 = vrot.slane %v16183_v53, %v15274_v50 }
 0xf36   :  { %3354 = vmatprep.mubr.f32.mxu0 %v15022_v27  ;;  %3443 = vmatprep.mubr.f32.mxu1 %v15022_v27 }
 0xf37   :  { %13661 = vmatprep.subr.bf16.mxu0 %v13660_v55  ;;  %13677 = vmatprep.subr.bf16.mxu1 %v13676_v34  ;;  %v13690_v55 = vpack.c.bf16 %v3697_v57, %v3696_v21  ;;  %v13722_v34 = vpack.c.bf16 %v3729_v0, %v3728_v58  ;;  %v2985_v24 = vadd.f32 %v15717_v22, %v16204_v16  ;;  %v3749_v22 = vld [vmem:[%s20055_s12 + $0x1c8] sm:$0xff]  ;;  %v3734_v21 = vld [vmem:[%s20055_s12 + $0x150] sm:$0xff]  ;;  %v3735_v57 = vld [vmem:[%s20055_s12 + $0x158] sm:$0xff] }
 0xf38   :  { %10968 = vmatmul.mubr.msk.f32.gmra.mrb[48].mxu0 %vm231_vm2, %v15880_v4  ;;  %10972 = vmatmul.mubr.msk.f32.gmra.mrb[48].mxu1 %vm231_vm2, %v15880_v4  ;;  %v3720_v58 = vld [vmem:[%s20055_s12 + $0xe0] sm:$0xff]  ;;  %v3721_v0 = vld [vmem:[%s20055_s12 + $0xe8] sm:$0xff] }
 0xf39   :  { %13663 = vmatpush1.bf16.msra.mxu0 %v13662_v26  ;;  %13679 = vmatpush1.bf16.msra.mxu1 %v13678_v40  ;;  %v13692_v26 = vpack.c.bf16 %v3715_v7, %v3714_v63  ;;  %v13724_v40 = vpack.c.bf16 %v3747_v10, %v3746_v8  ;;  %v13702_v63 = vpack.c.bf16 %v3703_v49, %v3702_v20  ;;  %v3704_v8 = vld [vmem:[%s20055_s12 + $0x60] sm:$0xff]  ;;  %v3705_v10 = vld [vmem:[%s20055_s12 + $0x68] sm:$0xff] }
 0xf3a   :  { %3514 = vmatprep.mubr.f32.mxu0 %v15022_v27  ;;  %3603 = vmatprep.mubr.f32.mxu1 %v15022_v27  ;;  %v13734_v7 = vpack.c.bf16 %v3735_v57, %v3734_v21  ;;  %v3757_v20 = vld [vmem:[%s20055_s12 + $0x208] sm:$0xff]  ;;  %v3080_v49 = vadd.f32 %v15753_v37, %v16208_v5  ;;  %v3775_v21 = vld [vmem:[%s20055_s12 + $0x298] sm:$0xff] }
 0xf3b   :  { %13681 = vmatprep.subr.bf16.mxu0 %v13680_v52  ;;  %13713 = vmatprep.subr.bf16.mxu1 %v13712_v62  ;;  %v3748_v52 = vld [vmem:[%s20055_s12 + $0x1c0] sm:$0xff]  ;;  %v13726_v62 = vpack.c.bf16 %v3731_v18, %v3730_v15  ;;  %v3737_v15 = vld [vmem:[%s20055_s12 + $0x168] sm:$0xff]  ;;  %v3722_v18 = vld [vmem:[%s20055_s12 + $0xf0] sm:$0xff] }
 0xf3c   :  { %10973 = vmatmul.mubr.msk.f32.vlgmr.msra.gmra.mrb[50].mxu0 %vm231_vm2, %v15651_v9  ;;  %10977 = vmatmul.mubr.msk.f32.vlgmr.msra.gmra.mrb[50].mxu1 %vm231_vm2, %v15651_v9  ;;  %v13728_v31 = vpack.c.bf16 %v3749_v22, %v3748_v52  ;;  %v3706_v52 = vld [vmem:[%s20055_s12 + $0x70] sm:$0xff]  ;;  %v3707_v22 = vld [vmem:[%s20055_s12 + $0x78] sm:$0xff] }
 0xf3d   :  { %13683 = vmatpush3.bf16.msra.mxu0 %v13682_v43  ;;  %13715 = vmatpush3.bf16.msra.mxu1 %v13714_v32  ;;  %v3718_v43 = vld [vmem:[%s20055_s12 + $0xd0] sm:$0xff]  ;;  %v13696_v32 = vpack.c.bf16 %v3717_v35, %v3716_v19  ;;  %v3755_v19 = vld [vmem:[%s20055_s12 + $0x1f8] sm:$0xff]  ;;  %v13738_v35 = vpack.c.bf16 %v3737_v15, %v3736_v13  ;;  %v3776_v15 = vld [vmem:[%s20055_s12 + $0x2a0] sm:$0xff] }
 0xf3e   :  { %3520 = vmatprep.mubr.f32.mxu0 %v15022_v27  ;;  %3609 = vmatprep.mubr.f32.mxu1 %v15022_v27  ;;  %v3807_v37 = vld [vmem:[%s20055_s12 + $0x398] sm:$0xff] }
 0xf3f   :  { %13685 = vmatprep.subr.bf16.mxu0 %v13684_v60  ;;  %13717 = vmatprep.subr.bf16.mxu1 %v13716_v51  ;;  %v3629_v60 = vmax.f32 %v2985_v24, 0.0  ;;  %v3631_v51 = vmax.f32 %v3074_v61, 0.0  ;;  %v16340_v24 = vrot.slane %v16183_v53, %v15267_v47  ;;  %v13706_v61 = vpack.c.bf16 %v3705_v10, %v3704_v8  ;;  %v3759_v8 = vld [vmem:[%s20055_s12 + $0x218] sm:$0xff] }
 0xf40   :  { %10974 = vmatmul.mubr.msk.f32.gmra.mrb[52].mxu0 %vm231_vm2, %v15659_v2  ;;  %10978 = vmatmul.mubr.msk.f32.gmra.mrb[52].mxu1 %vm231_vm2, %v15659_v2  ;;  %v3791_v13 = vld [vmem:[%s20055_s12 + $0x318] sm:$0xff] }
 0xf41   :  { %13687 = vmatpush3.bf16.msra.mxu0 %v13686_v54  ;;  %13719 = vmatpush3.bf16.msra.mxu1 %v13718_v56  ;;  %v13700_v54 = vpack.c.bf16 %v3719_v17, %v3718_v43  ;;  %v13732_v56 = vpack.c.bf16 %v3751_v38, %v3750_v1  ;;  %v3773_v43 = vld [vmem:[%s20055_s12 + $0x288] sm:$0xff]  ;;  %v2983_v17 = vadd.f32 %v15715_v33, %v16340_v24 }
 0xf42   :  { %3526 = vmatprep.mubr.f32.mxu0 %v15022_v27  ;;  %3615 = vmatprep.mubr.f32.mxu1 %v15022_v27  ;;  %v13710_v1 = vpack.c.bf16 %v3707_v22, %v3706_v52  ;;  %v13742_v38 = vpack.c.bf16 %v3739_v3, %v3738_v29  ;;  %v2991_v33 = vadd.f32 %v15726_v36, %v16204_v16  ;;  %v3806_v36 = vld [vmem:[%s20055_s12 + $0x390] sm:$0xff]  ;;  %v3760_v22 = vld [vmem:[%s20055_s12 + $0x220] sm:$0xff] }
 0xf43   :  { %13689 = vmatprep.subr.bf16.mxu0 %v13688_v59  ;;  %13721 = vmatprep.subr.bf16.mxu1 %v13720_v42  ;;  %v3752_v59 = vld [vmem:[%s20055_s12 + $0x1e0] sm:$0xff]  ;;  %v3753_v42 = vld [vmem:[%s20055_s12 + $0x1e8] sm:$0xff]  ;;  %v3628_v57 = vmax.f32 %v2983_v17, 0.0  ;;  %v3811_v17 = vld [vmem:[%s20055_s12 + $0x3b8] sm:$0xff] }
 0xf44   :  { %10975 = vmatmul.mubr.msk.f32.gmra.mrb[54].mxu0 %vm231_vm2, %v15867_v25  ;;  %10979 = vmatmul.mubr.msk.f32.gmra.mrb[54].mxu1 %vm231_vm2, %v15867_v25  ;;  %v13736_v12 = vpack.c.bf16 %v3753_v42, %v3752_v59  ;;  %v3645_v10 = vmax.f32 %v2991_v33, 0.0  ;;  %v3792_v3 = vld [vmem:[%s20055_s12 + $0x320] sm:$0xff]  ;;  %v3795_v33 = vld [vmem:[%s20055_s12 + $0x338] sm:$0xff] }
 0xf45   :  { %13691 = vmatpush3.bf16.msra.mxu0 %v13690_v55  ;;  %13723 = vmatpush3.bf16.msra.mxu1 %v13722_v34  ;;  %v16318_v55 = vsub.s32 2, %v15264_v46  ;;  %v13704_v34 = vpack.c.bf16 %v3721_v0, %v3720_v58  ;;  %v2989_v58 = vadd.f32 %v15722_v23, %v16340_v24  ;;  %v3647_v23 = vmax.f32 %v3080_v49, 0.0  ;;  %v3780_v49 = vld [vmem:[%s20055_s12 + $0x2c0] sm:$0xff] }
 0xf46   :  { %3532 = vmatprep.mubr.f32.mxu0 %v15022_v27  ;;  %3621 = vmatprep.mubr.f32.mxu1 %v15022_v27 }
 0xf47   :  { %13693 = vmatprep.subr.bf16.mxu0 %v13692_v26  ;;  %13725 = vmatprep.subr.bf16.mxu1 %v13724_v40  ;;  %v3723_v26 = vld [vmem:[%s20055_s12 + $0xf8] sm:$0xff]  ;;  %v3754_v40 = vld [vmem:[%s20055_s12 + $0x1f0] sm:$0xff] }
 0xf48   :  { %10976 = vmatmul.mubr.msk.f32.gmra.mrb[56].mxu0 %vm231_vm2, %v15880_v4  ;;  %10980 = vmatmul.mubr.msk.f32.gmra.mrb[56].mxu1 %vm231_vm2, %v15880_v4  ;;  %v13740_v28 = vpack.c.bf16 %v3755_v19, %v3754_v40  ;;  %v3809_v40 = vld [vmem:[%s20055_s12 + $0x3a8] sm:$0xff]  ;;  %v3644_v19 = vmax.f32 %v2989_v58, 0.0 }
 0xf49   :  { %13695 = vmatpush3.bf16.msra.mxu0 %v13694_v14  ;;  %13727 = vmatpush3.bf16.msra.mxu1 %v13726_v62  ;;  %v16350_v14 = vrot.slane %v16183_v53, %v16318_v55  ;;  %v13708_v62 = vpack.c.bf16 %v3723_v26, %v3722_v18  ;;  %v3777_v18 = vld [vmem:[%s20055_s12 + $0x2a8] sm:$0xff]  ;;  %v3808_v26 = vld [vmem:[%s20055_s12 + $0x3a0] sm:$0xff] }
 0xf4a   :  { %4019 = vmatprep.mubr.f32.mxu0 %v3629_v60  ;;  %4104 = vmatprep.mubr.f32.mxu1 %v3631_v51  ;;  %v13744_v51 = vpack.c.bf16 %v3773_v43, %v3772_v44  ;;  %v13784_v29 = vpack.c.bf16 %v3809_v40, %v3808_v26  ;;  %v3793_v44 = vld [vmem:[%s20055_s12 + $0x328] sm:$0xff]  ;;  %v3778_v43 = vld [vmem:[%s20055_s12 + $0x2b0] sm:$0xff]  ;;  %v3799_v26 = vld [vmem:[%s20055_s12 + $0x358] sm:$0xff] }
 0xf4b   :  { %13697 = vmatprep.subr.bf16.mxu0 %v13696_v32  ;;  %13729 = vmatprep.subr.bf16.mxu1 %v13728_v31  ;;  %v3804_v32 = vld [vmem:[%s20055_s12 + $0x380] sm:$0xff]  ;;  %v3805_v31 = vld [vmem:[%s20055_s12 + $0x388] sm:$0xff]  ;;  %v3072_v60 = vadd.f32 %v15746_v30, %v16350_v14  ;;  %v3078_v59 = vadd.f32 %v15751_v11, %v16350_v14  ;;  %v3790_v11 = vld [vmem:[%s20055_s12 + $0x310] sm:$0xff] }
 0xf4c   :  { %v3788_v30 = vld [vmem:[%s20055_s12 + $0x300] sm:$0xff]  ;;  %v13782_v52 = vpack.c.bf16 %v3791_v13, %v3790_v11  ;;  %v3767_v11 = vld [vmem:[%s20055_s12 + $0x258] sm:$0xff] }
 0xf4d   :  { %13699 = vmatpush3.bf16.msra.mxu0 %v13698_v41  ;;  %13731 = vmatpush3.bf16.msra.mxu1 %v13730_v39  ;;  %v13776_v41 = vpack.c.bf16 %v3805_v31, %v3804_v32  ;;  %v3756_v39 = vld [vmem:[%s20055_s12 + $0x200] sm:$0xff]  ;;  %v3630_v0 = vmax.f32 %v3072_v60, 0.0  ;;  %v3779_v32 = vld [vmem:[%s20055_s12 + $0x2b8] sm:$0xff]  ;;  %v3810_v31 = vld [vmem:[%s20055_s12 + $0x3b0] sm:$0xff] }
 0xf4e   :  { %13701 = vmatprep.subr.bf16.mxu0 %v13700_v54  ;;  %13733 = vmatprep.subr.bf16.mxu1 %v13732_v56  ;;  %v3789_v54 = vld [vmem:[%s20055_s12 + $0x308] sm:$0xff]  ;;  %v3774_v56 = vld [vmem:[%s20055_s12 + $0x290] sm:$0xff]  ;;  %v13746_v42 = vpack.c.bf16 %v3757_v20, %v3756_v39  ;;  %v13788_v39 = vpack.c.bf16 %v3811_v17, %v3810_v31  ;;  %v3784_v40 = vld [vmem:[%s20055_s12 + $0x2e0] sm:$0xff] }
 0xf4f   :  { %v3762_v60 = vld [vmem:[%s20055_s12 + $0x230] sm:$0xff]  ;;  %v3787_v31 = vld [vmem:[%s20055_s12 + $0x2f8] sm:$0xff] }
 0xf50   :  { %v3794_v20 = vld [vmem:[%s20055_s12 + $0x330] sm:$0xff] }
 0xf51   :  { %13703 = vmatpush3.bf16.msra.mxu0 %v13702_v63  ;;  %13735 = vmatpush3.bf16.msra.mxu1 %v13734_v7  ;;  %v13778_v63 = vpack.c.bf16 %v3789_v54, %v3788_v30  ;;  %v3758_v7 = vld [vmem:[%s20055_s12 + $0x210] sm:$0xff]  ;;  %v3781_v30 = vld [vmem:[%s20055_s12 + $0x2c8] sm:$0xff]  ;;  %v3812_v54 = vld [vmem:[%s20055_s12 + $0x3c0] sm:$0xff] }
 0xf52   :  { %13705 = vmatprep.subr.bf16.mxu0 %v13704_v34  ;;  %13737 = vmatprep.subr.bf16.mxu1 %v13736_v12  ;;  %v13748_v34 = vpack.c.bf16 %v3775_v21, %v3774_v56  ;;  %v13780_v12 = vpack.c.bf16 %v3807_v37, %v3806_v36  ;;  %v3813_v56 = vld [vmem:[%s20055_s12 + $0x3c8] sm:$0xff]  ;;  %v13790_v36 = vpack.c.bf16 %v3795_v33, %v3794_v20  ;;  %v3764_v37 = vld [vmem:[%s20055_s12 + $0x240] sm:$0xff]  ;;  %v3818_v17 = vld [vmem:[%s20055_s12 + $0x3f0] sm:$0xff] }
 0xf53   :  { %v13760_v58 = vpack.c.bf16 %v3781_v30, %v3780_v49  ;;  %v3802_v33 = vld [vmem:[%s20055_s12 + $0x370] sm:$0xff]  ;;  %v3803_v49 = vld [vmem:[%s20055_s12 + $0x378] sm:$0xff]  ;;  %v3836_v30 = vld [vmem:[%s20055_s12 + $0x480] sm:$0xff] }
 0xf55   :  { %13707 = vmatpush3.bf16.msra.mxu0 %v13706_v61  ;;  %13739 = vmatpush3.bf16.msra.mxu1 %v13738_v35  ;;  %v3646_v61 = vmax.f32 %v3078_v59, 0.0  ;;  %v13750_v35 = vpack.c.bf16 %v3759_v8, %v3758_v7  ;;  %v3796_v59 = vld [vmem:[%s20055_s12 + $0x340] sm:$0xff]  ;;  %v3783_v7 = vld [vmem:[%s20055_s12 + $0x2d8] sm:$0xff]  ;;  %v3814_v8 = vld [vmem:[%s20055_s12 + $0x3d0] sm:$0xff] }
 0xf56   :  { %13709 = vmatprep.subr.bf16.mxu0 %v13708_v62  ;;  %13741 = vmatprep.subr.bf16.mxu1 %v13740_v28  ;;  %v3761_v62 = vld [vmem:[%s20055_s12 + $0x228] sm:$0xff]  ;;  %v13752_v28 = vpack.c.bf16 %v3777_v18, %v3776_v15  ;;  %v3798_v18 = vld [vmem:[%s20055_s12 + $0x350] sm:$0xff] }
 0xf59   :  { %13711 = vmatpush3.bf16.msra.mxu0 %v13710_v1  ;;  %13743 = vmatpush3.bf16.msra.mxu1 %v13742_v38  ;;  %v13754_v1 = vpack.c.bf16 %v3761_v62, %v3760_v22  ;;  %v13786_v38 = vpack.c.bf16 %v3793_v44, %v3792_v3  ;;  %v13798_v22 = vpack.c.bf16 %v3799_v26, %v3798_v18  ;;  %v3768_v62 = vld [vmem:[%s20055_s12 + $0x260] sm:$0xff] }
 0xf5a   :  { %13745 = vmatprep.subr.bf16.mxu0 %v13744_v51  ;;  %13777 = vmatprep.subr.bf16.mxu1 %v13776_v41  ;;  %v3763_v51 = vld [vmem:[%s20055_s12 + $0x238] sm:$0xff]  ;;  %v13756_v41 = vpack.c.bf16 %v3779_v32, %v3778_v43  ;;  %v3800_v44 = vld [vmem:[%s20055_s12 + $0x360] sm:$0xff]  ;;  %v3801_v43 = vld [vmem:[%s20055_s12 + $0x368] sm:$0xff] }
 0xf5b   :  { %v13758_v21 = vpack.c.bf16 %v3763_v51, %v3762_v60  ;;  %v3786_v32 = vld [vmem:[%s20055_s12 + $0x2f0] sm:$0xff]  ;;  %v13802_v60 = vpack.c.bf16 %v3801_v43, %v3800_v44 }
 0xf5c   :  { %4020 = vmatmul.mubr.f32.vlgmr.msra.gmra.mrb[58].mxu0 %v3628_v57  ;;  %4105 = vmatmul.mubr.f32.vlgmr.msra.gmra.mrb[58].mxu1 %v3630_v0  ;;  %v3765_v57 = vld [vmem:[%s20055_s12 + $0x248] sm:$0xff]  ;;  %v13792_v0 = vpack.c.bf16 %v3813_v56, %v3812_v54  ;;  %v3770_v51 = vld [vmem:[%s20055_s12 + $0x270] sm:$0xff]  ;;  %v3868_v56 = vld [vmem:[%s20055_s12 + $0x580] sm:$0xff] }
 0xf5d   :  { %4024 = vmatprep.mubr.f32.mxu0 %v3645_v10  ;;  %4109 = vmatprep.mubr.f32.mxu1 %v3647_v23  ;;  %v3815_v10 = vld [vmem:[%s20055_s12 + $0x3d8] sm:$0xff]  ;;  %v13762_v23 = vpack.c.bf16 %v3765_v57, %v3764_v37  ;;  %v3837_v54 = vld [vmem:[%s20055_s12 + $0x488] sm:$0xff]  ;;  %v13806_v37 = vpack.c.bf16 %v3803_v49, %v3802_v33  ;;  %v3870_v49 = vld [vmem:[%s20055_s12 + $0x590] sm:$0xff] }
 0xf5e   :  { %13747 = vmatpush3.bf16.msra.mxu0 %v13746_v42  ;;  %13779 = vmatpush3.bf16.msra.mxu1 %v13778_v63  ;;  %v3797_v42 = vld [vmem:[%s20055_s12 + $0x348] sm:$0xff]  ;;  %v3782_v63 = vld [vmem:[%s20055_s12 + $0x2d0] sm:$0xff]  ;;  %v13796_v15 = vpack.c.bf16 %v3815_v10, %v3814_v8  ;;  %v13808_v57 = vpack.c.bf16 %v3837_v54, %v3836_v30  ;;  %v3871_v30 = vld [vmem:[%s20055_s12 + $0x598] sm:$0xff] }
 0xf5f   :  { %13749 = vmatprep.subr.bf16.mxu0 %v13748_v34  ;;  %13781 = vmatprep.subr.bf16.mxu1 %v13780_v12  ;;  %v13794_v34 = vpack.c.bf16 %v3797_v42, %v3796_v59  ;;  %v3766_v12 = vld [vmem:[%s20055_s12 + $0x250] sm:$0xff]  ;;  %v13764_v13 = vpack.c.bf16 %v3783_v7, %v3782_v63  ;;  %v16578_v63 = vsub.s32 6, %v15264_v46  ;;  %v16581_v7 = vsub.s32 5, %v15264_v46 }
 0xf60   :  { %4025 = vmatmul.mubr.f32.gmra.mrb[60].mxu0 %v3644_v19  ;;  %4110 = vmatmul.mubr.f32.gmra.mrb[60].mxu1 %v3646_v61  ;;  %v3785_v19 = vld [vmem:[%s20055_s12 + $0x2e8] sm:$0xff]  ;;  %v3816_v61 = vld [vmem:[%s20055_s12 + $0x3e0] sm:$0xff] }
 0xf62   :  { %13751 = vmatpush3.bf16.msra.mxu0 %v13750_v35  ;;  %13783 = vmatpush3.bf16.msra.mxu1 %v13782_v52  ;;  %v3817_v35 = vld [vmem:[%s20055_s12 + $0x3e8] sm:$0xff]  ;;  %v13766_v52 = vpack.c.bf16 %v3767_v11, %v3766_v12 }
 0xf63   :  { %13753 = vmatprep.subr.bf16.mxu0 %v13752_v28  ;;  %13785 = vmatprep.subr.bf16.mxu1 %v13784_v29  ;;  %v3769_v28 = vld [vmem:[%s20055_s12 + $0x268] sm:$0xff]  ;;  %v13768_v29 = vpack.c.bf16 %v3785_v19, %v3784_v40  ;;  %v13800_v3 = vpack.c.bf16 %v3817_v35, %v3816_v61  ;;  %v16596_v61 = vrot.slane %v16183_v53, %v16578_v63 }
 0xf64   :  { %v16600_v35 = vrot.slane %v16183_v53, %v16581_v7 }
 0xf66   :  { %13755 = vmatpush3.bf16.msra.mxu0 %v13754_v1  ;;  %13787 = vmatpush3.bf16.msra.mxu1 %v13786_v38  ;;  %v3819_v1 = vld [vmem:[%s20055_s12 + $0x3f8] sm:$0xff]  ;;  %v13770_v38 = vpack.c.bf16 %v3769_v28, %v3768_v62 }
 0xf67   :  { %13757 = vmatprep.subr.bf16.mxu0 %v13756_v41  ;;  %13789 = vmatprep.subr.bf16.mxu1 %v13788_v39  ;;  %v3771_v41 = vld [vmem:[%s20055_s12 + $0x278] sm:$0xff]  ;;  %v13772_v39 = vpack.c.bf16 %v3787_v31, %v3786_v32  ;;  %v13804_v20 = vpack.c.bf16 %v3819_v1, %v3818_v17  ;;  %v16613_v32 = vld [vmem:[%s20055_s12 + $0x400] sm:$0xff]  ;;  %v16627_v1 = vld [vmem:[%s20055_s12 + $0x490] sm:$0xff] }
 0xf6a   :  { %13759 = vmatpush3.bf16.msra.mxu0 %v13758_v21  ;;  %13791 = vmatpush3.bf16.msra.mxu1 %v13790_v36  ;;  %v3869_v21 = vld [vmem:[%s20055_s12 + $0x588] sm:$0xff]  ;;  %v13774_v36 = vpack.c.bf16 %v3771_v41, %v3770_v51 }
 0xf6b   :  { %13761 = vmatprep.subr.bf16.mxu0 %v13760_v58  ;;  %13793 = vmatprep.subr.bf16.mxu1 %v13792_v0  ;;  %v13840_v58 = vpack.c.bf16 %v3869_v21, %v3868_v56  ;;  %v16575_v0 = vsub.s32 4, %v15264_v46  ;;  %v16647_v21 = vld [vmem:[%s20055_s12 + $0x410] sm:$0xff] }
 0xf6e   :  { %13763 = vmatpush3.bf16.msra.mxu0 %v13762_v23  ;;  %13795 = vmatpush3.bf16.msra.mxu1 %v13794_v34 }
 0xf6f   :  { %13765 = vmatprep.subr.bf16.mxu0 %v13764_v13  ;;  %13797 = vmatprep.subr.bf16.mxu1 %v13796_v15  ;;  %v16588_v13 = vsub.s32 7, %v15264_v46  ;;  %v16592_v15 = vrot.slane %v16183_v53, %v16575_v0 }
 0xf71   :  { %v16608_v43 = vrot.slane %v16183_v53, %v16588_v13  ;;  %v3853_v53 = vld [vmem:[%s20055_s12 + $0x508] sm:$0xff] }
 0xf72   :  { %13767 = vmatpush3.bf16.msra.mxu0 %v13766_v52  ;;  %13799 = vmatpush3.bf16.msra.mxu1 %v13798_v22 }
 0xf73   :  { %13769 = vmatprep.subr.bf16.mxu0 %v13768_v29  ;;  %13801 = vmatprep.subr.bf16.mxu1 %v13800_v3 }
 0xf76   :  { %13771 = vmatpush3.bf16.msra.mxu0 %v13770_v38  ;;  %13803 = vmatpush3.bf16.msra.mxu1 %v13802_v60  ;;  %v16632_v38 = vld [vmem:[%s20055_s12 + $0x498] sm:$0xff] }
 0xf77   :  { %13773 = vmatprep.subr.bf16.mxu0 %v13772_v39  ;;  %13805 = vmatprep.subr.bf16.mxu1 %v13804_v20 }
 0xf7a   :  { %13775 = vmatpush3.bf16.msra.mxu0 %v13774_v36  ;;  %13807 = vmatpush3.bf16.msra.mxu1 %v13806_v37 }
 0xf7b   :  { %13809 = vmatprep.subr.bf16.mxu0 %v13808_v57  ;;  %13841 = vmatprep.subr.bf16.mxu1 %v13840_v58  ;;  %v16653_v57 = vld [vmem:[%s20055_s12 + $0x418] sm:$0xff]  ;;  %v16658_v58 = vld [vmem:[%s20055_s12 + $0x510] sm:$0xff] }
 0xfe7   :  { %v2994_v59 = vpop.f32.mrb[30].mxu0  ;;  %v3083_v42 = vpop.f32.mrb[30].mxu1 }
 0xfe8   :  { %v2995_v8 = vadd.f32 %v2994_v59, %v16340_v24  ;;  %v3084_v10 = vadd.f32 %v3083_v42, %v16350_v14  ;;  %v2996_v23 = vpop.f32.mrb[31].mxu0  ;;  %v3085_v34 = vpop.f32.mrb[31].mxu1  ;;  %v16663_v59 = vld [vmem:[%s20055_s12 + $0x518] sm:$0xff] }
 0xfe9   :  { %v2997_v12 = vadd.f32 %v2996_v23, %v16204_v16  ;;  %v3086_v11 = vadd.f32 %v3085_v34, %v16208_v5  ;;  %v13812_v34 = vpack.c.bf16 %v16632_v38, %v16627_v1 }
 0xfea   :  { %v3660_v52 = vmax.f32 %v2995_v8, 0.0  ;;  %v3662_v22 = vmax.f32 %v3084_v10, 0.0 }
 0xfeb   :  { %v3661_v18 = vmax.f32 %v2997_v12, 0.0  ;;  %v3663_v26 = vmax.f32 %v3086_v11, 0.0  ;;  %v3000_v40 = vpop.f32.mrb[32].mxu0  ;;  %v3089_v19 = vpop.f32.mrb[32].mxu1  ;;  %v13844_v12 = vpack.c.bf16 %v3871_v30, %v3870_v49  ;;  %v16670_v11 = vld [vmem:[%s20055_s12 + $0x4a0] sm:$0xff] }
 0xfec   :  { %v3001_v46 = vadd.f32 %v3000_v40, %v16340_v24  ;;  %v3090_v62 = vadd.f32 %v3089_v19, %v16350_v14  ;;  %v3002_v28 = vpop.f32.mrb[33].mxu0  ;;  %v3091_v29 = vpop.f32.mrb[33].mxu1  ;;  %v3821_v24 = vld [vmem:[%s20055_s12 + $0x408] sm:$0xff] }
 0xfed   :  { %v3003_v3 = vadd.f32 %v3002_v28, %v16204_v16  ;;  %v3092_v44 = vadd.f32 %v3091_v29, %v16208_v5  ;;  %4029 = vmatprep.mubr.f32.mxu0 %v3661_v18  ;;  %4114 = vmatprep.mubr.f32.mxu1 %v3663_v26  ;;  %v3852_v16 = vld [vmem:[%s20055_s12 + $0x500] sm:$0xff]  ;;  %v13810_v36 = vpack.c.bf16 %v3821_v24, %v16613_v32  ;;  %v16675_v18 = vld [vmem:[%s20055_s12 + $0x4a8] sm:$0xff] }
 0xfee   :  { %4030 = vmatmul.mubr.f32.gmra.mrb[62].mxu0 %v3660_v52  ;;  %4115 = vmatmul.mubr.f32.gmra.mrb[62].mxu1 %v3662_v22  ;;  %v3676_v60 = vmax.f32 %v3001_v46, 0.0  ;;  %v3678_v51 = vmax.f32 %v3090_v62, 0.0  ;;  %v13842_v37 = vpack.c.bf16 %v3853_v53, %v3852_v16  ;;  %v3872_v62 = vld [vmem:[%s20055_s12 + $0x5a0] sm:$0xff]  ;;  %v3873_v28 = vld [vmem:[%s20055_s12 + $0x5a8] sm:$0xff]  ;;  %v13814_v24 = vpack.c.bf16 %v16653_v57, %v16647_v21  ;;  %v3874_v21 = vld [vmem:[%s20055_s12 + $0x5b0] sm:$0xff] }
 0xfef   :  { %v3677_v5 = vmax.f32 %v3003_v3, 0.0  ;;  %v3679_v14 = vmax.f32 %v3092_v44, 0.0  ;;  %v3160_v31 = vpop.f32.mrb[34].mxu0  ;;  %v3249_v17 = vpop.f32.mrb[34].mxu1  ;;  %v16690_v44 = vld [vmem:[%s20055_s12 + $0x420] sm:$0xff]  ;;  %v16695_v32 = vld [vmem:[%s20055_s12 + $0x428] sm:$0xff]  ;;  %v13846_v16 = vpack.c.bf16 %v16663_v59, %v16658_v58 }
 0xff0   :  { %v3161_v41 = vadd.f32 %v3160_v31, %v16592_v15  ;;  %v3250_v39 = vadd.f32 %v3249_v17, %v16596_v61  ;;  %v3162_v20 = vpop.f32.mrb[35].mxu0  ;;  %v3251_v33 = vpop.f32.mrb[35].mxu1  ;;  %v16704_v53 = vld [vmem:[%s20055_s12 + $0x520] sm:$0xff]  ;;  %v13818_v58 = vpack.c.bf16 %v16695_v32, %v16690_v44 }
 0xff1   :  { %v3163_v54 = vadd.f32 %v3162_v20, %v16600_v35  ;;  %v3252_v56 = vadd.f32 %v3251_v33, %v16608_v43  ;;  %4034 = vmatprep.mubr.f32.mxu0 %v3677_v5  ;;  %4119 = vmatprep.mubr.f32.mxu1 %v3679_v14  ;;  %v16709_v5 = vld [vmem:[%s20055_s12 + $0x528] sm:$0xff] }
 0xff2   :  { %4035 = vmatmul.mubr.f32.gmra.mrb[64].mxu0 %v3676_v60  ;;  %4120 = vmatmul.mubr.f32.gmra.mrb[64].mxu1 %v3678_v51  ;;  %v3632_v26 = vmax.f32 %v3161_v41, 0.0  ;;  %v3634_v40 = vmax.f32 %v3250_v39, 0.0  ;;  %v16714_v14 = vld [vmem:[%s20056_s11 + $0x8] sm:$0xff]  ;;  %v13816_v60 = vpack.c.bf16 %v16675_v18, %v16670_v11  ;;  %v13848_v51 = vpack.c.bf16 %v3873_v28, %v3872_v62  ;;  %v16721_v41 = vld [vmem:[%s20055_s12 + $0x4b0] sm:$0xff]  ;;  %v16726_v39 = vld [vmem:[%s20055_s12 + $0x4b8] sm:$0xff] }
 0xff3   :  { %v3633_v42 = vmax.f32 %v3163_v54, 0.0  ;;  %v3635_v8 = vmax.f32 %v3252_v56, 0.0  ;;  %v3166_v10 = vpop.f32.mrb[36].mxu0  ;;  %v3255_v23 = vpop.f32.mrb[36].mxu1  ;;  %v13850_v59 = vpack.c.bf16 %v16709_v5, %v16704_v53  ;;  %v13820_v11 = vpack.c.bf16 %v16726_v39, %v16721_v41 }
 0xff4   :  { %v3167_v19 = vadd.f32 %v3166_v10, %v16592_v15  ;;  %v3256_v52 = vadd.f32 %v3255_v23, %v16596_v61  ;;  %v3168_v22 = vpop.f32.mrb[37].mxu0  ;;  %v3257_v46 = vpop.f32.mrb[37].mxu1 }
 0xff5   :  { %v3169_v29 = vadd.f32 %v3168_v22, %v16600_v35  ;;  %v3258_v3 = vadd.f32 %v3257_v46, %v16608_v43  ;;  %4189 = vmatprep.mubr.f32.mxu0 %v3633_v42  ;;  %4274 = vmatprep.mubr.f32.mxu1 %v3635_v8  ;;  %v16744_v42 = vrot.slane %v16714_v14, %v15274_v50  ;;  %v16749_v8 = vld [vmem:[%s20055_s12 + $0x430] sm:$0xff] }
 0xff6   :  { %4190 = vmatmul.mubr.f32.vlgmr.msra.gmra.mrb[66].mxu0 %v3632_v26  ;;  %4275 = vmatmul.mubr.f32.vlgmr.msra.gmra.mrb[66].mxu1 %v3634_v40  ;;  %v3648_v20 = vmax.f32 %v3167_v19, 0.0  ;;  %v3650_v33 = vmax.f32 %v3256_v52, 0.0  ;;  %v3827_v26 = vld [vmem:[%s20055_s12 + $0x438] sm:$0xff]  ;;  %v3858_v40 = vld [vmem:[%s20055_s12 + $0x530] sm:$0xff] }
 0xff7   :  { %v3649_v31 = vmax.f32 %v3169_v29, 0.0  ;;  %v3651_v17 = vmax.f32 %v3258_v3, 0.0  ;;  %13811 = vmatpush3.bf16.msra.mxu0 %v13810_v36  ;;  %13843 = vmatpush3.bf16.msra.mxu1 %v13842_v37  ;;  %v3172_v1 = vpop.f32.mrb[38].mxu0  ;;  %v3261_v38 = vpop.f32.mrb[38].mxu1  ;;  %v3875_v36 = vld [vmem:[%s20055_s12 + $0x5b8] sm:$0xff]  ;;  %v3844_v3 = vld [vmem:[%s20055_s12 + $0x4c0] sm:$0xff] }
 0xff8   :  { %v3173_v49 = vadd.f32 %v3172_v1, %v16592_v15  ;;  %v3262_v30 = vadd.f32 %v3261_v38, %v16596_v61  ;;  %v3174_v54 = vpop.f32.mrb[39].mxu0  ;;  %v3263_v56 = vpop.f32.mrb[39].mxu1  ;;  %13813 = vmatprep.subr.bf16.mxu0 %v13812_v34  ;;  %13845 = vmatprep.subr.bf16.mxu1 %v13844_v12  ;;  %v13852_v18 = vpack.c.bf16 %v3875_v36, %v3874_v21  ;;  %v3859_v29 = vld [vmem:[%s20055_s12 + $0x538] sm:$0xff]  ;;  %v3829_v38 = vld [vmem:[%s20055_s12 + $0x448] sm:$0xff] }
 0xff9   :  { %v3175_v37 = vadd.f32 %v3174_v54, %v16600_v35  ;;  %v3264_v57 = vadd.f32 %v3263_v56, %v16608_v43  ;;  %4194 = vmatprep.mubr.f32.mxu0 %v3649_v31  ;;  %4279 = vmatprep.mubr.f32.mxu1 %v3651_v17  ;;  %v13822_v17 = vpack.c.bf16 %v3827_v26, %v16749_v8  ;;  %v3846_v54 = vld [vmem:[%s20055_s12 + $0x4d0] sm:$0xff]  ;;  %v3847_v36 = vld [vmem:[%s20055_s12 + $0x4d8] sm:$0xff] }
 0xffa   :  { %4195 = vmatmul.mubr.f32.gmra.mrb[68].mxu0 %v3648_v20  ;;  %4280 = vmatmul.mubr.f32.gmra.mrb[68].mxu1 %v3650_v33  ;;  %v3664_v19 = vmax.f32 %v3173_v49, 0.0  ;;  %v3666_v52 = vmax.f32 %v3262_v30, 0.0  ;;  %v13854_v1 = vpack.c.bf16 %v3859_v29, %v3858_v40  ;;  %v3861_v30 = vld [vmem:[%s20055_s12 + $0x548] sm:$0xff]  ;;  %v13828_v40 = vpack.c.bf16 %v3847_v36, %v3846_v54  ;;  %v3866_v36 = vld [vmem:[%s20055_s12 + $0x570] sm:$0xff] }
 0xffb   :  { %v3665_v10 = vmax.f32 %v3175_v37, 0.0  ;;  %v3667_v23 = vmax.f32 %v3264_v57, 0.0  ;;  %13815 = vmatpush3.bf16.msra.mxu0 %v13814_v24  ;;  %13847 = vmatpush3.bf16.msra.mxu1 %v13846_v16  ;;  %v3178_v34 = vpop.f32.mrb[40].mxu0  ;;  %v3267_v12 = vpop.f32.mrb[40].mxu1  ;;  %v3876_v24 = vld [vmem:[%s20055_s12 + $0x5c0] sm:$0xff]  ;;  %v3878_v37 = vld [vmem:[%s20055_s12 + $0x5d0] sm:$0xff] }
 0xffc   :  { %v3179_v22 = vadd.f32 %v3178_v34, %v16592_v15  ;;  %v3268_v46 = vadd.f32 %v3267_v12, %v16596_v61  ;;  %v3180_v62 = vpop.f32.mrb[41].mxu0  ;;  %v3269_v28 = vpop.f32.mrb[41].mxu1  ;;  %13817 = vmatprep.subr.bf16.mxu0 %v13816_v60  ;;  %13849 = vmatprep.subr.bf16.mxu1 %v13848_v51  ;;  %v16771_v15 = vrot.slane %v16714_v14, %v16165_v48  ;;  %v3845_v61 = vld [vmem:[%s20055_s12 + $0x4c8] sm:$0xff]  ;;  %v3860_v60 = vld [vmem:[%s20055_s12 + $0x540] sm:$0xff]  ;;  %v3879_v57 = vld [vmem:[%s20055_s12 + $0x5d8] sm:$0xff] }
 0xffd   :  { %v3181_v44 = vadd.f32 %v3180_v62, %v16600_v35  ;;  %v3270_v32 = vadd.f32 %v3269_v28, %v16608_v43  ;;  %4199 = vmatprep.mubr.f32.mxu0 %v3665_v10  ;;  %4284 = vmatprep.mubr.f32.mxu1 %v3667_v23  ;;  %v3877_v35 = vld [vmem:[%s20055_s12 + $0x5c8] sm:$0xff]  ;;  %v3828_v43 = vld [vmem:[%s20055_s12 + $0x440] sm:$0xff]  ;;  %v13824_v33 = vpack.c.bf16 %v3845_v61, %v3844_v3  ;;  %v3830_v12 = vld [vmem:[%s20055_s12 + $0x450] sm:$0xff] }
 0xffe   :  { %4200 = vmatmul.mubr.f32.gmra.mrb[70].mxu0 %v3664_v19  ;;  %4285 = vmatmul.mubr.f32.gmra.mrb[70].mxu1 %v3666_v52  ;;  %v3680_v51 = vmax.f32 %v3179_v22, 0.0  ;;  %v3682_v41 = vmax.f32 %v3268_v46, 0.0  ;;  %v13856_v49 = vpack.c.bf16 %v3877_v35, %v3876_v24  ;;  %v13826_v23 = vpack.c.bf16 %v3829_v38, %v3828_v43  ;;  %v3862_v52 = vld [vmem:[%s20055_s12 + $0x550] sm:$0xff]  ;;  %v3863_v22 = vld [vmem:[%s20055_s12 + $0x558] sm:$0xff]  ;;  %v3848_v46 = vld [vmem:[%s20055_s12 + $0x4e0] sm:$0xff] }
 0xfff   :  { %v3681_v16 = vmax.f32 %v3181_v44, 0.0  ;;  %v3683_v53 = vmax.f32 %v3270_v32, 0.0  ;;  %13819 = vmatpush3.bf16.msra.mxu0 %v13818_v58  ;;  %13851 = vmatpush3.bf16.msra.mxu1 %v13850_v59  ;;  %v16785_v5 = vpop.f32.mrb[42].mxu0  ;;  %v16787_v31 = vpop.f32.mrb[42].mxu1  ;;  %v13858_v34 = vpack.c.bf16 %v3861_v30, %v3860_v60  ;;  %v13860_v19 = vpack.c.bf16 %v3879_v57, %v3878_v37  ;;  %v3849_v62 = vld [vmem:[%s20055_s12 + $0x4e8] sm:$0xff]  ;;  %v3880_v28 = vld [vmem:[%s20055_s12 + $0x5e0] sm:$0xff] }
0x1000   :  { %v3340_v39 = vpop.f32.mrb[43].mxu0  ;;  %v3429_v20 = vpop.f32.mrb[43].mxu1  ;;  %13821 = vmatprep.subr.bf16.mxu0 %v13820_v11  ;;  %13853 = vmatprep.subr.bf16.mxu1 %v13852_v18  ;;  %v3831_v11 = vld [vmem:[%s20055_s12 + $0x458] sm:$0xff]  ;;  %v3881_v29 = vld [vmem:[%s20055_s12 + $0x5e8] sm:$0xff]  ;;  %v13862_v61 = vpack.c.bf16 %v3863_v22, %v3862_v52  ;;  %v3832_v24 = vld [vmem:[%s20055_s12 + $0x460] sm:$0xff]  ;;  %v16896_v37 = vrot.slane %v16714_v14, %v16318_v55 }
0x1001   :  { %v3341_v56 = vadd.f32 %v3340_v39, %v16744_v42  ;;  %v3430_v21 = vadd.f32 %v3429_v20, %v16771_v15  ;;  %4204 = vmatprep.mubr.f32.mxu0 %v3681_v16  ;;  %4289 = vmatprep.mubr.f32.mxu1 %v3683_v53  ;;  %v13830_v32 = vpack.c.bf16 %v3831_v11, %v3830_v12  ;;  %v3833_v35 = vld [vmem:[%s20055_s12 + $0x468] sm:$0xff]  ;;  %v3850_v60 = vld [vmem:[%s20055_s12 + $0x4f0] sm:$0xff]  ;;  %v3883_v39 = vld [vmem:[%s20055_s12 + $0x5f8] sm:$0xff] }
0x1002   :  { %4205 = vmatmul.mubr.f32.gmra.mrb[72].mxu0 %v3680_v51  ;;  %4290 = vmatmul.mubr.f32.gmra.mrb[72].mxu1 %v3682_v41  ;;  %v13832_v53 = vpack.c.bf16 %v3849_v62, %v3848_v46  ;;  %v3865_v38 = vld [vmem:[%s20055_s12 + $0x568] sm:$0xff]  ;;  %v3851_v51 = vld [vmem:[%s20055_s12 + $0x4f8] sm:$0xff]  ;;  %v3882_v41 = vld [vmem:[%s20055_s12 + $0x5f0] sm:$0xff]  ;;  %v16879_v20 = vrot.slane %v16714_v14, %v15267_v47  ;;  %v13834_v30 = vpack.c.bf16 %v3833_v35, %v3832_v24 }
0x1003   :  { %v3637_v58 = vmax.f32 %v3341_v56, 0.0  ;;  %v3639_v59 = vmax.f32 %v3430_v21, 0.0  ;;  %13823 = vmatpush3.bf16.msra.mxu0 %v13822_v17  ;;  %13855 = vmatpush3.bf16.msra.mxu1 %v13854_v1  ;;  %v16813_v8 = vpop.f32.mrb[44].mxu0  ;;  %v16815_v10 = vpop.f32.mrb[44].mxu1  ;;  %v13864_v17 = vpack.c.bf16 %v3881_v29, %v3880_v28  ;;  %v3864_v1 = vld [vmem:[%s20055_s12 + $0x560] sm:$0xff]  ;;  %v3834_v56 = vld [vmem:[%s20055_s12 + $0x470] sm:$0xff] }
0x1004   :  { %v16823_v18 = vpop.f32.mrb[45].mxu0  ;;  %v16825_v26 = vpop.f32.mrb[45].mxu1  ;;  %13825 = vmatprep.subr.bf16.mxu0 %v13824_v33  ;;  %13857 = vmatprep.subr.bf16.mxu1 %v13856_v49  ;;  %v13866_v54 = vpack.c.bf16 %v3865_v38, %v3864_v1  ;;  %v3835_v21 = vld [vmem:[%s20055_s12 + $0x478] sm:$0xff]  ;;  %v3900_v12 = vld [vmem:[%s20055_s12 + $0x680] sm:$0xff]  ;;  %v3901_v11 = vld [vmem:[%s20055_s12 + $0x688] sm:$0xff] }
0x1005   :  { %4359 = vmatprep.mubr.f32.mxu0 %v3637_v58  ;;  %4444 = vmatprep.mubr.f32.mxu1 %v3639_v59  ;;  %v13836_v59 = vpack.c.bf16 %v3851_v51, %v3850_v60  ;;  %v16920_v52 = vld [vmem:[%s20055_s12 + $0x600] sm:$0xff]  ;;  %v16925_v22 = vld [vmem:[%s20055_s12 + $0x608] sm:$0xff]  ;;  %v13838_v28 = vpack.c.bf16 %v3835_v21, %v3834_v56  ;;  %v16944_v35 = vld [vmem:[%s20055_s12 + $0x690] sm:$0xff] }
0x1006   :  { %v16939_v24 = vld [vmem:[%s20055_s12 + $0x708] sm:$0xff]  ;;  %v16957_v51 = vld [vmem:[%s20055_s12 + $0x698] sm:$0xff] }
0x1007   :  { %13827 = vmatpush3.bf16.msra.mxu0 %v13826_v23  ;;  %13859 = vmatpush3.bf16.msra.mxu1 %v13858_v34  ;;  %v16845_v3 = vpop.f32.mrb[46].mxu0  ;;  %v16847_v44 = vpop.f32.mrb[46].mxu1  ;;  %v13868_v23 = vpack.c.bf16 %v3883_v39, %v3882_v41  ;;  %v3867_v34 = vld [vmem:[%s20055_s12 + $0x578] sm:$0xff]  ;;  %v16962_v41 = vld [vmem:[%s20055_s12 + $0x790] sm:$0xff]  ;;  %v3436_v39 = vadd.f32 %v16825_v26, %v16771_v15 }
0x1008   :  { %v16855_v43 = vpop.f32.mrb[47].mxu0  ;;  %v16857_v16 = vpop.f32.mrb[47].mxu1  ;;  %13829 = vmatprep.subr.bf16.mxu0 %v13828_v40  ;;  %13861 = vmatprep.subr.bf16.mxu1 %v13860_v19  ;;  %v3932_v40 = vld [vmem:[%s20055_s12 + $0x780] sm:$0xff]  ;;  %v3933_v19 = vld [vmem:[%s20055_s12 + $0x788] sm:$0xff]  ;;  %v13870_v29 = vpack.c.bf16 %v3867_v34, %v3866_v36  ;;  %v16983_v56 = vld [vmem:[%s20055_s12 + $0x618] sm:$0xff] }
0x1009   :  { %v13904_v60 = vpack.c.bf16 %v3933_v19, %v3932_v40  ;;  %v17003_v34 = vld [vmem:[%s20055_s12 + $0x718] sm:$0xff] }
0x100b   :  { %13831 = vmatpush3.bf16.msra.mxu0 %v13830_v32  ;;  %13863 = vmatpush3.bf16.msra.mxu1 %v13862_v61  ;;  %v16881_v33 = vpop.f32.mrb[48].mxu0  ;;  %v16883_v49 = vpop.f32.mrb[48].mxu1  ;;  %v13872_v32 = vpack.c.bf16 %v3901_v11, %v3900_v12  ;;  %v16934_v61 = vld [vmem:[%s20055_s12 + $0x700] sm:$0xff]  ;;  %v17013_v11 = vld [vmem:[%s20055_s12 + $0x6a8] sm:$0xff] }
0x100c   :  { %v16898_v57 = vpop.f32.mrb[49].mxu0  ;;  %v16900_v58 = vpop.f32.mrb[49].mxu1  ;;  %13833 = vmatprep.subr.bf16.mxu0 %v13832_v53  ;;  %13865 = vmatprep.subr.bf16.mxu1 %v13864_v17  ;;  %v3339_v53 = vadd.f32 %v16785_v5, %v16879_v20  ;;  %v3428_v17 = vadd.f32 %v16787_v31, %v16896_v37  ;;  %v16967_v5 = vld [vmem:[%s20055_s12 + $0x798] sm:$0xff]  ;;  %v3347_v31 = vadd.f32 %v16823_v18, %v16744_v42  ;;  %v16988_v18 = vld [vmem:[%s20055_s12 + $0x710] sm:$0xff]  ;;  %v17008_v12 = vld [vmem:[%s20055_s12 + $0x6a0] sm:$0xff] }
0x100d   :  { %v13906_v36 = vpack.c.bf16 %v16939_v24, %v16934_v61  ;;  %v17026_v61 = vld [vmem:[%s20055_s12 + $0x7a0] sm:$0xff]  ;;  %v17031_v24 = vld [vmem:[%s20055_s12 + $0x7a8] sm:$0xff] }
0x100e   :  { %v3636_v40 = vmax.f32 %v3339_v53, 0.0  ;;  %v3638_v19 = vmax.f32 %v3428_v17, 0.0  ;;  %v3442_v53 = vadd.f32 %v16857_v16, %v16771_v15  ;;  %v17043_v17 = vrot.slane %v16714_v14, %v16588_v13  ;;  %v17055_v16 = vld [vmem:[%s20055_s12 + $0x628] sm:$0xff] }
0x100f   :  { %13835 = vmatpush3.bf16.msra.mxu0 %v13834_v30  ;;  %13867 = vmatpush3.bf16.msra.mxu1 %v13866_v54  ;;  %v16927_v46 = vpop.f32.mrb[50].mxu0  ;;  %v16929_v62 = vpop.f32.mrb[50].mxu1  ;;  %v13874_v30 = vpack.c.bf16 %v16925_v22, %v16920_v52  ;;  %v16978_v54 = vld [vmem:[%s20055_s12 + $0x610] sm:$0xff]  ;;  %v3345_v52 = vadd.f32 %v16813_v8, %v16879_v20  ;;  %v3434_v22 = vadd.f32 %v16815_v10, %v16896_v37  ;;  %v3653_v8 = vmax.f32 %v3347_v31, 0.0 }
0x1010   :  { %v16950_v1 = vpop.f32.mrb[51].mxu0  ;;  %v16952_v38 = vpop.f32.mrb[51].mxu1  ;;  %13837 = vmatprep.subr.bf16.mxu0 %v13836_v59  ;;  %13869 = vmatprep.subr.bf16.mxu1 %v13868_v23  ;;  %v13876_v59 = vpack.c.bf16 %v16957_v51, %v16944_v35  ;;  %v13908_v23 = vpack.c.bf16 %v16967_v5, %v16962_v41  ;;  %v3655_v35 = vmax.f32 %v3436_v39, 0.0  ;;  %v3353_v10 = vadd.f32 %v16855_v43, %v16744_v42  ;;  %v17050_v43 = vld [vmem:[%s20055_s12 + $0x620] sm:$0xff] }
0x1011   :  { %v17060_v51 = vld [vmem:[%s20055_s12 + $0x720] sm:$0xff]  ;;  %v13910_v31 = vpack.c.bf16 %v17003_v34, %v16988_v18  ;;  %v13880_v39 = vpack.c.bf16 %v17013_v11, %v17008_v12  ;;  %v3652_v18 = vmax.f32 %v3345_v52, 0.0  ;;  %v3654_v34 = vmax.f32 %v3434_v22, 0.0  ;;  %v3939_v52 = vld [vmem:[%s20055_s12 + $0x7b8] sm:$0xff] }
0x1012   :  { %v3351_v12 = vadd.f32 %v16845_v3, %v16879_v20  ;;  %v3440_v11 = vadd.f32 %v16847_v44, %v16896_v37  ;;  %v3669_v22 = vmax.f32 %v3353_v10, 0.0  ;;  %v3359_v3 = vadd.f32 %v16898_v57, %v16744_v42 }
0x1013   :  { %13839 = vmatpush3.bf16.msra.mxu0 %v13838_v28  ;;  %13871 = vmatpush3.bf16.msra.mxu1 %v13870_v29  ;;  %v16990_v26 = vpop.f32.mrb[52].mxu0  ;;  %v16992_v21 = vpop.f32.mrb[52].mxu1  ;;  %v3448_v44 = vadd.f32 %v16900_v58, %v16771_v15 }
0x1014   :  { %v17019_v28 = vpop.f32.mrb[53].mxu0  ;;  %v17021_v29 = vpop.f32.mrb[53].mxu1  ;;  %13873 = vmatprep.subr.bf16.mxu0 %v13872_v32  ;;  %13905 = vmatprep.subr.bf16.mxu1 %v13904_v60  ;;  %v17039_v32 = vrot.slane %v16714_v14, %v16581_v7  ;;  %v13878_v60 = vpack.c.bf16 %v16983_v56, %v16978_v54  ;;  %v13912_v54 = vpack.c.bf16 %v17031_v24, %v17026_v61  ;;  %v3921_v56 = vld [vmem:[%s20055_s12 + $0x728] sm:$0xff]  ;;  %v3668_v15 = vmax.f32 %v3351_v12, 0.0 }
0x1015   :  { %v13914_v10 = vpack.c.bf16 %v3921_v56, %v17060_v51  ;;  %v3670_v58 = vmax.f32 %v3440_v11, 0.0  ;;  %v3891_v51 = vld [vmem:[%s20055_s12 + $0x638] sm:$0xff]  ;;  %v3685_v56 = vmax.f32 %v3359_v3, 0.0  ;;  %v3893_v12 = vld [vmem:[%s20055_s12 + $0x648] sm:$0xff] }
0x1016   :  { %4360 = vmatmul.mubr.f32.vlgmr.msra.gmra.mrb[74].mxu0 %v3636_v40  ;;  %4445 = vmatmul.mubr.f32.vlgmr.msra.gmra.mrb[74].mxu1 %v3638_v19  ;;  %v17078_v40 = vld [vmem:[%s20055_s12 + $0x6b0] sm:$0xff]  ;;  %v17083_v19 = vld [vmem:[%s20055_s12 + $0x6b8] sm:$0xff]  ;;  %v3925_v3 = vld [vmem:[%s20055_s12 + $0x748] sm:$0xff] }
0x1017   :  { %4364 = vmatprep.mubr.f32.mxu0 %v3653_v8  ;;  %4449 = vmatprep.mubr.f32.mxu1 %v3655_v35  ;;  %v17062_v41 = vpop.f32.mrb[54].mxu0  ;;  %v17064_v5 = vpop.f32.mrb[54].mxu1  ;;  %v3938_v8 = vld [vmem:[%s20055_s12 + $0x7b0] sm:$0xff]  ;;  %v3671_v35 = vmax.f32 %v3442_v53, 0.0  ;;  %v13884_v42 = vpack.c.bf16 %v17083_v19, %v17078_v40  ;;  %v3687_v40 = vmax.f32 %v3448_v44, 0.0 }
0x1018   :  { %13875 = vmatpush3.bf16.msra.mxu0 %v13874_v30  ;;  %13907 = vmatpush3.bf16.msra.mxu1 %v13906_v36  ;;  %v17089_v61 = vpop.f32.mrb[55].mxu0  ;;  %v17091_v24 = vpop.f32.mrb[55].mxu1  ;;  %v13882_v30 = vpack.c.bf16 %v17055_v16, %v17050_v43  ;;  %v13916_v57 = vpack.c.bf16 %v3939_v52, %v3938_v8  ;;  %v3890_v16 = vld [vmem:[%s20055_s12 + $0x630] sm:$0xff] }
0x1019   :  { %13877 = vmatprep.subr.bf16.mxu0 %v13876_v59  ;;  %13909 = vmatprep.subr.bf16.mxu1 %v13908_v23  ;;  %v3357_v59 = vadd.f32 %v16881_v33, %v16879_v20  ;;  %v3446_v23 = vadd.f32 %v16883_v49, %v16896_v37  ;;  %v3519_v20 = vadd.f32 %v16950_v1, %v17039_v32  ;;  %v3922_v49 = vld [vmem:[%s20055_s12 + $0x730] sm:$0xff]  ;;  %v3923_v37 = vld [vmem:[%s20055_s12 + $0x738] sm:$0xff]  ;;  %v3909_v1 = vld [vmem:[%s20055_s12 + $0x6c8] sm:$0xff] }
0x101a   :  { %4365 = vmatmul.mubr.f32.gmra.mrb[76].mxu0 %v3652_v18  ;;  %4450 = vmatmul.mubr.f32.gmra.mrb[76].mxu1 %v3654_v34  ;;  %v3608_v33 = vadd.f32 %v16952_v38, %v17043_v17  ;;  %v3940_v38 = vld [vmem:[%s20055_s12 + $0x7c0] sm:$0xff]  ;;  %v13886_v19 = vpack.c.bf16 %v3891_v51, %v3890_v16  ;;  %v13918_v18 = vpack.c.bf16 %v3923_v37, %v3922_v49  ;;  %v3910_v44 = vld [vmem:[%s20055_s12 + $0x6d0] sm:$0xff]  ;;  %v3945_v49 = vld [vmem:[%s20055_s12 + $0x7e8] sm:$0xff] }
0x101b   :  { %4369 = vmatprep.mubr.f32.mxu0 %v3669_v22  ;;  %4454 = vmatprep.mubr.f32.mxu1 %v3671_v35  ;;  %v17105_v36 = vpop.f32.mrb[56].mxu0  ;;  %v17107_v45 = vpop.f32.mrb[56].mxu1  ;;  %v3892_v34 = vld [vmem:[%s20055_s12 + $0x640] sm:$0xff]  ;;  %v3641_v11 = vmax.f32 %v3519_v20, 0.0  ;;  %v3926_v51 = vld [vmem:[%s20055_s12 + $0x750] sm:$0xff]  ;;  %v3913_v20 = vld [vmem:[%s20055_s12 + $0x6e8] sm:$0xff] }
0x101c   :  { %13879 = vmatpush3.bf16.msra.mxu0 %v13878_v60  ;;  %13911 = vmatpush3.bf16.msra.mxu1 %v13910_v31  ;;  %v17116_v53 = vpop.f32.mrb[57].mxu0  ;;  %v17118_v43 = vpop.f32.mrb[57].mxu1  ;;  %v3908_v60 = vld [vmem:[%s20055_s12 + $0x6c0] sm:$0xff]  ;;  %v3941_v31 = vld [vmem:[%s20055_s12 + $0x7c8] sm:$0xff]  ;;  %v3643_v8 = vmax.f32 %v3608_v33, 0.0 }
0x101d   :  { %13881 = vmatprep.subr.bf16.mxu0 %v13880_v39  ;;  %13913 = vmatprep.subr.bf16.mxu1 %v13912_v54  ;;  %v3684_v39 = vmax.f32 %v3357_v59, 0.0  ;;  %v3686_v54 = vmax.f32 %v3446_v23, 0.0  ;;  %v13888_v52 = vpack.c.bf16 %v3909_v1, %v3908_v60  ;;  %v13920_v22 = vpack.c.bf16 %v3941_v31, %v3940_v38  ;;  %v3924_v35 = vld [vmem:[%s20055_s12 + $0x740] sm:$0xff]  ;;  %v3895_v59 = vld [vmem:[%s20055_s12 + $0x658] sm:$0xff]  ;;  %v3897_v38 = vld [vmem:[%s20055_s12 + $0x668] sm:$0xff] }
0x101e   :  { %4370 = vmatmul.mubr.f32.gmra.mrb[78].mxu0 %v3668_v15  ;;  %4455 = vmatmul.mubr.f32.gmra.mrb[78].mxu1 %v3670_v58  ;;  %v13922_v15 = vpack.c.bf16 %v3925_v3, %v3924_v35  ;;  %v3894_v58 = vld [vmem:[%s20055_s12 + $0x650] sm:$0xff]  ;;  %v3944_v33 = vld [vmem:[%s20055_s12 + $0x7e0] sm:$0xff] }
0x101f   :  { %4374 = vmatprep.mubr.f32.mxu0 %v3685_v56  ;;  %4459 = vmatprep.mubr.f32.mxu1 %v3687_v40  ;;  %v3927_v56 = vld [vmem:[%s20055_s12 + $0x758] sm:$0xff]  ;;  %v3912_v40 = vld [vmem:[%s20055_s12 + $0x6e0] sm:$0xff]  ;;  %v13894_v37 = vpack.c.bf16 %v3895_v59, %v3894_v58  ;;  %v3898_v3 = vld [vmem:[%s20055_s12 + $0x670] sm:$0xff] }
0x1020   :  { %13883 = vmatpush3.bf16.msra.mxu0 %v13882_v30  ;;  %13915 = vmatpush3.bf16.msra.mxu1 %v13914_v10  ;;  %v3911_v30 = vld [vmem:[%s20055_s12 + $0x6d8] sm:$0xff]  ;;  %v3942_v10 = vld [vmem:[%s20055_s12 + $0x7d0] sm:$0xff]  ;;  %v13926_v60 = vpack.c.bf16 %v3927_v56, %v3926_v51  ;;  %v3896_v1 = vld [vmem:[%s20055_s12 + $0x660] sm:$0xff]  ;;  %v13896_v31 = vpack.c.bf16 %v3913_v20, %v3912_v40 }
0x1021   :  { %13885 = vmatprep.subr.bf16.mxu0 %v13884_v42  ;;  %13917 = vmatprep.subr.bf16.mxu1 %v13916_v57  ;;  %v3943_v42 = vld [vmem:[%s20055_s12 + $0x7d8] sm:$0xff]  ;;  %v13890_v57 = vpack.c.bf16 %v3893_v12, %v3892_v34  ;;  %v13892_v23 = vpack.c.bf16 %v3911_v30, %v3910_v44  ;;  %v3946_v12 = vld [vmem:[%s20055_s12 + $0x7f0] sm:$0xff] }
0x1022   :  { %4375 = vmatmul.mubr.f32.gmra.mrb[80].mxu0 %v3684_v39  ;;  %4460 = vmatmul.mubr.f32.gmra.mrb[80].mxu1 %v3686_v54  ;;  %v13924_v16 = vpack.c.bf16 %v3943_v42, %v3942_v10  ;;  %v13928_v39 = vpack.c.bf16 %v3945_v49, %v3944_v33  ;;  %v3928_v54 = vld [vmem:[%s20055_s12 + $0x760] sm:$0xff]  ;;  %v3915_v34 = vld [vmem:[%s20055_s12 + $0x6f8] sm:$0xff] }
0x1023   :  { %4529 = vmatprep.mubr.f32.mxu0 %v3641_v11  ;;  %4614 = vmatprep.mubr.f32.mxu1 %v3643_v8  ;;  %v3947_v11 = vld [vmem:[%s20055_s12 + $0x7f8] sm:$0xff]  ;;  %v17222_v8 = vrot.slane %v16714_v14, %v16575_v0 }
0x1024   :  { %13887 = vmatpush3.bf16.msra.mxu0 %v13886_v19  ;;  %13919 = vmatpush3.bf16.msra.mxu1 %v13918_v18  ;;  %v3929_v19 = vld [vmem:[%s20055_s12 + $0x768] sm:$0xff]  ;;  %v3914_v18 = vld [vmem:[%s20055_s12 + $0x6f0] sm:$0xff]  ;;  %v3899_v44 = vld [vmem:[%s20055_s12 + $0x678] sm:$0xff]  ;;  %v13932_v10 = vpack.c.bf16 %v3947_v11, %v3946_v12  ;;  %v3531_v11 = vadd.f32 %v17089_v61, %v17039_v32 }
0x1025   :  { %13889 = vmatprep.subr.bf16.mxu0 %v13888_v52  ;;  %13921 = vmatprep.subr.bf16.mxu1 %v13920_v22  ;;  %v17226_v52 = vrot.slane %v16714_v14, %v16578_v63  ;;  %v13898_v22 = vpack.c.bf16 %v3897_v38, %v3896_v1  ;;  %v13930_v35 = vpack.c.bf16 %v3929_v19, %v3928_v54  ;;  %v3930_v14 = vld [vmem:[%s20055_s12 + $0x770] sm:$0xff]  ;;  %v3931_v42 = vld [vmem:[%s20055_s12 + $0x778] sm:$0xff] }
0x1026   :  { %v13900_v30 = vpack.c.bf16 %v3915_v34, %v3914_v18  ;;  %v13902_v58 = vpack.c.bf16 %v3899_v44, %v3898_v3  ;;  %v3517_v59 = vadd.f32 %v16927_v46, %v17222_v8  ;;  %v13934_v40 = vpack.c.bf16 %v3931_v42, %v3930_v14 }
0x1027   :  { %v3525_v46 = vadd.f32 %v17019_v28, %v17039_v32  ;;  %v3612_v19 = vadd.f32 %v16992_v21, %v17226_v52  ;;  %v3529_v21 = vadd.f32 %v17062_v41, %v17222_v8  ;;  %v3618_v44 = vadd.f32 %v17064_v5, %v17226_v52 }
0x1028   :  { %13891 = vmatpush3.bf16.msra.mxu0 %v13890_v57  ;;  %13923 = vmatpush3.bf16.msra.mxu1 %v13922_v15  ;;  %v3640_v1 = vmax.f32 %v3517_v59, 0.0  ;;  %v3626_v14 = vadd.f32 %v17118_v43, %v17043_v17  ;;  %v3535_v41 = vadd.f32 %v17105_v36, %v17222_v8  ;;  %v3624_v5 = vadd.f32 %v17107_v45, %v17226_v52 }
0x1029   :  { %13893 = vmatprep.subr.bf16.mxu0 %v13892_v23  ;;  %13925 = vmatprep.subr.bf16.mxu1 %v13924_v16  ;;  %v3606_v23 = vadd.f32 %v16929_v62, %v17226_v52  ;;  %v17247_v16 = vld [vmem:[%s20057_s13] ss:$0 sm:$0xff]  ;;  %v3614_v62 = vadd.f32 %v17021_v29, %v17043_v17  ;;  %v3657_v29 = vmax.f32 %v3525_v46, 0.0  ;;  %v3658_v3 = vmax.f32 %v3612_v19, 0.0 }
0x102a   :  { %v3672_v42 = vmax.f32 %v3529_v21, 0.0 }
0x102b   :  { %v3642_v38 = vmax.f32 %v3606_v23, 0.0  ;;  %v3659_v12 = vmax.f32 %v3614_v62, 0.0 }
0x102c   :  { %13895 = vmatpush3.bf16.msra.mxu0 %v13894_v37  ;;  %13927 = vmatpush3.bf16.msra.mxu1 %v13926_v60 }
0x102d   :  { %13897 = vmatprep.subr.bf16.mxu0 %v13896_v31  ;;  %13929 = vmatprep.subr.bf16.mxu1 %v13928_v39  ;;  %v3523_v31 = vadd.f32 %v16990_v26, %v17222_v8 }
0x102f   :  { %v11784_v57 = vpop.f32.mrb[58].mxu0  ;;  %v11828_v15 = vpop.f32.mrb[58].mxu1 }
0x1030   :  { %13899 = vmatpush3.bf16.msra.mxu0 %v13898_v22  ;;  %13931 = vmatpush3.bf16.msra.mxu1 %v13930_v35  ;;  %v11785_v51 = vpop.f32.mrb[59].mxu0  ;;  %v11829_v56 = vpop.f32.mrb[59].mxu1  ;;  %v3620_v22 = vadd.f32 %v17091_v24, %v17043_v17  ;;  %v3656_v35 = vmax.f32 %v3523_v31, 0.0  ;;  %v3537_v24 = vadd.f32 %v17116_v53, %v17039_v32  ;;  %v3688_v32 = vmax.f32 %v3535_v41, 0.0 }
0x1031   :  { %v11786_v20 = vadd.f32 %v11785_v51, %v11784_v57  ;;  %v11830_v33 = vadd.f32 %v11829_v56, %v11828_v15  ;;  %13901 = vmatprep.subr.bf16.mxu0 %v13900_v30  ;;  %13933 = vmatprep.subr.bf16.mxu1 %v13932_v10  ;;  %v3673_v10 = vmax.f32 %v3531_v11, 0.0  ;;  %v3674_v57 = vmax.f32 %v3618_v44, 0.0 }
0x1032   :  { %v3675_v61 = vmax.f32 %v3620_v22, 0.0  ;;  %v3689_v15 = vmax.f32 %v3537_v24, 0.0  ;;  %v3690_v17 = vmax.f32 %v3624_v5, 0.0 }
0x1033   :  { %v4022_v49 = vadd.f32 %v11786_v20, %v17247_v16  ;;  %v11787_v37 = vpop.f32.mrb[60].mxu0  ;;  %v11831_v60 = vpop.f32.mrb[60].mxu1 }
0x1034   :  { %13903 = vmatpush3.bf16.msra.mxu0 %v13902_v58  ;;  %13935 = vmatpush3.bf16.msra.mxu1 %v13934_v40  ;;  %v11788_v39 = vpop.f32.mrb[61].mxu0  ;;  %v11832_v54 = vpop.f32.mrb[61].mxu1  ;;  %v3691_v58 = vmax.f32 %v3626_v14, 0.0 }
0x1035   :  { %v4107_v28 = vadd.f32 %v11830_v33, %v4022_v49  ;;  %v11789_v18 = vadd.f32 %v11788_v39, %v11787_v37  ;;  %v11833_v34 = vadd.f32 %v11832_v54, %v11831_v60 }
0x1037   :  { %v4027_v26 = vadd.f32 %v11789_v18, %v17247_v16  ;;  %4530 = vmatmul.mubr.f32.vlgmr.msra.gmra.mrb[82].mxu0 %v3640_v1  ;;  %4615 = vmatmul.mubr.f32.vlgmr.msra.gmra.mrb[82].mxu1 %v3642_v38 }
0x1038   :  { %4534 = vmatprep.mubr.f32.mxu0 %v3657_v29  ;;  %4619 = vmatprep.mubr.f32.mxu1 %v3659_v12 }
0x1039   :  { %v4112_v30 = vadd.f32 %v11833_v34, %v4027_v26 }
0x103b   :  { %4535 = vmatmul.mubr.f32.gmra.mrb[84].mxu0 %v3656_v35  ;;  %4620 = vmatmul.mubr.f32.gmra.mrb[84].mxu1 %v3658_v3 }
0x103c   :  { %4539 = vmatprep.mubr.f32.mxu0 %v3673_v10  ;;  %4624 = vmatprep.mubr.f32.mxu1 %v3675_v61 }
0x103f   :  { %4540 = vmatmul.mubr.f32.gmra.mrb[86].mxu0 %v3672_v42  ;;  %4625 = vmatmul.mubr.f32.gmra.mrb[86].mxu1 %v3674_v57 }
0x1040   :  { %4544 = vmatprep.mubr.f32.mxu0 %v3689_v15  ;;  %4629 = vmatprep.mubr.f32.mxu1 %v3691_v58 }
0x1043   :  { %4545 = vmatmul.mubr.f32.gmra.mrb[88].mxu0 %v3688_v32  ;;  %4630 = vmatmul.mubr.f32.gmra.mrb[88].mxu1 %v3690_v17 }
0x1044   :  { %4827 = vmatprep.mubr.f32.mxu0 %v15022_v27 }
0x10c1   :  { %v11790_v53 = vpop.f32.mrb[62].mxu0  ;;  %v11834_v43 = vpop.f32.mrb[62].mxu1 }
0x10c2   :  { %v11791_v59 = vpop.f32.mrb[63].mxu0  ;;  %v11835_v23 = vpop.f32.mrb[63].mxu1 }
0x10c3   :  { %v11792_v36 = vadd.f32 %v11791_v59, %v11790_v53  ;;  %v11836_v8 = vadd.f32 %v11835_v23, %v11834_v43 }
0x10c5   :  { %v4032_v45 = vadd.f32 %v11792_v36, %v17247_v16  ;;  %v11793_v52 = vpop.f32.mrb[64].mxu0  ;;  %v11837_v51 = vpop.f32.mrb[64].mxu1 }
0x10c6   :  { %v11794_v56 = vpop.f32.mrb[65].mxu0  ;;  %v11838_v40 = vpop.f32.mrb[65].mxu1 }
0x10c7   :  { %v4117_v20 = vadd.f32 %v11836_v8, %v4032_v45  ;;  %v11795_v33 = vadd.f32 %v11794_v56, %v11793_v52  ;;  %v11839_v46 = vadd.f32 %v11838_v40, %v11837_v51 }
0x10c9   :  { %v4037_v62 = vadd.f32 %v11795_v33, %v17247_v16  ;;  %v11872_v49 = vpop.f32.mrb[66].mxu0  ;;  %v11916_v37 = vpop.f32.mrb[66].mxu1 }
0x10ca   :  { %v11873_v60 = vpop.f32.mrb[67].mxu0  ;;  %v11917_v1 = vpop.f32.mrb[67].mxu1 }
0x10cb   :  { %v4122_v38 = vadd.f32 %v11839_v46, %v4037_v62  ;;  %v11874_v31 = vadd.f32 %v11873_v60, %v11872_v49  ;;  %v11918_v39 = vadd.f32 %v11917_v1, %v11916_v37 }
0x10cd   :  { %v4192_v54 = vadd.f32 %v11874_v31, %v4107_v28  ;;  %v11875_v19 = vpop.f32.mrb[68].mxu0  ;;  %v11919_v18 = vpop.f32.mrb[68].mxu1 }
0x10ce   :  { %v11876_v34 = vpop.f32.mrb[69].mxu0  ;;  %v11920_v29 = vpop.f32.mrb[69].mxu1 }
0x10cf   :  { %v4277_v12 = vadd.f32 %v11918_v39, %v4192_v54  ;;  %v11877_v11 = vadd.f32 %v11876_v34, %v11875_v19  ;;  %v11921_v22 = vadd.f32 %v11920_v29, %v11919_v18 }
0x10d1   :  { %v4197_v26 = vadd.f32 %v11877_v11, %v4112_v30  ;;  %v11878_v35 = vpop.f32.mrb[70].mxu0  ;;  %v11922_v3 = vpop.f32.mrb[70].mxu1 }
0x10d2   :  { %v11879_v21 = vpop.f32.mrb[71].mxu0  ;;  %v11923_v16 = vpop.f32.mrb[71].mxu1 }
0x10d3   :  { %v4282_v44 = vadd.f32 %v11921_v22, %v4197_v26  ;;  %v11880_v10 = vadd.f32 %v11879_v21, %v11878_v35  ;;  %v11924_v61 = vadd.f32 %v11923_v16, %v11922_v3 }
0x10d5   :  { %v4202_v24 = vadd.f32 %v11880_v10, %v4117_v20  ;;  %v11881_v14 = vpop.f32.mrb[72].mxu0  ;;  %v11925_v42 = vpop.f32.mrb[72].mxu1 }
0x10d6   :  { %v11882_v57 = vpop.f32.mrb[73].mxu0  ;;  %v11926_v28 = vpop.f32.mrb[73].mxu1 }
0x10d7   :  { %v4287_v41 = vadd.f32 %v11924_v61, %v4202_v24  ;;  %v11883_v5 = vadd.f32 %v11882_v57, %v11881_v14  ;;  %v11927_v15 = vadd.f32 %v11926_v28, %v11925_v42 }
0x10d9   :  { %v4207_v58 = vadd.f32 %v11883_v5, %v4122_v38 }
0x10db   :  { %v4292_v32 = vadd.f32 %v11927_v15, %v4207_v58 }
0x10e9   :  { %v11960_v17 = vpop.f32.mrb[74].mxu0  ;;  %v12004_v53 = vpop.f32.mrb[74].mxu1 }
0x10ea   :  { %v11961_v30 = vpop.f32.mrb[75].mxu0  ;;  %v12005_v43 = vpop.f32.mrb[75].mxu1 }
0x10eb   :  { %v11962_v59 = vadd.f32 %v11961_v30, %v11960_v17  ;;  %v12006_v23 = vadd.f32 %v12005_v43, %v12004_v53 }
0x10ed   :  { %v4362_v36 = vadd.f32 %v11962_v59, %v4277_v12  ;;  %v11963_v8 = vpop.f32.mrb[76].mxu0  ;;  %v12007_v45 = vpop.f32.mrb[76].mxu1 }
0x10ee   :  { %v11964_v52 = vpop.f32.mrb[77].mxu0  ;;  %v12008_v51 = vpop.f32.mrb[77].mxu1 }
0x10ef   :  { %v4447_v56 = vadd.f32 %v12006_v23, %v4362_v36  ;;  %v11965_v40 = vadd.f32 %v11964_v52, %v11963_v8  ;;  %v12009_v20 = vadd.f32 %v12008_v51, %v12007_v45 }
0x10f1   :  { %v4367_v33 = vadd.f32 %v11965_v40, %v4282_v44  ;;  %v11966_v46 = vpop.f32.mrb[78].mxu0  ;;  %v12010_v62 = vpop.f32.mrb[78].mxu1 }
0x10f2   :  { %v11967_v49 = vpop.f32.mrb[79].mxu0  ;;  %v12011_v37 = vpop.f32.mrb[79].mxu1 }
0x10f3   :  { %v4452_v60 = vadd.f32 %v12009_v20, %v4367_v33  ;;  %v11968_v1 = vadd.f32 %v11967_v49, %v11966_v46  ;;  %v12012_v38 = vadd.f32 %v12011_v37, %v12010_v62 }
0x10f5   :  { %v4372_v31 = vadd.f32 %v11968_v1, %v4287_v41  ;;  %v11969_v39 = vpop.f32.mrb[80].mxu0  ;;  %v12013_v54 = vpop.f32.mrb[80].mxu1 }
0x10f6   :  { %v11970_v19 = vpop.f32.mrb[81].mxu0  ;;  %v12014_v18 = vpop.f32.mrb[81].mxu1 }
0x10f7   :  { %v4457_v34 = vadd.f32 %v12012_v38, %v4372_v31  ;;  %v11971_v29 = vadd.f32 %v11970_v19, %v11969_v39  ;;  %v12015_v12 = vadd.f32 %v12014_v18, %v12013_v54 }
0x10f9   :  { %v4377_v11 = vadd.f32 %v11971_v29, %v4292_v32 }
0x10fb   :  { %v4462_v22 = vadd.f32 %v12015_v12, %v4377_v11  ;;  %v10984_v12 = vld [vmem:[%s20115_s4 + $0x80] sm:$0xff]  ;;  %v10986_v11 = vld [vmem:[%s20115_s4 + $0x90] sm:$0xff] }
0x110a   :  { %v12048_v26 = vpop.f32.mrb[82].mxu0  ;;  %v12092_v35 = vpop.f32.mrb[82].mxu1 }
0x110b   :  { %v12049_v3 = vpop.f32.mrb[83].mxu0  ;;  %v12093_v21 = vpop.f32.mrb[83].mxu1 }
0x110c   :  { %v12050_v16 = vadd.f32 %v12049_v3, %v12048_v26  ;;  %v12094_v44 = vadd.f32 %v12093_v21, %v12092_v35  ;;  %v10989_v26 = vld [vmem:[%s20115_s4 + $0xa8] sm:$0xff]  ;;  %v10991_v35 = vld [vmem:[%s20115_s4 + $0xb8] sm:$0xff]  ;;  %v10988_v21 = vld [vmem:[%s20115_s4 + $0xa0] sm:$0xff] }
0x110d   :  { %v13940_v3 = vpack.c.bf16 %v10991_v35, %v10989_v26 }
0x110e   :  { %v4532_v10 = vadd.f32 %v12050_v16, %v4447_v56  ;;  %v12051_v61 = vpop.f32.mrb[84].mxu0  ;;  %v12095_v24 = vpop.f32.mrb[84].mxu1  ;;  %v10990_v16 = vld [vmem:[%s20115_s4 + $0xb0] sm:$0xff] }
0x110f   :  { %v12052_v14 = vpop.f32.mrb[85].mxu0  ;;  %v12096_v42 = vpop.f32.mrb[85].mxu1 }
0x1110   :  { %v4617_v57 = vadd.f32 %v12094_v44, %v4532_v10  ;;  %v12053_v28 = vadd.f32 %v12052_v14, %v12051_v61  ;;  %v12097_v41 = vadd.f32 %v12096_v42, %v12095_v24  ;;  %v13942_v44 = vpack.c.bf16 %v10990_v16, %v10988_v21  ;;  %v10993_v10 = vld [vmem:[%s20115_s4 + $0xc8] sm:$0xff]  ;;  %v10995_v61 = vld [vmem:[%s20115_s4 + $0xd8] sm:$0xff]  ;;  %v10992_v14 = vld [vmem:[%s20115_s4 + $0xc0] sm:$0xff] }
0x1111   :  { %v13944_v24 = vpack.c.bf16 %v10995_v61, %v10993_v10  ;;  %v10994_v42 = vld [vmem:[%s20115_s4 + $0xd0] sm:$0xff] }
0x1112   :  { %v17279_v5 = vadd.f32 %v4617_v57, %v15651_v9  ;;  %v4537_v15 = vadd.f32 %v12053_v28, %v4452_v60  ;;  %v12054_v58 = vpop.f32.mrb[86].mxu0  ;;  %v12098_v32 = vpop.f32.mrb[86].mxu1  ;;  %v13946_v57 = vpack.c.bf16 %v10994_v42, %v10992_v14  ;;  %v10997_v28 = vld [vmem:[%s20115_s4 + $0xe8] sm:$0xff] }
0x1113   :  { %v12055_v17 = vpop.f32.mrb[87].mxu0  ;;  %v12099_v53 = vpop.f32.mrb[87].mxu1 }
0x1114   :  { %v4622_v30 = vadd.f32 %v12097_v41, %v4537_v15  ;;  %v12056_v43 = vadd.f32 %v12055_v17, %v12054_v58  ;;  %v12100_v59 = vadd.f32 %v12099_v53, %v12098_v32  ;;  %v4641_v23 = vsel %vm231_vm2, %v17279_v5, 0.0  ;;  %v10999_v41 = vld [vmem:[%s20115_s4 + $0xf8] sm:$0xff]  ;;  %v10996_v58 = vld [vmem:[%s20115_s4 + $0xe0] sm:$0xff]  ;;  %v10998_v32 = vld [vmem:[%s20115_s4 + $0xf0] sm:$0xff] }
0x1115   :  { %4642 = vadd.xlane.f32.xlu0 %v4641_v23  ;;  %v4657_v36 = vmul.f32 %v17279_v5, %v17279_v5  ;;  %v13948_v15 = vpack.c.bf16 %v10999_v41, %v10997_v28  ;;  %v13950_v17 = vpack.c.bf16 %v10998_v32, %v10996_v58 }
0x1116   :  { %v17286_v8 = vadd.f32 %v4622_v30, %v15659_v2  ;;  %v4542_v9 = vadd.f32 %v12056_v43, %v4457_v34  ;;  %v12057_v45 = vpop.f32.mrb[88].mxu0  ;;  %v12101_v52 = vpop.f32.mrb[88].mxu1  ;;  %v10987_v34 = vld [vmem:[%s20115_s4 + $0x98] sm:$0xff] }
0x1117   :  { %v12058_v51 = vpop.f32.mrb[89].mxu0  ;;  %v12102_v56 = vpop.f32.mrb[89].mxu1  ;;  %v4661_v40 = vsel %vm231_vm2, %v4657_v36, 0.0 }
0x1118   :  { %v4627_v20 = vadd.f32 %v12100_v59, %v4542_v9  ;;  %v12059_v33 = vadd.f32 %v12058_v51, %v12057_v45  ;;  %v12103_v46 = vadd.f32 %v12102_v56, %v12101_v52  ;;  %v4658_v62 = vmul.f32 %v17286_v8, %v17286_v8 }
0x1119   :  { %4662 = vadd.xlane.f32.xlu0 %v4661_v40  ;;  %v4644_v1 = vsel %vm231_vm2, %v17286_v8, 0.0 }
0x111a   :  { %v17292_v49 = vadd.f32 %v4627_v20, %v15867_v25  ;;  %v4547_v37 = vadd.f32 %v12059_v33, %v4462_v22  ;;  %v4664_v2 = vsel %vm231_vm2, %v4658_v62, 0.0  ;;  %v13938_v22 = vpack.c.bf16 %v10986_v11, %v10984_v12 }
0x111b   :  { %4665 = vadd.xlane.f32.xlu1 %v4664_v2 }
0x111c   :  { %v4632_v60 = vadd.f32 %v12103_v46, %v4547_v37  ;;  %v4659_v38 = vmul.f32 %v17292_v49, %v17292_v49  ;;  %v4647_v25 = vsel %vm231_vm2, %v17292_v49, 0.0 }
0x111d   :  { %4645 = vadd.xlane.f32.xlu0 %v4644_v1 }
0x111e   :  { %v17300_v31 = vadd.f32 %v4632_v60, %v15880_v4  ;;  %v4667_v39 = vsel %vm231_vm2, %v4659_v38, 0.0  ;;  %v10985_v4 = vld [vmem:[%s20115_s4 + $0x88] sm:$0xff] }
0x111f   :  { %4668 = vadd.xlane.f32.xlu1 %v4667_v39  ;;  %v13936_v29 = vpack.c.bf16 %v10987_v34, %v10985_v4 }
0x1120   :  { %v4660_v54 = vmul.f32 %v17300_v31, %v17300_v31  ;;  %v4650_v18 = vsel %vm231_vm2, %v17300_v31, 0.0 }
0x1121   :  { %4648 = vadd.xlane.f32.xlu0 %v4647_v25  ;;  %13937 = vmatprep.subr.bf16.mxu0 %v13936_v29  ;;  %v10982_v29 = vld [vmem:[%s20058_s14] ss:$0 sm:$0xff] }
0x1122   :  { %v4670_v19 = vsel %vm231_vm2, %v4660_v54, 0.0  ;;  %13939 = vmatpush1.bf16.msra.mxu0 %v13938_v22  ;;  %v10983_v22 = vld [vmem:[%s20059_s15] ss:$0 sm:$0xff] }
0x1123   :  { %4671 = vadd.xlane.f32.xlu1 %v4670_v19  ;;  %13941 = vmatprep.subr.bf16.mxu0 %v13940_v3 }
0x1125   :  { %4651 = vadd.xlane.f32.xlu0 %v4650_v18 }
0x1126   :  { %13943 = vmatpush1.bf16.msra.mxu0 %v13942_v44 }
0x1127   :  { %13945 = vmatprep.subr.bf16.mxu0 %v13944_v24 }
0x112a   :  { %13947 = vmatpush1.bf16.msra.mxu0 %v13946_v57 }
0x112b   :  { %13949 = vmatprep.subr.bf16.mxu0 %v13948_v15 }
0x112e   :  { %13951 = vmatpush1.bf16.msra.mxu0 %v13950_v17 }
0x11a2   :  { %v4643_v53 = vpop.xlane.xlu0 %4642 }
0x11a3   :  { %v4653_v30 = vmul.f32 0.015625, %v4643_v53 }
0x11a5   :  { %v4677_v59 = vmul.f32 %v4653_v30, %v4653_v30  ;;  %v4685_v4 = vsub.f32 %v17279_v5, %v4653_v30 }
0x11a6   :  { %v4663_v43 = vpop.xlane.xlu0 %4662 }
0x11a7   :  { %v4673_v23 = vmul.f32 0.015625, %v4663_v43 }
0x11a8   :  { %v4666_v36 = vpop.xlane.xlu1 %4665 }
0x11a9   :  { %v4681_v9 = vsub.f32 %v4673_v23, %v4677_v59  ;;  %v4674_v40 = vmul.f32 0.015625, %v4666_v36 }
0x11aa   :  { %v4646_v45 = vpop.xlane.xlu0 %4645 }
0x11ab   :  { %v4689_v52 = vadd.f32 1e-05, %v4681_v9  ;;  %v4654_v51 = vmul.f32 0.015625, %v4646_v45 }
0x11ac   :  { %v4669_v56 = vpop.xlane.xlu1 %4668 }
0x11ad   :  { %14922 = vrsqrt.f32 %v4689_v52  ;;  %v4678_v20 = vmul.f32 %v4654_v51, %v4654_v51  ;;  %v4675_v2 = vmul.f32 0.015625, %v4669_v56  ;;  %v4686_v21 = vsub.f32 %v17286_v8, %v4654_v51 }
0x11ae   :  { %v4649_v33 = vpop.xlane.xlu0 %4648 }
0x11af   :  { %v4682_v46 = vsub.f32 %v4674_v40, %v4678_v20  ;;  %v4655_v62 = vmul.f32 0.015625, %v4649_v33 }
0x11b0   :  { %v4672_v1 = vpop.xlane.xlu1 %4671 }
0x11b1   :  { %v4690_v37 = vadd.f32 1e-05, %v4682_v46  ;;  %v4679_v60 = vmul.f32 %v4655_v62, %v4655_v62  ;;  %v4676_v19 = vmul.f32 0.015625, %v4672_v1  ;;  %v4687_v10 = vsub.f32 %v17292_v49, %v4655_v62 }
0x11b2   :  { %v4652_v38 = vpop.xlane.xlu0 %4651 }
0x11b3   :  { %14924 = vrsqrt.f32 %v4690_v37  ;;  %v4683_v39 = vsub.f32 %v4675_v2, %v4679_v60  ;;  %v4656_v25 = vmul.f32 0.015625, %v4652_v38 }
0x11b5   :  { %v4691_v54 = vadd.f32 1e-05, %v4683_v39  ;;  %v4680_v18 = vmul.f32 %v4656_v25, %v4656_v25  ;;  %v4688_v57 = vsub.f32 %v17300_v31, %v4656_v25  ;;  %v11000_v31 = vld [vmem:[%s20118_s27 + $0x2] sm:$0x3]  ;;  %s20128_s27 = smov 64  }
0x11b6   :  { %v4744_v58 = vrot.slane %v11000_v31, %v15267_v47  ;;  %v4748_v43 = vrot.slane %v11000_v31, %v15274_v50 }
0x11b7   :  { %v14923_v34 = vpop.eup %14922  ;;  %14926 = vrsqrt.f32 %v4691_v54  ;;  %v4684_v12 = vsub.f32 %v4676_v19, %v4680_v18 }
0x11b8   :  { %v4697_v11 = vmul.f32 %v14923_v34, %v4685_v4 }
0x11b9   :  { %v4692_v26 = vadd.f32 1e-05, %v4684_v12 }
0x11ba   :  { %v4707_v35 = vmul.f32 %v10982_v29, %v4697_v11 }
0x11bb   :  { %14928 = vrsqrt.f32 %v4692_v26 }
0x11bc   :  { %v17365_v3 = vadd.f32 %v10983_v22, %v4707_v35 }
0x11bd   :  { %v14925_v5 = vpop.eup %14924 }
0x11be   :  { %v4698_v16 = vmul.f32 %v14925_v5, %v4686_v21  ;;  %11001 = vmatmul.mubr.msk.f32.vlgmr.msra.gmra.mrb[90].mxu0 %vm231_vm2, %v17365_v3 }
0x11bf   :  { %4833 = vmatprep.mubr.f32.mxu0 %v15022_v27 }
0x11c0   :  { %v4708_v44 = vmul.f32 %v10982_v29, %v4698_v16 }
0x11c1   :  { %v14927_v61 = vpop.eup %14926 }
0x11c2   :  { %v4699_v24 = vmul.f32 %v14927_v61, %v4687_v10  ;;  %v17372_v14 = vadd.f32 %v10983_v22, %v4708_v44 }
0x11c4   :  { %v4709_v42 = vmul.f32 %v10982_v29, %v4699_v24  ;;  %11002 = vmatmul.mubr.msk.f32.gmra.mrb[92].mxu0 %vm231_vm2, %v17372_v14 }
0x11c5   :  { %v14929_v8 = vpop.eup %14928  ;;  %4839 = vmatprep.mubr.f32.mxu0 %v15022_v27 }
0x11c6   :  { %v4700_v28 = vmul.f32 %v14929_v8, %v4688_v57  ;;  %v17378_v41 = vadd.f32 %v10983_v22, %v4709_v42 }
0x11c8   :  { %v4710_v15 = vmul.f32 %v10982_v29, %v4700_v28  ;;  %11003 = vmatmul.mubr.msk.f32.gmra.mrb[94].mxu0 %vm231_vm2, %v17378_v41 }
0x11c9   :  { %4845 = vmatprep.mubr.f32.mxu0 %v15022_v27 }
0x11ca   :  { %v17383_v49 = vadd.f32 %v10983_v22, %v4710_v15 }
0x11cc   :  { %11004 = vmatmul.mubr.msk.f32.gmra.mrb[96].mxu0 %vm231_vm2, %v17383_v49 }
0x1291   :  { %v4829_v32 = vpop.f32.mrb[90].mxu0 }
0x1292   :  { %v4830_v17 = vadd.f32 %v4829_v32, %v4744_v58  ;;  %v4831_v53 = vpop.f32.mrb[91].mxu0 }
0x1293   :  { %v4832_v9 = vadd.f32 %v4831_v53, %v4748_v43 }
0x1294   :  { %v17391_v30 = vmul.f32 0.25, %v4830_v17 }
0x1296   :  { %12902 = vmatprep.mubr.msk.f32.mxu1 %vm349_vm3, %v17391_v30 }
0x1297   :  { %v4835_v59 = vpop.f32.mrb[92].mxu0 }
0x1298   :  { %v4836_v23 = vadd.f32 %v4835_v59, %v4744_v58  ;;  %v4837_v36 = vpop.f32.mrb[93].mxu0 }
0x1299   :  { %v4838_v45 = vadd.f32 %v4837_v36, %v4748_v43 }
0x129a   :  { %v17396_v52 = vpack.i.bf16 %v4836_v23, %v4830_v17  ;;  %v17406_v62 = vmul.f32 0.25, %v4836_v23 }
0x129b   :  { %v4841_v51 = vpop.f32.mrb[94].mxu0  ;;  %v13958_v56 = vpack.c.bf16 %v4838_v45, %v4832_v9  ;;  %v17398_v40 = vpack.i.bf16 %v4838_v45, %v4832_v9 }
0x129c   :  { %v17400_v20 = vadd.f32 %v4841_v51, %v4744_v58  ;;  %v4843_v33 = vpop.f32.mrb[95].mxu0  ;;  %14786 = vrot.lane.b32.xlu1 %v17396_v52, %s20122_s8  ;;  %14781 = vrot.lane.b32.xlu0 %v17396_v52, %s20128_s27 }
0x129d   :  { %v4844_v46 = vadd.f32 %v4843_v33, %v4748_v43 }
0x129f   :  { %v4847_v37 = vpop.f32.mrb[96].mxu0 }
0x12a0   :  { %v17408_v2 = vadd.f32 %v4847_v37, %v4744_v58  ;;  %5057 = vrot.lane.b32.xlu1 %v17391_v30, %s20129_s1  ;;  %5059 = vrot.lane.b32.xlu0 %v17406_v62, %s20129_s1  ;;  %v4849_v60 = vpop.f32.mrb[97].mxu0 }
0x12a1   :  { %v4850_v1 = vadd.f32 %v4849_v60, %v4748_v43 }
0x12a2   :  { %v17416_v38 = vpack.i.bf16 %v17408_v2, %v17400_v20 }
0x12a3   :  { %v17418_v39 = vpack.c.bf16 %v4850_v1, %v4844_v46  ;;  %v17420_v25 = vpack.i.bf16 %v4850_v1, %v4844_v46 }
0x12a4   :  { %14791 = vrot.lane.b32.xlu1 %v17396_v52, %s20130_s21  ;;  %5421 = vrot.lane.b32.xlu0 %v17391_v30, %s20131_s28 }
0x12a8   :  { %5423 = vrot.lane.b32.xlu1 %v17406_v62, %s20131_s28 }
0x130e   :  { %v14787_v54 = vpop.permute.xlu1 %14786  ;;  %v14782_v19 = vpop.permute.xlu0 %14781 }
0x130f   :  { %v14789_v18 = vunpack.i.h.bf16 %v14787_v54  ;;  %v14788_v4 = vunpack.i.l.bf16 %v14787_v54  ;;  %v14784_v34 = vunpack.i.h.bf16 %v14782_v19  ;;  %v14783_v29 = vunpack.i.l.bf16 %v14782_v19 }
0x1311   :  { %v13962_v12 = vpack.c.bf16 %v14789_v18, %v14788_v4  ;;  %v13952_v11 = vpack.c.bf16 %v14784_v34, %v14783_v29 }
0x1312   :  { %v5058_v22 = vpop.permute.xlu1 %5057  ;;  %v5060_v26 = vpop.permute.xlu0 %5059 }
0x1313   :  { %13954 = vmatprep.subr.msk.bf16.mxu1 %vm15298_vm4, %v13952_v11  ;;  %13964 = vmatprep.subr.msk.bf16.mxu0 %vm15298_vm4, %v13962_v12 }
0x1314   :  { %12916 = vmatprep.mubr.msk.f32.mxu0 %vm349_vm3, %v5058_v22  ;;  %13957 = vmatpush3.bf16.xpose.msk.msra.mxu1 %vm15298_vm4, %v13952_v11 }
0x1315   :  { %13967 = vmatpush3.bf16.xpose.msk.msra.mxu0 %vm15298_vm4, %v13962_v12  ;;  %13959 = vmatprep.subr.bf16.mxu1 %v13958_v56 }
0x1316   :  { %v14792_v35 = vpop.permute.xlu1 %14791  ;;  %v5422_v44 = vpop.permute.xlu0 %5421 }
0x1317   :  { %v14794_v21 = vunpack.i.h.bf16 %v14792_v35  ;;  %v14793_v5 = vunpack.i.l.bf16 %v14792_v35 }
0x1319   :  { %v13980_v16 = vpack.c.bf16 %v14794_v21, %v14793_v5 }
0x131a   :  { %v5424_v10 = vpop.permute.xlu1 %5423 }
0x131b   :  { %12903 = vmatmul.mubr.msk.f32.vlgmr.msra.gmra.mrb[90].mxu1 %vm349_vm3, %v17406_v62  ;;  %13982 = vmatprep.subr.msk.bf16.mxu0 %vm15298_vm4, %v13980_v16 }
0x131c   :  { %12917 = vmatmul.mubr.msk.f32.vlgmr.msra.gmra.mrb[98].mxu0 %vm349_vm3, %v5060_v26  ;;  %13961 = vmatpush3.bf16.msra.mxu1 %v13958_v56 }
0x131d   :  { %13985 = vmatpush3.bf16.xpose.msk.msra.mxu0 %vm15298_vm4, %v13980_v16  ;;  %12944 = vmatprep.mubr.msk.f32.mxu0 %vm349_vm3, %v5422_v44 }
0x1324   :  { %12945 = vmatmul.mubr.msk.f32.vlgmr.msra.gmra.mrb[100].mxu0 %vm349_vm3, %v5424_v10 }
0x13ee   :  { %v12904_v61 = vpop.f32.mrb[90].mxu1 }
0x13ef   :  { %v12918_v24 = vpop.f32.mrb[98].mxu0  ;;  %v4945_v42 = vpop.f32.mrb[91].mxu1  ;;  %v4957_v57 = vsel %vm349_vm3, %v12904_v61, -inf }
0x13f0   :  { %v5139_v8 = vpop.f32.mrb[99].mxu0  ;;  %4958 = vmax.xlane.f32.xlu1 %v4957_v57  ;;  %v4954_v28 = vsel %vm349_vm3, %v4945_v42, -inf  ;;  %v5151_v32 = vsel %vm349_vm3, %v12918_v24, -inf }
0x13f1   :  { %4955 = vmax.xlane.f32.xlu0 %v4954_v28  ;;  %v5148_v15 = vsel %vm349_vm3, %v5139_v8, -inf }
0x13f5   :  { %5149 = vmax.xlane.f32.xlu0 %v5148_v15 }
0x13f7   :  { %v17449_v31 = vpop.f32.mrb[100].mxu0 }
0x13f8   :  { %v17451_v58 = vpop.f32.mrb[101].mxu0  ;;  %v5515_v12 = vsel %vm349_vm3, %v17449_v31, -inf }
0x13f9   :  { %5152 = vmax.xlane.f32.xlu0 %v5151_v32  ;;  %v5512_v29 = vsel %vm349_vm3, %v17451_v58, -inf }
0x147d   :  { %v4959_v17 = vpop.xlane.xlu1 %4958 }
0x147e   :  { %v4961_v53 = vsub.f32 %v12904_v61, %v4959_v17  ;;  %v4956_v43 = vpop.xlane.xlu0 %4955 }
0x147f   :  { %v4960_v59 = vsub.f32 %v4945_v42, %v4956_v43 }
0x1480   :  { %v4964_v23 = vmul.f32 1.442695, %v4961_v53 }
0x1481   :  { %v4962_v36 = vmul.f32 1.442695, %v4960_v59 }
0x1482   :  { %14930 = vpow2.f32 %v4964_v23  ;;  %v5150_v9 = vpop.xlane.xlu0 %5149 }
0x1483   :  { %14932 = vpow2.f32 %v4962_v36  ;;  %v5154_v45 = vsub.f32 %v5139_v8, %v5150_v9 }
0x1485   :  { %v5156_v51 = vmul.f32 1.442695, %v5154_v45 }
0x1486   :  { %v5153_v56 = vpop.xlane.xlu0 %5152 }
0x1487   :  { %14934 = vpow2.f32 %v5156_v51  ;;  %v5155_v33 = vsub.f32 %v12918_v24, %v5153_v56 }
0x1489   :  { %v5158_v46 = vmul.f32 1.442695, %v5155_v33 }
0x148b   :  { %14936 = vpow2.f32 %v5158_v46 }
0x148c   :  { %v14931_v37 = vpop.eup %14930 }
0x148d   :  { %v14933_v60 = vpop.eup %14932  ;;  %v4969_v1 = vsel %vm349_vm3, %v14931_v37, 0.0 }
0x148e   :  { %4970 = vadd.xlane.f32.xlu0 %v4969_v1  ;;  %v4966_v54 = vsel %vm349_vm3, %v14933_v60, 0.0  ;;  %v11006_v1 = vld [vmem:[%s20121_s5 + $0x48] sm:$0xff] }
0x148f   :  { %4967 = vadd.xlane.f32.xlu1 %v4966_v54  ;;  %v17514_v54 = vmul.f32 0.25, %v17408_v2 }
0x1491   :  { %v14935_v19 = vpop.eup %14934 }
0x1492   :  { %v5160_v18 = vsel %vm349_vm3, %v14935_v19, 0.0 }
0x1493   :  { %5161 = vadd.xlane.f32.xlu1 %v5160_v18 }
0x1495   :  { %v14937_v4 = vpop.eup %14936 }
0x1496   :  { %v5163_v34 = vsel %vm349_vm3, %v14937_v4, 0.0 }
0x1497   :  { %5164 = vadd.xlane.f32.xlu0 %v5163_v34 }
0x14a4   :  { %14796 = vrot.lane.b32.xlu1 %v17398_v40, %s20129_s1 }
0x14a8   :  { %5704 = vrot.lane.b32.xlu1 %v17391_v30, %s20132_s24  ;;  %v17475_v30 = vmul.f32 0.25, %v17400_v20 }
0x14ac   :  { %5706 = vrot.lane.b32.xlu1 %v17406_v62, %s20132_s24 }
0x14ad   :  { %14801 = vrot.lane.b32.xlu0 %v17396_v52, %s20124_s7 }
0x14cc   :  { %5513 = vmax.xlane.f32.xlu0 %v5512_v29 }
0x14d0   :  { %5516 = vmax.xlane.f32.xlu1 %v5515_v12 }
0x14e1   :  { %14806 = vrot.lane.b32.xlu1 %v17398_v40, %s20131_s28 }
0x14e5   :  { %14816 = vrot.lane.b32.xlu1 %v17416_v38, %s20122_s8  ;;  %s20137_s8 = sld [smem:[#allocation17_spill]] }
0x14e9   :  { %6183 = vrot.lane.b32.xlu1 %v17475_v30, %s20129_s1 }
0x151b   :  { %v4971_v52 = vpop.xlane.xlu0 %4970 }
0x151c   :  { %14938 = vrcp.f32 %v4971_v52  ;;  %v4968_v62 = vpop.xlane.xlu1 %4967 }
0x151d   :  { %14940 = vrcp.f32 %v4968_v62 }
0x1520   :  { %v5162_v11 = vpop.xlane.xlu1 %5161 }
0x1521   :  { %14942 = vrcp.f32 %v5162_v11 }
0x1524   :  { %v14797_v22 = vpop.permute.xlu1 %14796  ;;  %v5165_v26 = vpop.xlane.xlu0 %5164 }
0x1525   :  { %v14799_v35 = vunpack.i.h.bf16 %v14797_v22  ;;  %v14798_v21 = vunpack.i.l.bf16 %v14797_v22  ;;  %14944 = vrcp.f32 %v5165_v26 }
0x1526   :  { %v14939_v5 = vpop.eup %14938 }
0x1527   :  { %v14941_v16 = vpop.eup %14940  ;;  %v13968_v44 = vpack.c.bf16 %v14799_v35, %v14798_v21  ;;  %v4975_v24 = vmul.f32 %v14939_v5, %v14931_v37  ;;  %v11007_v37 = vld [vmem:[%s20121_s5 + $0x50] sm:$0xff] }
0x1528   :  { %v5705_v10 = vpop.permute.xlu1 %5704  ;;  %v14802_v20 = vpop.permute.xlu0 %14801  ;;  %v4974_v61 = vmul.f32 %v14941_v16, %v14933_v60 }
0x1529   :  { %v14804_v42 = vunpack.i.h.bf16 %v14802_v20  ;;  %v14803_v57 = vunpack.i.l.bf16 %v14802_v20  ;;  %13969 = vmatprep.subr.bf16.mxu1 %v13968_v44  ;;  %12965 = vmatprep.mubr.msk.f32.mxu0 %vm349_vm3, %v5705_v10 }
0x152a   :  { %12909 = vmatprep.mubr.msk.f32.mxu1 %vm349_vm3, %v4974_v61 }
0x152b   :  { %v14943_v8 = vpop.eup %14942  ;;  %v13994_v28 = vpack.c.bf16 %v14804_v42, %v14803_v57  ;;  %12910 = vmatmul.mubr.msk.f32.vlgmr.msra.gmra.mrb[92].mxu1 %vm349_vm3, %v4975_v24 }
0x152c   :  { %13971 = vmatpush3.bf16.msra.mxu1 %v13968_v44  ;;  %v5168_v15 = vmul.f32 %v14943_v8, %v14935_v19  ;;  %v5707_v53 = vpop.permute.xlu1 %5706 }
0x152d   :  { %13996 = vmatprep.subr.msk.bf16.mxu0 %vm15298_vm4, %v13994_v28 }
0x152e   :  { %12923 = vmatprep.mubr.msk.f32.mxu1 %vm349_vm3, %v5168_v15  ;;  %13999 = vmatpush3.bf16.xpose.msk.msra.mxu0 %vm15298_vm4, %v13994_v28 }
0x152f   :  { %v14945_v32 = vpop.eup %14944 }
0x1530   :  { %v5169_v17 = vmul.f32 %v14945_v32, %v14937_v4 }
0x1532   :  { %12924 = vmatmul.mubr.msk.f32.vlgmr.msra.gmra.mrb[94].mxu1 %vm349_vm3, %v5169_v17 }
0x1535   :  { %12966 = vmatmul.mubr.msk.f32.vlgmr.msra.gmra.mrb[102].mxu0 %vm349_vm3, %v5707_v53 }
0x1536   :  { %12986 = vmatprep.mubr.msk.f32.mxu0 %vm349_vm3, %v17475_v30 }
0x1559   :  { %v5514_v43 = vpop.xlane.xlu0 %5513 }
0x155a   :  { %v5518_v59 = vsub.f32 %v17451_v58, %v5514_v43  ;;  %v11008_v58 = vld [vmem:[%s20121_s5 + $0x58] sm:$0xff]  ;;  %v11009_v43 = vld [vmem:[%s20121_s5 + $0x60] sm:$0xff] }
0x155b   :  { %v17501_v60 = vpack.c.bf16 %v11008_v58, %v11007_v37 }
0x155c   :  { %v5520_v23 = vmul.f32 1.442695, %v5518_v59  ;;  %v11010_v59 = vld [vmem:[%s20121_s5 + $0x68] sm:$0xff] }
0x155d   :  { %v5517_v36 = vpop.xlane.xlu1 %5516  ;;  %13973 = vmatprep.subr.bf16.mxu1 %v17501_v60 }
0x155e   :  { %14946 = vpow2.f32 %v5520_v23  ;;  %v5519_v9 = vsub.f32 %v17449_v31, %v5517_v36  ;;  %13975 = vmatpush3.bf16.msra.mxu1 %v17501_v60  ;;  %v11005_v31 = vld [vmem:[%s20121_s5 + $0x40] sm:$0xff]  ;;  %v17548_v23 = vpack.c.bf16 %v11010_v59, %v11009_v43 }
0x155f   :  { %v17516_v19 = vpack.c.bf16 %v11006_v1, %v11005_v31 }
0x1560   :  { %v5522_v45 = vmul.f32 1.442695, %v5519_v9 }
0x1561   :  { %13977 = vmatprep.subr.bf16.mxu1 %v17516_v19  ;;  %v14807_v18 = vpop.permute.xlu1 %14806 }
0x1562   :  { %14948 = vpow2.f32 %v5522_v45  ;;  %v14809_v21 = vunpack.i.h.bf16 %v14807_v18  ;;  %v14808_v5 = vunpack.i.l.bf16 %v14807_v18 }
0x1564   :  { %v13986_v20 = vpack.c.bf16 %v14809_v21, %v14808_v5 }
0x1565   :  { %v14817_v29 = vpop.permute.xlu1 %14816 }
0x1566   :  { %v14819_v11 = vunpack.i.h.bf16 %v14817_v29  ;;  %v14818_v22 = vunpack.i.l.bf16 %v14817_v29 }
0x1568   :  { %v14947_v51 = vpop.eup %14946  ;;  %v14018_v16 = vpack.c.bf16 %v14819_v11, %v14818_v22 }
0x1569   :  { %v5524_v56 = vsel %vm349_vm3, %v14947_v51, 0.0  ;;  %v6184_v28 = vpop.permute.xlu1 %6183 }
0x156a   :  { %5525 = vadd.xlane.f32.xlu0 %v5524_v56 }
0x156c   :  { %v14949_v33 = vpop.eup %14948 }
0x156d   :  { %v5527_v46 = vsel %vm349_vm3, %v14949_v33, 0.0 }
0x156e   :  { %5528 = vadd.xlane.f32.xlu0 %v5527_v46 }
0x1584   :  { %14811 = vrot.lane.b32.xlu0 %v17416_v38, %s20128_s27 }
0x1588   :  { %6185 = vrot.lane.b32.xlu0 %v17514_v54, %s20129_s1 }
0x15f7   :  { %v5526_v4 = vpop.xlane.xlu0 %5525 }
0x15f8   :  { %14950 = vrcp.f32 %v5526_v4 }
0x15fb   :  { %v5529_v34 = vpop.xlane.xlu0 %5528 }
0x15fc   :  { %14952 = vrcp.f32 %v5529_v34 }
0x15fe   :  { %v12911_v12 = vpop.f32.mrb[92].mxu1 }
0x15ff   :  { %v5048_v52 = vpop.f32.mrb[93].mxu1  ;;  %v14812_v62 = vpop.permute.xlu0 %14811 }
0x1600   :  { %v14814_v26 = vunpack.i.h.bf16 %v14812_v62  ;;  %v14813_v35 = vunpack.i.l.bf16 %v14812_v62 }
0x1602   :  { %v14008_v2 = vpack.c.bf16 %v14814_v26, %v14813_v35  ;;  %v14951_v8 = vpop.eup %14950 }
0x1603   :  { %v5532_v32 = vmul.f32 %v14951_v8, %v14947_v51  ;;  %v6186_v53 = vpop.permute.xlu0 %6185 }
0x1604   :  { %14010 = vmatprep.subr.msk.bf16.mxu0 %vm15298_vm4, %v14008_v2 }
0x1605   :  { %v12925_v44 = vpop.f32.mrb[94].mxu1  ;;  %14013 = vmatpush3.bf16.xpose.msk.msra.mxu0 %vm15298_vm4, %v14008_v2 }
0x1606   :  { %v5250_v10 = vpop.f32.mrb[95].mxu1  ;;  %14020 = vmatprep.subr.msk.bf16.mxu0 %vm15298_vm4, %v14018_v16  ;;  %v14953_v15 = vpop.eup %14952 }
0x1607   :  { %12930 = vmatprep.mubr.msk.f32.mxu1 %vm349_vm3, %v5250_v10  ;;  %v5533_v17 = vmul.f32 %v14953_v15, %v14949_v33 }
0x1608   :  { %12931 = vmatmul.mubr.msk.f32.vlgmr.msra.gmra.mrb[96].mxu1 %vm349_vm3, %v12925_v44  ;;  %v12967_v61 = vpop.f32.mrb[102].mxu0  ;;  %v11012_v44 = vld [vmem:[%s20121_s5 + $0x78] sm:$0xff] }
0x1609   :  { %13979 = vmatpush3.bf16.msra.mxu1 %v17516_v19  ;;  %12937 = vmatprep.mubr.msk.f32.mxu1 %vm349_vm3, %v5048_v52  ;;  %v5786_v24 = vpop.f32.mrb[103].mxu0  ;;  %v5798_v42 = vsel %vm349_vm3, %v12967_v61, -inf }
0x160a   :  { %13987 = vmatprep.subr.bf16.mxu1 %v13986_v20  ;;  %5799 = vmax.xlane.f32.xlu0 %v5798_v42  ;;  %v5795_v57 = vsel %vm349_vm3, %v5786_v24, -inf }
0x160b   :  { %5796 = vmax.xlane.f32.xlu1 %v5795_v57 }
0x160c   :  { %12987 = vmatmul.mubr.msk.f32.vlgmr.msra.gmra.mrb[104].mxu0 %vm349_vm3, %v17514_v54 }
0x160d   :  { %14023 = vmatpush3.bf16.xpose.msk.msra.mxu0 %vm15298_vm4, %v14018_v16  ;;  %13000 = vmatprep.mubr.msk.f32.mxu0 %vm349_vm3, %v6184_v28  ;;  %v11011_v16 = vld [vmem:[%s20121_s5 + $0x70] sm:$0xff] }
0x160e   :  { %v17574_v57 = vpack.c.bf16 %v11012_v44, %v11011_v16 }
0x1610   :  { %12938 = vmatmul.mubr.msk.f32.vlgmr.msra.gmra.mrb[96].mxu1 %vm349_vm3, %v12911_v12 }
0x1611   :  { %13989 = vmatpush3.bf16.msra.mxu1 %v13986_v20  ;;  %12951 = vmatprep.mubr.msk.f32.mxu1 %vm349_vm3, %v5532_v32 }
0x1612   :  { %13991 = vmatprep.subr.bf16.mxu1 %v17548_v23 }
0x1614   :  { %12952 = vmatmul.mubr.msk.f32.vlgmr.msra.gmra.mrb[98].mxu1 %vm349_vm3, %v5533_v17  ;;  %13001 = vmatmul.mubr.msk.f32.vlgmr.msra.gmra.mrb[106].mxu0 %vm349_vm3, %v6186_v53 }
0x1615   :  { %13993 = vmatpush3.bf16.msra.mxu1 %v17548_v23 }
0x1697   :  { %v5800_v36 = vpop.xlane.xlu0 %5799 }
0x1698   :  { %v5802_v9 = vsub.f32 %v12967_v61, %v5800_v36  ;;  %v5797_v45 = vpop.xlane.xlu1 %5796 }
0x1699   :  { %v5801_v51 = vsub.f32 %v5786_v24, %v5797_v45 }
0x169a   :  { %v5805_v56 = vmul.f32 1.442695, %v5802_v9 }
0x169b   :  { %v5803_v33 = vmul.f32 1.442695, %v5801_v51 }
0x169c   :  { %14954 = vpow2.f32 %v5805_v56 }
0x169d   :  { %14956 = vpow2.f32 %v5803_v33 }
0x16a6   :  { %v14955_v46 = vpop.eup %14954 }
0x16a7   :  { %v14957_v37 = vpop.eup %14956  ;;  %v5810_v58 = vsel %vm349_vm3, %v14955_v46, 0.0 }
0x16a8   :  { %5811 = vadd.xlane.f32.xlu1 %v5810_v58  ;;  %v5807_v31 = vsel %vm349_vm3, %v14957_v37, 0.0 }
0x16a9   :  { %5808 = vadd.xlane.f32.xlu0 %v5807_v31 }
0x16b9   :  { %14826 = vrot.lane.b32.xlu1 %v17416_v38, %s20130_s21 }
0x16bd   :  { %6547 = vrot.lane.b32.xlu1 %v17475_v30, %s20131_s28 }
0x16bf   :  { %14821 = vrot.lane.b32.xlu0 %v17398_v40, %s20132_s24 }
0x16c3   :  { %6549 = vrot.lane.b32.xlu0 %v17514_v54, %s20131_s28 }
0x16df   :  { %v12988_v1 = vpop.f32.mrb[104].mxu0 }
0x16e0   :  { %v6071_v18 = vpop.f32.mrb[105].mxu0  ;;  %v6083_v4 = vsel %vm349_vm3, %v12988_v1, -inf }
0x16e1   :  { %v6080_v34 = vsel %vm349_vm3, %v6071_v18, -inf }
0x16e2   :  { %6081 = vmax.xlane.f32.xlu1 %v6080_v34  ;;  %6084 = vmax.xlane.f32.xlu0 %v6083_v4 }
0x16e7   :  { %v12953_v29 = vpop.f32.mrb[98].mxu1  ;;  %v13002_v12 = vpop.f32.mrb[106].mxu0 }
0x16e8   :  { %v5612_v52 = vpop.f32.mrb[99].mxu1  ;;  %v6265_v62 = vpop.f32.mrb[107].mxu0  ;;  %v6277_v11 = vsel %vm349_vm3, %v13002_v12, -inf }
0x16e9   :  { %12958 = vmatprep.mubr.msk.f32.mxu1 %vm349_vm3, %v5612_v52  ;;  %6278 = vmax.xlane.f32.xlu1 %v6277_v11  ;;  %v6274_v40 = vsel %vm349_vm3, %v6265_v62, -inf }
0x16ea   :  { %12959 = vmatmul.mubr.msk.f32.vlgmr.msra.gmra.mrb[96].mxu1 %vm349_vm3, %v12953_v29  ;;  %6275 = vmax.xlane.f32.xlu0 %v6274_v40 }
0x1735   :  { %v5812_v22 = vpop.xlane.xlu1 %5811 }
0x1736   :  { %14958 = vrcp.f32 %v5812_v22  ;;  %v5809_v26 = vpop.xlane.xlu0 %5808 }
0x1737   :  { %14960 = vrcp.f32 %v5809_v26 }
0x1739   :  { %v14827_v35 = vpop.permute.xlu1 %14826 }
0x173a   :  { %v14829_v2 = vunpack.i.h.bf16 %v14827_v35  ;;  %v14828_v21 = vunpack.i.l.bf16 %v14827_v35  ;;  %v14822_v5 = vpop.permute.xlu0 %14821 }
0x173b   :  { %v14824_v10 = vunpack.i.h.bf16 %v14822_v5  ;;  %v14823_v20 = vunpack.i.l.bf16 %v14822_v5 }
0x173c   :  { %v14036_v61 = vpack.c.bf16 %v14829_v2, %v14828_v21 }
0x173d   :  { %v14000_v24 = vpack.c.bf16 %v14824_v10, %v14823_v20  ;;  %v6548_v42 = vpop.permute.xlu1 %6547 }
0x173e   :  { %14038 = vmatprep.subr.msk.bf16.mxu0 %vm15298_vm4, %v14036_v61  ;;  %13028 = vmatprep.mubr.msk.f32.mxu0 %vm349_vm3, %v6548_v42  ;;  %v6550_v17 = vpop.permute.xlu0 %6549 }
0x173f   :  { %14001 = vmatprep.subr.bf16.mxu1 %v14000_v24  ;;  %14041 = vmatpush3.bf16.xpose.msk.msra.mxu0 %vm15298_vm4, %v14036_v61 }
0x1740   :  { %v14959_v8 = vpop.eup %14958  ;;  %14003 = vmatpush3.bf16.msra.mxu1 %v14000_v24 }
0x1741   :  { %v14961_v28 = vpop.eup %14960  ;;  %14005 = vmatprep.subr.bf16.mxu1 %v17574_v57  ;;  %v5816_v32 = vmul.f32 %v14959_v8, %v14955_v46 }
0x1742   :  { %v5815_v15 = vmul.f32 %v14961_v28, %v14957_v37 }
0x1744   :  { %12972 = vmatprep.mubr.msk.f32.mxu1 %vm349_vm3, %v5815_v15 }
0x1745   :  { %12973 = vmatmul.mubr.msk.f32.vlgmr.msra.gmra.mrb[100].mxu1 %vm349_vm3, %v5816_v32 }
0x1746   :  { %14007 = vmatpush3.bf16.msra.mxu1 %v17574_v57  ;;  %13029 = vmatmul.mubr.msk.f32.vlgmr.msra.gmra.mrb[108].mxu0 %vm349_vm3, %v6550_v17 }
0x1747   :  { %14015 = vmatprep.subr.bf16.mxu1 %v17418_v39 }
0x176f   :  { %v6085_v53 = vpop.xlane.xlu0 %6084  ;;  %v6082_v43 = vpop.xlane.xlu1 %6081 }
0x1770   :  { %v6087_v59 = vsub.f32 %v12988_v1, %v6085_v53  ;;  %v6086_v36 = vsub.f32 %v6071_v18, %v6082_v43 }
0x1772   :  { %v6090_v9 = vmul.f32 1.442695, %v6087_v59  ;;  %v6088_v45 = vmul.f32 1.442695, %v6086_v36 }
0x1774   :  { %14962 = vpow2.f32 %v6090_v9 }
0x1775   :  { %14964 = vpow2.f32 %v6088_v45 }
0x1776   :  { %v6279_v51 = vpop.xlane.xlu1 %6278 }
0x1777   :  { %v6281_v56 = vsub.f32 %v13002_v12, %v6279_v51  ;;  %v6276_v33 = vpop.xlane.xlu0 %6275 }
0x1778   :  { %v6280_v46 = vsub.f32 %v6265_v62, %v6276_v33 }
0x1779   :  { %v6284_v37 = vmul.f32 1.442695, %v6281_v56 }
0x177a   :  { %v6282_v58 = vmul.f32 1.442695, %v6280_v46 }
0x177b   :  { %14966 = vpow2.f32 %v6284_v37 }
0x177c   :  { %14968 = vpow2.f32 %v6282_v58 }
0x177e   :  { %v14963_v31 = vpop.eup %14962 }
0x177f   :  { %v14965_v4 = vpop.eup %14964  ;;  %v6095_v34 = vsel %vm349_vm3, %v14963_v31, 0.0 }
0x1780   :  { %6096 = vadd.xlane.f32.xlu1 %v6095_v34  ;;  %v6092_v1 = vsel %vm349_vm3, %v14965_v4, 0.0 }
0x1781   :  { %6093 = vadd.xlane.f32.xlu0 %v6092_v1 }
0x1785   :  { %v14967_v18 = vpop.eup %14966 }
0x1786   :  { %v14969_v29 = vpop.eup %14968  ;;  %v6289_v52 = vsel %vm349_vm3, %v14967_v18, 0.0 }
0x1787   :  { %6290 = vadd.xlane.f32.xlu1 %v6289_v52  ;;  %v6286_v12 = vsel %vm349_vm3, %v14969_v29, 0.0 }
0x1788   :  { %6287 = vadd.xlane.f32.xlu0 %v6286_v12 }
0x1798   :  { %14836 = vrot.lane.b32.xlu1 %v17416_v38, %s20124_s7 }
0x179c   :  { %6830 = vrot.lane.b32.xlu1 %v17475_v30, %s20132_s24 }
0x179e   :  { %14831 = vrot.lane.b32.xlu0 %v17420_v25, %s20129_s1 }
0x17a2   :  { %6832 = vrot.lane.b32.xlu0 %v17514_v54, %s20132_s24 }
0x180d   :  { %v6097_v11 = vpop.xlane.xlu1 %6096 }
0x180e   :  { %v6094_v62 = vpop.xlane.xlu0 %6093 }
0x180f   :  { %14970 = vrcp.f32 %v6094_v62 }
0x1810   :  { %14972 = vrcp.f32 %v6097_v11 }
0x1814   :  { %v6291_v40 = vpop.xlane.xlu1 %6290 }
0x1815   :  { %14974 = vrcp.f32 %v6291_v40  ;;  %v6288_v22 = vpop.xlane.xlu0 %6287 }
0x1816   :  { %14976 = vrcp.f32 %v6288_v22 }
0x1818   :  { %v12974_v26 = vpop.f32.mrb[100].mxu1  ;;  %v14837_v35 = vpop.permute.xlu1 %14836 }
0x1819   :  { %v14971_v38 = vpop.eup %14970  ;;  %v14839_v2 = vunpack.i.h.bf16 %v14837_v35  ;;  %v14838_v21 = vunpack.i.l.bf16 %v14837_v35  ;;  %v5895_v30 = vpop.f32.mrb[101].mxu1 }
0x181a   :  { %v14832_v5 = vpop.permute.xlu0 %14831  ;;  %v13030_v10 = vpop.f32.mrb[108].mxu0  ;;  %12979 = vmatprep.mubr.msk.f32.mxu1 %vm349_vm3, %v5895_v30  ;;  %v6100_v54 = vmul.f32 %v14971_v38, %v14965_v4 }
0x181b   :  { %v14834_v16 = vunpack.i.h.bf16 %v14832_v5  ;;  %v14833_v44 = vunpack.i.l.bf16 %v14832_v5  ;;  %v14973_v20 = vpop.eup %14972  ;;  %v14050_v61 = vpack.c.bf16 %v14839_v2, %v14838_v21  ;;  %v6629_v24 = vpop.f32.mrb[109].mxu0  ;;  %12980 = vmatmul.mubr.msk.f32.vlgmr.msra.gmra.mrb[96].mxu1 %vm349_vm3, %v12974_v26  ;;  %v6641_v42 = vsel %vm349_vm3, %v13030_v10, -inf }
0x181c   :  { %14017 = vmatpush3.bf16.msra.mxu1 %v17418_v39  ;;  %6642 = vmax.xlane.f32.xlu0 %v6641_v42  ;;  %v6831_v28 = vpop.permute.xlu1 %6830  ;;  %v6638_v15 = vsel %vm349_vm3, %v6629_v24, -inf  ;;  %v6101_v32 = vmul.f32 %v14973_v20, %v14963_v31  ;;  %v17625_v31 = vld [vmem:[%s20123_s9 + $0x1] ss:$0 sm:$0xff] }
0x181d   :  { %v14024_v8 = vpack.c.bf16 %v14834_v16, %v14833_v44  ;;  %12993 = vmatprep.mubr.msk.f32.mxu1 %vm349_vm3, %v6100_v54  ;;  %6639 = vmax.xlane.f32.xlu1 %v6638_v15 }
0x181e   :  { %14052 = vmatprep.subr.msk.bf16.mxu0 %vm15298_vm4, %v14050_v61  ;;  %13049 = vmatprep.mubr.msk.f32.mxu0 %vm349_vm3, %v6831_v28  ;;  %v6833_v59 = vpop.permute.xlu0 %6832 }
0x181f   :  { %v14975_v17 = vpop.eup %14974  ;;  %14025 = vmatprep.subr.bf16.mxu1 %v14024_v8  ;;  %14055 = vmatpush3.bf16.xpose.msk.msra.mxu0 %vm15298_vm4, %v14050_v61 }
0x1820   :  { %v14977_v53 = vpop.eup %14976  ;;  %12994 = vmatmul.mubr.msk.f32.vlgmr.msra.gmra.mrb[102].mxu1 %vm349_vm3, %v6101_v32  ;;  %v6295_v43 = vmul.f32 %v14975_v17, %v14967_v18 }
0x1821   :  { %14027 = vmatpush3.bf16.msra.mxu1 %v14024_v8  ;;  %v6294_v39 = vmul.f32 %v14977_v53, %v14969_v29 }
0x1822   :  { %14029 = vmatprep.subr.bf16.mxu1 %v17501_v60 }
0x1823   :  { %13007 = vmatprep.mubr.msk.f32.mxu1 %vm349_vm3, %v6294_v39 }
0x1824   :  { %13008 = vmatmul.mubr.msk.f32.vlgmr.msra.gmra.mrb[104].mxu1 %vm349_vm3, %v6295_v43 }
0x1825   :  { %14031 = vmatpush3.bf16.msra.mxu1 %v17501_v60 }
0x1826   :  { %13050 = vmatmul.mubr.msk.f32.vlgmr.msra.gmra.mrb[110].mxu0 %vm349_vm3, %v6833_v59  ;;  %14033 = vmatprep.subr.bf16.mxu1 %v17516_v19 }
0x1827   :  { %7503 = vmatprep.mubr.f32.mxu0 %v15022_v27 }
0x18a9   :  { %v6643_v6 = vpop.xlane.xlu0 %6642 }
0x18aa   :  { %v6645_v36 = vsub.f32 %v13030_v10, %v6643_v6  ;;  %v6640_v9 = vpop.xlane.xlu1 %6639  ;;  %v11084_v6 = vld [vmem:[%s20125_s0 + $0x408] sm:$0xff] }
0x18ab   :  { %v6644_v45 = vsub.f32 %v6629_v24, %v6640_v9 }
0x18ac   :  { %v6648_v51 = vmul.f32 1.442695, %v6645_v36  ;;  %v11100_v36 = vld [vmem:[%s20125_s0 + $0x488] sm:$0xff] }
0x18ad   :  { %v6646_v56 = vmul.f32 1.442695, %v6644_v45  ;;  %v14064_v9 = vpack.c.bf16 %v11100_v36, %v11084_v6  ;;  %v11083_v45 = vld [vmem:[%s20125_s0 + $0x400] sm:$0xff] }
0x18ae   :  { %14978 = vpow2.f32 %v6648_v51 }
0x18af   :  { %14980 = vpow2.f32 %v6646_v56  ;;  %14065 = vmatprep.subr.bf16.mxu0 %v14064_v9  ;;  %v11116_v56 = vld [vmem:[%s20125_s0 + $0x508] sm:$0xff] }
0x18b8   :  { %v14979_v33 = vpop.eup %14978 }
0x18b9   :  { %v14981_v46 = vpop.eup %14980  ;;  %v6653_v37 = vsel %vm349_vm3, %v14979_v33, 0.0 }
0x18ba   :  { %6654 = vadd.xlane.f32.xlu1 %v6653_v37  ;;  %v6650_v60 = vsel %vm349_vm3, %v14981_v46, 0.0  ;;  %v11115_v37 = vld [vmem:[%s20125_s0 + $0x500] sm:$0xff] }
0x18bb   :  { %6651 = vadd.xlane.f32.xlu0 %v6650_v60  ;;  %v11131_v60 = vld [vmem:[%s20125_s0 + $0x580] sm:$0xff] }
0x18d1   :  { %14841 = vrot.lane.b32.xlu0 %v17420_v25, %s20131_s28 }
0x18ee   :  { %v12981_v58 = vpop.f32.mrb[96].mxu1 }
0x18ef   :  { %v5976_v4 = vpop.f32.mrb[97].mxu1  ;;  %v7114_v34 = vadd.f32 %v12981_v58, %v17372_v14  ;;  %v14070_v58 = vpack.c.bf16 %v11131_v60, %v11115_v37  ;;  %v11086_v60 = vld [vmem:[%s20125_s0 + $0x418] sm:$0xff] }
0x18f0   :  { %v7113_v1 = vadd.f32 %v5976_v4, %v17365_v3  ;;  %v11148_v4 = vld [vmem:[%s20125_s0 + $0x608] sm:$0xff] }
0x18f1   :  { %v17633_v52 = vadd.f32 %v17625_v31, %v7114_v34  ;;  %v11164_v34 = vld [vmem:[%s20125_s0 + $0x688] sm:$0xff] }
0x18f2   :  { %v17630_v18 = vadd.f32 %v17625_v31, %v7113_v1  ;;  %v14072_v1 = vpack.c.bf16 %v11164_v34, %v11148_v4  ;;  %v11085_v34 = vld [vmem:[%s20125_s0 + $0x410] sm:$0xff] }
0x18f3   :  { %v12995_v29 = vpop.f32.mrb[102].mxu1  ;;  %v7136_v22 = vsel %vm231_vm2, %v17633_v52, 0.0  ;;  %v7150_v3 = vmul.f32 %v17633_v52, %v17633_v52 }
0x18f4   :  { %v6174_v12 = vpop.f32.mrb[103].mxu1  ;;  %v7133_v62 = vsel %vm231_vm2, %v17630_v18, 0.0 }
0x18f5   :  { %7134 = vadd.xlane.f32.xlu0 %v7133_v62  ;;  %v7156_v38 = vsel %vm231_vm2, %v7150_v3, 0.0  ;;  %v11179_v3 = vld [vmem:[%s20125_s0 + $0x700] sm:$0xff] }
0x18f7   :  { %v13009_v11 = vpop.f32.mrb[104].mxu1 }
0x18f8   :  { %v6376_v40 = vpop.f32.mrb[105].mxu1 }
0x18f9   :  { %v13051_v14 = vpop.f32.mrb[110].mxu0  ;;  %13014 = vmatprep.mubr.msk.f32.mxu1 %vm349_vm3, %v6376_v40  ;;  %7137 = vadd.xlane.f32.xlu0 %v7136_v22  ;;  %v11196_v40 = vld [vmem:[%s20125_s0 + $0x788] sm:$0xff] }
0x18fa   :  { %v6912_v26 = vpop.f32.mrb[111].mxu0  ;;  %13015 = vmatmul.mubr.msk.f32.vlgmr.msra.gmra.mrb[106].mxu1 %vm349_vm3, %v13009_v11  ;;  %v6924_v2 = vsel %vm349_vm3, %v13051_v14, -inf  ;;  %v11180_v11 = vld [vmem:[%s20125_s0 + $0x708] sm:$0xff] }
0x18fb   :  { %13021 = vmatprep.mubr.msk.f32.mxu1 %vm349_vm3, %v6174_v12  ;;  %v6921_v35 = vsel %vm349_vm3, %v6912_v26, -inf  ;;  %14035 = vmatpush3.bf16.msra.mxu1 %v17516_v19  ;;  %v11163_v12 = vld [vmem:[%s20125_s0 + $0x680] sm:$0xff]  ;;  %v14076_v22 = vpack.c.bf16 %v11196_v40, %v11180_v11 }
0x18fc   :  { %6922 = vmax.xlane.f32.xlu1 %v6921_v35 }
0x18fd   :  { %7157 = vadd.xlane.f32.xlu0 %v7156_v38 }
0x1900   :  { %6925 = vmax.xlane.f32.xlu1 %v6924_v2 }
0x1902   :  { %13022 = vmatmul.mubr.msk.f32.vlgmr.msra.gmra.mrb[106].mxu1 %vm349_vm3, %v12995_v29  ;;  %v11147_v29 = vld [vmem:[%s20125_s0 + $0x600] sm:$0xff] }
0x1903   :  { %v14074_v62 = vpack.c.bf16 %v11163_v12, %v11147_v29  ;;  %v11118_v29 = vld [vmem:[%s20125_s0 + $0x518] sm:$0xff] }
0x1904   :  { %v11134_v12 = vld [vmem:[%s20125_s0 + $0x598] sm:$0xff] }
0x1947   :  { %v6655_v21 = vpop.xlane.xlu1 %6654 }
0x1948   :  { %14982 = vrcp.f32 %v6655_v21  ;;  %v6652_v30 = vpop.xlane.xlu0 %6651 }
0x1949   :  { %14984 = vrcp.f32 %v6652_v30 }
0x194c   :  { %v14842_v5 = vpop.permute.xlu0 %14841 }
0x194d   :  { %v14844_v16 = vunpack.i.h.bf16 %v14842_v5  ;;  %v14843_v44 = vunpack.i.l.bf16 %v14842_v5 }
0x194f   :  { %v14042_v10 = vpack.c.bf16 %v14844_v16, %v14843_v44 }
0x1951   :  { %14043 = vmatprep.subr.bf16.mxu1 %v14042_v10 }
0x1952   :  { %v14983_v54 = vpop.eup %14982  ;;  %14045 = vmatpush3.bf16.msra.mxu1 %v14042_v10 }
0x1953   :  { %v14985_v19 = vpop.eup %14984  ;;  %14047 = vmatprep.subr.bf16.mxu1 %v17548_v23  ;;  %v6659_v61 = vmul.f32 %v14983_v54, %v14979_v33  ;;  %v11132_v33 = vld [vmem:[%s20125_s0 + $0x588] sm:$0xff] }
0x1954   :  { %v6658_v20 = vmul.f32 %v14985_v19, %v14981_v46  ;;  %v14068_v46 = vpack.c.bf16 %v11132_v33, %v11116_v56  ;;  %v17719_v56 = vld [vmem:[%s20126_s2 + $0x1] ss:$0 sm:$0xff] }
0x1956   :  { %13035 = vmatprep.mubr.msk.f32.mxu1 %vm349_vm3, %v6658_v20 }
0x1957   :  { %13036 = vmatmul.mubr.msk.f32.vlgmr.msra.gmra.mrb[108].mxu1 %vm349_vm3, %v6659_v61 }
0x1958   :  { %14049 = vmatpush3.bf16.msra.mxu1 %v17548_v23  ;;  %v7149_v23 = vmul.f32 %v17630_v18, %v17630_v18 }
0x195a   :  { %v7153_v59 = vsel %vm231_vm2, %v7149_v23, 0.0 }
0x1982   :  { %v7135_v61 = vpop.xlane.xlu0 %7134 }
0x1989   :  { %v6923_v24 = vpop.xlane.xlu1 %6922 }
0x198a   :  { %v6927_v42 = vsub.f32 %v6912_v26, %v6923_v24  ;;  %v7138_v24 = vpop.xlane.xlu0 %7137 }
0x198c   :  { %v6929_v15 = vmul.f32 1.442695, %v6927_v42 }
0x198d   :  { %v6926_v8 = vpop.xlane.xlu1 %6925 }
0x198e   :  { %v6928_v28 = vsub.f32 %v13051_v14, %v6926_v8  ;;  %v11195_v14 = vld [vmem:[%s20125_s0 + $0x780] sm:$0xff]  ;;  %v7158_v42 = vpop.xlane.xlu0 %7157  ;;  %v7146_v8 = vmul.f32 0.015625, %v7138_v24 }
0x198f   :  { %v14078_v26 = vpack.c.bf16 %v11195_v14, %v11179_v3  ;;  %v11117_v3 = vld [vmem:[%s20125_s0 + $0x510] sm:$0xff] }
0x1990   :  { %v6931_v32 = vmul.f32 1.442695, %v6928_v28  ;;  %v7166_v28 = vmul.f32 0.015625, %v7158_v42  ;;  %v11133_v14 = vld [vmem:[%s20125_s0 + $0x590] sm:$0xff] }
0x1992   :  { %14986 = vpow2.f32 %v6931_v32  ;;  %v7145_v32 = vmul.f32 0.015625, %v7135_v61 }
0x1993   :  { %14988 = vpow2.f32 %v6929_v15  ;;  %v7170_v15 = vmul.f32 %v7146_v8, %v7146_v8 }
0x1994   :  { %v7169_v23 = vmul.f32 %v7145_v32, %v7145_v32  ;;  %v7177_v9 = vsub.f32 %v17630_v18, %v7145_v32 }
0x199c   :  { %v14987_v17 = vpop.eup %14986 }
0x199d   :  { %v6936_v53 = vsel %vm349_vm3, %v14987_v17, 0.0  ;;  %v14989_v39 = vpop.eup %14988 }
0x199e   :  { %6937 = vadd.xlane.f32.xlu1 %v6936_v53  ;;  %v6933_v43 = vsel %vm349_vm3, %v14989_v39, 0.0  ;;  %v7174_v53 = vsub.f32 %v7166_v28, %v7170_v15 }
0x19a2   :  { %6934 = vadd.xlane.f32.xlu1 %v6933_v43 }
0x19b3   :  { %14846 = vrot.lane.b32.xlu1 %v17420_v25, %s20132_s24  ;;  %v11099_v25 = vld [vmem:[%s20125_s0 + $0x480] sm:$0xff] }
0x19b4   :  { %v14066_v51 = vpack.c.bf16 %v11099_v25, %v11083_v45 }
0x19b6   :  { %14067 = vmatpush1.bf16.msra.mxu0 %v14066_v51 }
0x19b7   :  { %14069 = vmatprep.subr.bf16.mxu0 %v14068_v46  ;;  %v17725_v46 = vld [vmem:[%s20127_s29 + $0x1] ss:$0 sm:$0xff] }
0x19ba   :  { %14071 = vmatpush1.bf16.msra.mxu0 %v14070_v58  ;;  %v11102_v58 = vld [vmem:[%s20125_s0 + $0x498] sm:$0xff] }
0x19bb   :  { %14073 = vmatprep.subr.bf16.mxu0 %v14072_v1  ;;  %v14080_v4 = vpack.c.bf16 %v11102_v58, %v11086_v60  ;;  %v11101_v1 = vld [vmem:[%s20125_s0 + $0x490] sm:$0xff]  ;;  %v11087_v60 = vld [vmem:[%s20125_s0 + $0x420] sm:$0xff] }
0x19bc   :  { %v14082_v11 = vpack.c.bf16 %v11101_v1, %v11085_v34  ;;  %v11103_v58 = vld [vmem:[%s20125_s0 + $0x4a0] sm:$0xff]  ;;  %v11089_v1 = vld [vmem:[%s20125_s0 + $0x430] sm:$0xff] }
0x19bd   :  { %v14098_v34 = vpack.c.bf16 %v11103_v58, %v11087_v60  ;;  %v11201_v60 = vld [vmem:[%s20125_s0 + $0x7b0] sm:$0xff] }
0x19be   :  { %14075 = vmatpush1.bf16.msra.mxu0 %v14074_v62 }
0x19bf   :  { %14077 = vmatprep.subr.bf16.mxu0 %v14076_v22  ;;  %v14084_v22 = vpack.c.bf16 %v11134_v12, %v11118_v29  ;;  %v11105_v29 = vld [vmem:[%s20125_s0 + $0x4b0] sm:$0xff] }
0x19c0   :  { %v14114_v12 = vpack.c.bf16 %v11105_v29, %v11089_v1  ;;  %v11094_v1 = vld [vmem:[%s20125_s0 + $0x458] sm:$0xff] }
0x19c2   :  { %14079 = vmatpush1.bf16.msra.mxu0 %v14078_v26  ;;  %v11150_v26 = vld [vmem:[%s20125_s0 + $0x618] sm:$0xff] }
0x19d7   :  { %7154 = vadd.xlane.f32.xlu1 %v7153_v59  ;;  %v7182_v59 = vadd.f32 1e-05, %v7174_v53 }
0x1a2a   :  { %v13037_v35 = vpop.f32.mrb[108].mxu1 }
0x1a2b   :  { %v6738_v38 = vpop.f32.mrb[109].mxu1  ;;  %v6938_v2 = vpop.xlane.xlu1 %6937 }
0x1a2c   :  { %13042 = vmatprep.mubr.msk.f32.mxu1 %vm349_vm3, %v6738_v38  ;;  %14990 = vrcp.f32 %v6938_v2  ;;  %v14086_v38 = vpack.c.bf16 %v11133_v14, %v11117_v3  ;;  %v11138_v3 = vld [vmem:[%s20125_s0 + $0x5b8] sm:$0xff]  ;;  %v11119_v14 = vld [vmem:[%s20125_s0 + $0x520] sm:$0xff] }
0x1a2d   :  { %13043 = vmatmul.mubr.msk.f32.vlgmr.msra.gmra.mrb[106].mxu1 %vm349_vm3, %v13037_v35  ;;  %v11166_v35 = vld [vmem:[%s20125_s0 + $0x698] sm:$0xff] }
0x1a2e   :  { %v14088_v2 = vpack.c.bf16 %v11166_v35, %v11150_v26  ;;  %v11135_v26 = vld [vmem:[%s20125_s0 + $0x5a0] sm:$0xff] }
0x1a2f   :  { %v6935_v21 = vpop.xlane.xlu1 %6934 }
0x1a30   :  { %14992 = vrcp.f32 %v6935_v21  ;;  %v11149_v21 = vld [vmem:[%s20125_s0 + $0x610] sm:$0xff] }
0x1a31   :  { %14994 = vrsqrt.f32 %v7182_v59 }
0x1a33   :  { %v14847_v30 = vpop.permute.xlu1 %14846 }
0x1a34   :  { %v14849_v5 = vunpack.i.h.bf16 %v14847_v30  ;;  %v14848_v16 = vunpack.i.l.bf16 %v14847_v30  ;;  %v11165_v30 = vld [vmem:[%s20125_s0 + $0x690] sm:$0xff] }
0x1a36   :  { %v14056_v44 = vpack.c.bf16 %v14849_v5, %v14848_v16  ;;  %v14991_v10 = vpop.eup %14990  ;;  %v11182_v5 = vld [vmem:[%s20125_s0 + $0x718] sm:$0xff] }
0x1a37   :  { %v6942_v20 = vmul.f32 %v14991_v10, %v14987_v17  ;;  %v11198_v16 = vld [vmem:[%s20125_s0 + $0x798] sm:$0xff] }
0x1a38   :  { %14057 = vmatprep.subr.bf16.mxu1 %v14056_v44  ;;  %v14092_v10 = vpack.c.bf16 %v11198_v16, %v11182_v5  ;;  %v11152_v5 = vld [vmem:[%s20125_s0 + $0x628] sm:$0xff] }
0x1a39   :  { %14059 = vmatpush3.bf16.msra.mxu1 %v14056_v44  ;;  %v14090_v44 = vpack.c.bf16 %v11165_v30, %v11149_v21  ;;  %v11137_v21 = vld [vmem:[%s20125_s0 + $0x5b0] sm:$0xff]  ;;  %v11168_v16 = vld [vmem:[%s20125_s0 + $0x6a8] sm:$0xff] }
0x1a3a   :  { %v14993_v54 = vpop.eup %14992  ;;  %14061 = vmatprep.subr.bf16.mxu1 %v17574_v57 }
0x1a3b   :  { %v6941_v19 = vmul.f32 %v14993_v54, %v14989_v39  ;;  %v14995_v36 = vpop.eup %14994  ;;  %v11181_v54 = vld [vmem:[%s20125_s0 + $0x710] sm:$0xff] }
0x1a3d   :  { %13056 = vmatprep.mubr.msk.f32.mxu1 %vm349_vm3, %v6941_v19  ;;  %v11197_v19 = vld [vmem:[%s20125_s0 + $0x790] sm:$0xff] }
0x1a3e   :  { %13057 = vmatmul.mubr.msk.f32.vlgmr.msra.gmra.mrb[110].mxu1 %vm349_vm3, %v6942_v20  ;;  %v14094_v20 = vpack.c.bf16 %v11197_v19, %v11181_v54  ;;  %v11170_v54 = vld [vmem:[%s20125_s0 + $0x6b8] sm:$0xff]  ;;  %v11151_v19 = vld [vmem:[%s20125_s0 + $0x620] sm:$0xff] }
0x1a3f   :  { %14063 = vmatpush3.bf16.msra.mxu1 %v17574_v57  ;;  %v7178_v57 = vsub.f32 %v17633_v52, %v7146_v8 }
0x1a40   :  { %14081 = vmatprep.subr.bf16.mxu1 %v14080_v4 }
0x1a41   :  { %v7190_v25 = vmul.f32 %v14995_v36, %v7178_v57 }
0x1a43   :  { %v7200_v37 = vmul.f32 %v17719_v56, %v7190_v25  ;;  %v11104_v25 = vld [vmem:[%s20125_s0 + $0x4a8] sm:$0xff] }
0x1a45   :  { %v17735_v52 = vadd.f32 %v17725_v46, %v7200_v37  ;;  %v11106_v37 = vld [vmem:[%s20125_s0 + $0x4b8] sm:$0xff] }
0x1a64   :  { %v7155_v43 = vpop.xlane.xlu1 %7154 }
0x1a65   :  { %v7165_v6 = vmul.f32 0.015625, %v7155_v43 }
0x1a67   :  { %v7173_v39 = vsub.f32 %v7165_v6, %v7169_v23 }
0x1a69   :  { %v7181_v17 = vadd.f32 1e-05, %v7173_v39 }
0x1a6b   :  { %14996 = vrsqrt.f32 %v7181_v17 }
0x1a75   :  { %v14997_v45 = vpop.eup %14996 }
0x1a76   :  { %v7189_v51 = vmul.f32 %v14997_v45, %v7177_v9  ;;  %v11088_v45 = vld [vmem:[%s20125_s0 + $0x428] sm:$0xff] }
0x1a78   :  { %v7199_v33 = vmul.f32 %v17719_v56, %v7189_v51  ;;  %v11090_v51 = vld [vmem:[%s20125_s0 + $0x438] sm:$0xff] }
0x1a79   :  { %v14112_v4 = vpack.c.bf16 %v11106_v37, %v11090_v51  ;;  %v11185_v37 = vld [vmem:[%s20125_s0 + $0x730] sm:$0xff] }
0x1a7a   :  { %v17729_v18 = vadd.f32 %v17725_v46, %v7199_v33  ;;  %v14096_v33 = vpack.c.bf16 %v11104_v25, %v11088_v45  ;;  %v11183_v45 = vld [vmem:[%s20125_s0 + $0x720] sm:$0xff]  ;;  %v14126_v58 = vpack.c.bf16 %v11201_v60, %v11185_v37  ;;  %v11125_v37 = vld [vmem:[%s20125_s0 + $0x550] sm:$0xff] }
0x1a7b   :  { %v11199_v25 = vld [vmem:[%s20125_s0 + $0x7a0] sm:$0xff]  ;;  %v11141_v60 = vld [vmem:[%s20125_s0 + $0x5d0] sm:$0xff] }
0x1a7c   :  { %11213 = vmatmul.mubr.msk.f32.vlgmr.msra.gmra.mrb[112].mxu0 %vm231_vm2, %v17729_v18  ;;  %14097 = vmatprep.subr.bf16.mxu0 %v14096_v33  ;;  %v14110_v33 = vpack.c.bf16 %v11199_v25, %v11183_v45 }
0x1a7d   :  { %7509 = vmatprep.mubr.f32.mxu0 %v15022_v27  ;;  %14099 = vmatpush1.bf16.msra.mxu0 %v14098_v34  ;;  %v11108_v34 = vld [vmem:[%s20125_s0 + $0x4c8] sm:$0xff] }
0x1a80   :  { %11214 = vmatmul.mubr.msk.f32.gmra.mrb[114].mxu0 %vm231_vm2, %v17735_v52 }
0x1a81   :  { %7515 = vmatprep.mubr.f32.mxu0 %v15022_v27 }
0x1b11   :  { %v13058_v62 = vpop.f32.mrb[110].mxu1 }
0x1b12   :  { %v7021_v40 = vpop.f32.mrb[111].mxu1 }
0x1b13   :  { %13063 = vmatprep.mubr.msk.f32.mxu1 %vm349_vm3, %v7021_v40  ;;  %v11122_v40 = vld [vmem:[%s20125_s0 + $0x538] sm:$0xff] }
0x1b14   :  { %13064 = vmatmul.mubr.msk.f32.vlgmr.msra.gmra.mrb[106].mxu1 %vm349_vm3, %v13058_v62  ;;  %v11120_v62 = vld [vmem:[%s20125_s0 + $0x528] sm:$0xff]  ;;  %v14116_v35 = vpack.c.bf16 %v11138_v3, %v11122_v40 }
0x1b15   :  { %14083 = vmatpush1.bf16.msra.mxu1 %v14082_v11  ;;  %7592 = vmatprep.mubr.f32.mxu1 %v15022_v27  ;;  %v11136_v11 = vld [vmem:[%s20125_s0 + $0x5a8] sm:$0xff] }
0x1b16   :  { %14085 = vmatprep.subr.bf16.mxu1 %v14084_v22  ;;  %v14100_v22 = vpack.c.bf16 %v11136_v11, %v11120_v62 }
0x1b18   :  { %14101 = vmatprep.subr.bf16.mxu0 %v14100_v22 }
0x1b19   :  { %14087 = vmatpush1.bf16.msra.mxu1 %v14086_v38  ;;  %v14102_v38 = vpack.c.bf16 %v11135_v26, %v11119_v14 }
0x1b1a   :  { %14089 = vmatprep.subr.bf16.mxu1 %v14088_v2  ;;  %v11121_v2 = vld [vmem:[%s20125_s0 + $0x530] sm:$0xff] }
0x1b1b   :  { %v14118_v30 = vpack.c.bf16 %v11137_v21, %v11121_v2  ;;  %14103 = vmatpush1.bf16.msra.mxu0 %v14102_v38 }
0x1b1d   :  { %14091 = vmatpush1.bf16.msra.mxu1 %v14090_v44  ;;  %v11154_v44 = vld [vmem:[%s20125_s0 + $0x638] sm:$0xff] }
0x1b1e   :  { %14093 = vmatprep.subr.bf16.mxu1 %v14092_v10  ;;  %v14104_v10 = vpack.c.bf16 %v11168_v16, %v11152_v5 }
0x1b20   :  { %14105 = vmatprep.subr.bf16.mxu0 %v14104_v10 }
0x1b21   :  { %14095 = vmatpush1.bf16.msra.mxu1 %v14094_v20  ;;  %v11167_v20 = vld [vmem:[%s20125_s0 + $0x6a0] sm:$0xff] }
0x1b22   :  { %14113 = vmatprep.subr.bf16.mxu1 %v14112_v4  ;;  %v11092_v4 = vld [vmem:[%s20125_s0 + $0x448] sm:$0xff] }
0x1b23   :  { %v14128_v29 = vpack.c.bf16 %v11108_v34, %v11092_v4  ;;  %v11156_v34 = vld [vmem:[%s20125_s0 + $0x648] sm:$0xff] }
0x1b24   :  { %11217 = vmatmul.mubr.msk.f32.vlgmr.msra.gmra.mrb[112].mxu1 %vm231_vm2, %v17729_v18 }
0x1b25   :  { %7598 = vmatprep.mubr.f32.mxu1 %v15022_v27  ;;  %14115 = vmatpush1.bf16.msra.mxu1 %v14114_v12  ;;  %v11110_v12 = vld [vmem:[%s20125_s0 + $0x4d8] sm:$0xff] }
0x1b26   :  { %14117 = vmatprep.subr.bf16.mxu1 %v14116_v35  ;;  %v14144_v62 = vpack.c.bf16 %v11110_v12, %v11094_v1  ;;  %v11172_v1 = vld [vmem:[%s20125_s0 + $0x6c8] sm:$0xff]  ;;  %v11174_v12 = vld [vmem:[%s20125_s0 + $0x6d8] sm:$0xff] }
0x1b28   :  { %11218 = vmatmul.mubr.msk.f32.gmra.mrb[114].mxu1 %vm231_vm2, %v17735_v52 }
0x1b29   :  { %7604 = vmatprep.mubr.f32.mxu1 %v15022_v27  ;;  %14119 = vmatpush1.bf16.msra.mxu1 %v14118_v30 }
0x1b4f   :  { %v17797_v61 = vpop.f32.mrb[112].mxu0 }
0x1b50   :  { %v17799_v24 = vpop.f32.mrb[113].mxu0 }
0x1b53   :  { %v17801_v42 = vpop.f32.mrb[114].mxu0 }
0x1b54   :  { %v17803_v8 = vpop.f32.mrb[115].mxu0 }
0x1be7   :  { %v13065_v28 = vpop.f32.mrb[106].mxu1 }
0x1be8   :  { %v7116_v15 = vadd.f32 %v13065_v28, %v17383_v49  ;;  %v7102_v32 = vpop.f32.mrb[107].mxu1  ;;  %v14120_v28 = vpack.c.bf16 %v11170_v54, %v11154_v44 }
0x1be9   :  { %v7115_v53 = vadd.f32 %v7102_v32, %v17378_v41  ;;  %v11153_v32 = vld [vmem:[%s20125_s0 + $0x630] sm:$0xff] }
0x1bea   :  { %v17808_v43 = vadd.f32 %v17625_v31, %v7116_v15  ;;  %v14106_v15 = vpack.c.bf16 %v11167_v20, %v11151_v19  ;;  %14121 = vmatprep.subr.bf16.mxu1 %v14120_v28 }
0x1beb   :  { %v17811_v23 = vadd.f32 %v17625_v31, %v7115_v53  ;;  %v11169_v53 = vld [vmem:[%s20125_s0 + $0x6b0] sm:$0xff] }
0x1bec   :  { %v7152_v59 = vmul.f32 %v17808_v43, %v17808_v43  ;;  %v7142_v31 = vsel %vm231_vm2, %v17808_v43, 0.0  ;;  %14107 = vmatpush1.bf16.msra.mxu0 %v14106_v15 }
0x1bed   :  { %v7139_v6 = vsel %vm231_vm2, %v17811_v23, 0.0  ;;  %v7151_v39 = vmul.f32 %v17811_v23, %v17811_v23 }
0x1bee   :  { %7140 = vadd.xlane.f32.xlu0 %v7139_v6  ;;  %v7162_v49 = vsel %vm231_vm2, %v7152_v59, 0.0  ;;  %v14122_v59 = vpack.c.bf16 %v11169_v53, %v11153_v32  ;;  %v11184_v6 = vld [vmem:[%s20125_s0 + $0x728] sm:$0xff] }
0x1bef   :  { %7163 = vadd.xlane.f32.xlu1 %v7162_v49  ;;  %v7159_v41 = vsel %vm231_vm2, %v7151_v39, 0.0  ;;  %v11200_v39 = vld [vmem:[%s20125_s0 + $0x7a8] sm:$0xff]  ;;  %v11186_v49 = vld [vmem:[%s20125_s0 + $0x738] sm:$0xff] }
0x1bf0   :  { %14123 = vmatpush1.bf16.msra.mxu1 %v14122_v59  ;;  %v11091_v59 = vld [vmem:[%s20125_s0 + $0x440] sm:$0xff] }
0x1bf2   :  { %7160 = vadd.xlane.f32.xlu0 %v7159_v41  ;;  %v14108_v41 = vpack.c.bf16 %v11200_v39, %v11184_v6  ;;  %v11107_v6 = vld [vmem:[%s20125_s0 + $0x4c0] sm:$0xff]  ;;  %v11093_v39 = vld [vmem:[%s20125_s0 + $0x450] sm:$0xff] }
0x1bf3   :  { %v14130_v45 = vpack.c.bf16 %v11107_v6, %v11091_v59  ;;  %v11114_v59 = vld [vmem:[%s20125_s0 + $0x4f8] sm:$0xff] }
0x1bf4   :  { %14109 = vmatprep.subr.bf16.mxu0 %v14108_v41  ;;  %v11126_v41 = vld [vmem:[%s20125_s0 + $0x558] sm:$0xff] }
0x1bf5   :  { %14111 = vmatpush1.bf16.msra.mxu0 %v14110_v33  ;;  %v11139_v33 = vld [vmem:[%s20125_s0 + $0x5c0] sm:$0xff] }
0x1bf6   :  { %7143 = vadd.xlane.f32.xlu0 %v7142_v31  ;;  %v11202_v31 = vld [vmem:[%s20125_s0 + $0x7b8] sm:$0xff]  ;;  %14129 = vmatprep.subr.bf16.mxu0 %v14128_v29 }
0x1bf7   :  { %v17823_v17 = vpop.f32.mrb[112].mxu1  ;;  %v14124_v51 = vpack.c.bf16 %v11202_v31, %v11186_v49  ;;  %v11109_v49 = vld [vmem:[%s20125_s0 + $0x4d0] sm:$0xff]  ;;  %v11142_v31 = vld [vmem:[%s20125_s0 + $0x5d8] sm:$0xff] }
0x1bf8   :  { %v17825_v36 = vpop.f32.mrb[113].mxu1  ;;  %v14146_v25 = vpack.c.bf16 %v11109_v49, %v11093_v39  ;;  %v14148_v4 = vpack.c.bf16 %v11142_v31, %v11126_v41  ;;  %v11158_v29 = vld [vmem:[%s20125_s0 + $0x658] sm:$0xff]  ;;  %v11095_v49 = vld [vmem:[%s20125_s0 + $0x460] sm:$0xff]  ;;  %v11113_v41 = vld [vmem:[%s20125_s0 + $0x4f0] sm:$0xff] }
0x1bf9   :  { %14125 = vmatprep.subr.bf16.mxu1 %v14124_v51  ;;  %v11123_v51 = vld [vmem:[%s20125_s0 + $0x540] sm:$0xff] }
0x1bfa   :  { %14127 = vmatpush1.bf16.msra.mxu1 %v14126_v58 }
0x1bfb   :  { %v17827_v9 = vpop.f32.mrb[114].mxu1  ;;  %14145 = vmatprep.subr.bf16.mxu1 %v14144_v62  ;;  %v14134_v62 = vpack.c.bf16 %v11139_v33, %v11123_v51  ;;  %v11144_v51 = vld [vmem:[%s20125_s0 + $0x5e8] sm:$0xff]  ;;  %v11130_v33 = vld [vmem:[%s20125_s0 + $0x578] sm:$0xff] }
0x1bfc   :  { %v17829_v57 = vpop.f32.mrb[115].mxu1 }
0x1c7b   :  { %v7141_v11 = vpop.xlane.xlu0 %7140 }
0x1c7c   :  { %v7147_v40 = vmul.f32 0.015625, %v7141_v11  ;;  %v7164_v35 = vpop.xlane.xlu1 %7163  ;;  %v14150_v11 = vpack.c.bf16 %v11141_v60, %v11125_v37  ;;  %v11146_v37 = vld [vmem:[%s20125_s0 + $0x5f8] sm:$0xff] }
0x1c7d   :  { %v7168_v30 = vmul.f32 0.015625, %v7164_v35  ;;  %v14152_v35 = vpack.c.bf16 %v11174_v12, %v11158_v29  ;;  %v11145_v29 = vld [vmem:[%s20125_s0 + $0x5f0] sm:$0xff] }
0x1c7e   :  { %v7171_v3 = vmul.f32 %v7147_v40, %v7147_v40  ;;  %v7179_v10 = vsub.f32 %v17811_v23, %v7147_v40  ;;  %v11155_v40 = vld [vmem:[%s20125_s0 + $0x640] sm:$0xff] }
0x1c7f   :  { %v7161_v22 = vpop.xlane.xlu0 %7160 }
0x1c80   :  { %v7167_v14 = vmul.f32 0.015625, %v7161_v22  ;;  %v11171_v22 = vld [vmem:[%s20125_s0 + $0x6c0] sm:$0xff] }
0x1c82   :  { %v7175_v26 = vsub.f32 %v7167_v14, %v7171_v3  ;;  %v11157_v3 = vld [vmem:[%s20125_s0 + $0x650] sm:$0xff] }
0x1c83   :  { %v7144_v38 = vpop.xlane.xlu0 %7143  ;;  %v11173_v14 = vld [vmem:[%s20125_s0 + $0x6d0] sm:$0xff] }
0x1c84   :  { %v7183_v2 = vadd.f32 1e-05, %v7175_v26  ;;  %v7148_v21 = vmul.f32 0.015625, %v7144_v38  ;;  %v14136_v26 = vpack.c.bf16 %v11172_v1, %v11156_v34  ;;  %v11188_v38 = vld [vmem:[%s20125_s0 + $0x748] sm:$0xff]  ;;  %v11143_v34 = vld [vmem:[%s20125_s0 + $0x5e0] sm:$0xff]  ;;  %v11129_v1 = vld [vmem:[%s20125_s0 + $0x570] sm:$0xff] }
0x1c86   :  { %14998 = vrsqrt.f32 %v7183_v2  ;;  %v7172_v5 = vmul.f32 %v7148_v21, %v7148_v21  ;;  %v7180_v15 = vsub.f32 %v17808_v43, %v7148_v21  ;;  %v11204_v2 = vld [vmem:[%s20125_s0 + $0x7c8] sm:$0xff]  ;;  %v11190_v21 = vld [vmem:[%s20125_s0 + $0x758] sm:$0xff] }
0x1c88   :  { %v7176_v16 = vsub.f32 %v7168_v30, %v7172_v5  ;;  %v11206_v30 = vld [vmem:[%s20125_s0 + $0x7d8] sm:$0xff]  ;;  %v14138_v5 = vpack.c.bf16 %v11171_v22, %v11155_v40  ;;  %v11176_v40 = vld [vmem:[%s20125_s0 + $0x6e8] sm:$0xff] }
0x1c89   :  { %v11162_v22 = vld [vmem:[%s20125_s0 + $0x678] sm:$0xff] }
0x1c8a   :  { %v7184_v44 = vadd.f32 1e-05, %v7176_v16  ;;  %v14154_v16 = vpack.c.bf16 %v11173_v14, %v11157_v3  ;;  %v11178_v3 = vld [vmem:[%s20125_s0 + $0x6f8] sm:$0xff] }
0x1c8c   :  { %15000 = vrsqrt.f32 %v7184_v44  ;;  %v11187_v44 = vld [vmem:[%s20125_s0 + $0x740] sm:$0xff] }
0x1c90   :  { %v14999_v54 = vpop.eup %14998 }
0x1c91   :  { %v7191_v19 = vmul.f32 %v14999_v54, %v7179_v10  ;;  %v11203_v10 = vld [vmem:[%s20125_s0 + $0x7c0] sm:$0xff]  ;;  %v11189_v54 = vld [vmem:[%s20125_s0 + $0x750] sm:$0xff] }
0x1c92   :  { %v14142_v6 = vpack.c.bf16 %v11203_v10, %v11187_v44  ;;  %v11208_v44 = vld [vmem:[%s20125_s0 + $0x7e8] sm:$0xff]  ;;  %v11194_v10 = vld [vmem:[%s20125_s0 + $0x778] sm:$0xff] }
0x1c93   :  { %v7201_v20 = vmul.f32 %v17719_v56, %v7191_v19  ;;  %v11205_v19 = vld [vmem:[%s20125_s0 + $0x7d0] sm:$0xff] }
0x1c94   :  { %v14158_v39 = vpack.c.bf16 %v11205_v19, %v11189_v54  ;;  %v11210_v54 = vld [vmem:[%s20125_s0 + $0x7f8] sm:$0xff] }
0x1c95   :  { %v17942_v28 = vadd.f32 %v17725_v46, %v7201_v20  ;;  %v14140_v20 = vpack.c.bf16 %v11204_v2, %v11188_v38  ;;  %v11175_v38 = vld [vmem:[%s20125_s0 + $0x6e0] sm:$0xff]  ;;  %v11161_v2 = vld [vmem:[%s20125_s0 + $0x670] sm:$0xff] }
0x1c96   :  { %v15001_v32 = vpop.eup %15000 }
0x1c97   :  { %v7192_v53 = vmul.f32 %v15001_v32, %v7180_v15  ;;  %11215 = vmatmul.mubr.msk.f32.gmra.mrb[116].mxu0 %vm231_vm2, %v17942_v28  ;;  %11219 = vmatmul.mubr.msk.f32.gmra.mrb[116].mxu1 %vm231_vm2, %v17942_v28  ;;  %v14156_v15 = vpack.c.bf16 %v11206_v30, %v11190_v21  ;;  %v11096_v32 = vld [vmem:[%s20125_s0 + $0x468] sm:$0xff]  ;;  %v11177_v21 = vld [vmem:[%s20125_s0 + $0x6f0] sm:$0xff] }
0x1c98   :  { %7521 = vmatprep.mubr.f32.mxu0 %v15022_v27  ;;  %7610 = vmatprep.mubr.f32.mxu1 %v15022_v27 }
0x1c99   :  { %v7202_v23 = vmul.f32 %v17719_v56, %v7192_v53  ;;  %v11124_v56 = vld [vmem:[%s20125_s0 + $0x548] sm:$0xff] }
0x1c9a   :  { %v11112_v53 = vld [vmem:[%s20125_s0 + $0x4e8] sm:$0xff] }
0x1c9b   :  { %v17956_v43 = vadd.f32 %v17725_v46, %v7202_v23  ;;  %v11140_v46 = vld [vmem:[%s20125_s0 + $0x5c8] sm:$0xff]  ;;  %v11098_v23 = vld [vmem:[%s20125_s0 + $0x478] sm:$0xff]  ;;  %v14160_v31 = vpack.c.bf16 %v11112_v53, %v11096_v32  ;;  %v11207_v32 = vld [vmem:[%s20125_s0 + $0x7e0] sm:$0xff] }
0x1c9c   :  { %v14132_v58 = vpack.c.bf16 %v11140_v46, %v11124_v56  ;;  %v11111_v56 = vld [vmem:[%s20125_s0 + $0x4e0] sm:$0xff]  ;;  %v11097_v46 = vld [vmem:[%s20125_s0 + $0x470] sm:$0xff] }
0x1c9d   :  { %11216 = vmatmul.mubr.msk.f32.gmra.mrb[118].mxu0 %vm231_vm2, %v17956_v43  ;;  %11220 = vmatmul.mubr.msk.f32.gmra.mrb[118].mxu1 %vm231_vm2, %v17956_v43  ;;  %v14162_v60 = vpack.c.bf16 %v11111_v56, %v11095_v49  ;;  %v11193_v53 = vld [vmem:[%s20125_s0 + $0x770] sm:$0xff]  ;;  %v11262_v49 = vld [vmem:[%s20055_s12 + $0x888] sm:$0xff]  ;;  %v11293_v56 = vld [vmem:[%s20055_s12 + $0x980] sm:$0xff] }
0x1c9e   :  { %7681 = vmatprep.mubr.f32.mxu0 %v15022_v27  ;;  %7770 = vmatprep.mubr.f32.mxu1 %v15022_v27 }
0x1ca1   :  { %11221 = vmatmul.mubr.msk.f32.vlgmr.msra.gmra.mrb[120].mxu0 %vm231_vm2, %v17729_v18  ;;  %11225 = vmatmul.mubr.msk.f32.vlgmr.msra.gmra.mrb[120].mxu1 %vm231_vm2, %v17729_v18 }
0x1ca2   :  { %14131 = vmatpush1.bf16.msra.mxu0 %v14130_v45  ;;  %14147 = vmatpush1.bf16.msra.mxu1 %v14146_v25  ;;  %v14176_v45 = vpack.c.bf16 %v11114_v59, %v11098_v23  ;;  %v11128_v25 = vld [vmem:[%s20125_s0 + $0x568] sm:$0xff]  ;;  %v11209_v23 = vld [vmem:[%s20125_s0 + $0x7f0] sm:$0xff] }
0x1ca3   :  { %7687 = vmatprep.mubr.f32.mxu0 %v15022_v27  ;;  %7776 = vmatprep.mubr.f32.mxu1 %v15022_v27  ;;  %v14164_v12 = vpack.c.bf16 %v11144_v51, %v11128_v25  ;;  %v11246_v25 = vld [vmem:[%s20055_s12 + $0x808] sm:$0xff]  ;;  %v11277_v51 = vld [vmem:[%s20055_s12 + $0x900] sm:$0xff] }
0x1ca4   :  { %14133 = vmatprep.subr.bf16.mxu0 %v14132_v58  ;;  %14149 = vmatprep.subr.bf16.mxu1 %v14148_v4  ;;  %v14178_v58 = vpack.c.bf16 %v11113_v41, %v11097_v46  ;;  %v11127_v4 = vld [vmem:[%s20125_s0 + $0x560] sm:$0xff]  ;;  %v11294_v46 = vld [vmem:[%s20055_s12 + $0x988] sm:$0xff] }
0x1ca5   :  { %11222 = vmatmul.mubr.msk.f32.gmra.mrb[122].mxu0 %vm231_vm2, %v17735_v52  ;;  %11226 = vmatmul.mubr.msk.f32.gmra.mrb[122].mxu1 %vm231_vm2, %v17735_v52  ;;  %v14166_v14 = vpack.c.bf16 %v11143_v34, %v11127_v4  ;;  %v11264_v4 = vld [vmem:[%s20055_s12 + $0x898] sm:$0xff]  ;;  %v11295_v34 = vld [vmem:[%s20055_s12 + $0x990] sm:$0xff] }
0x1ca6   :  { %14135 = vmatpush1.bf16.msra.mxu0 %v14134_v62  ;;  %14151 = vmatpush1.bf16.msra.mxu1 %v14150_v11  ;;  %v14180_v62 = vpack.c.bf16 %v11146_v37, %v11130_v33  ;;  %v11160_v11 = vld [vmem:[%s20125_s0 + $0x668] sm:$0xff] }
0x1ca7   :  { %7693 = vmatprep.mubr.f32.mxu0 %v15022_v27  ;;  %7782 = vmatprep.mubr.f32.mxu1 %v15022_v27  ;;  %v14168_v30 = vpack.c.bf16 %v11176_v40, %v11160_v11  ;;  %v11278_v33 = vld [vmem:[%s20055_s12 + $0x908] sm:$0xff]  ;;  %v11248_v11 = vld [vmem:[%s20055_s12 + $0x818] sm:$0xff]  ;;  %v11279_v40 = vld [vmem:[%s20055_s12 + $0x910] sm:$0xff] }
0x1ca8   :  { %14137 = vmatprep.subr.bf16.mxu0 %v14136_v26  ;;  %14153 = vmatprep.subr.bf16.mxu1 %v14152_v35  ;;  %v14182_v26 = vpack.c.bf16 %v11145_v29, %v11129_v1  ;;  %v11159_v35 = vld [vmem:[%s20125_s0 + $0x660] sm:$0xff]  ;;  %v11296_v1 = vld [vmem:[%s20055_s12 + $0x998] sm:$0xff] }
0x1ca9   :  { %11223 = vmatmul.mubr.msk.f32.gmra.mrb[124].mxu0 %vm231_vm2, %v17942_v28  ;;  %11227 = vmatmul.mubr.msk.f32.gmra.mrb[124].mxu1 %vm231_vm2, %v17942_v28  ;;  %v14170_v19 = vpack.c.bf16 %v11175_v38, %v11159_v35  ;;  %v11266_v35 = vld [vmem:[%s20055_s12 + $0x8a8] sm:$0xff]  ;;  %v11297_v38 = vld [vmem:[%s20055_s12 + $0x9a0] sm:$0xff] }
0x1caa   :  { %14139 = vmatpush1.bf16.msra.mxu0 %v14138_v5  ;;  %14155 = vmatpush1.bf16.msra.mxu1 %v14154_v16  ;;  %v14184_v5 = vpack.c.bf16 %v11178_v3, %v11162_v22  ;;  %v11192_v16 = vld [vmem:[%s20125_s0 + $0x768] sm:$0xff]  ;;  %v11280_v22 = vld [vmem:[%s20055_s12 + $0x918] sm:$0xff] }
0x1cab   :  { %7699 = vmatprep.mubr.f32.mxu0 %v15022_v27  ;;  %7788 = vmatprep.mubr.f32.mxu1 %v15022_v27  ;;  %v14172_v59 = vpack.c.bf16 %v11208_v44, %v11192_v16  ;;  %v11249_v16 = vld [vmem:[%s20055_s12 + $0x820] sm:$0xff]  ;;  %v11250_v44 = vld [vmem:[%s20055_s12 + $0x828] sm:$0xff] }
0x1cac   :  { %14141 = vmatprep.subr.bf16.mxu0 %v14140_v20  ;;  %14157 = vmatprep.subr.bf16.mxu1 %v14156_v15  ;;  %v14186_v20 = vpack.c.bf16 %v11177_v21, %v11161_v2  ;;  %v11191_v15 = vld [vmem:[%s20125_s0 + $0x760] sm:$0xff]  ;;  %v11298_v2 = vld [vmem:[%s20055_s12 + $0x9a8] sm:$0xff]  ;;  %v18256_v21 = vld [vmem:[%s20056_s11 + $0x10] sm:$0xff]  ;;  %s20135_s0 = sld [smem:[#allocation15_spill]] }
0x1cad   :  { %11224 = vmatmul.mubr.msk.f32.gmra.mrb[126].mxu0 %vm231_vm2, %v17956_v43  ;;  %11228 = vmatmul.mubr.msk.f32.gmra.mrb[126].mxu1 %vm231_vm2, %v17956_v43  ;;  %v14174_v41 = vpack.c.bf16 %v11207_v32, %v11191_v15  ;;  %v11267_v15 = vld [vmem:[%s20055_s12 + $0x8b0] sm:$0xff]  ;;  %v18277_v32 = vrot.slane %v18256_v21, %v15274_v50 }
0x1cae   :  { %14143 = vmatpush1.bf16.msra.mxu0 %v14142_v6  ;;  %14159 = vmatpush1.bf16.msra.mxu1 %v14158_v39  ;;  %v14188_v6 = vpack.c.bf16 %v11210_v54, %v11194_v10  ;;  %v11261_v39 = vld [vmem:[%s20055_s12 + $0x880] sm:$0xff]  ;;  %v11282_v54 = vld [vmem:[%s20055_s12 + $0x928] sm:$0xff] }
0x1caf   :  { %7859 = vmatprep.mubr.f32.mxu0 %v15022_v27  ;;  %7948 = vmatprep.mubr.f32.mxu1 %v15022_v27  ;;  %v14192_v37 = vpack.c.bf16 %v11262_v49, %v11261_v39  ;;  %v11281_v10 = vld [vmem:[%s20055_s12 + $0x920] sm:$0xff]  ;;  %v14202_v39 = vpack.c.bf16 %v11250_v44, %v11249_v16 }
0x1cb0   :  { %14161 = vmatprep.subr.bf16.mxu0 %v14160_v31  ;;  %14177 = vmatprep.subr.bf16.mxu1 %v14176_v45  ;;  %v14190_v31 = vpack.c.bf16 %v11209_v23, %v11193_v53  ;;  %v11245_v45 = vld [vmem:[%s20055_s12 + $0x800] sm:$0xff]  ;;  %v18281_v53 = vrot.slane %v18256_v21, %v16165_v48  ;;  %v11268_v23 = vld [vmem:[%s20055_s12 + $0x8b8] sm:$0xff]  ;;  %v14234_v49 = vpack.c.bf16 %v11282_v54, %v11281_v10  ;;  %v11287_v10 = vld [vmem:[%s20055_s12 + $0x950] sm:$0xff] }
0x1cb1   :  { %11229 = vmatmul.mubr.msk.f32.vlgmr.msra.gmra.mrb[128].mxu0 %vm231_vm2, %v17729_v18  ;;  %11233 = vmatmul.mubr.msk.f32.vlgmr.msra.gmra.mrb[128].mxu1 %vm231_vm2, %v17729_v18  ;;  %v14194_v29 = vpack.c.bf16 %v11246_v25, %v11245_v45  ;;  %v14204_v45 = vpack.c.bf16 %v11268_v23, %v11267_v15  ;;  %v11288_v54 = vld [vmem:[%s20055_s12 + $0x958] sm:$0xff]  ;;  %v11305_v15 = vld [vmem:[%s20055_s12 + $0x9e0] sm:$0xff]  ;;  %v11306_v23 = vld [vmem:[%s20055_s12 + $0x9e8] sm:$0xff] }
0x1cb2   :  { %14163 = vmatpush1.bf16.msra.mxu0 %v14162_v60  ;;  %14179 = vmatpush1.bf16.msra.mxu1 %v14178_v58  ;;  %v14224_v60 = vpack.c.bf16 %v11294_v46, %v11293_v56  ;;  %v11263_v58 = vld [vmem:[%s20055_s12 + $0x890] sm:$0xff]  ;;  %v11252_v46 = vld [vmem:[%s20055_s12 + $0x838] sm:$0xff] }
0x1cb3   :  { %7865 = vmatprep.mubr.f32.mxu0 %v15022_v27  ;;  %7954 = vmatprep.mubr.f32.mxu1 %v15022_v27  ;;  %v14196_v3 = vpack.c.bf16 %v11264_v4, %v11263_v58  ;;  %v11251_v56 = vld [vmem:[%s20055_s12 + $0x830] sm:$0xff]  ;;  %v11301_v58 = vld [vmem:[%s20055_s12 + $0x9c0] sm:$0xff] }
0x1cb4   :  { %14165 = vmatprep.subr.bf16.mxu0 %v14164_v12  ;;  %14181 = vmatprep.subr.bf16.mxu1 %v14180_v62  ;;  %v14226_v12 = vpack.c.bf16 %v11278_v33, %v11277_v51  ;;  %v11247_v62 = vld [vmem:[%s20055_s12 + $0x810] sm:$0xff]  ;;  %v11269_v51 = vld [vmem:[%s20055_s12 + $0x8c0] sm:$0xff]  ;;  %v7508_v33 = vadd.f32 %v17799_v24, %v18277_v32  ;;  %v11302_v24 = vld [vmem:[%s20055_s12 + $0x9c8] sm:$0xff] }
0x1cb5   :  { %11230 = vmatmul.mubr.msk.f32.gmra.mrb[130].mxu0 %vm231_vm2, %v17735_v52  ;;  %11234 = vmatmul.mubr.msk.f32.gmra.mrb[130].mxu1 %vm231_vm2, %v17735_v52 }
0x1cb6   :  { %14167 = vmatpush1.bf16.msra.mxu0 %v14166_v14  ;;  %14183 = vmatpush1.bf16.msra.mxu1 %v14182_v26  ;;  %v14228_v14 = vpack.c.bf16 %v11296_v1, %v11295_v34  ;;  %v11265_v26 = vld [vmem:[%s20055_s12 + $0x8a0] sm:$0xff]  ;;  %v11254_v1 = vld [vmem:[%s20055_s12 + $0x848] sm:$0xff] }
0x1cb7   :  { %7871 = vmatprep.mubr.f32.mxu0 %v15022_v27  ;;  %7960 = vmatprep.mubr.f32.mxu1 %v15022_v27  ;;  %v11253_v34 = vld [vmem:[%s20055_s12 + $0x840] sm:$0xff] }
0x1cb8   :  { %14169 = vmatprep.subr.bf16.mxu0 %v14168_v30  ;;  %14185 = vmatprep.subr.bf16.mxu1 %v14184_v5  ;;  %v14198_v30 = vpack.c.bf16 %v11248_v11, %v11247_v62  ;;  %v14230_v5 = vpack.c.bf16 %v11280_v22, %v11279_v40  ;;  %v11271_v62 = vld [vmem:[%s20055_s12 + $0x8d0] sm:$0xff]  ;;  %v14240_v40 = vpack.c.bf16 %v11302_v24, %v11301_v58  ;;  %v11272_v22 = vld [vmem:[%s20055_s12 + $0x8d8] sm:$0xff] }
0x1cb9   :  { %11231 = vmatmul.mubr.msk.f32.gmra.mrb[132].mxu0 %vm231_vm2, %v17942_v28  ;;  %11235 = vmatmul.mubr.msk.f32.gmra.mrb[132].mxu1 %vm231_vm2, %v17942_v28  ;;  %v14212_v16 = vpack.c.bf16 %v11272_v22, %v11271_v62  ;;  %v11259_v24 = vld [vmem:[%s20055_s12 + $0x870] sm:$0xff]  ;;  %v11325_v62 = vld [vmem:[%s20055_s12 + $0xa80] sm:$0xff]  ;;  %v11358_v22 = vld [vmem:[%s20055_s12 + $0xb88] sm:$0xff] }
0x1cba   :  { %14171 = vmatpush1.bf16.msra.mxu0 %v14170_v19  ;;  %14187 = vmatpush1.bf16.msra.mxu1 %v14186_v20  ;;  %v14200_v19 = vpack.c.bf16 %v11266_v35, %v11265_v26  ;;  %v14232_v20 = vpack.c.bf16 %v11298_v2, %v11297_v38  ;;  %v8152_v26 = vmax.f32 %v7508_v33, 0.0  ;;  %v14210_v38 = vpack.c.bf16 %v11254_v1, %v11253_v34  ;;  %v11308_v33 = vld [vmem:[%s20055_s12 + $0x9f8] sm:$0xff] }
0x1cbb   :  { %7877 = vmatprep.mubr.f32.mxu0 %v15022_v27  ;;  %7966 = vmatprep.mubr.f32.mxu1 %v15022_v27 }
0x1cbc   :  { %14173 = vmatprep.subr.bf16.mxu0 %v14172_v59  ;;  %14189 = vmatprep.subr.bf16.mxu1 %v14188_v6  ;;  %v11299_v59 = vld [vmem:[%s20055_s12 + $0x9b0] sm:$0xff]  ;;  %v11300_v6 = vld [vmem:[%s20055_s12 + $0x9b8] sm:$0xff] }
0x1cbd   :  { %11232 = vmatmul.mubr.msk.f32.gmra.mrb[134].mxu0 %vm231_vm2, %v17956_v43  ;;  %11236 = vmatmul.mubr.msk.f32.gmra.mrb[134].mxu1 %vm231_vm2, %v17956_v43  ;;  %v14236_v25 = vpack.c.bf16 %v11300_v6, %v11299_v59  ;;  %v14246_v6 = vpack.c.bf16 %v11288_v54, %v11287_v10  ;;  %v11327_v10 = vld [vmem:[%s20055_s12 + $0xa90] sm:$0xff]  ;;  %v11328_v54 = vld [vmem:[%s20055_s12 + $0xa98] sm:$0xff] }
0x1cbe   :  { %14175 = vmatpush1.bf16.msra.mxu0 %v14174_v41  ;;  %14191 = vmatpush1.bf16.msra.mxu1 %v14190_v31  ;;  %v11283_v41 = vld [vmem:[%s20055_s12 + $0x930] sm:$0xff]  ;;  %v11284_v31 = vld [vmem:[%s20055_s12 + $0x938] sm:$0xff] }
0x1cbf   :  { %8037 = vmatprep.mubr.f32.mxu0 %v15022_v27  ;;  %8126 = vmatprep.mubr.f32.mxu1 %v15022_v27  ;;  %v14238_v4 = vpack.c.bf16 %v11284_v31, %v11283_v41  ;;  %v11289_v41 = vld [vmem:[%s20055_s12 + $0x960] sm:$0xff]  ;;  %v11290_v31 = vld [vmem:[%s20055_s12 + $0x968] sm:$0xff] }
0x1cc0   :  { %14193 = vmatprep.subr.bf16.mxu0 %v14192_v37  ;;  %14225 = vmatprep.subr.bf16.mxu1 %v14224_v60  ;;  %v7597_v37 = vadd.f32 %v17825_v36, %v18281_v53  ;;  %v11270_v60 = vld [vmem:[%s20055_s12 + $0x8c8] sm:$0xff]  ;;  %v14206_v36 = vpack.c.bf16 %v11252_v46, %v11251_v56  ;;  %v14248_v46 = vpack.c.bf16 %v11306_v23, %v11305_v15 }
0x1cc1   :  { %11237 = vmatmul.mubr.msk.f32.vlgmr.msra.gmra.mrb[136].mxu0 %vm231_vm2, %v17729_v18  ;;  %11241 = vmatmul.mubr.msk.f32.vlgmr.msra.gmra.mrb[136].mxu1 %vm231_vm2, %v17729_v18  ;;  %v14208_v11 = vpack.c.bf16 %v11270_v60, %v11269_v51  ;;  %v11307_v51 = vld [vmem:[%s20055_s12 + $0x9f0] sm:$0xff]  ;;  %v14250_v58 = vpack.c.bf16 %v11290_v31, %v11289_v41  ;;  %v11344_v31 = vld [vmem:[%s20055_s12 + $0xb18] sm:$0xff] }
0x1cc2   :  { %14195 = vmatpush3.bf16.msra.mxu0 %v14194_v29  ;;  %14227 = vmatpush3.bf16.msra.mxu1 %v14226_v12  ;;  %v11285_v29 = vld [vmem:[%s20055_s12 + $0x940] sm:$0xff]  ;;  %v11286_v12 = vld [vmem:[%s20055_s12 + $0x948] sm:$0xff]  ;;  %v8154_v35 = vmax.f32 %v7597_v37, 0.0  ;;  %v18410_v37 = vrot.slane %v18256_v21, %v15267_v47  ;;  %v14252_v1 = vpack.c.bf16 %v11308_v33, %v11307_v51 }
0x1cc3   :  { %8043 = vmatprep.mubr.f32.mxu0 %v15022_v27  ;;  %8132 = vmatprep.mubr.f32.mxu1 %v15022_v27  ;;  %v14242_v2 = vpack.c.bf16 %v11286_v12, %v11285_v29  ;;  %v11291_v29 = vld [vmem:[%s20055_s12 + $0x970] sm:$0xff]  ;;  %v11292_v12 = vld [vmem:[%s20055_s12 + $0x978] sm:$0xff]  ;;  %v11361_v51 = vld [vmem:[%s20055_s12 + $0xba0] sm:$0xff] }
0x1cc4   :  { %14197 = vmatprep.subr.bf16.mxu0 %v14196_v3  ;;  %14229 = vmatprep.subr.bf16.mxu1 %v14228_v14  ;;  %v11303_v3 = vld [vmem:[%s20055_s12 + $0x9d0] sm:$0xff]  ;;  %v11304_v14 = vld [vmem:[%s20055_s12 + $0x9d8] sm:$0xff]  ;;  %v11362_v33 = vld [vmem:[%s20055_s12 + $0xba8] sm:$0xff] }
0x1cc5   :  { %11238 = vmatmul.mubr.msk.f32.gmra.mrb[138].mxu0 %vm231_vm2, %v17735_v52  ;;  %11242 = vmatmul.mubr.msk.f32.gmra.mrb[138].mxu1 %vm231_vm2, %v17735_v52  ;;  %v14244_v44 = vpack.c.bf16 %v11304_v14, %v11303_v3  ;;  %v7506_v3 = vadd.f32 %v17797_v61, %v18410_v37  ;;  %v7514_v61 = vadd.f32 %v17803_v8, %v18277_v32  ;;  %v11359_v8 = vld [vmem:[%s20055_s12 + $0xb90] sm:$0xff] }
0x1cc6   :  { %14199 = vmatpush3.bf16.msra.mxu0 %v14198_v30  ;;  %14231 = vmatpush3.bf16.msra.mxu1 %v14230_v5  ;;  %v11255_v30 = vld [vmem:[%s20055_s12 + $0x850] sm:$0xff]  ;;  %v11256_v5 = vld [vmem:[%s20055_s12 + $0x858] sm:$0xff] }
0x1cc7   :  { %8049 = vmatprep.mubr.f32.mxu0 %v15022_v27  ;;  %8138 = vmatprep.mubr.f32.mxu1 %v15022_v27  ;;  %v14214_v59 = vpack.c.bf16 %v11256_v5, %v11255_v30  ;;  %v11309_v30 = vld [vmem:[%s20055_s12 + $0xa00] sm:$0xff]  ;;  %v11310_v5 = vld [vmem:[%s20055_s12 + $0xa08] sm:$0xff] }
0x1cc8   :  { %14201 = vmatprep.subr.bf16.mxu0 %v14200_v19  ;;  %14233 = vmatprep.subr.bf16.mxu1 %v14232_v20  ;;  %v11273_v19 = vld [vmem:[%s20055_s12 + $0x8e0] sm:$0xff]  ;;  %v11274_v20 = vld [vmem:[%s20055_s12 + $0x8e8] sm:$0xff] }
0x1cc9   :  { %11239 = vmatmul.mubr.msk.f32.gmra.mrb[140].mxu0 %vm231_vm2, %v17942_v28  ;;  %11243 = vmatmul.mubr.msk.f32.gmra.mrb[140].mxu1 %vm231_vm2, %v17942_v28  ;;  %v14216_v56 = vpack.c.bf16 %v11274_v20, %v11273_v19  ;;  %v8151_v19 = vmax.f32 %v7506_v3, 0.0  ;;  %v7512_v20 = vadd.f32 %v17801_v42, %v18410_v37  ;;  %v11363_v3 = vld [vmem:[%s20055_s12 + $0xbb0] sm:$0xff] }
0x1cca   :  { %14203 = vmatpush3.bf16.msra.mxu0 %v14202_v39  ;;  %14235 = vmatpush3.bf16.msra.mxu1 %v14234_v49  ;;  %v11257_v39 = vld [vmem:[%s20055_s12 + $0x860] sm:$0xff]  ;;  %v11258_v49 = vld [vmem:[%s20055_s12 + $0x868] sm:$0xff] }
0x1ccb   :  { %8055 = vmatprep.mubr.f32.mxu0 %v15022_v27  ;;  %8144 = vmatprep.mubr.f32.mxu1 %v15022_v27  ;;  %v14218_v60 = vpack.c.bf16 %v11258_v49, %v11257_v39  ;;  %v11311_v39 = vld [vmem:[%s20055_s12 + $0xa10] sm:$0xff]  ;;  %v11312_v49 = vld [vmem:[%s20055_s12 + $0xa18] sm:$0xff] }
0x1ccc   :  { %14205 = vmatprep.subr.bf16.mxu0 %v14204_v45  ;;  %14237 = vmatprep.subr.bf16.mxu1 %v14236_v25  ;;  %v11275_v45 = vld [vmem:[%s20055_s12 + $0x8f0] sm:$0xff]  ;;  %v11276_v25 = vld [vmem:[%s20055_s12 + $0x8f8] sm:$0xff] }
0x1ccd   :  { %11240 = vmatmul.mubr.msk.f32.gmra.mrb[142].mxu0 %vm231_vm2, %v17956_v43  ;;  %11244 = vmatmul.mubr.msk.f32.gmra.mrb[142].mxu1 %vm231_vm2, %v17956_v43  ;;  %v14220_v34 = vpack.c.bf16 %v11276_v25, %v11275_v45  ;;  %v11329_v45 = vld [vmem:[%s20055_s12 + $0xaa0] sm:$0xff]  ;;  %v11330_v25 = vld [vmem:[%s20055_s12 + $0xaa8] sm:$0xff] }
0x1cce   :  { %14207 = vmatpush3.bf16.msra.mxu0 %v14206_v36  ;;  %14239 = vmatpush3.bf16.msra.mxu1 %v14238_v4  ;;  %v11260_v36 = vld [vmem:[%s20055_s12 + $0x878] sm:$0xff]  ;;  %v18420_v4 = vrot.slane %v18256_v21, %v16318_v55 }
0x1ccf   :  { %8544 = vmatprep.mubr.f32.mxu0 %v8152_v26  ;;  %8629 = vmatprep.mubr.f32.mxu1 %v8154_v35  ;;  %v14222_v14 = vpack.c.bf16 %v11260_v36, %v11259_v24  ;;  %v14254_v26 = vpack.c.bf16 %v11292_v12, %v11291_v29  ;;  %v14262_v24 = vpack.c.bf16 %v11312_v49, %v11311_v39  ;;  %v11335_v39 = vld [vmem:[%s20055_s12 + $0xad0] sm:$0xff]  ;;  %v11336_v49 = vld [vmem:[%s20055_s12 + $0xad8] sm:$0xff] }
0x1cd0   :  { %14209 = vmatprep.subr.bf16.mxu0 %v14208_v11  ;;  %14241 = vmatprep.subr.bf16.mxu1 %v14240_v40  ;;  %v11326_v11 = vld [vmem:[%s20055_s12 + $0xa88] sm:$0xff]  ;;  %v11357_v40 = vld [vmem:[%s20055_s12 + $0xb80] sm:$0xff]  ;;  %v7595_v35 = vadd.f32 %v17823_v17, %v18420_v4  ;;  %v7601_v23 = vadd.f32 %v17827_v9, %v18420_v4  ;;  %v11343_v9 = vld [vmem:[%s20055_s12 + $0xb10] sm:$0xff]  ;;  %v14264_v29 = vpack.c.bf16 %v11330_v25, %v11329_v45 }
0x1cd1   :  { %v11341_v17 = vld [vmem:[%s20055_s12 + $0xb00] sm:$0xff]  ;;  %v14294_v36 = vpack.c.bf16 %v11344_v31, %v11343_v9  ;;  %v14296_v12 = vpack.c.bf16 %v11362_v33, %v11361_v51  ;;  %v11319_v9 = vld [vmem:[%s20055_s12 + $0xa50] sm:$0xff]  ;;  %v11320_v31 = vld [vmem:[%s20055_s12 + $0xa58] sm:$0xff]  ;;  %v14276_v45 = vpack.c.bf16 %v11336_v49, %v11335_v39 }
0x1cd2   :  { %14211 = vmatpush3.bf16.msra.mxu0 %v14210_v38  ;;  %14243 = vmatpush3.bf16.msra.mxu1 %v14242_v2  ;;  %v14256_v38 = vpack.c.bf16 %v11326_v11, %v11325_v62  ;;  %v14288_v2 = vpack.c.bf16 %v11358_v22, %v11357_v40  ;;  %v8153_v15 = vmax.f32 %v7595_v35, 0.0  ;;  %v11345_v62 = vld [vmem:[%s20055_s12 + $0xb20] sm:$0xff]  ;;  %v11346_v11 = vld [vmem:[%s20055_s12 + $0xb28] sm:$0xff]  ;;  %v11331_v40 = vld [vmem:[%s20055_s12 + $0xab0] sm:$0xff] }
0x1cd3   :  { %14213 = vmatprep.subr.bf16.mxu0 %v14212_v16  ;;  %14245 = vmatprep.subr.bf16.mxu1 %v14244_v44  ;;  %v7603_v16 = vadd.f32 %v17829_v57, %v18281_v53  ;;  %v11342_v44 = vld [vmem:[%s20055_s12 + $0xb08] sm:$0xff]  ;;  %v11360_v57 = vld [vmem:[%s20055_s12 + $0xb98] sm:$0xff]  ;;  %v14298_v35 = vpack.c.bf16 %v11346_v11, %v11345_v62  ;;  %v11351_v51 = vld [vmem:[%s20055_s12 + $0xb50] sm:$0xff] }
0x1cd4   :  { %v14292_v41 = vpack.c.bf16 %v11360_v57, %v11359_v8  ;;  %v11332_v22 = vld [vmem:[%s20055_s12 + $0xab8] sm:$0xff] }
0x1cd5   :  { %v8170_v42 = vmax.f32 %v7603_v16, 0.0  ;;  %v11348_v16 = vld [vmem:[%s20055_s12 + $0xb38] sm:$0xff] }
0x1cd6   :  { %14215 = vmatpush3.bf16.msra.mxu0 %v14214_v59  ;;  %14247 = vmatpush3.bf16.msra.mxu1 %v14246_v6  ;;  %v14258_v59 = vpack.c.bf16 %v11310_v5, %v11309_v30  ;;  %v14290_v6 = vpack.c.bf16 %v11342_v44, %v11341_v17  ;;  %v14268_v30 = vpack.c.bf16 %v11332_v22, %v11331_v40  ;;  %v11333_v17 = vld [vmem:[%s20055_s12 + $0xac0] sm:$0xff]  ;;  %v11334_v44 = vld [vmem:[%s20055_s12 + $0xac8] sm:$0xff]  ;;  %v11352_v33 = vld [vmem:[%s20055_s12 + $0xb58] sm:$0xff] }
0x1cd7   :  { %14217 = vmatprep.subr.bf16.mxu0 %v14216_v56  ;;  %14249 = vmatprep.subr.bf16.mxu1 %v14248_v46  ;;  %v8168_v56 = vmax.f32 %v7514_v61, 0.0  ;;  %v14260_v46 = vpack.c.bf16 %v11328_v54, %v11327_v10  ;;  %v11347_v61 = vld [vmem:[%s20055_s12 + $0xb30] sm:$0xff]  ;;  %v11365_v10 = vld [vmem:[%s20055_s12 + $0xbc0] sm:$0xff]  ;;  %v11366_v54 = vld [vmem:[%s20055_s12 + $0xbc8] sm:$0xff] }
0x1cd8   :  { %v14302_v57 = vpack.c.bf16 %v11348_v16, %v11347_v61  ;;  %v11353_v40 = vld [vmem:[%s20055_s12 + $0xb60] sm:$0xff]  ;;  %v11354_v22 = vld [vmem:[%s20055_s12 + $0xb68] sm:$0xff] }
0x1cda   :  { %14219 = vmatpush3.bf16.msra.mxu0 %v14218_v60  ;;  %14251 = vmatpush3.bf16.msra.mxu1 %v14250_v58  ;;  %v8167_v60 = vmax.f32 %v7512_v20, 0.0  ;;  %v8169_v58 = vmax.f32 %v7601_v23, 0.0  ;;  %v11318_v20 = vld [vmem:[%s20055_s12 + $0xa48] sm:$0xff]  ;;  %v14304_v23 = vpack.c.bf16 %v11366_v54, %v11365_v10  ;;  %v11389_v10 = vld [vmem:[%s20055_s12 + $0xc80] sm:$0xff] }
0x1cdb   :  { %14221 = vmatprep.subr.bf16.mxu0 %v14220_v34  ;;  %14253 = vmatprep.subr.bf16.mxu1 %v14252_v1  ;;  %v11313_v34 = vld [vmem:[%s20055_s12 + $0xa20] sm:$0xff]  ;;  %v11314_v1 = vld [vmem:[%s20055_s12 + $0xa28] sm:$0xff] }
0x1cdc   :  { %v11390_v54 = vld [vmem:[%s20055_s12 + $0xc88] sm:$0xff] }
0x1cde   :  { %14223 = vmatpush3.bf16.msra.mxu0 %v14222_v14  ;;  %14255 = vmatpush3.bf16.msra.mxu1 %v14254_v26  ;;  %v11364_v14 = vld [vmem:[%s20055_s12 + $0xbb8] sm:$0xff]  ;;  %v14266_v26 = vpack.c.bf16 %v11314_v1, %v11313_v34  ;;  %v14278_v34 = vpack.c.bf16 %v11320_v31, %v11319_v9  ;;  %v14310_v1 = vpack.c.bf16 %v11352_v33, %v11351_v51 }
0x1cdf   :  { %14257 = vmatprep.subr.bf16.mxu0 %v14256_v38  ;;  %14289 = vmatprep.subr.bf16.mxu1 %v14288_v2  ;;  %v11315_v38 = vld [vmem:[%s20055_s12 + $0xa30] sm:$0xff]  ;;  %v11316_v2 = vld [vmem:[%s20055_s12 + $0xa38] sm:$0xff]  ;;  %v14300_v5 = vpack.c.bf16 %v11364_v14, %v11363_v3 }
0x1ce0   :  { %v14270_v8 = vpack.c.bf16 %v11316_v2, %v11315_v38  ;;  %v11339_v3 = vld [vmem:[%s20055_s12 + $0xaf0] sm:$0xff]  ;;  %v11340_v14 = vld [vmem:[%s20055_s12 + $0xaf8] sm:$0xff]  ;;  %v14314_v2 = vpack.c.bf16 %v11354_v22, %v11353_v40 }
0x1ce1   :  { %8545 = vmatmul.mubr.f32.vlgmr.msra.gmra.mrb[144].mxu0 %v8151_v19  ;;  %8630 = vmatmul.mubr.f32.vlgmr.msra.gmra.mrb[144].mxu1 %v8153_v15  ;;  %v11317_v19 = vld [vmem:[%s20055_s12 + $0xa40] sm:$0xff]  ;;  %v14272_v15 = vpack.c.bf16 %v11334_v44, %v11333_v17  ;;  %v14284_v61 = vpack.c.bf16 %v11340_v14, %v11339_v3  ;;  %v11355_v17 = vld [vmem:[%s20055_s12 + $0xb70] sm:$0xff]  ;;  %v11356_v44 = vld [vmem:[%s20055_s12 + $0xb78] sm:$0xff] }
0x1ce2   :  { %8549 = vmatprep.mubr.f32.mxu0 %v8168_v56  ;;  %8634 = vmatprep.mubr.f32.mxu1 %v8170_v42  ;;  %v11367_v56 = vld [vmem:[%s20055_s12 + $0xbd0] sm:$0xff]  ;;  %v11368_v42 = vld [vmem:[%s20055_s12 + $0xbd8] sm:$0xff] }
0x1ce3   :  { %14259 = vmatpush3.bf16.msra.mxu0 %v14258_v59  ;;  %14291 = vmatpush3.bf16.msra.mxu1 %v14290_v6  ;;  %v11349_v59 = vld [vmem:[%s20055_s12 + $0xb40] sm:$0xff]  ;;  %v11350_v6 = vld [vmem:[%s20055_s12 + $0xb48] sm:$0xff]  ;;  %v14308_v25 = vpack.c.bf16 %v11368_v42, %v11367_v56  ;;  %v18683_v14 = vld [vmem:[%s20055_s12 + $0xc90] sm:$0xff] }
0x1ce4   :  { %14261 = vmatprep.subr.bf16.mxu0 %v14260_v46  ;;  %14293 = vmatprep.subr.bf16.mxu1 %v14292_v41  ;;  %v14274_v46 = vpack.c.bf16 %v11318_v20, %v11317_v19  ;;  %v14306_v41 = vpack.c.bf16 %v11350_v6, %v11349_v59  ;;  %v14318_v20 = vpack.c.bf16 %v11356_v44, %v11355_v17  ;;  %v11424_v17 = vld [vmem:[%s20055_s12 + $0xd98] sm:$0xff] }
0x1ce5   :  { %8550 = vmatmul.mubr.f32.gmra.mrb[146].mxu0 %v8167_v60  ;;  %8635 = vmatmul.mubr.f32.gmra.mrb[146].mxu1 %v8169_v58  ;;  %v11337_v60 = vld [vmem:[%s20055_s12 + $0xae0] sm:$0xff]  ;;  %v11338_v58 = vld [vmem:[%s20055_s12 + $0xae8] sm:$0xff] }
0x1ce6   :  { %v14280_v62 = vpack.c.bf16 %v11338_v58, %v11337_v60  ;;  %v18650_v60 = vrot.slane %v18256_v21, %v16575_v0 }
0x1ce7   :  { %14263 = vmatpush3.bf16.msra.mxu0 %v14262_v24  ;;  %14295 = vmatpush3.bf16.msra.mxu1 %v14294_v36  ;;  %v11369_v24 = vld [vmem:[%s20055_s12 + $0xbe0] sm:$0xff]  ;;  %v11370_v36 = vld [vmem:[%s20055_s12 + $0xbe8] sm:$0xff] }
0x1ce8   :  { %14265 = vmatprep.subr.bf16.mxu0 %v14264_v29  ;;  %14297 = vmatprep.subr.bf16.mxu1 %v14296_v12  ;;  %v11321_v29 = vld [vmem:[%s20055_s12 + $0xa60] sm:$0xff]  ;;  %v11322_v12 = vld [vmem:[%s20055_s12 + $0xa68] sm:$0xff]  ;;  %v14312_v11 = vpack.c.bf16 %v11370_v36, %v11369_v24 }
0x1ce9   :  { %v14282_v38 = vpack.c.bf16 %v11322_v12, %v11321_v29 }
0x1ceb   :  { %14267 = vmatpush3.bf16.msra.mxu0 %v14266_v26  ;;  %14299 = vmatpush3.bf16.msra.mxu1 %v14298_v35  ;;  %v11371_v26 = vld [vmem:[%s20055_s12 + $0xbf0] sm:$0xff]  ;;  %v11372_v35 = vld [vmem:[%s20055_s12 + $0xbf8] sm:$0xff] }
0x1cec   :  { %14269 = vmatprep.subr.bf16.mxu0 %v14268_v30  ;;  %14301 = vmatprep.subr.bf16.mxu1 %v14300_v5  ;;  %v11323_v30 = vld [vmem:[%s20055_s12 + $0xa70] sm:$0xff]  ;;  %v11324_v5 = vld [vmem:[%s20055_s12 + $0xa78] sm:$0xff]  ;;  %v14316_v16 = vpack.c.bf16 %v11372_v35, %v11371_v26 }
0x1ced   :  { %v14286_v19 = vpack.c.bf16 %v11324_v5, %v11323_v30  ;;  %v18688_v26 = vld [vmem:[%s20055_s12 + $0xc98] sm:$0xff] }
0x1cef   :  { %14271 = vmatpush3.bf16.msra.mxu0 %v14270_v8  ;;  %14303 = vmatpush3.bf16.msra.mxu1 %v14302_v57  ;;  %v11421_v8 = vld [vmem:[%s20055_s12 + $0xd80] sm:$0xff]  ;;  %v11422_v57 = vld [vmem:[%s20055_s12 + $0xd88] sm:$0xff] }
0x1cf0   :  { %14273 = vmatprep.subr.bf16.mxu0 %v14272_v15  ;;  %14305 = vmatprep.subr.bf16.mxu1 %v14304_v23  ;;  %v14320_v15 = vpack.c.bf16 %v11390_v54, %v11389_v10  ;;  %v14352_v23 = vpack.c.bf16 %v11422_v57, %v11421_v8  ;;  %v18703_v54 = vld [vmem:[%s20055_s12 + $0xc10] sm:$0xff] }
0x1cf3   :  { %14275 = vmatpush3.bf16.msra.mxu0 %v14274_v46  ;;  %14307 = vmatpush3.bf16.msra.mxu1 %v14306_v41 }
0x1cf4   :  { %14277 = vmatprep.subr.bf16.mxu0 %v14276_v45  ;;  %14309 = vmatprep.subr.bf16.mxu1 %v14308_v25 }
0x1cf7   :  { %14279 = vmatpush3.bf16.msra.mxu0 %v14278_v34  ;;  %14311 = vmatpush3.bf16.msra.mxu1 %v14310_v1  ;;  %v18656_v1 = vrot.slane %v18256_v21, %v16578_v63 }
0x1cf8   :  { %14281 = vmatprep.subr.bf16.mxu0 %v14280_v62  ;;  %14313 = vmatprep.subr.bf16.mxu1 %v14312_v11  ;;  %v18662_v62 = vrot.slane %v18256_v21, %v16581_v7  ;;  %v11374_v11 = vld [vmem:[%s20055_s12 + $0xc08] sm:$0xff] }
0x1cfb   :  { %14283 = vmatpush3.bf16.msra.mxu0 %v14282_v38  ;;  %14315 = vmatpush3.bf16.msra.mxu1 %v14314_v2 }
0x1cfc   :  { %14285 = vmatprep.subr.bf16.mxu0 %v14284_v61  ;;  %14317 = vmatprep.subr.bf16.mxu1 %v14316_v16  ;;  %v11423_v16 = vld [vmem:[%s20055_s12 + $0xd90] sm:$0xff] }
0x1cff   :  { %14287 = vmatpush3.bf16.msra.mxu0 %v14286_v19  ;;  %14319 = vmatpush3.bf16.msra.mxu1 %v14318_v20  ;;  %v18708_v19 = vld [vmem:[%s20055_s12 + $0xc18] sm:$0xff]  ;;  %v18713_v20 = vld [vmem:[%s20055_s12 + $0xd10] sm:$0xff] }
0x1d00   :  { %14321 = vmatprep.subr.bf16.mxu0 %v14320_v15  ;;  %14353 = vmatprep.subr.bf16.mxu1 %v14352_v23  ;;  %v18718_v15 = vld [vmem:[%s20055_s12 + $0xd18] sm:$0xff] }
0x1d6a   :  { %v7517_v59 = vpop.f32.mrb[116].mxu0  ;;  %v7606_v6 = vpop.f32.mrb[116].mxu1 }
0x1d6b   :  { %v7518_v39 = vadd.f32 %v7517_v59, %v18410_v37  ;;  %v7607_v49 = vadd.f32 %v7606_v6, %v18420_v4  ;;  %v7519_v56 = vpop.f32.mrb[117].mxu0  ;;  %v7608_v42 = vpop.f32.mrb[117].mxu1 }
0x1d6c   :  { %v7520_v46 = vadd.f32 %v7519_v56, %v18277_v32  ;;  %v7609_v41 = vadd.f32 %v7608_v42, %v18281_v53  ;;  %v14356_v56 = vpack.c.bf16 %v11424_v17, %v11423_v16  ;;  %v18725_v42 = vld [vmem:[%s20055_s12 + $0xca0] sm:$0xff] }
0x1d6d   :  { %v8183_v45 = vmax.f32 %v7518_v39, 0.0  ;;  %v8185_v25 = vmax.f32 %v7607_v49, 0.0  ;;  %v14324_v49 = vpack.c.bf16 %v18688_v26, %v18683_v14 }
0x1d6e   :  { %v8184_v9 = vmax.f32 %v7520_v46, 0.0  ;;  %v8186_v31 = vmax.f32 %v7609_v41, 0.0  ;;  %v18730_v46 = vld [vmem:[%s20055_s12 + $0xca8] sm:$0xff] }
0x1d6f   :  { %v14328_v14 = vpack.c.bf16 %v18730_v46, %v18725_v42  ;;  %v11411_v42 = vld [vmem:[%s20055_s12 + $0xd30] sm:$0xff] }
0x1d70   :  { %v7523_v51 = vpop.f32.mrb[118].mxu0  ;;  %v7612_v33 = vpop.f32.mrb[118].mxu1  ;;  %8554 = vmatprep.mubr.f32.mxu0 %v8184_v9  ;;  %8639 = vmatprep.mubr.f32.mxu1 %v8186_v31 }
0x1d71   :  { %v7524_v58 = vadd.f32 %v7523_v51, %v18410_v37  ;;  %v7613_v24 = vadd.f32 %v7612_v33, %v18420_v4  ;;  %v7525_v36 = vpop.f32.mrb[119].mxu0  ;;  %v7614_v34 = vpop.f32.mrb[119].mxu1  ;;  %8555 = vmatmul.mubr.f32.gmra.mrb[148].mxu0 %v8183_v45  ;;  %8640 = vmatmul.mubr.f32.gmra.mrb[148].mxu1 %v8185_v25  ;;  %v18666_v37 = vrot.slane %v18256_v21, %v16588_v13  ;;  %v11373_v4 = vld [vmem:[%s20055_s12 + $0xc00] sm:$0xff] }
0x1d72   :  { %v7526_v29 = vadd.f32 %v7525_v36, %v18277_v32  ;;  %v7615_v12 = vadd.f32 %v7614_v34, %v18281_v53  ;;  %v11405_v32 = vld [vmem:[%s20055_s12 + $0xd00] sm:$0xff]  ;;  %v11406_v53 = vld [vmem:[%s20055_s12 + $0xd08] sm:$0xff]  ;;  %v14322_v8 = vpack.c.bf16 %v11374_v11, %v11373_v4  ;;  %v14358_v4 = vpack.c.bf16 %v18718_v15, %v18713_v20  ;;  %v18804_v15 = vld [vmem:[%s20055_s12 + $0xc30] sm:$0xff] }
0x1d73   :  { %v8199_v35 = vmax.f32 %v7524_v58, 0.0  ;;  %v8201_v38 = vmax.f32 %v7613_v24, 0.0  ;;  %v14354_v57 = vpack.c.bf16 %v11406_v53, %v11405_v32  ;;  %v11425_v33 = vld [vmem:[%s20055_s12 + $0xda0] sm:$0xff]  ;;  %v11426_v58 = vld [vmem:[%s20055_s12 + $0xda8] sm:$0xff]  ;;  %v18769_v53 = vld [vmem:[%s20056_s11 + $0x18] sm:$0xff] }
0x1d74   :  { %v8200_v40 = vmax.f32 %v7526_v29, 0.0  ;;  %v8202_v22 = vmax.f32 %v7615_v12, 0.0  ;;  %v7683_v21 = vpop.f32.mrb[120].mxu0  ;;  %v7772_v3 = vpop.f32.mrb[120].mxu1  ;;  %v18745_v34 = vld [vmem:[%s20055_s12 + $0xc20] sm:$0xff]  ;;  %v18750_v29 = vld [vmem:[%s20055_s12 + $0xc28] sm:$0xff]  ;;  %v14326_v12 = vpack.c.bf16 %v18708_v19, %v18703_v54  ;;  %v14360_v26 = vpack.c.bf16 %v11426_v58, %v11425_v33 }
0x1d75   :  { %v7684_v2 = vadd.f32 %v7683_v21, %v18650_v60  ;;  %v7773_v30 = vadd.f32 %v7772_v3, %v18656_v1  ;;  %v7685_v5 = vpop.f32.mrb[121].mxu0  ;;  %v7774_v61 = vpop.f32.mrb[121].mxu1  ;;  %v18759_v11 = vld [vmem:[%s20055_s12 + $0xd20] sm:$0xff]  ;;  %v18764_v32 = vld [vmem:[%s20055_s12 + $0xd28] sm:$0xff]  ;;  %v18799_v20 = vrot.slane %v18769_v53, %v15274_v50  ;;  %v11380_v50 = vld [vmem:[%s20055_s12 + $0xc38] sm:$0xff] }
0x1d76   :  { %v7686_v44 = vadd.f32 %v7685_v5, %v18662_v62  ;;  %v7775_v10 = vadd.f32 %v7774_v61, %v18666_v37  ;;  %8559 = vmatprep.mubr.f32.mxu0 %v8200_v40  ;;  %8644 = vmatprep.mubr.f32.mxu1 %v8202_v22  ;;  %v14362_v19 = vpack.c.bf16 %v18764_v32, %v18759_v11  ;;  %v11397_v33 = vld [vmem:[%s20055_s12 + $0xcc0] sm:$0xff]  ;;  %v11382_v32 = vld [vmem:[%s20055_s12 + $0xc48] sm:$0xff] }
0x1d77   :  { %8560 = vmatmul.mubr.f32.gmra.mrb[150].mxu0 %v8199_v35  ;;  %8645 = vmatmul.mubr.f32.gmra.mrb[150].mxu1 %v8201_v38  ;;  %v8155_v41 = vmax.f32 %v7684_v2, 0.0  ;;  %v8157_v9 = vmax.f32 %v7773_v30, 0.0  ;;  %v18776_v35 = vld [vmem:[%s20055_s12 + $0xcb0] sm:$0xff]  ;;  %v18781_v38 = vld [vmem:[%s20055_s12 + $0xcb8] sm:$0xff] }
0x1d78   :  { %v8156_v23 = vmax.f32 %v7686_v44, 0.0  ;;  %v8158_v59 = vmax.f32 %v7775_v10, 0.0  ;;  %v7689_v6 = vpop.f32.mrb[122].mxu0  ;;  %v7778_v39 = vpop.f32.mrb[122].mxu1  ;;  %v11427_v44 = vld [vmem:[%s20055_s12 + $0xdb0] sm:$0xff]  ;;  %v11428_v10 = vld [vmem:[%s20055_s12 + $0xdb8] sm:$0xff] }
0x1d79   :  { %v7690_v31 = vadd.f32 %v7689_v6, %v18650_v60  ;;  %v7779_v45 = vadd.f32 %v7778_v39, %v18656_v1  ;;  %v7691_v25 = vpop.f32.mrb[123].mxu0  ;;  %v7780_v51 = vpop.f32.mrb[123].mxu1 }
0x1d7a   :  { %v7692_v24 = vadd.f32 %v7691_v25, %v18662_v62  ;;  %v7781_v36 = vadd.f32 %v7780_v51, %v18666_v37  ;;  %8714 = vmatprep.mubr.f32.mxu0 %v8156_v23  ;;  %8799 = vmatprep.mubr.f32.mxu1 %v8158_v59  ;;  %v11412_v51 = vld [vmem:[%s20055_s12 + $0xd38] sm:$0xff] }
0x1d7b   :  { %8715 = vmatmul.mubr.f32.vlgmr.msra.gmra.mrb[152].mxu0 %v8155_v41  ;;  %8800 = vmatmul.mubr.f32.vlgmr.msra.gmra.mrb[152].mxu1 %v8157_v9  ;;  %v8171_v2 = vmax.f32 %v7690_v31, 0.0  ;;  %v8173_v30 = vmax.f32 %v7779_v45, 0.0  ;;  %v14366_v11 = vpack.c.bf16 %v11412_v51, %v11411_v42  ;;  %v11401_v42 = vld [vmem:[%s20055_s12 + $0xce0] sm:$0xff] }
0x1d7c   :  { %v8172_v40 = vmax.f32 %v7692_v24, 0.0  ;;  %v8174_v22 = vmax.f32 %v7781_v36, 0.0  ;;  %14323 = vmatpush3.bf16.msra.mxu0 %v14322_v8  ;;  %14355 = vmatpush3.bf16.msra.mxu1 %v14354_v57  ;;  %v7695_v21 = vpop.f32.mrb[124].mxu0  ;;  %v7784_v3 = vpop.f32.mrb[124].mxu1  ;;  %v14330_v57 = vpack.c.bf16 %v18750_v29, %v18745_v34  ;;  %v11429_v36 = vld [vmem:[%s20055_s12 + $0xdc0] sm:$0xff] }
0x1d7d   :  { %v7696_v5 = vadd.f32 %v7695_v21, %v18650_v60  ;;  %v7785_v61 = vadd.f32 %v7784_v3, %v18656_v1  ;;  %v7697_v16 = vpop.f32.mrb[125].mxu0  ;;  %v7786_v17 = vpop.f32.mrb[125].mxu1  ;;  %14325 = vmatprep.subr.bf16.mxu0 %v14324_v49  ;;  %14357 = vmatprep.subr.bf16.mxu1 %v14356_v56  ;;  %v14332_v49 = vpack.c.bf16 %v18781_v38, %v18776_v35  ;;  %v11414_v38 = vld [vmem:[%s20055_s12 + $0xd48] sm:$0xff] }
0x1d7e   :  { %v7698_v54 = vadd.f32 %v7697_v16, %v18662_v62  ;;  %v7787_v8 = vadd.f32 %v7786_v17, %v18666_v37  ;;  %8719 = vmatprep.mubr.f32.mxu0 %v8172_v40  ;;  %8804 = vmatprep.mubr.f32.mxu1 %v8174_v22  ;;  %v14364_v56 = vpack.c.bf16 %v11428_v10, %v11427_v44  ;;  %v11413_v40 = vld [vmem:[%s20055_s12 + $0xd40] sm:$0xff]  ;;  %v11431_v16 = vld [vmem:[%s20055_s12 + $0xdd0] sm:$0xff]  ;;  %v11432_v17 = vld [vmem:[%s20055_s12 + $0xdd8] sm:$0xff] }
0x1d7f   :  { %8720 = vmatmul.mubr.f32.gmra.mrb[154].mxu0 %v8171_v2  ;;  %8805 = vmatmul.mubr.f32.gmra.mrb[154].mxu1 %v8173_v30  ;;  %v8187_v46 = vmax.f32 %v7696_v5, 0.0  ;;  %v8189_v41 = vmax.f32 %v7785_v61, 0.0  ;;  %v11399_v2 = vld [vmem:[%s20055_s12 + $0xcd0] sm:$0xff]  ;;  %v11400_v61 = vld [vmem:[%s20055_s12 + $0xcd8] sm:$0xff] }
0x1d80   :  { %v8188_v23 = vmax.f32 %v7698_v54, 0.0  ;;  %v8190_v59 = vmax.f32 %v7787_v8, 0.0  ;;  %14327 = vmatpush3.bf16.msra.mxu0 %v14326_v12  ;;  %14359 = vmatpush3.bf16.msra.mxu1 %v14358_v4  ;;  %v7701_v6 = vpop.f32.mrb[126].mxu0  ;;  %v7790_v39 = vpop.f32.mrb[126].mxu1  ;;  %v14334_v4 = vpack.c.bf16 %v11380_v50, %v18804_v15  ;;  %v11383_v15 = vld [vmem:[%s20055_s12 + $0xc50] sm:$0xff]  ;;  %v11416_v50 = vld [vmem:[%s20055_s12 + $0xd58] sm:$0xff] }
0x1d81   :  { %v7702_v9 = vadd.f32 %v7701_v6, %v18650_v60  ;;  %v7791_v31 = vadd.f32 %v7790_v39, %v18656_v1  ;;  %v7703_v45 = vpop.f32.mrb[127].mxu0  ;;  %v7792_v25 = vpop.f32.mrb[127].mxu1  ;;  %14329 = vmatprep.subr.bf16.mxu0 %v14328_v14  ;;  %14361 = vmatprep.subr.bf16.mxu1 %v14360_v26  ;;  %v18826_v60 = vrot.slane %v18769_v53, %v16165_v48  ;;  %v11398_v1 = vld [vmem:[%s20055_s12 + $0xcc8] sm:$0xff] }
0x1d82   :  { %v7704_v58 = vadd.f32 %v7703_v45, %v18662_v62  ;;  %v7793_v24 = vadd.f32 %v7792_v25, %v18666_v37  ;;  %8724 = vmatprep.mubr.f32.mxu0 %v8188_v23  ;;  %8809 = vmatprep.mubr.f32.mxu1 %v8190_v59  ;;  %v11430_v62 = vld [vmem:[%s20055_s12 + $0xdc8] sm:$0xff]  ;;  %v11381_v37 = vld [vmem:[%s20055_s12 + $0xc40] sm:$0xff]  ;;  %v14336_v26 = vpack.c.bf16 %v11398_v1, %v11397_v33  ;;  %v11384_v23 = vld [vmem:[%s20055_s12 + $0xc58] sm:$0xff] }
0x1d83   :  { %8725 = vmatmul.mubr.f32.gmra.mrb[156].mxu0 %v8187_v46  ;;  %8810 = vmatmul.mubr.f32.gmra.mrb[156].mxu1 %v8189_v41  ;;  %v8203_v22 = vmax.f32 %v7702_v9, 0.0  ;;  %v8205_v21 = vmax.f32 %v7791_v31, 0.0  ;;  %v14368_v35 = vpack.c.bf16 %v11430_v62, %v11429_v36  ;;  %v14340_v39 = vpack.c.bf16 %v11400_v61, %v11399_v2  ;;  %v11402_v46 = vld [vmem:[%s20055_s12 + $0xce8] sm:$0xff]  ;;  %v11433_v41 = vld [vmem:[%s20055_s12 + $0xde0] sm:$0xff] }
0x1d84   :  { %v8204_v48 = vmax.f32 %v7704_v58, 0.0  ;;  %v8206_v34 = vmax.f32 %v7793_v24, 0.0  ;;  %14331 = vmatpush3.bf16.msra.mxu0 %v14330_v57  ;;  %14363 = vmatpush3.bf16.msra.mxu1 %v14362_v19  ;;  %v18840_v29 = vpop.f32.mrb[128].mxu0  ;;  %v18842_v12 = vpop.f32.mrb[128].mxu1  ;;  %v14338_v57 = vpack.c.bf16 %v11382_v32, %v11381_v37  ;;  %v14370_v19 = vpack.c.bf16 %v11414_v38, %v11413_v40  ;;  %v11434_v9 = vld [vmem:[%s20055_s12 + $0xde8] sm:$0xff]  ;;  %v11385_v33 = vld [vmem:[%s20055_s12 + $0xc60] sm:$0xff] }
0x1d85   :  { %v7863_v3 = vpop.f32.mrb[129].mxu0  ;;  %v7952_v14 = vpop.f32.mrb[129].mxu1  ;;  %14333 = vmatprep.subr.bf16.mxu0 %v14332_v49  ;;  %14365 = vmatprep.subr.bf16.mxu1 %v14364_v56  ;;  %v14372_v49 = vpack.c.bf16 %v11432_v17, %v11431_v16  ;;  %v11415_v56 = vld [vmem:[%s20055_s12 + $0xd50] sm:$0xff]  ;;  %v14342_v25 = vpack.c.bf16 %v11384_v23, %v11383_v15  ;;  %v11386_v58 = vld [vmem:[%s20055_s12 + $0xc68] sm:$0xff]  ;;  %v14344_v36 = vpack.c.bf16 %v11402_v46, %v11401_v42  ;;  %v11417_v37 = vld [vmem:[%s20055_s12 + $0xd60] sm:$0xff] }
0x1d86   :  { %v7864_v30 = vadd.f32 %v7863_v3, %v18799_v20  ;;  %v7953_v5 = vadd.f32 %v7952_v14, %v18826_v60  ;;  %8729 = vmatprep.mubr.f32.mxu0 %v8204_v48  ;;  %8814 = vmatprep.mubr.f32.mxu1 %v8206_v34  ;;  %v14374_v51 = vpack.c.bf16 %v11416_v50, %v11415_v56  ;;  %v11418_v48 = vld [vmem:[%s20055_s12 + $0xd68] sm:$0xff]  ;;  %v11403_v34 = vld [vmem:[%s20055_s12 + $0xcf0] sm:$0xff]  ;;  %v11436_v32 = vld [vmem:[%s20055_s12 + $0xdf8] sm:$0xff] }
0x1d87   :  { %8730 = vmatmul.mubr.f32.gmra.mrb[158].mxu0 %v8203_v22  ;;  %8815 = vmatmul.mubr.f32.gmra.mrb[158].mxu1 %v8205_v21  ;;  %v14376_v62 = vpack.c.bf16 %v11434_v9, %v11433_v41  ;;  %v18934_v40 = vrot.slane %v18769_v53, %v15267_v47  ;;  %v14346_v3 = vpack.c.bf16 %v11386_v58, %v11385_v33  ;;  %v11419_v47 = vld [vmem:[%s20055_s12 + $0xd70] sm:$0xff]  ;;  %v11420_v16 = vld [vmem:[%s20055_s12 + $0xd78] sm:$0xff]  ;;  %v11453_v17 = vld [vmem:[%s20055_s12 + $0xe80] sm:$0xff] }
0x1d88   :  { %v8160_v44 = vmax.f32 %v7864_v30, 0.0  ;;  %v8162_v10 = vmax.f32 %v7953_v5, 0.0  ;;  %14335 = vmatpush3.bf16.msra.mxu0 %v14334_v4  ;;  %14367 = vmatpush3.bf16.msra.mxu1 %v14366_v11  ;;  %v18868_v54 = vpop.f32.mrb[130].mxu0  ;;  %v18870_v8 = vpop.f32.mrb[130].mxu1  ;;  %v11404_v4 = vld [vmem:[%s20055_s12 + $0xcf8] sm:$0xff]  ;;  %v11435_v11 = vld [vmem:[%s20055_s12 + $0xdf0] sm:$0xff]  ;;  %v14378_v14 = vpack.c.bf16 %v11418_v48, %v11417_v37  ;;  %v18951_v38 = vrot.slane %v18769_v53, %v16318_v55 }
0x1d89   :  { %v18878_v59 = vpop.f32.mrb[131].mxu0  ;;  %v18880_v6 = vpop.f32.mrb[131].mxu1  ;;  %14337 = vmatprep.subr.bf16.mxu0 %v14336_v26  ;;  %14369 = vmatprep.subr.bf16.mxu1 %v14368_v35  ;;  %v11387_v26 = vld [vmem:[%s20055_s12 + $0xc70] sm:$0xff]  ;;  %v11388_v35 = vld [vmem:[%s20055_s12 + $0xc78] sm:$0xff]  ;;  %v14348_v5 = vpack.c.bf16 %v11404_v4, %v11403_v34  ;;  %v14380_v61 = vpack.c.bf16 %v11436_v32, %v11435_v11  ;;  %v11454_v55 = vld [vmem:[%s20055_s12 + $0xe88] sm:$0xff]  ;;  %v7862_v41 = vadd.f32 %v18840_v29, %v18934_v40 }
0x1d8a   :  { %8884 = vmatprep.mubr.f32.mxu0 %v8160_v44  ;;  %8969 = vmatprep.mubr.f32.mxu1 %v8162_v10  ;;  %v11485_v44 = vld [vmem:[%s20055_s12 + $0xf80] sm:$0xff]  ;;  %v11486_v10 = vld [vmem:[%s20055_s12 + $0xf88] sm:$0xff]  ;;  %v14384_v56 = vpack.c.bf16 %v11454_v55, %v11453_v17  ;;  %v18999_v46 = vld [vmem:[%s20055_s12 + $0xe90] sm:$0xff]  ;;  %v7951_v9 = vadd.f32 %v18842_v12, %v18951_v38  ;;  %v7870_v12 = vadd.f32 %v18878_v59, %v18799_v20 }
0x1d8b   :  { %v18989_v50 = vld [vmem:[%s20055_s12 + $0xf00] sm:$0xff]  ;;  %v18994_v42 = vld [vmem:[%s20055_s12 + $0xf08] sm:$0xff]  ;;  %v14416_v33 = vpack.c.bf16 %v11486_v10, %v11485_v44  ;;  %v19012_v58 = vld [vmem:[%s20055_s12 + $0xe98] sm:$0xff] }
0x1d8c   :  { %14339 = vmatpush3.bf16.msra.mxu0 %v14338_v57  ;;  %14371 = vmatpush3.bf16.msra.mxu1 %v14370_v19  ;;  %v18900_v31 = vpop.f32.mrb[132].mxu0  ;;  %v18902_v45 = vpop.f32.mrb[132].mxu1  ;;  %v18975_v57 = vld [vmem:[%s20055_s12 + $0xe00] sm:$0xff]  ;;  %v18980_v19 = vld [vmem:[%s20055_s12 + $0xe08] sm:$0xff]  ;;  %v19022_v29 = vld [vmem:[%s20055_s12 + $0xf98] sm:$0xff]  ;;  %v14418_v11 = vpack.c.bf16 %v18994_v42, %v18989_v50  ;;  %v14388_v32 = vpack.c.bf16 %v19012_v58, %v18999_v46 }
0x1d8d   :  { %v18910_v24 = vpop.f32.mrb[133].mxu0  ;;  %v18912_v1 = vpop.f32.mrb[133].mxu1  ;;  %14341 = vmatprep.subr.bf16.mxu0 %v14340_v39  ;;  %14373 = vmatprep.subr.bf16.mxu1 %v14372_v49  ;;  %v14350_v39 = vpack.c.bf16 %v11388_v35, %v11387_v26  ;;  %v14382_v49 = vpack.c.bf16 %v11420_v16, %v11419_v47  ;;  %v14386_v37 = vpack.c.bf16 %v18980_v19, %v18975_v57  ;;  %v19033_v48 = vld [vmem:[%s20055_s12 + $0xe10] sm:$0xff]  ;;  %v19038_v34 = vld [vmem:[%s20055_s12 + $0xe18] sm:$0xff]  ;;  %v19063_v26 = vld [vmem:[%s20055_s12 + $0xea0] sm:$0xff]  ;;  %v8159_v47 = vmax.f32 %v7862_v41, 0.0 }
0x1d8e   :  { %v19043_v59 = vld [vmem:[%s20055_s12 + $0xf10] sm:$0xff]  ;;  %v19068_v35 = vld [vmem:[%s20055_s12 + $0xea8] sm:$0xff]  ;;  %v7957_v16 = vadd.f32 %v18870_v8, %v18951_v38  ;;  %v19081_v44 = vld [vmem:[%s20055_s12 + $0xfa0] sm:$0xff]  ;;  %v7876_v8 = vadd.f32 %v18910_v24, %v18799_v20  ;;  %v7965_v19 = vadd.f32 %v18912_v1, %v18826_v60 }
0x1d8f   :  { %v19086_v10 = vld [vmem:[%s20055_s12 + $0xfa8] sm:$0xff]  ;;  %v19105_v24 = vld [vmem:[%s20055_s12 + $0xe20] sm:$0xff]  ;;  %v14392_v46 = vpack.c.bf16 %v19068_v35, %v19063_v26  ;;  %v19138_v58 = vld [vmem:[%s20055_s12 + $0xeb8] sm:$0xff] }
0x1d90   :  { %14343 = vmatpush3.bf16.msra.mxu0 %v14342_v25  ;;  %14375 = vmatpush3.bf16.msra.mxu1 %v14374_v51  ;;  %v18936_v22 = vpop.f32.mrb[134].mxu0  ;;  %v18938_v21 = vpop.f32.mrb[134].mxu1  ;;  %v19110_v1 = vld [vmem:[%s20055_s12 + $0xe28] sm:$0xff]  ;;  %v14424_v41 = vpack.c.bf16 %v19086_v10, %v19081_v44  ;;  %v8192_v26 = vmax.f32 %v7876_v8, 0.0  ;;  %v8194_v35 = vmax.f32 %v7965_v19, 0.0  ;;  %v11443_v44 = vld [vmem:[%s20055_s12 + $0xe30] sm:$0xff] }
0x1d91   :  { %v18953_v2 = vpop.f32.mrb[135].mxu0  ;;  %v18955_v30 = vpop.f32.mrb[135].mxu1  ;;  %14345 = vmatprep.subr.bf16.mxu0 %v14344_v36  ;;  %14377 = vmatprep.subr.bf16.mxu1 %v14376_v62  ;;  %v19017_v36 = vld [vmem:[%s20055_s12 + $0xf90] sm:$0xff]  ;;  %v7959_v62 = vadd.f32 %v18880_v6, %v18826_v60  ;;  %v11444_v10 = vld [vmem:[%s20055_s12 + $0xe38] sm:$0xff]  ;;  %v11461_v8 = vld [vmem:[%s20055_s12 + $0xec0] sm:$0xff] }
0x1d92   :  { %v11494_v19 = vld [vmem:[%s20055_s12 + $0xfc8] sm:$0xff] }
0x1d93   :  { %v8178_v57 = vmax.f32 %v7959_v62, 0.0  ;;  %v7963_v62 = vadd.f32 %v18902_v45, %v18951_v38  ;;  %v7971_v45 = vadd.f32 %v18955_v30, %v18826_v60 }
0x1d94   :  { %14347 = vmatpush3.bf16.msra.mxu0 %v14346_v3  ;;  %14379 = vmatpush3.bf16.msra.mxu1 %v14378_v14  ;;  %v18982_v15 = vpop.f32.mrb[136].mxu0  ;;  %v18984_v23 = vpop.f32.mrb[136].mxu1  ;;  %v14420_v3 = vpack.c.bf16 %v19022_v29, %v19017_v36  ;;  %v19058_v14 = vld [vmem:[%s20055_s12 + $0xf18] sm:$0xff]  ;;  %v8177_v29 = vmax.f32 %v7957_v16, 0.0 }
0x1d95   :  { %v19005_v25 = vpop.f32.mrb[137].mxu0  ;;  %v19007_v51 = vpop.f32.mrb[137].mxu1  ;;  %14349 = vmatprep.subr.bf16.mxu0 %v14348_v5  ;;  %14381 = vmatprep.subr.bf16.mxu1 %v14380_v61  ;;  %v8161_v5 = vmax.f32 %v7951_v9, 0.0  ;;  %v7868_v61 = vadd.f32 %v18868_v54, %v18934_v40  ;;  %v8176_v54 = vmax.f32 %v7870_v12, 0.0  ;;  %v14422_v42 = vpack.c.bf16 %v19058_v14, %v19043_v59  ;;  %v11474_v9 = vld [vmem:[%s20055_s12 + $0xf28] sm:$0xff]  ;;  %v11491_v59 = vld [vmem:[%s20055_s12 + $0xfb0] sm:$0xff] }
0x1d96   :  { %v7874_v12 = vadd.f32 %v18900_v31, %v18934_v40  ;;  %v11492_v14 = vld [vmem:[%s20055_s12 + $0xfb8] sm:$0xff]  ;;  %v7882_v31 = vadd.f32 %v18953_v2, %v18799_v20  ;;  %v8193_v30 = vmax.f32 %v7963_v62, 0.0 }
0x1d97   :  { %v8175_v36 = vmax.f32 %v7868_v61, 0.0  ;;  %v14428_v2 = vpack.c.bf16 %v11492_v14, %v11491_v59  ;;  %v11464_v62 = vld [vmem:[%s20055_s12 + $0xed8] sm:$0xff]  ;;  %v11495_v59 = vld [vmem:[%s20055_s12 + $0xfd0] sm:$0xff] }
0x1d98   :  { %14351 = vmatpush3.bf16.msra.mxu0 %v14350_v39  ;;  %14383 = vmatpush3.bf16.msra.mxu1 %v14382_v49  ;;  %v19045_v6 = vpop.f32.mrb[138].mxu0  ;;  %v19047_v4 = vpop.f32.mrb[138].mxu1  ;;  %v19094_v39 = vrot.slane %v18769_v53, %v16581_v7  ;;  %v19098_v49 = vrot.slane %v18769_v53, %v16588_v13  ;;  %v19115_v7 = vld [vmem:[%s20055_s12 + $0xf20] sm:$0xff]  ;;  %v8191_v60 = vmax.f32 %v7874_v12, 0.0  ;;  %v11463_v12 = vld [vmem:[%s20055_s12 + $0xed0] sm:$0xff]  ;;  %v11496_v14 = vld [vmem:[%s20055_s12 + $0xfd8] sm:$0xff] }
0x1d99   :  { %v19074_v17 = vpop.f32.mrb[139].mxu0  ;;  %v19076_v55 = vpop.f32.mrb[139].mxu1  ;;  %14385 = vmatprep.subr.bf16.mxu0 %v14384_v56  ;;  %14417 = vmatprep.subr.bf16.mxu1 %v14416_v33  ;;  %v14390_v56 = vpack.c.bf16 %v19038_v34, %v19033_v48  ;;  %v19133_v33 = vld [vmem:[%s20055_s12 + $0xeb0] sm:$0xff] }
0x1d9a   :  { %v14396_v20 = vpack.c.bf16 %v19138_v58, %v19133_v33 }
0x1d9b   :  { %8885 = vmatmul.mubr.f32.vlgmr.msra.gmra.mrb[160].mxu0 %v8159_v47  ;;  %8970 = vmatmul.mubr.f32.vlgmr.msra.gmra.mrb[160].mxu1 %v8161_v5  ;;  %v14426_v5 = vpack.c.bf16 %v11474_v9, %v19115_v7 }
0x1d9c   :  { %8889 = vmatprep.mubr.f32.mxu0 %v8176_v54  ;;  %8974 = vmatprep.mubr.f32.mxu1 %v8178_v57  ;;  %v19117_v13 = vpop.f32.mrb[140].mxu0  ;;  %v19119_v50 = vpop.f32.mrb[140].mxu1  ;;  %v8208_v54 = vmax.f32 %v7882_v31, 0.0  ;;  %v8210_v57 = vmax.f32 %v7971_v45, 0.0  ;;  %v11447_v31 = vld [vmem:[%s20055_s12 + $0xe50] sm:$0xff]  ;;  %v11448_v45 = vld [vmem:[%s20055_s12 + $0xe58] sm:$0xff] }
0x1d9d   :  { %14387 = vmatpush3.bf16.msra.mxu0 %v14386_v37  ;;  %14419 = vmatpush3.bf16.msra.mxu1 %v14418_v11  ;;  %v19144_v48 = vpop.f32.mrb[141].mxu0  ;;  %v19146_v34 = vpop.f32.mrb[141].mxu1  ;;  %v14394_v37 = vpack.c.bf16 %v19110_v1, %v19105_v24  ;;  %v14398_v1 = vpack.c.bf16 %v11444_v10, %v11443_v44  ;;  %v14406_v44 = vpack.c.bf16 %v11448_v45, %v11447_v31 }
0x1d9e   :  { %14389 = vmatprep.subr.bf16.mxu0 %v14388_v32  ;;  %14421 = vmatprep.subr.bf16.mxu1 %v14420_v3  ;;  %v7880_v32 = vadd.f32 %v18936_v22, %v18934_v40  ;;  %v7969_v3 = vadd.f32 %v18938_v21, %v18951_v38  ;;  %v8042_v40 = vadd.f32 %v19005_v25, %v19094_v39  ;;  %v11475_v21 = vld [vmem:[%s20055_s12 + $0xf30] sm:$0xff]  ;;  %v11476_v38 = vld [vmem:[%s20055_s12 + $0xf38] sm:$0xff]  ;;  %v11462_v25 = vld [vmem:[%s20055_s12 + $0xec8] sm:$0xff] }
0x1d9f   :  { %8890 = vmatmul.mubr.f32.gmra.mrb[162].mxu0 %v8175_v36  ;;  %8975 = vmatmul.mubr.f32.gmra.mrb[162].mxu1 %v8177_v29  ;;  %v8131_v22 = vadd.f32 %v19007_v51, %v19098_v49  ;;  %v11493_v51 = vld [vmem:[%s20055_s12 + $0xfc0] sm:$0xff]  ;;  %v14430_v7 = vpack.c.bf16 %v11476_v38, %v11475_v21  ;;  %v14400_v33 = vpack.c.bf16 %v11462_v25, %v11461_v8  ;;  %v11478_v29 = vld [vmem:[%s20055_s12 + $0xf48] sm:$0xff]  ;;  %v11467_v8 = vld [vmem:[%s20055_s12 + $0xef0] sm:$0xff] }
0x1da0   :  { %8894 = vmatprep.mubr.f32.mxu0 %v8192_v26  ;;  %8979 = vmatprep.mubr.f32.mxu1 %v8194_v35  ;;  %v19160_v11 = vpop.f32.mrb[142].mxu0  ;;  %v19162_v47 = vpop.f32.mrb[142].mxu1  ;;  %v8209_v24 = vmax.f32 %v7969_v3, 0.0  ;;  %v14432_v58 = vpack.c.bf16 %v11494_v19, %v11493_v51  ;;  %v11477_v36 = vld [vmem:[%s20055_s12 + $0xf40] sm:$0xff]  ;;  %v11498_v3 = vld [vmem:[%s20055_s12 + $0xfe8] sm:$0xff]  ;;  %v11468_v25 = vld [vmem:[%s20055_s12 + $0xef8] sm:$0xff] }
0x1da1   :  { %14391 = vmatpush3.bf16.msra.mxu0 %v14390_v56  ;;  %14423 = vmatpush3.bf16.msra.mxu1 %v14422_v42  ;;  %v19171_v61 = vpop.f32.mrb[143].mxu0  ;;  %v19173_v16 = vpop.f32.mrb[143].mxu1  ;;  %v8207_v56 = vmax.f32 %v7880_v32, 0.0  ;;  %v11445_v42 = vld [vmem:[%s20055_s12 + $0xe40] sm:$0xff]  ;;  %v8166_v9 = vmax.f32 %v8131_v22, 0.0  ;;  %v14434_v35 = vpack.c.bf16 %v11478_v29, %v11477_v36  ;;  %v11482_v38 = vld [vmem:[%s20055_s12 + $0xf68] sm:$0xff] }
0x1da2   :  { %14393 = vmatprep.subr.bf16.mxu0 %v14392_v46  ;;  %14425 = vmatprep.subr.bf16.mxu1 %v14424_v41  ;;  %v11446_v46 = vld [vmem:[%s20055_s12 + $0xe48] sm:$0xff]  ;;  %v8164_v41 = vmax.f32 %v8042_v40, 0.0  ;;  %v11497_v32 = vld [vmem:[%s20055_s12 + $0xfe0] sm:$0xff]  ;;  %v11499_v51 = vld [vmem:[%s20055_s12 + $0xff0] sm:$0xff] }
0x1da3   :  { %8895 = vmatmul.mubr.f32.gmra.mrb[164].mxu0 %v8191_v60  ;;  %8980 = vmatmul.mubr.f32.gmra.mrb[164].mxu1 %v8193_v30  ;;  %v14402_v26 = vpack.c.bf16 %v11446_v46, %v11445_v42  ;;  %v11465_v60 = vld [vmem:[%s20055_s12 + $0xee0] sm:$0xff]  ;;  %v11466_v30 = vld [vmem:[%s20055_s12 + $0xee8] sm:$0xff]  ;;  %v14440_v22 = vpack.c.bf16 %v11498_v3, %v11497_v32  ;;  %v11500_v19 = vld [vmem:[%s20055_s12 + $0xff8] sm:$0xff] }
0x1da4   :  { %8899 = vmatprep.mubr.f32.mxu0 %v8208_v54  ;;  %8984 = vmatprep.mubr.f32.mxu1 %v8210_v57  ;;  %v11449_v54 = vld [vmem:[%s20055_s12 + $0xe60] sm:$0xff]  ;;  %v11450_v57 = vld [vmem:[%s20055_s12 + $0xe68] sm:$0xff]  ;;  %v14408_v40 = vpack.c.bf16 %v11466_v30, %v11465_v60  ;;  %v11451_v42 = vld [vmem:[%s20055_s12 + $0xe70] sm:$0xff] }
0x1da5   :  { %14395 = vmatpush3.bf16.msra.mxu0 %v14394_v37  ;;  %14427 = vmatpush3.bf16.msra.mxu1 %v14426_v5  ;;  %v14404_v37 = vpack.c.bf16 %v11464_v62, %v11463_v12  ;;  %v14436_v5 = vpack.c.bf16 %v11496_v14, %v11495_v59  ;;  %v11481_v21 = vld [vmem:[%s20055_s12 + $0xf60] sm:$0xff]  ;;  %v11452_v46 = vld [vmem:[%s20055_s12 + $0xe78] sm:$0xff] }
0x1da6   :  { %14397 = vmatprep.subr.bf16.mxu0 %v14396_v20  ;;  %14429 = vmatprep.subr.bf16.mxu1 %v14428_v2  ;;  %v11479_v20 = vld [vmem:[%s20055_s12 + $0xf50] sm:$0xff]  ;;  %v11480_v2 = vld [vmem:[%s20055_s12 + $0xf58] sm:$0xff]  ;;  %v19302_v12 = vld [vmem:[%s20057_s13 + $0x1] ss:$0 sm:$0xff]  ;;  %s20134_s13 = sld [smem:[#allocation14_spill]] }
0x1da7   :  { %8900 = vmatmul.mubr.f32.gmra.mrb[166].mxu0 %v8207_v56  ;;  %8985 = vmatmul.mubr.f32.gmra.mrb[166].mxu1 %v8209_v24  ;;  %v14438_v10 = vpack.c.bf16 %v11480_v2, %v11479_v20  ;;  %v19277_v56 = vrot.slane %v18769_v53, %v16575_v0  ;;  %v19281_v24 = vrot.slane %v18769_v53, %v16578_v63  ;;  %v11483_v63 = vld [vmem:[%s20055_s12 + $0xf70] sm:$0xff]  ;;  %v11484_v53 = vld [vmem:[%s20055_s12 + $0xf78] sm:$0xff] }
0x1da8   :  { %9054 = vmatprep.mubr.f32.mxu0 %v8164_v41  ;;  %9139 = vmatprep.mubr.f32.mxu1 %v8166_v9  ;;  %v14412_v0 = vpack.c.bf16 %v11468_v25, %v11467_v8  ;;  %v14444_v41 = vpack.c.bf16 %v11500_v19, %v11499_v51  ;;  %v14446_v14 = vpack.c.bf16 %v11484_v53, %v11483_v63 }
0x1da9   :  { %14399 = vmatpush3.bf16.msra.mxu0 %v14398_v1  ;;  %14431 = vmatpush3.bf16.msra.mxu1 %v14430_v7  ;;  %v14410_v1 = vpack.c.bf16 %v11450_v57, %v11449_v54  ;;  %v14442_v7 = vpack.c.bf16 %v11482_v38, %v11481_v21  ;;  %v8040_v36 = vadd.f32 %v18982_v15, %v19277_v56 }
0x1daa   :  { %14401 = vmatprep.subr.bf16.mxu0 %v14400_v33  ;;  %14433 = vmatprep.subr.bf16.mxu1 %v14432_v58  ;;  %v14414_v58 = vpack.c.bf16 %v11452_v46, %v11451_v42  ;;  %v8129_v29 = vadd.f32 %v18984_v23, %v19281_v24  ;;  %v8048_v15 = vadd.f32 %v19074_v17, %v19094_v39 }
0x1dab   :  { %v8137_v23 = vadd.f32 %v19076_v55, %v19098_v49  ;;  %v8046_v2 = vadd.f32 %v19045_v6, %v19277_v56  ;;  %v8135_v32 = vadd.f32 %v19047_v4, %v19281_v24  ;;  %v8054_v54 = vadd.f32 %v19144_v48, %v19094_v39 }
0x1dac   :  { %v8165_v20 = vmax.f32 %v8129_v29, 0.0  ;;  %v8180_v55 = vmax.f32 %v8048_v15, 0.0  ;;  %v8143_v57 = vadd.f32 %v19146_v34, %v19098_v49  ;;  %v8052_v4 = vadd.f32 %v19117_v13, %v19277_v56 }
0x1dad   :  { %14403 = vmatpush3.bf16.msra.mxu0 %v14402_v26  ;;  %14435 = vmatpush3.bf16.msra.mxu1 %v14434_v35  ;;  %v8141_v21 = vadd.f32 %v19119_v50, %v19281_v24  ;;  %v8196_v8 = vmax.f32 %v8054_v54, 0.0  ;;  %v8060_v34 = vadd.f32 %v19171_v61, %v19094_v39  ;;  %v8149_v25 = vadd.f32 %v19173_v16, %v19098_v49 }
0x1dae   :  { %14405 = vmatprep.subr.bf16.mxu0 %v14404_v37  ;;  %14437 = vmatprep.subr.bf16.mxu1 %v14436_v5  ;;  %v8163_v5 = vmax.f32 %v8040_v36, 0.0  ;;  %v8198_v48 = vmax.f32 %v8143_v57, 0.0  ;;  %v8195_v51 = vmax.f32 %v8052_v4, 0.0  ;;  %v8058_v13 = vadd.f32 %v19160_v11, %v19277_v56 }
0x1daf   :  { %v8197_v19 = vmax.f32 %v8141_v21, 0.0  ;;  %v8147_v50 = vadd.f32 %v19162_v47, %v19281_v24 }
0x1db0   :  { %v8211_v39 = vmax.f32 %v8058_v13, 0.0 }
0x1db1   :  { %14407 = vmatpush3.bf16.msra.mxu0 %v14406_v44  ;;  %14439 = vmatpush3.bf16.msra.mxu1 %v14438_v10  ;;  %v8182_v10 = vmax.f32 %v8137_v23, 0.0  ;;  %v8213_v49 = vmax.f32 %v8147_v50, 0.0 }
0x1db2   :  { %14409 = vmatprep.subr.bf16.mxu0 %v14408_v40  ;;  %14441 = vmatprep.subr.bf16.mxu1 %v14440_v22  ;;  %v8179_v40 = vmax.f32 %v8046_v2, 0.0  ;;  %v8181_v22 = vmax.f32 %v8135_v32, 0.0 }
0x1db4   :  { %v12232_v9 = vpop.f32.mrb[144].mxu0  ;;  %v12276_v33 = vpop.f32.mrb[144].mxu1 }
0x1db5   :  { %14411 = vmatpush3.bf16.msra.mxu0 %v14410_v1  ;;  %14443 = vmatpush3.bf16.msra.mxu1 %v14442_v7  ;;  %v12233_v62 = vpop.f32.mrb[145].mxu0  ;;  %v12277_v59 = vpop.f32.mrb[145].mxu1  ;;  %v8212_v1 = vmax.f32 %v8060_v34, 0.0  ;;  %v8214_v7 = vmax.f32 %v8149_v25, 0.0 }
0x1db6   :  { %v12234_v26 = vadd.f32 %v12233_v62, %v12232_v9  ;;  %v12278_v35 = vadd.f32 %v12277_v59, %v12276_v33  ;;  %14413 = vmatprep.subr.bf16.mxu0 %v14412_v0  ;;  %14445 = vmatprep.subr.bf16.mxu1 %v14444_v41 }
0x1db8   :  { %v8547_v31 = vadd.f32 %v12234_v26, %v19302_v12  ;;  %v12235_v45 = vpop.f32.mrb[146].mxu0  ;;  %v12279_v37 = vpop.f32.mrb[146].mxu1 }
0x1db9   :  { %14415 = vmatpush3.bf16.msra.mxu0 %v14414_v58  ;;  %14447 = vmatpush3.bf16.msra.mxu1 %v14446_v14  ;;  %v12236_v60 = vpop.f32.mrb[147].mxu0  ;;  %v12280_v30 = vpop.f32.mrb[147].mxu1 }
0x1dba   :  { %v8632_v17 = vadd.f32 %v12278_v35, %v8547_v31  ;;  %v12237_v3 = vadd.f32 %v12236_v60, %v12235_v45  ;;  %v12281_v44 = vadd.f32 %v12280_v30, %v12279_v37 }
0x1dbc   :  { %v8552_v6 = vadd.f32 %v12237_v3, %v19302_v12  ;;  %9055 = vmatmul.mubr.f32.vlgmr.msra.gmra.mrb[168].mxu0 %v8163_v5  ;;  %9140 = vmatmul.mubr.f32.vlgmr.msra.gmra.mrb[168].mxu1 %v8165_v20 }
0x1dbd   :  { %9059 = vmatprep.mubr.f32.mxu0 %v8180_v55  ;;  %9144 = vmatprep.mubr.f32.mxu1 %v8182_v10 }
0x1dbe   :  { %v8637_v38 = vadd.f32 %v12281_v44, %v8552_v6 }
0x1dc0   :  { %9060 = vmatmul.mubr.f32.gmra.mrb[170].mxu0 %v8179_v40  ;;  %9145 = vmatmul.mubr.f32.gmra.mrb[170].mxu1 %v8181_v22 }
0x1dc1   :  { %9064 = vmatprep.mubr.f32.mxu0 %v8196_v8  ;;  %9149 = vmatprep.mubr.f32.mxu1 %v8198_v48 }
0x1dc4   :  { %9065 = vmatmul.mubr.f32.gmra.mrb[172].mxu0 %v8195_v51  ;;  %9150 = vmatmul.mubr.f32.gmra.mrb[172].mxu1 %v8197_v19 }
0x1dc5   :  { %9069 = vmatprep.mubr.f32.mxu0 %v8212_v1  ;;  %9154 = vmatprep.mubr.f32.mxu1 %v8214_v7 }
0x1dc8   :  { %9070 = vmatmul.mubr.f32.gmra.mrb[174].mxu0 %v8211_v39  ;;  %9155 = vmatmul.mubr.f32.gmra.mrb[174].mxu1 %v8213_v49 }
0x1dc9   :  { %13082 = vmatprep.mubr.msk.f32.mxu0 %vm15031_vm5, %v15022_v27  ;;  %13101 = vmatprep.mubr.msk.f32.mxu1 %vm15031_vm5, %v15022_v27 }
0x1e44   :  { %v12238_v61 = vpop.f32.mrb[148].mxu0  ;;  %v12282_v16 = vpop.f32.mrb[148].mxu1 }
0x1e45   :  { %v12239_v42 = vpop.f32.mrb[149].mxu0  ;;  %v12283_v46 = vpop.f32.mrb[149].mxu1 }
0x1e46   :  { %v12240_v0 = vadd.f32 %v12239_v42, %v12238_v61  ;;  %v12284_v41 = vadd.f32 %v12283_v46, %v12282_v16 }
0x1e48   :  { %v8557_v11 = vadd.f32 %v12240_v0, %v19302_v12 }
0x1e4a   :  { %v8642_v56 = vadd.f32 %v12284_v41, %v8557_v11  ;;  %v12241_v47 = vpop.f32.mrb[150].mxu0  ;;  %v12285_v24 = vpop.f32.mrb[150].mxu1 }
0x1e4b   :  { %v12242_v63 = vpop.f32.mrb[151].mxu0  ;;  %v12286_v53 = vpop.f32.mrb[151].mxu1 }
0x1e4c   :  { %v12243_v9 = vadd.f32 %v12242_v63, %v12241_v47  ;;  %v12287_v33 = vadd.f32 %v12286_v53, %v12285_v24 }
0x1e4e   :  { %v8562_v58 = vadd.f32 %v12243_v9, %v19302_v12  ;;  %v12320_v36 = vpop.f32.mrb[152].mxu0  ;;  %v12364_v29 = vpop.f32.mrb[152].mxu1 }
0x1e4f   :  { %v12321_v62 = vpop.f32.mrb[153].mxu0  ;;  %v12365_v59 = vpop.f32.mrb[153].mxu1 }
0x1e50   :  { %v8647_v14 = vadd.f32 %v12287_v33, %v8562_v58  ;;  %v12322_v26 = vadd.f32 %v12321_v62, %v12320_v36  ;;  %v12366_v35 = vadd.f32 %v12365_v59, %v12364_v29 }
0x1e52   :  { %v8717_v15 = vadd.f32 %v12322_v26, %v8632_v17  ;;  %v12323_v23 = vpop.f32.mrb[154].mxu0  ;;  %v12367_v31 = vpop.f32.mrb[154].mxu1 }
0x1e53   :  { %v12324_v45 = vpop.f32.mrb[155].mxu0  ;;  %v12368_v37 = vpop.f32.mrb[155].mxu1 }
0x1e54   :  { %v8802_v5 = vadd.f32 %v12366_v35, %v8717_v15  ;;  %v12325_v20 = vadd.f32 %v12324_v45, %v12323_v23  ;;  %v12369_v2 = vadd.f32 %v12368_v37, %v12367_v31 }
0x1e56   :  { %v8722_v60 = vadd.f32 %v12325_v20, %v8637_v38  ;;  %v12326_v30 = vpop.f32.mrb[156].mxu0  ;;  %v12370_v32 = vpop.f32.mrb[156].mxu1 }
0x1e57   :  { %v12327_v3 = vpop.f32.mrb[157].mxu0  ;;  %v12371_v12 = vpop.f32.mrb[157].mxu1 }
0x1e58   :  { %v8807_v44 = vadd.f32 %v12369_v2, %v8722_v60  ;;  %v12328_v55 = vadd.f32 %v12327_v3, %v12326_v30  ;;  %v12372_v10 = vadd.f32 %v12371_v12, %v12370_v32 }
0x1e5a   :  { %v8727_v54 = vadd.f32 %v12328_v55, %v8642_v56  ;;  %v12329_v57 = vpop.f32.mrb[158].mxu0  ;;  %v12373_v6 = vpop.f32.mrb[158].mxu1 }
0x1e5b   :  { %v12330_v40 = vpop.f32.mrb[159].mxu0  ;;  %v12374_v17 = vpop.f32.mrb[159].mxu1 }
0x1e5c   :  { %v8812_v22 = vadd.f32 %v12372_v10, %v8727_v54  ;;  %v12331_v4 = vadd.f32 %v12330_v40, %v12329_v57  ;;  %v12375_v21 = vadd.f32 %v12374_v17, %v12373_v6 }
0x1e5e   :  { %v8732_v8 = vadd.f32 %v12331_v4, %v8647_v14 }
0x1e60   :  { %v8817_v48 = vadd.f32 %v12375_v21, %v8732_v8 }
0x1e6e   :  { %v12408_v34 = vpop.f32.mrb[160].mxu0  ;;  %v12452_v25 = vpop.f32.mrb[160].mxu1 }
0x1e6f   :  { %v12409_v38 = vpop.f32.mrb[161].mxu0  ;;  %v12453_v51 = vpop.f32.mrb[161].mxu1 }
0x1e70   :  { %v12410_v19 = vadd.f32 %v12409_v38, %v12408_v34  ;;  %v12454_v13 = vadd.f32 %v12453_v51, %v12452_v25 }
0x1e72   :  { %v8887_v50 = vadd.f32 %v12410_v19, %v8802_v5  ;;  %v12411_v1 = vpop.f32.mrb[162].mxu0  ;;  %v12455_v7 = vpop.f32.mrb[162].mxu1 }
0x1e73   :  { %v12412_v39 = vpop.f32.mrb[163].mxu0  ;;  %v12456_v49 = vpop.f32.mrb[163].mxu1 }
0x1e74   :  { %v8972_v61 = vadd.f32 %v12454_v13, %v8887_v50  ;;  %v12413_v16 = vadd.f32 %v12412_v39, %v12411_v1  ;;  %v12457_v42 = vadd.f32 %v12456_v49, %v12455_v7 }
0x1e76   :  { %v8892_v46 = vadd.f32 %v12413_v16, %v8807_v44  ;;  %v12414_v0 = vpop.f32.mrb[164].mxu0  ;;  %v12458_v41 = vpop.f32.mrb[164].mxu1 }
0x1e77   :  { %v12415_v11 = vpop.f32.mrb[165].mxu0  ;;  %v12459_v56 = vpop.f32.mrb[165].mxu1 }
0x1e78   :  { %v8977_v47 = vadd.f32 %v12457_v42, %v8892_v46  ;;  %v12416_v24 = vadd.f32 %v12415_v11, %v12414_v0  ;;  %v12460_v63 = vadd.f32 %v12459_v56, %v12458_v41  ;;  %v11507_v11 = vld [vmem:[%s20060_s16 + $0x40] sm:$0xff]  ;;  %v11508_v56 = vld [vmem:[%s20060_s16 + $0x48] sm:$0xff] }
0x1e7a   :  { %v8897_v53 = vadd.f32 %v12416_v24, %v8812_v22  ;;  %v12417_v9 = vpop.f32.mrb[166].mxu0  ;;  %v12461_v33 = vpop.f32.mrb[166].mxu1  ;;  %v15030_v24 = vmov 0.0|0.0  }
0x1e7b   :  { %v12418_v58 = vpop.f32.mrb[167].mxu0  ;;  %v12462_v36 = vpop.f32.mrb[167].mxu1  ;;  %14448 = vmatprep.subr.bf16.mxu0 %v15030_v24  ;;  %14460 = vmatprep.subr.bf16.mxu1 %v15030_v24 }
0x1e7c   :  { %v8982_v29 = vadd.f32 %v12460_v63, %v8897_v53  ;;  %v12419_v62 = vadd.f32 %v12418_v58, %v12417_v9  ;;  %v12463_v59 = vadd.f32 %v12462_v36, %v12461_v33  ;;  %v9248_v63 = vld [vmem:[%s20060_s16] sm:$0xff]  ;;  %v9249_v53 = vld [vmem:[%s20060_s16 + $0x8] sm:$0xff]  ;;  %v11509_v33 = vld [vmem:[%s20060_s16 + $0x50] sm:$0xff] }
0x1e7d   :  { %v14461_v9 = vpack.c.bf16 %v9249_v53, %v9248_v63  ;;  %v11510_v58 = vld [vmem:[%s20060_s16 + $0x58] sm:$0xff]  ;;  %v11517_v63 = vld [vmem:[%s20060_s16 + $0x80] sm:$0xff]  ;;  %v11518_v53 = vld [vmem:[%s20060_s16 + $0x88] sm:$0xff] }
0x1e7e   :  { %v8902_v14 = vadd.f32 %v12419_v62, %v8817_v48  ;;  %v14452_v36 = vpack.c.bf16 %v11510_v58, %v11509_v33  ;;  %v9251_v62 = vld [vmem:[%s20060_s16 + $0x18] sm:$0xff]  ;;  %v11526_v58 = vld [vmem:[%s20060_s16 + $0xc0] sm:$0xff] }
0x1e7f   :  { %14462 = vmatpush3.bf16.msra.mxu1 %v14461_v9 }
0x1e80   :  { %v8987_v26 = vadd.f32 %v12463_v59, %v8902_v14  ;;  %14463 = vmatprep.subr.bf16.mxu1 %v15030_v24  ;;  %v11511_v14 = vld [vmem:[%s20060_s16 + $0x60] sm:$0xff] }
0x1e8f   :  { %v12496_v35 = vpop.f32.mrb[168].mxu0  ;;  %v12540_v15 = vpop.f32.mrb[168].mxu1 }
0x1e90   :  { %v12497_v23 = vpop.f32.mrb[169].mxu0  ;;  %v12541_v31 = vpop.f32.mrb[169].mxu1 }
0x1e91   :  { %v12498_v45 = vadd.f32 %v12497_v23, %v12496_v35  ;;  %v12542_v37 = vadd.f32 %v12541_v31, %v12540_v15  ;;  %v9252_v15 = vld [vmem:[%s20060_s16 + $0x20] sm:$0xff]  ;;  %v9253_v23 = vld [vmem:[%s20060_s16 + $0x28] sm:$0xff] }
0x1e92   :  { %v14467_v31 = vpack.c.bf16 %v9253_v23, %v9252_v15 }
0x1e93   :  { %v9057_v5 = vadd.f32 %v12498_v45, %v8972_v61  ;;  %v12499_v20 = vpop.f32.mrb[170].mxu0  ;;  %v12543_v2 = vpop.f32.mrb[170].mxu1  ;;  %v11513_v45 = vld [vmem:[%s20060_s16 + $0x70] sm:$0xff] }
0x1e94   :  { %v12500_v60 = vpop.f32.mrb[171].mxu0  ;;  %v12544_v30 = vpop.f32.mrb[171].mxu1 }
0x1e95   :  { %v9142_v32 = vadd.f32 %v12542_v37, %v9057_v5  ;;  %v12501_v3 = vadd.f32 %v12500_v60, %v12499_v20  ;;  %v12545_v12 = vadd.f32 %v12544_v30, %v12543_v2  ;;  %v11514_v37 = vld [vmem:[%s20060_s16 + $0x78] sm:$0xff]  ;;  %v9254_v20 = vld [vmem:[%s20060_s16 + $0x30] sm:$0xff] }
0x1e96   :  { %v14458_v5 = vpack.c.bf16 %v11514_v37, %v11513_v45  ;;  %v9255_v2 = vld [vmem:[%s20060_s16 + $0x38] sm:$0xff] }
0x1e97   :  { %v19333_v44 = vadd.f32 %v9142_v32, %v17729_v18  ;;  %v9062_v55 = vadd.f32 %v12501_v3, %v8977_v47  ;;  %v12502_v10 = vpop.f32.mrb[172].mxu0  ;;  %v12546_v54 = vpop.f32.mrb[172].mxu1  ;;  %v14449_v47 = vpack.c.bf16 %v11508_v56, %v11507_v11  ;;  %v14470_v60 = vpack.c.bf16 %v9255_v2, %v9254_v20  ;;  %v11528_v20 = vld [vmem:[%s20060_s16 + $0xd0] sm:$0xff]  ;;  %v11529_v2 = vld [vmem:[%s20060_s16 + $0xd8] sm:$0xff] }
0x1e98   :  { %v12503_v57 = vpop.f32.mrb[173].mxu0  ;;  %v12547_v6 = vpop.f32.mrb[173].mxu1 }
0x1e99   :  { %v9147_v40 = vadd.f32 %v12545_v12, %v9062_v55  ;;  %v12504_v17 = vadd.f32 %v12503_v57, %v12502_v10  ;;  %v12548_v22 = vadd.f32 %v12547_v6, %v12546_v54  ;;  %v9168_v4 = vsel %vm231_vm2, %v19333_v44, 0.0  ;;  %14450 = vmatpush3.bf16.msra.mxu0 %v14449_v47 }
0x1e9a   :  { %9169 = vadd.xlane.f32.xlu0 %v9168_v4  ;;  %v9184_v21 = vmul.f32 %v19333_v44, %v19333_v44  ;;  %14451 = vmatprep.subr.bf16.mxu0 %v15030_v24 }
0x1e9b   :  { %v9067_v8 = vadd.f32 %v12504_v17, %v8982_v29  ;;  %v12505_v48 = vpop.f32.mrb[174].mxu0  ;;  %v12549_v34 = vpop.f32.mrb[174].mxu1  ;;  %v19351_v16 = vadd.f32 %v9147_v40, %v17735_v52  ;;  %v9250_v29 = vld [vmem:[%s20060_s16 + $0x10] sm:$0xff] }
0x1e9c   :  { %v12506_v18 = vpop.f32.mrb[175].mxu0  ;;  %v12550_v25 = vpop.f32.mrb[175].mxu1  ;;  %v9188_v13 = vsel %vm231_vm2, %v9184_v21, 0.0  ;;  %v14464_v59 = vpack.c.bf16 %v9251_v62, %v9250_v29 }
0x1e9d   :  { %v9152_v38 = vadd.f32 %v12548_v22, %v9067_v8  ;;  %v12507_v51 = vadd.f32 %v12506_v18, %v12505_v48  ;;  %v12551_v19 = vadd.f32 %v12550_v25, %v12549_v34  ;;  %v9171_v0 = vsel %vm231_vm2, %v19351_v16, 0.0  ;;  %14453 = vmatpush3.bf16.msra.mxu0 %v14452_v36 }
0x1e9e   :  { %9189 = vadd.xlane.f32.xlu0 %v9188_v13  ;;  %14454 = vmatprep.subr.bf16.mxu0 %v15030_v24 }
0x1e9f   :  { %v19341_v50 = vadd.f32 %v9152_v38, %v17942_v28  ;;  %v9072_v1 = vadd.f32 %v12507_v51, %v8987_v26  ;;  %v11512_v26 = vld [vmem:[%s20060_s16 + $0x68] sm:$0xff]  ;;  %14465 = vmatpush3.bf16.msra.mxu1 %v14464_v59 }
0x1ea0   :  { %v14455_v35 = vpack.c.bf16 %v11512_v26, %v11511_v14  ;;  %14466 = vmatprep.subr.bf16.mxu1 %v15030_v24  ;;  %v14473_v14 = vpack.c.bf16 %v11518_v53, %v11517_v63  ;;  %v11520_v26 = vld [vmem:[%s20060_s16 + $0x98] sm:$0xff] }
0x1ea1   :  { %v9157_v7 = vadd.f32 %v12551_v19, %v9072_v1  ;;  %v9174_v39 = vsel %vm231_vm2, %v19341_v50, 0.0  ;;  %v9186_v49 = vmul.f32 %v19341_v50, %v19341_v50 }
0x1ea2   :  { %9175 = vadd.xlane.f32.xlu1 %v9174_v39  ;;  %14456 = vmatpush3.bf16.msra.mxu0 %v14455_v35 }
0x1ea3   :  { %v19348_v61 = vadd.f32 %v9157_v7, %v17956_v43  ;;  %v9194_v42 = vsel %vm231_vm2, %v9186_v49, 0.0  ;;  %v9185_v43 = vmul.f32 %v19351_v16, %v19351_v16  ;;  %14457 = vmatprep.subr.bf16.mxu0 %v15030_v24  ;;  %14468 = vmatpush3.bf16.msra.mxu1 %v14467_v31 }
0x1ea4   :  { %14469 = vmatprep.subr.bf16.mxu1 %v15030_v24 }
0x1ea5   :  { %v9177_v28 = vsel %vm231_vm2, %v19348_v61, 0.0  ;;  %v9187_v46 = vmul.f32 %v19348_v61, %v19348_v61  ;;  %v9191_v52 = vsel %vm231_vm2, %v9185_v43, 0.0 }
0x1ea6   :  { %9195 = vadd.xlane.f32.xlu1 %v9194_v42  ;;  %9178 = vadd.xlane.f32.xlu0 %v9177_v28 }
0x1ea7   :  { %v9197_v41 = vsel %vm231_vm2, %v9187_v46, 0.0  ;;  %14459 = vmatpush3.bf16.msra.mxu0 %v14458_v5  ;;  %14471 = vmatpush3.bf16.msra.mxu1 %v14470_v60  ;;  %v11505_v46 = vld [vmem:[%s20058_s14 + $0x1] ss:$0 sm:$0xff] }
0x1ea8   :  { %14472 = vmatprep.subr.bf16.mxu0 %v15030_v24  ;;  %14484 = vmatprep.subr.bf16.mxu1 %v15030_v24 }
0x1eaa   :  { %9172 = vadd.xlane.f32.xlu1 %v9171_v0  ;;  %9198 = vadd.xlane.f32.xlu0 %v9197_v41 }
0x1eae   :  { %9192 = vadd.xlane.f32.xlu1 %v9191_v52  ;;  %v11506_v52 = vld [vmem:[%s20059_s15 + $0x1] ss:$0 sm:$0xff] }
0x1f27   :  { %v9170_v30 = vpop.xlane.xlu0 %9169 }
0x1f28   :  { %v9180_v32 = vmul.f32 0.015625, %v9170_v30 }
0x1f2a   :  { %v9204_v12 = vmul.f32 %v9180_v32, %v9180_v32  ;;  %v9212_v13 = vsub.f32 %v19333_v44, %v9180_v32 }
0x1f2b   :  { %v9190_v3 = vpop.xlane.xlu0 %9189 }
0x1f2c   :  { %v9200_v55 = vmul.f32 0.015625, %v9190_v3  ;;  %v11522_v3 = vld [vmem:[%s20060_s16 + $0xa8] sm:$0xff] }
0x1f2e   :  { %v9208_v10 = vsub.f32 %v9200_v55, %v9204_v12  ;;  %v11530_v12 = vld [vmem:[%s20060_s16 + $0xe0] sm:$0xff]  ;;  %v11531_v55 = vld [vmem:[%s20060_s16 + $0xe8] sm:$0xff] }
0x1f2f   :  { %v9176_v54 = vpop.xlane.xlu1 %9175 }
0x1f30   :  { %v9216_v57 = vadd.f32 1e-05, %v9208_v10  ;;  %v9182_v6 = vmul.f32 0.015625, %v9176_v54  ;;  %v14488_v54 = vpack.c.bf16 %v11529_v2, %v11528_v20  ;;  %v11540_v20 = vld [vmem:[%s20060_s16 + $0x128] sm:$0xff] }
0x1f32   :  { %15002 = vrsqrt.f32 %v9216_v57  ;;  %v9206_v22 = vmul.f32 %v9182_v6, %v9182_v6  ;;  %v9214_v44 = vsub.f32 %v19341_v50, %v9182_v6  ;;  %v11527_v50 = vld [vmem:[%s20060_s16 + $0xc8] sm:$0xff]  ;;  %v14491_v6 = vpack.c.bf16 %v11531_v55, %v11530_v12  ;;  %v11550_v55 = vld [vmem:[%s20060_s16 + $0x170] sm:$0xff] }
0x1f33   :  { %v9196_v40 = vpop.xlane.xlu1 %9195  ;;  %v9179_v17 = vpop.xlane.xlu0 %9178  ;;  %v14485_v35 = vpack.c.bf16 %v11527_v50, %v11526_v58  ;;  %v11544_v58 = vld [vmem:[%s20060_s16 + $0x140] sm:$0xff]  ;;  %v11545_v50 = vld [vmem:[%s20060_s16 + $0x148] sm:$0xff] }
0x1f34   :  { %v9202_v4 = vmul.f32 0.015625, %v9196_v40  ;;  %v9183_v21 = vmul.f32 0.015625, %v9179_v17 }
0x1f36   :  { %v9210_v8 = vsub.f32 %v9202_v4, %v9206_v22  ;;  %v9207_v25 = vmul.f32 %v9183_v21, %v9183_v21  ;;  %v9215_v33 = vsub.f32 %v19348_v61, %v9183_v21  ;;  %v11519_v61 = vld [vmem:[%s20060_s16 + $0x90] sm:$0xff] }
0x1f37   :  { %v9173_v48 = vpop.xlane.xlu1 %9172  ;;  %v9199_v34 = vpop.xlane.xlu0 %9198  ;;  %v14476_v5 = vpack.c.bf16 %v11520_v26, %v11519_v61  ;;  %v11523_v21 = vld [vmem:[%s20060_s16 + $0xb0] sm:$0xff]  ;;  %v11538_v61 = vld [vmem:[%s20060_s16 + $0x118] sm:$0xff] }
0x1f38   :  { %v9218_v18 = vadd.f32 1e-05, %v9210_v8  ;;  %v9181_v38 = vmul.f32 0.015625, %v9173_v48  ;;  %v9203_v51 = vmul.f32 0.015625, %v9199_v34  ;;  %v11524_v8 = vld [vmem:[%s20060_s16 + $0xb8] sm:$0xff] }
0x1f3a   :  { %15004 = vrsqrt.f32 %v9218_v18  ;;  %v9211_v19 = vsub.f32 %v9203_v51, %v9207_v25  ;;  %v9205_v39 = vmul.f32 %v9181_v38, %v9181_v38  ;;  %v9213_v15 = vsub.f32 %v19351_v16, %v9181_v38  ;;  %v11521_v16 = vld [vmem:[%s20060_s16 + $0xa0] sm:$0xff] }
0x1f3b   :  { %v9193_v1 = vpop.xlane.xlu1 %9192  ;;  %v14479_v57 = vpack.c.bf16 %v11522_v3, %v11521_v16  ;;  %v11548_v16 = vld [vmem:[%s20060_s16 + $0x160] sm:$0xff]  ;;  %v11542_v3 = vld [vmem:[%s20060_s16 + $0x138] sm:$0xff] }
0x1f3c   :  { %v15003_v7 = vpop.eup %15002  ;;  %v9219_v49 = vadd.f32 1e-05, %v9211_v19  ;;  %v9201_v42 = vmul.f32 0.015625, %v9193_v1  ;;  %v11532_v1 = vld [vmem:[%s20060_s16 + $0xf0] sm:$0xff] }
0x1f3d   :  { %v9224_v28 = vmul.f32 %v15003_v7, %v9212_v13  ;;  %v11533_v7 = vld [vmem:[%s20060_s16 + $0xf8] sm:$0xff] }
0x1f3e   :  { %15006 = vrsqrt.f32 %v9219_v49  ;;  %v9209_v0 = vsub.f32 %v9201_v42, %v9205_v39 }
0x1f3f   :  { %v9234_v43 = vmul.f32 %v11505_v46, %v9224_v28 }
0x1f40   :  { %v9217_v41 = vadd.f32 1e-05, %v9209_v0 }
0x1f41   :  { %v19434_v56 = vadd.f32 %v11506_v52, %v9234_v43 }
0x1f42   :  { %15008 = vrsqrt.f32 %v9217_v41 }
0x1f43   :  { %v9267_v59 = vrot.slane %v19434_v56, 1 }
0x1f44   :  { %v15005_v11 = vpop.eup %15004 }
0x1f45   :  { %v9226_v47 = vmul.f32 %v15005_v11, %v9214_v44  ;;  %v11536_v44 = vld [vmem:[%s20060_s16 + $0x108] sm:$0xff] }
0x1f47   :  { %v9236_v9 = vmul.f32 %v11505_v46, %v9226_v47 }
0x1f48   :  { %v15007_v36 = vpop.eup %15006 }
0x1f49   :  { %v19449_v29 = vadd.f32 %v11506_v52, %v9236_v9  ;;  %v9227_v62 = vmul.f32 %v15007_v36, %v9215_v33  ;;  %v14494_v9 = vpack.c.bf16 %v11533_v7, %v11532_v1  ;;  %v9425_v36 = vrot.slane %v19434_v56, 2  ;;  %v11565_v1 = vld [vmem:[%s20060_s16 + $0x1d8] sm:$0xff] }
0x1f4b   :  { %v9237_v23 = vmul.f32 %v11505_v46, %v9227_v62  ;;  %v9269_v31 = vsel %vm9268_vm6, %v19449_v29, %v9267_v59  ;;  %v9342_v45 = vrot.slane %v19449_v29, 7  ;;  %v9426_v33 = vrot.slane %v19449_v29, 1 }
0x1f4c   :  { %v15009_v37 = vpop.eup %15008  ;;  %13083 = vmatmul.mubr.msk.f32.vlgmr.msra.gmra.mrb[176].mxu0 %vm231_vm2, %v9269_v31  ;;  %v9511_v59 = vrot.slane %v19449_v29, 2  ;;  %v11547_v31 = vld [vmem:[%s20060_s16 + $0x158] sm:$0xff] }
0x1f4d   :  { %v9247_v60 = vadd.f32 %v11506_v52, %v9237_v23  ;;  %v9225_v30 = vmul.f32 %v15009_v37, %v9213_v15  ;;  %14474 = vmatpush3.bf16.msra.mxu0 %v14473_v14  ;;  %v9343_v32 = vsel %vm9268_vm6, %v9342_v45, %v19434_v56  ;;  %13120 = vmatprep.mubr.msk.f32.mxu0 %vm15031_vm5, %v15022_v27  ;;  %v11537_v14 = vld [vmem:[%s20060_s16 + $0x110] sm:$0xff] }
0x1f4e   :  { %13102 = vmatmul.mubr.msk.f32.vlgmr.msra.gmra.mrb[176].mxu1 %vm231_vm2, %v9343_v32  ;;  %14475 = vmatprep.subr.bf16.mxu0 %v15030_v24  ;;  %v9427_v26 = vsel %vm9268_vm6, %v9426_v33, %v9425_v36  ;;  %v14509_v15 = vpack.c.bf16 %v11545_v50, %v11544_v58  ;;  %v11546_v23 = vld [vmem:[%s20060_s16 + $0x150] sm:$0xff]  ;;  %v14500_v37 = vpack.c.bf16 %v11538_v61, %v11537_v14  ;;  %v11560_v33 = vld [vmem:[%s20060_s16 + $0x1b8] sm:$0xff]  ;;  %v11572_v14 = vld [vmem:[%s20060_s16 + $0x208] sm:$0xff] }
0x1f4f   :  { %v9235_v10 = vmul.f32 %v11505_v46, %v9225_v30  ;;  %14486 = vmatpush3.bf16.msra.mxu1 %v14485_v35  ;;  %13139 = vmatprep.mubr.msk.f32.mxu1 %vm15031_vm5, %v15022_v27  ;;  %v9937_v17 = vrot.slane %v9247_v60, 7  ;;  %v10106_v22 = vrot.slane %v9247_v60, 1  ;;  %v10191_v4 = vrot.slane %v9247_v60, 2  ;;  %v11541_v32 = vld [vmem:[%s20060_s16 + $0x130] sm:$0xff]  ;;  %v11569_v36 = vld [vmem:[%s20060_s16 + $0x1f8] sm:$0xff] }
0x1f50   :  { %14487 = vmatprep.subr.bf16.mxu1 %v15030_v24  ;;  %v10276_v48 = vrot.slane %v9247_v60, 3  ;;  %v10361_v34 = vrot.slane %v9247_v60, 4  ;;  %v10446_v18 = vrot.slane %v9247_v60, 5  ;;  %v10531_v25 = vrot.slane %v9247_v60, 6  ;;  %v11568_v50 = vld [vmem:[%s20060_s16 + $0x1f0] sm:$0xff] }
0x1f51   :  { %v9245_v40 = vadd.f32 %v11506_v52, %v9235_v10  ;;  %14477 = vmatpush3.bf16.msra.mxu0 %v14476_v5  ;;  %v14482_v46 = vpack.c.bf16 %v11524_v8, %v11523_v21  ;;  %v11535_v52 = vld [vmem:[%s20060_s16 + $0x100] sm:$0xff]  ;;  %v9510_v35 = vrot.slane %v19434_v56, 3  ;;  %v14512_v2 = vpack.c.bf16 %v11547_v31, %v11546_v23  ;;  %v11551_v10 = vld [vmem:[%s20060_s16 + $0x178] sm:$0xff] }
0x1f52   :  { %14478 = vmatprep.subr.bf16.mxu0 %v15030_v24  ;;  %v14497_v62 = vpack.c.bf16 %v11536_v44, %v11535_v52  ;;  %v11539_v5 = vld [vmem:[%s20060_s16 + $0x120] sm:$0xff]  ;;  %v9595_v21 = vrot.slane %v19434_v56, 4  ;;  %v11567_v52 = vld [vmem:[%s20060_s16 + $0x1e8] sm:$0xff]  ;;  %v14542_v61 = vpack.c.bf16 %v11569_v36, %v11568_v50  ;;  %v9765_v23 = vrot.slane %v19434_v56, 6 }
0x1f53   :  { %14489 = vmatpush3.bf16.msra.mxu1 %v14488_v54  ;;  %v19498_v38 = vsel %vm9268_vm6, %v9937_v17, %v9245_v40  ;;  %v10021_v51 = vrot.slane %v9245_v40, 1  ;;  %v10105_v19 = vrot.slane %v9245_v40, 2  ;;  %v10190_v13 = vrot.slane %v9245_v40, 3  ;;  %v11607_v36 = vld [vmem:[%s20060_s16 + $0x300] sm:$0xff] }
0x1f54   :  { %14490 = vmatprep.subr.bf16.mxu1 %v15030_v24  ;;  %v10275_v39 = vrot.slane %v9245_v40, 4  ;;  %v10360_v49 = vrot.slane %v9245_v40, 5  ;;  %v10445_v42 = vrot.slane %v9245_v40, 6  ;;  %v10530_v28 = vrot.slane %v9245_v40, 7 }
0x1f55   :  { %14480 = vmatpush3.bf16.msra.mxu0 %v14479_v57  ;;  %v19508_v0 = vsel %vm9268_vm6, %v9247_v60, %v10021_v51  ;;  %v19511_v41 = vsel %vm9268_vm6, %v10106_v22, %v10105_v19  ;;  %v19514_v43 = vsel %vm9268_vm6, %v10191_v4, %v10190_v13  ;;  %v9512_v45 = vsel %vm9268_vm6, %v9511_v59, %v9510_v35  ;;  %v11549_v60 = vld [vmem:[%s20060_s16 + $0x168] sm:$0xff]  ;;  %v11553_v57 = vld [vmem:[%s20060_s16 + $0x180] sm:$0xff]  ;;  %v11564_v13 = vld [vmem:[%s20060_s16 + $0x1d0] sm:$0xff] }
0x1f56   :  { %14481 = vmatprep.subr.bf16.mxu0 %v15030_v24  ;;  %v19524_v11 = vsel %vm9268_vm6, %v10276_v48, %v10275_v39  ;;  %v19527_v47 = vsel %vm9268_vm6, %v10361_v34, %v10360_v49  ;;  %v19530_v63 = vsel %vm9268_vm6, %v10446_v18, %v10445_v42  ;;  %v19533_v53 = vsel %vm9268_vm6, %v10531_v25, %v10530_v28  ;;  %v11562_v22 = vld [vmem:[%s20060_s16 + $0x1c0] sm:$0xff]  ;;  %v11563_v4 = vld [vmem:[%s20060_s16 + $0x1c8] sm:$0xff]  ;;  %v11555_v34 = vld [vmem:[%s20060_s16 + $0x190] sm:$0xff] }
0x1f57   :  { %14492 = vmatpush3.bf16.msra.mxu1 %v14491_v6  ;;  %v14503_v30 = vpack.c.bf16 %v11540_v20, %v11539_v5  ;;  %v14515_v12 = vpack.c.bf16 %v11549_v60, %v11548_v16  ;;  %v14506_v54 = vpack.c.bf16 %v11542_v3, %v11541_v32  ;;  %v11554_v6 = vld [vmem:[%s20060_s16 + $0x188] sm:$0xff]  ;;  %v14518_v40 = vpack.c.bf16 %v11551_v10, %v11550_v55  ;;  %v11556_v18 = vld [vmem:[%s20060_s16 + $0x198] sm:$0xff]  ;;  %v11557_v49 = vld [vmem:[%s20060_s16 + $0x1a0] sm:$0xff] }
0x1f58   :  { %14493 = vmatprep.subr.bf16.mxu1 %v15030_v24  ;;  %v9596_v17 = vrot.slane %v19449_v29, 3  ;;  %v14521_v8 = vpack.c.bf16 %v11554_v6, %v11553_v57  ;;  %v9681_v48 = vrot.slane %v19449_v29, 4  ;;  %v9680_v51 = vrot.slane %v19434_v56, 5  ;;  %v11558_v42 = vld [vmem:[%s20060_s16 + $0x1a8] sm:$0xff]  ;;  %v11571_v59 = vld [vmem:[%s20060_s16 + $0x200] sm:$0xff]  ;;  %v11574_v5 = vld [vmem:[%s20060_s16 + $0x218] sm:$0xff] }
0x1f59   :  { %14483 = vmatpush3.bf16.msra.mxu0 %v14482_v46  ;;  %v14533_v19 = vpack.c.bf16 %v11563_v4, %v11562_v22  ;;  %v14524_v39 = vpack.c.bf16 %v11556_v18, %v11555_v34  ;;  %v14536_v28 = vpack.c.bf16 %v11565_v1, %v11564_v13  ;;  %v11566_v46 = vld [vmem:[%s20060_s16 + $0x1e0] sm:$0xff]  ;;  %v14527_v44 = vpack.c.bf16 %v11558_v42, %v11557_v49  ;;  %v11583_v60 = vld [vmem:[%s20060_s16 + $0x258] sm:$0xff]  ;;  %v11576_v3 = vld [vmem:[%s20060_s16 + $0x228] sm:$0xff] }
0x1f5a   :  { %14496 = vmatprep.subr.bf16.mxu0 %v15030_v24  ;;  %v9597_v25 = vsel %vm9268_vm6, %v9596_v17, %v9595_v21  ;;  %v9682_v7 = vsel %vm9268_vm6, %v9681_v48, %v9680_v51  ;;  %v14539_v58 = vpack.c.bf16 %v11567_v52, %v11566_v46  ;;  %v11580_v35 = vld [vmem:[%s20060_s16 + $0x240] sm:$0xff]  ;;  %v14545_v31 = vpack.c.bf16 %v11572_v14, %v11571_v59  ;;  %v11585_v10 = vld [vmem:[%s20060_s16 + $0x268] sm:$0xff]  ;;  %v11577_v57 = vld [vmem:[%s20060_s16 + $0x230] sm:$0xff] }
0x1f5b   :  { %14495 = vmatpush3.bf16.msra.mxu1 %v14494_v9  ;;  %v11559_v9 = vld [vmem:[%s20060_s16 + $0x1b0] sm:$0xff]  ;;  %v11584_v55 = vld [vmem:[%s20060_s16 + $0x260] sm:$0xff]  ;;  %v11578_v6 = vld [vmem:[%s20060_s16 + $0x238] sm:$0xff] }
0x1f5c   :  { %13121 = vmatmul.mubr.msk.f32.vlgmr.msra.gmra.mrb[178].mxu0 %vm231_vm2, %v9427_v26  ;;  %14508 = vmatprep.subr.bf16.mxu1 %v15030_v24  ;;  %v9766_v26 = vrot.slane %v19449_v29, 5  ;;  %v11586_v17 = vld [vmem:[%s20060_s16 + $0x270] sm:$0xff]  ;;  %v11587_v22 = vld [vmem:[%s20060_s16 + $0x278] sm:$0xff]  ;;  %v14554_v4 = vpack.c.bf16 %v11578_v6, %v11577_v57  ;;  %v11589_v21 = vld [vmem:[%s20060_s16 + $0x280] sm:$0xff] }
0x1f5d   :  { %14498 = vmatpush3.bf16.msra.mxu0 %v14497_v62  ;;  %13158 = vmatprep.mubr.msk.f32.mxu0 %vm15031_vm5, %v15022_v27  ;;  %v14530_v62 = vpack.c.bf16 %v11560_v33, %v11559_v9  ;;  %v14566_v48 = vpack.c.bf16 %v11587_v22, %v11586_v17  ;;  %v11598_v34 = vld [vmem:[%s20060_s16 + $0x2c0] sm:$0xff]  ;;  %v11599_v18 = vld [vmem:[%s20060_s16 + $0x2c8] sm:$0xff]  ;;  %v11591_v51 = vld [vmem:[%s20060_s16 + $0x290] sm:$0xff] }
0x1f5e   :  { %13140 = vmatmul.mubr.msk.f32.vlgmr.msra.gmra.mrb[178].mxu1 %vm231_vm2, %v9512_v45  ;;  %14499 = vmatprep.subr.bf16.mxu0 %v15030_v24  ;;  %v9851_v45 = vrot.slane %v19449_v29, 6  ;;  %v9767_v20 = vsel %vm9268_vm6, %v9766_v26, %v9765_v23  ;;  %v11582_v29 = vld [vmem:[%s20060_s16 + $0x250] sm:$0xff]  ;;  %v14581_v13 = vpack.c.bf16 %v11599_v18, %v11598_v34  ;;  %v11594_v49 = vld [vmem:[%s20060_s16 + $0x2a8] sm:$0xff]  ;;  %v11616_v14 = vld [vmem:[%s20060_s16 + $0x340] sm:$0xff] }
0x1f5f   :  { %14510 = vmatpush3.bf16.msra.mxu1 %v14509_v15  ;;  %13177 = vmatprep.mubr.msk.f32.mxu1 %vm15031_vm5, %v15022_v27  ;;  %v11581_v15 = vld [vmem:[%s20060_s16 + $0x248] sm:$0xff]  ;;  %v11600_v1 = vld [vmem:[%s20060_s16 + $0x2d0] sm:$0xff]  ;;  %v11628_v17 = vld [vmem:[%s20060_s16 + $0x398] sm:$0xff] }
0x1f60   :  { %14511 = vmatprep.subr.bf16.mxu1 %v15030_v24  ;;  %v14557_v16 = vpack.c.bf16 %v11581_v15, %v11580_v35  ;;  %v11595_v52 = vld [vmem:[%s20060_s16 + $0x2b0] sm:$0xff]  ;;  %v11610_v15 = vld [vmem:[%s20060_s16 + $0x318] sm:$0xff]  ;;  %v11635_v57 = vld [vmem:[%s20060_s16 + $0x3c8] sm:$0xff] }
0x1f61   :  { %14501 = vmatpush3.bf16.msra.mxu0 %v14500_v37  ;;  %v11573_v37 = vld [vmem:[%s20060_s16 + $0x210] sm:$0xff]  ;;  %v11639_v18 = vld [vmem:[%s20060_s16 + $0x3e8] sm:$0xff] }
0x1f62   :  { %14502 = vmatprep.subr.bf16.mxu0 %v15030_v24  ;;  %v14548_v32 = vpack.c.bf16 %v11574_v5, %v11573_v37  ;;  %v11604_v33 = vld [vmem:[%s20060_s16 + $0x2f0] sm:$0xff]  ;;  %v11612_v5 = vld [vmem:[%s20060_s16 + $0x328] sm:$0xff] }
0x1f63   :  { %14513 = vmatpush3.bf16.msra.mxu1 %v14512_v2  ;;  %v9850_v2 = vrot.slane %v19434_v56, 7  ;;  %v11575_v56 = vld [vmem:[%s20060_s16 + $0x220] sm:$0xff]  ;;  %v11609_v35 = vld [vmem:[%s20060_s16 + $0x310] sm:$0xff] }
0x1f64   :  { %14514 = vmatprep.subr.bf16.mxu1 %v15030_v24  ;;  %v14596_v37 = vpack.c.bf16 %v11610_v15, %v11609_v35  ;;  %v10649_v35 = vld [vmem:[%s20061_s20 + $0x50] sm:$0xff]  ;;  %v10650_v15 = vld [vmem:[%s20061_s20 + $0x58] sm:$0xff] }
0x1f65   :  { %14504 = vmatpush3.bf16.msra.mxu0 %v14503_v30  ;;  %v9852_v30 = vsel %vm9268_vm6, %v9851_v45, %v9850_v2  ;;  %v11619_v45 = vld [vmem:[%s20060_s16 + $0x358] sm:$0xff]  ;;  %v11621_v2 = vld [vmem:[%s20060_s16 + $0x368] sm:$0xff] }
0x1f66   :  { %14505 = vmatprep.subr.bf16.mxu0 %v15030_v24 }
0x1f67   :  { %14516 = vmatpush3.bf16.msra.mxu1 %v14515_v12  ;;  %v14560_v12 = vpack.c.bf16 %v11583_v60, %v11582_v29  ;;  %v11613_v29 = vld [vmem:[%s20060_s16 + $0x330] sm:$0xff]  ;;  %v11614_v60 = vld [vmem:[%s20060_s16 + $0x338] sm:$0xff] }
0x1f68   :  { %14517 = vmatprep.subr.bf16.mxu1 %v15030_v24 }
0x1f69   :  { %14507 = vmatpush3.bf16.msra.mxu0 %v14506_v54  ;;  %v14551_v54 = vpack.c.bf16 %v11576_v3, %v11575_v56  ;;  %v11623_v56 = vld [vmem:[%s20060_s16 + $0x378] sm:$0xff]  ;;  %v14602_v3 = vpack.c.bf16 %v11614_v60, %v11613_v29 }
0x1f6a   :  { %14520 = vmatprep.subr.bf16.mxu0 %v15030_v24 }
0x1f6b   :  { %14519 = vmatpush3.bf16.msra.mxu1 %v14518_v40  ;;  %v14563_v40 = vpack.c.bf16 %v11585_v10, %v11584_v55  ;;  %v11626_v55 = vld [vmem:[%s20060_s16 + $0x388] sm:$0xff] }
0x1f6c   :  { %13159 = vmatmul.mubr.msk.f32.vlgmr.msra.gmra.mrb[180].mxu0 %vm231_vm2, %v9597_v25  ;;  %14532 = vmatprep.subr.bf16.mxu1 %v15030_v24 }
0x1f6d   :  { %14522 = vmatpush3.bf16.msra.mxu0 %v14521_v8  ;;  %13196 = vmatprep.mubr.msk.f32.mxu0 %vm15031_vm5, %v15022_v27  ;;  %v11590_v8 = vld [vmem:[%s20060_s16 + $0x288] sm:$0xff] }
0x1f6e   :  { %13178 = vmatmul.mubr.msk.f32.vlgmr.msra.gmra.mrb[180].mxu1 %vm231_vm2, %v9682_v7  ;;  %14523 = vmatprep.subr.bf16.mxu0 %v15030_v24  ;;  %v14569_v25 = vpack.c.bf16 %v11590_v8, %v11589_v21  ;;  %v11601_v7 = vld [vmem:[%s20060_s16 + $0x2d8] sm:$0xff] }
0x1f6f   :  { %14534 = vmatpush3.bf16.msra.mxu1 %v14533_v19  ;;  %13215 = vmatprep.mubr.msk.f32.mxu1 %vm15031_vm5, %v15022_v27  ;;  %v11592_v19 = vld [vmem:[%s20060_s16 + $0x298] sm:$0xff]  ;;  %v14584_v42 = vpack.c.bf16 %v11601_v7, %v11600_v1  ;;  %v11640_v1 = vld [vmem:[%s20060_s16 + $0x3f0] sm:$0xff] }
0x1f70   :  { %14535 = vmatprep.subr.bf16.mxu1 %v15030_v24  ;;  %v11637_v21 = vld [vmem:[%s20060_s16 + $0x3d8] sm:$0xff] }
0x1f71   :  { %14525 = vmatpush3.bf16.msra.mxu0 %v14524_v39  ;;  %v14572_v39 = vpack.c.bf16 %v11592_v19, %v11591_v51  ;;  %v11631_v51 = vld [vmem:[%s20060_s16 + $0x3b0] sm:$0xff]  ;;  %v11632_v19 = vld [vmem:[%s20060_s16 + $0x3b8] sm:$0xff] }
0x1f72   :  { %14526 = vmatprep.subr.bf16.mxu0 %v15030_v24  ;;  %v11641_v7 = vld [vmem:[%s20060_s16 + $0x3f8] sm:$0xff] }
0x1f73   :  { %14537 = vmatpush3.bf16.msra.mxu1 %v14536_v28  ;;  %v11603_v28 = vld [vmem:[%s20060_s16 + $0x2e8] sm:$0xff] }
0x1f74   :  { %14538 = vmatprep.subr.bf16.mxu1 %v15030_v24 }
0x1f75   :  { %14528 = vmatpush3.bf16.msra.mxu0 %v14527_v44  ;;  %v11596_v44 = vld [vmem:[%s20060_s16 + $0x2b8] sm:$0xff] }
0x1f76   :  { %14529 = vmatprep.subr.bf16.mxu0 %v15030_v24  ;;  %v14578_v50 = vpack.c.bf16 %v11596_v44, %v11595_v52  ;;  %v10645_v44 = vld [vmem:[%s20061_s20 + $0x30] sm:$0xff] }
0x1f77   :  { %14540 = vmatpush3.bf16.msra.mxu1 %v14539_v58  ;;  %v11605_v58 = vld [vmem:[%s20060_s16 + $0x2f8] sm:$0xff] }
0x1f78   :  { %14541 = vmatprep.subr.bf16.mxu1 %v15030_v24  ;;  %v14590_v59 = vpack.c.bf16 %v11605_v58, %v11604_v33 }
0x1f79   :  { %14531 = vmatpush3.bf16.msra.mxu0 %v14530_v62  ;;  %v11608_v62 = vld [vmem:[%s20060_s16 + $0x308] sm:$0xff] }
0x1f7a   :  { %14544 = vmatprep.subr.bf16.mxu0 %v15030_v24  ;;  %v14593_v26 = vpack.c.bf16 %v11608_v62, %v11607_v36  ;;  %v10648_v36 = vld [vmem:[%s20061_s20 + $0x48] sm:$0xff] }
0x1f7b   :  { %14543 = vmatpush3.bf16.msra.mxu1 %v14542_v61  ;;  %v11617_v61 = vld [vmem:[%s20060_s16 + $0x348] sm:$0xff] }
0x1f7c   :  { %13197 = vmatmul.mubr.msk.f32.vlgmr.msra.gmra.mrb[182].mxu0 %vm231_vm2, %v9767_v20  ;;  %14556 = vmatprep.subr.bf16.mxu1 %v15030_v24  ;;  %v14605_v23 = vpack.c.bf16 %v11617_v61, %v11616_v14 }
0x1f7d   :  { %14546 = vmatpush3.bf16.msra.mxu0 %v14545_v31  ;;  %13234 = vmatprep.mubr.msk.f32.mxu0 %vm15031_vm5, %v15022_v27  ;;  %v11618_v31 = vld [vmem:[%s20060_s16 + $0x350] sm:$0xff] }
0x1f7e   :  { %13216 = vmatmul.mubr.msk.f32.vlgmr.msra.gmra.mrb[182].mxu1 %vm231_vm2, %v9852_v30  ;;  %14547 = vmatprep.subr.bf16.mxu0 %v15030_v24  ;;  %v14608_v20 = vpack.c.bf16 %v11619_v45, %v11618_v31  ;;  %v10651_v31 = vld [vmem:[%s20061_s20 + $0x60] sm:$0xff]  ;;  %v10652_v45 = vld [vmem:[%s20061_s20 + $0x68] sm:$0xff] }
0x1f7f   :  { %14558 = vmatpush3.bf16.msra.mxu1 %v14557_v16  ;;  %13253 = vmatprep.mubr.msk.f32.mxu1 %vm15031_vm5, %v15022_v27 }
0x1f80   :  { %14559 = vmatprep.subr.bf16.mxu1 %v15030_v24 }
0x1f81   :  { %14549 = vmatpush3.bf16.msra.mxu0 %v14548_v32  ;;  %v11622_v32 = vld [vmem:[%s20060_s16 + $0x370] sm:$0xff] }
0x1f82   :  { %14550 = vmatprep.subr.bf16.mxu0 %v15030_v24  ;;  %v14614_v10 = vpack.c.bf16 %v11623_v56, %v11622_v32 }
0x1f83   :  { %14561 = vmatpush3.bf16.msra.mxu1 %v14560_v12  ;;  %v11625_v12 = vld [vmem:[%s20060_s16 + $0x380] sm:$0xff] }
0x1f84   :  { %14562 = vmatprep.subr.bf16.mxu1 %v15030_v24  ;;  %v14617_v6 = vpack.c.bf16 %v11626_v55, %v11625_v12 }
0x1f85   :  { %14552 = vmatpush3.bf16.msra.mxu0 %v14551_v54  ;;  %v11634_v54 = vld [vmem:[%s20060_s16 + $0x3c0] sm:$0xff] }
0x1f86   :  { %14553 = vmatprep.subr.bf16.mxu0 %v15030_v24  ;;  %v14629_v22 = vpack.c.bf16 %v11635_v57, %v11634_v54 }
0x1f87   :  { %14564 = vmatpush3.bf16.msra.mxu1 %v14563_v40  ;;  %v11627_v40 = vld [vmem:[%s20060_s16 + $0x390] sm:$0xff] }
0x1f88   :  { %14565 = vmatprep.subr.bf16.mxu1 %v15030_v24  ;;  %v14620_v8 = vpack.c.bf16 %v11628_v17, %v11627_v40 }
0x1f89   :  { %14555 = vmatpush3.bf16.msra.mxu0 %v14554_v4  ;;  %v11636_v4 = vld [vmem:[%s20060_s16 + $0x3d0] sm:$0xff] }
0x1f8a   :  { %14568 = vmatprep.subr.bf16.mxu0 %v15030_v24  ;;  %v14632_v34 = vpack.c.bf16 %v11637_v21, %v11636_v4 }
0x1f8b   :  { %14567 = vmatpush3.bf16.msra.mxu1 %v14566_v48  ;;  %v11630_v48 = vld [vmem:[%s20060_s16 + $0x3a8] sm:$0xff] }
0x1f8c   :  { %13235 = vmatmul.mubr.msk.f32.vlgmr.msra.gmra.mrb[184].mxu0 %vm231_vm2, %v19498_v38  ;;  %14580 = vmatprep.subr.bf16.mxu1 %v15030_v24  ;;  %v11593_v38 = vld [vmem:[%s20060_s16 + $0x2a0] sm:$0xff] }
0x1f8d   :  { %14570 = vmatpush3.bf16.msra.mxu0 %v14569_v25  ;;  %13272 = vmatprep.mubr.msk.f32.mxu0 %vm15031_vm5, %v15022_v27  ;;  %v14575_v46 = vpack.c.bf16 %v11594_v49, %v11593_v38  ;;  %v14638_v38 = vpack.c.bf16 %v11641_v7, %v11640_v1  ;;  %v10639_v49 = vld [vmem:[%s20061_s20] sm:$0xff] }
0x1f8e   :  { %13254 = vmatmul.mubr.msk.f32.vlgmr.msra.gmra.mrb[184].mxu1 %vm231_vm2, %v19508_v0  ;;  %14571 = vmatprep.subr.bf16.mxu0 %v15030_v24  ;;  %v11602_v0 = vld [vmem:[%s20060_s16 + $0x2e0] sm:$0xff] }
0x1f8f   :  { %14582 = vmatpush3.bf16.msra.mxu1 %v14581_v13  ;;  %13291 = vmatprep.mubr.msk.f32.mxu1 %vm15031_vm5, %v15022_v27  ;;  %v14587_v9 = vpack.c.bf16 %v11603_v28, %v11602_v0  ;;  %v10641_v0 = vld [vmem:[%s20061_s20 + $0x10] sm:$0xff]  ;;  %v10643_v28 = vld [vmem:[%s20061_s20 + $0x20] sm:$0xff] }
0x1f90   :  { %14583 = vmatprep.subr.bf16.mxu1 %v15030_v24 }
0x1f91   :  { %14573 = vmatpush3.bf16.msra.mxu0 %v14572_v39  ;;  %v14626_v39 = vpack.c.bf16 %v11632_v19, %v11631_v51 }
0x1f92   :  { %14574 = vmatprep.subr.bf16.mxu0 %v15030_v24 }
0x1f93   :  { %14585 = vmatpush3.bf16.msra.mxu1 %v14584_v42  ;;  %v10640_v42 = vld [vmem:[%s20061_s20 + $0x8] sm:$0xff] }
0x1f94   :  { %14586 = vmatprep.subr.bf16.mxu1 %v15030_v24 }
0x1f95   :  { %14576 = vmatpush3.bf16.msra.mxu0 %v14575_v46  ;;  %v10644_v46 = vld [vmem:[%s20061_s20 + $0x28] sm:$0xff] }
0x1f96   :  { %14577 = vmatprep.subr.bf16.mxu0 %v15030_v24  ;;  %v14647_v52 = vpack.c.bf16 %v10644_v46, %v10643_v28  ;;  %v11643_v28 = vld [vmem:[%s20062_s17] ss:$0 sm:$0xff]  ;;  %s20139_s17 = sld [smem:[#allocation18_spill]] }
0x1f97   :  { %14588 = vmatpush3.bf16.msra.mxu1 %v14587_v9  ;;  %v10646_v9 = vld [vmem:[%s20061_s20 + $0x38] sm:$0xff] }
0x1f98   :  { %14589 = vmatprep.subr.bf16.mxu1 %v15030_v24  ;;  %v14650_v33 = vpack.c.bf16 %v10646_v9, %v10645_v44  ;;  %v11644_v44 = vld [vmem:[%s20063_s18] ss:$0 sm:$0xff] }
0x1f99   :  { %14579 = vmatpush3.bf16.msra.mxu0 %v14578_v50  ;;  %v10647_v50 = vld [vmem:[%s20061_s20 + $0x40] sm:$0xff] }
0x1f9a   :  { %14592 = vmatprep.subr.bf16.mxu0 %v15030_v24 }
0x1f9b   :  { %14591 = vmatpush3.bf16.msra.mxu1 %v14590_v59 }
0x1f9c   :  { %13273 = vmatmul.mubr.msk.f32.vlgmr.msra.gmra.mrb[186].mxu0 %vm231_vm2, %v19511_v41  ;;  %14604 = vmatprep.subr.bf16.mxu1 %v15030_v24  ;;  %v11611_v41 = vld [vmem:[%s20060_s16 + $0x320] sm:$0xff] }
0x1f9d   :  { %14594 = vmatpush3.bf16.msra.mxu0 %v14593_v26  ;;  %13310 = vmatprep.mubr.msk.f32.mxu0 %vm15031_vm5, %v15022_v27  ;;  %v14599_v16 = vpack.c.bf16 %v11612_v5, %v11611_v41  ;;  %v14653_v26 = vpack.c.bf16 %v10648_v36, %v10647_v50  ;;  %v10653_v41 = vld [vmem:[%s20061_s20 + $0x70] sm:$0xff]  ;;  %v10654_v5 = vld [vmem:[%s20061_s20 + $0x78] sm:$0xff] }
0x1f9e   :  { %13292 = vmatmul.mubr.msk.f32.vlgmr.msra.gmra.mrb[186].mxu1 %vm231_vm2, %v19514_v43  ;;  %14595 = vmatprep.subr.bf16.mxu0 %v15030_v24  ;;  %v11620_v43 = vld [vmem:[%s20060_s16 + $0x360] sm:$0xff] }
0x1f9f   :  { %14606 = vmatpush3.bf16.msra.mxu1 %v14605_v23  ;;  %13329 = vmatprep.mubr.msk.f32.mxu1 %vm15031_vm5, %v15022_v27  ;;  %v14611_v30 = vpack.c.bf16 %v11621_v2, %v11620_v43  ;;  %v14656_v23 = vpack.c.bf16 %v10650_v15, %v10649_v35 }
0x1fa0   :  { %14607 = vmatprep.subr.bf16.mxu1 %v15030_v24 }
0x1fa1   :  { %14597 = vmatpush3.bf16.msra.mxu0 %v14596_v37  ;;  %v14659_v37 = vpack.c.bf16 %v10652_v45, %v10651_v31  ;;  %v10757_v31 = vld [vmem:[%s20133_s26] sm:$0xff]  ;;  %v10758_v45 = vld [vmem:[%s20133_s26 + $0x8] sm:$0xff] }
0x1fa2   :  { %14598 = vmatprep.subr.bf16.mxu0 %v15030_v24 }
0x1fa3   :  { %14609 = vmatpush3.bf16.msra.mxu1 %v14608_v20  ;;  %v14662_v20 = vpack.c.bf16 %v10654_v5, %v10653_v41  ;;  %v14665_v41 = vpack.c.bf16 %v10758_v45, %v10757_v31  ;;  %v10760_v5 = vld [vmem:[%s20133_s26 + $0x18] sm:$0xff] }
0x1fa4   :  { %14610 = vmatprep.subr.bf16.mxu1 %v15030_v24 }
0x1fa5   :  { %14600 = vmatpush3.bf16.msra.mxu0 %v14599_v16 }
0x1fa6   :  { %14601 = vmatprep.subr.bf16.mxu0 %v15030_v24 }
0x1fa7   :  { %14612 = vmatpush3.bf16.msra.mxu1 %v14611_v30 }
0x1fa8   :  { %14613 = vmatprep.subr.bf16.mxu1 %v15030_v24 }
0x1fa9   :  { %14603 = vmatpush3.bf16.msra.mxu0 %v14602_v3 }
0x1faa   :  { %14616 = vmatprep.subr.bf16.mxu0 %v15030_v24 }
0x1fab   :  { %14615 = vmatpush3.bf16.msra.mxu1 %v14614_v10 }
0x1fac   :  { %13311 = vmatmul.mubr.msk.f32.vlgmr.msra.gmra.mrb[188].mxu0 %vm231_vm2, %v19524_v11  ;;  %14628 = vmatprep.subr.bf16.mxu1 %v15030_v24  ;;  %v11629_v11 = vld [vmem:[%s20060_s16 + $0x3a0] sm:$0xff] }
0x1fad   :  { %14618 = vmatpush3.bf16.msra.mxu0 %v14617_v6  ;;  %13348 = vmatprep.mubr.msk.f32.mxu0 %vm15031_vm5, %v15022_v27  ;;  %v14623_v25 = vpack.c.bf16 %v11630_v48, %v11629_v11 }
0x1fae   :  { %13330 = vmatmul.mubr.msk.f32.vlgmr.msra.gmra.mrb[188].mxu1 %vm231_vm2, %v19527_v47  ;;  %14619 = vmatprep.subr.bf16.mxu0 %v15030_v24  ;;  %v11638_v47 = vld [vmem:[%s20060_s16 + $0x3e0] sm:$0xff] }
0x1faf   :  { %14630 = vmatpush3.bf16.msra.mxu1 %v14629_v22  ;;  %13367 = vmatprep.mubr.msk.f32.mxu1 %vm15031_vm5, %v15022_v27  ;;  %v14635_v13 = vpack.c.bf16 %v11639_v18, %v11638_v47 }
0x1fb0   :  { %14631 = vmatprep.subr.bf16.mxu1 %v15030_v24 }
0x1fb1   :  { %14621 = vmatpush3.bf16.msra.mxu0 %v14620_v8 }
0x1fb2   :  { %14622 = vmatprep.subr.bf16.mxu0 %v15030_v24 }
0x1fb3   :  { %14633 = vmatpush3.bf16.msra.mxu1 %v14632_v34 }
0x1fb4   :  { %14634 = vmatprep.subr.bf16.mxu1 %v15030_v24 }
0x1fb5   :  { %14624 = vmatpush3.bf16.msra.mxu0 %v14623_v25 }
0x1fb6   :  { %14625 = vmatprep.subr.bf16.mxu0 %v15030_v24 }
0x1fb7   :  { %14636 = vmatpush3.bf16.msra.mxu1 %v14635_v13 }
0x1fb8   :  { %14637 = vmatprep.subr.bf16.mxu1 %v15030_v24 }
0x1fb9   :  { %14627 = vmatpush3.bf16.msra.mxu0 %v14626_v39 }
0x1fba   :  { %14640 = vmatprep.subr.bf16.mxu0 %v15030_v24 }
0x1fbb   :  { %14639 = vmatpush3.bf16.msra.mxu1 %v14638_v38 }
0x1fbc   :  { %13349 = vmatmul.mubr.msk.f32.vlgmr.msra.gmra.mrb[190].mxu0 %vm231_vm2, %v19530_v63  ;;  %14664 = vmatprep.subr.bf16.mxu1 %v15030_v24  ;;  %v14641_v63 = vpack.c.bf16 %v10640_v42, %v10639_v49 }
0x1fbd   :  { %13402 = vmatprep.mubr.msk.f32.mxu0 %vm15031_vm5, %v15022_v27 }
0x1fbe   :  { %13368 = vmatmul.mubr.msk.f32.vlgmr.msra.gmra.mrb[190].mxu1 %vm231_vm2, %v19533_v53  ;;  %14642 = vmatpush3.bf16.msra.mxu0 %v14641_v63 }
0x1fbf   :  { %13421 = vmatprep.mubr.msk.f32.mxu1 %vm15031_vm5, %v15022_v27  ;;  %14643 = vmatprep.subr.bf16.mxu0 %v15030_v24  ;;  %v10642_v27 = vld [vmem:[%s20061_s20 + $0x18] sm:$0xff]  ;;  %s20136_s20 = sld [smem:[#allocation16_spill]] }
0x1fc0   :  { %v14644_v53 = vpack.c.bf16 %v10642_v27, %v10641_v0  ;;  %14666 = vmatpush3.bf16.msra.mxu1 %v14665_v41 }
0x1fc1   :  { %14667 = vmatprep.subr.bf16.mxu1 %v15030_v24 }
0x1fc2   :  { %14645 = vmatpush3.bf16.msra.mxu0 %v14644_v53 }
0x1fc3   :  { %14646 = vmatprep.subr.bf16.mxu0 %v15030_v24 }
0x1fc6   :  { %14648 = vmatpush3.bf16.msra.mxu0 %v14647_v52 }
0x1fc7   :  { %14649 = vmatprep.subr.bf16.mxu0 %v15030_v24 }
0x1fca   :  { %14651 = vmatpush3.bf16.msra.mxu0 %v14650_v33  ;;  %v11645_v33 = vld [vmem:[%s20064_s19] ss:$0 sm:$0xff] }
0x1fcb   :  { %14652 = vmatprep.subr.bf16.mxu0 %v15030_v24 }
0x1fce   :  { %14654 = vmatpush3.bf16.msra.mxu0 %v14653_v26 }
0x1fcf   :  { %14655 = vmatprep.subr.bf16.mxu0 %v15030_v24 }
0x1fd2   :  { %14657 = vmatpush3.bf16.msra.mxu0 %v14656_v23 }
0x1fd3   :  { %14658 = vmatprep.subr.bf16.mxu0 %v15030_v24 }
0x1fd6   :  { %14660 = vmatpush3.bf16.msra.mxu0 %v14659_v37  ;;  %v10759_v37 = vld [vmem:[%s20133_s26 + $0x10] sm:$0xff] }
0x1fd7   :  { %14661 = vmatprep.subr.bf16.mxu0 %v15030_v24 }
0x1fda   :  { %14663 = vmatpush3.bf16.msra.mxu0 %v14662_v20  ;;  %v14668_v20 = vpack.c.bf16 %v10760_v5, %v10759_v37 }
0x1fdc   :  { %14669 = vmatpush3.bf16.msra.mxu1 %v14668_v20 }
0x1fdd   :  { %14670 = vmatprep.subr.bf16.mxu1 %v15030_v24 }
0x201f   :  { %v9338_v58 = vpop.f32.mrb[176].mxu0 }
0x2020   :  { %v13084_v62 = vpop.f32.mrb[177].mxu0 }
0x2021   :  { %v9412_v59 = vpop.f32.mrb[176].mxu1 }
0x2022   :  { %v9413_v14 = vadd.f32 %v9412_v59, %v9338_v58  ;;  %v13103_v61 = vpop.f32.mrb[177].mxu1 }
0x202f   :  { %v9496_v43 = vpop.f32.mrb[178].mxu0 }
0x2030   :  { %v9500_v2 = vadd.f32 %v9496_v43, %v9413_v14  ;;  %v13122_v16 = vpop.f32.mrb[179].mxu0  ;;  %v10761_v43 = vld [vmem:[%s20133_s26 + $0x20] sm:$0xff] }
0x2031   :  { %v9581_v29 = vpop.f32.mrb[178].mxu1 }
0x2032   :  { %v9585_v60 = vadd.f32 %v9581_v29, %v9500_v2  ;;  %v13141_v30 = vpop.f32.mrb[179].mxu1  ;;  %v10762_v2 = vld [vmem:[%s20133_s26 + $0x28] sm:$0xff]  ;;  %v10763_v29 = vld [vmem:[%s20133_s26 + $0x30] sm:$0xff] }
0x2033   :  { %v14671_v16 = vpack.c.bf16 %v10762_v2, %v10761_v43 }
0x2035   :  { %14672 = vmatpush3.bf16.msra.mxu1 %v14671_v16 }
0x2036   :  { %14673 = vmatprep.subr.bf16.mxu1 %v15030_v24 }
0x203f   :  { %v9666_v32 = vpop.f32.mrb[180].mxu0 }
0x2040   :  { %v9670_v56 = vadd.f32 %v9666_v32, %v9585_v60  ;;  %v13160_v3 = vpop.f32.mrb[181].mxu0  ;;  %v10764_v60 = vld [vmem:[%s20133_s26 + $0x38] sm:$0xff]  ;;  %v11646_v32 = vld [vmem:[%s20134_s13] ss:$0 sm:$0xff] }
0x2041   :  { %v9751_v12 = vpop.f32.mrb[180].mxu1  ;;  %v14674_v30 = vpack.c.bf16 %v10764_v60, %v10763_v29  ;;  %v11647_v3 = vld [vmem:[%s20135_s0] ss:$0 sm:$0xff] }
0x2042   :  { %v9755_v55 = vadd.f32 %v9751_v12, %v9670_v56  ;;  %v13179_v10 = vpop.f32.mrb[181].mxu1 }
0x2043   :  { %14675 = vmatpush3.bf16.msra.mxu1 %v14674_v30  ;;  %v11648_v10 = vld [vmem:[%s20136_s20] ss:$0 sm:$0xff] }
0x204f   :  { %v9836_v54 = vpop.f32.mrb[182].mxu0 }
0x2050   :  { %v9840_v57 = vadd.f32 %v9836_v54, %v9755_v55  ;;  %v13198_v6 = vpop.f32.mrb[183].mxu0 }
0x2051   :  { %v9921_v40 = vpop.f32.mrb[182].mxu1 }
0x2052   :  { %v9925_v17 = vadd.f32 %v9921_v40, %v9840_v57  ;;  %v13217_v22 = vpop.f32.mrb[183].mxu1 }
0x205f   :  { %v10007_v4 = vpop.f32.mrb[184].mxu0 }
0x2060   :  { %v10011_v21 = vadd.f32 %v10007_v4, %v9925_v17  ;;  %v13236_v8 = vpop.f32.mrb[185].mxu0 }
0x2061   :  { %v10091_v11 = vpop.f32.mrb[184].mxu1 }
0x2062   :  { %v10095_v48 = vadd.f32 %v10091_v11, %v10011_v21  ;;  %v13255_v34 = vpop.f32.mrb[185].mxu1 }
0x206f   :  { %v10176_v47 = vpop.f32.mrb[186].mxu0 }
0x2070   :  { %v10180_v18 = vadd.f32 %v10176_v47, %v10095_v48  ;;  %v13274_v25 = vpop.f32.mrb[187].mxu0  ;;  %v11649_v48 = vld [vmem:[%s20137_s8] ss:$0 sm:$0xff] }
0x2071   :  { %v10261_v51 = vpop.f32.mrb[186].mxu1 }
0x2072   :  { %v10265_v19 = vadd.f32 %v10261_v51, %v10180_v18  ;;  %v13293_v13 = vpop.f32.mrb[187].mxu1 }
0x207f   :  { %v10346_v1 = vpop.f32.mrb[188].mxu0 }
0x2080   :  { %v10350_v7 = vadd.f32 %v10346_v1, %v10265_v19  ;;  %v13312_v39 = vpop.f32.mrb[189].mxu0 }
0x2081   :  { %v10431_v38 = vpop.f32.mrb[188].mxu1 }
0x2082   :  { %v10435_v49 = vadd.f32 %v10431_v38, %v10350_v7  ;;  %v13331_v42 = vpop.f32.mrb[189].mxu1 }
0x2083   :  { %v20138_v42 = vlaneseq }
0x208f   :  { %v10516_v63 = vpop.f32.mrb[190].mxu0 }
0x2090   :  { %v10520_v0 = vadd.f32 %v10516_v63, %v10435_v49  ;;  %v13350_v27 = vpop.f32.mrb[191].mxu0  ;;  %v10846_v63 = vand.u32 127, %v20138_v42 }
0x2091   :  { %v10601_v53 = vpop.f32.mrb[190].mxu1 }
0x2092   :  { %v10605_v46 = vadd.f32 %v10601_v53, %v10520_v0  ;;  %v13369_v52 = vpop.f32.mrb[191].mxu1  ;;  %vm10862_vm7 = vcmp.eq.s32.totalorder %v10846_v63, 0  ;;  %vm10864_vm8 = vcmp.eq.s32.totalorder %v10846_v63, 24 }
0x2094   :  { %v10613_v9 = vadd.f32 %v11643_v28, %v10605_v46 }
0x2096   :  { %v10621_v58 = vmul.f32 %v11644_v44, %v10613_v9 }
0x2098   :  { %v10629_v50 = vadd.f32 %v11645_v33, %v10621_v58 }
0x209a   :  { %v10631_v36 = vmul.f32 0.044715, %v10629_v50  ;;  %v10630_v35 = vmul.f32 0.5, %v10629_v50 }
0x209c   :  { %v10632_v62 = vmul.f32 %v10631_v36, %v10629_v50 }
0x209e   :  { %v10633_v59 = vmul.f32 %v10632_v62, %v10629_v50 }
0x20a0   :  { %v10634_v14 = vadd.f32 %v10633_v59, %v10629_v50 }
0x20a2   :  { %v10635_v61 = vmul.f32 0.7978846, %v10634_v14 }
0x20a4   :  { %15010 = vtanh.f32 %v10635_v61 }
0x20ae   :  { %v15011_v26 = vpop.eup %15010 }
0x20af   :  { %v10637_v15 = vadd.f32 1.0, %v15011_v26 }
0x20b1   :  { %v10638_v23 = vmul.f32 %v10637_v15, %v10630_v35 }
0x20b3   :  { %13403 = vmatmul.mubr.f32.vlgmr.msra.gmra.mrb[192].mxu0 %v10638_v23 }
0x2186   :  { %v10728_v56 = vpop.f32.mrb[192].mxu0 }
0x2187   :  { %v10729_v12 = vadd.f32 %v11646_v32, %v10728_v56  ;;  %v13404_v55 = vpop.f32.mrb[193].mxu0 }
0x2189   :  { %v10739_v54 = vmul.f32 %v11647_v3, %v10729_v12 }
0x218b   :  { %v10747_v57 = vadd.f32 %v11648_v10, %v10739_v54 }
0x218d   :  { %v10749_v6 = vmul.f32 0.044715, %v10747_v57  ;;  %v10748_v21 = vmul.f32 0.5, %v10747_v57 }
0x218f   :  { %v10750_v24 = vmul.f32 %v10749_v6, %v10747_v57 }
0x2191   :  { %v10751_v40 = vmul.f32 %v10750_v24, %v10747_v57 }
0x2193   :  { %v10752_v17 = vadd.f32 %v10751_v40, %v10747_v57 }
0x2195   :  { %v10753_v22 = vmul.f32 0.7978846, %v10752_v17 }
0x2197   :  { %15012 = vtanh.f32 %v10753_v22 }
0x21a1   :  { %v15013_v4 = vpop.eup %15012 }
0x21a2   :  { %v10755_v8 = vadd.f32 1.0, %v15013_v4 }
0x21a4   :  { %v10756_v11 = vmul.f32 %v10755_v8, %v10748_v21 }
0x21a6   :  { %13422 = vmatmul.mubr.msk.f32.vlgmr.msra.gmra.mrb[192].mxu1 %vm231_vm2, %v10756_v11 }
0x2279   :  { %v10841_v34 = vpop.f32.mrb[192].mxu1 }
0x227a   :  { %v10842_v47 = vadd.f32 %v11649_v48, %v10841_v34  ;;  %v13423_v18 = vpop.f32.mrb[193].mxu1 }
0x227c   :  { %v10847_v25 = vsub.f32 0.0, %v10842_v47  ;;  %v10854_v51 = vand.u32 2147483647, %v10842_v47  ;;  %v10853_v53 = vmax.f32 %v10842_v47, 0.0 }
0x227e   :  { %v10848_v19 = vmul.f32 1.442695, %v10847_v25  ;;  %v10855_v13 = vsub.f32 0.0, %v10854_v51 }
0x2280   :  { %15014 = vpow2.f32 %v10848_v19  ;;  %v10856_v1 = vmul.f32 1.442695, %v10855_v13 }
0x2282   :  { %15016 = vpow2.f32 %v10856_v1 }
0x228a   :  { %v15015_v7 = vpop.eup %15014 }
0x228b   :  { %v10850_v38 = vadd.f32 1.0, %v15015_v7 }
0x228c   :  { %v15017_v39 = vpop.eup %15016 }
0x228d   :  { %v10858_v49 = vadd.f32 1.0, %v15017_v39 }
0x228f   :  { %15018 = vlog2.f32 %v10858_v49 }
0x2290   :  { %15020 = vrcp.f32 %v10850_v38 }
0x2299   :  { %v15019_v0 = vpop.eup %15018 }
0x229a   :  { %v15021_v27 = vpop.eup %15020  ;;  %v10860_v28 = vmul.f32 0.6931472, %v15019_v0 }
0x229b   :  { %v10863_v52 = vsel %vm10862_vm7, %v15021_v27, %v10842_v47 }
0x229c   :  { %v10861_v46 = vadd.f32 %v10860_v28, %v10853_v53 }
0x229e   :  { %v10865_v44 = vsel %vm10864_vm8, %v10861_v46, %v10863_v52 }
0x229f   :  { %10867 = vst.msk [vmem:[%s20139_s17] sm:$0x3] %vm10866_vm9, %v10865_v44 }

</bundles_post_ra>
